<compile_context>
chip_gen: v6e
topology: v6e:2x2x1
jax: 0.10.0
libtpu: 0.0.40
codegen_flags: <defaults>
</compile_context>

<pallas_src>
import numpy as np
import jax
import jax.numpy as jnp
from jax.experimental import pallas as pl
from jax.experimental.pallas import tpu as pltpu


_K_SLICE = 128        # K granularity of the conv accumulation dots
_GATHER_CHUNK = 288   # max M rows per stacked-gather GEMM (36 f32 vregs/chunk)


def _round16(m):
    return ((m + 15) // 16) * 16


def _out_hw(h, w, stride):
    return (h + 2 - 3) // stride + 1, (w + 2 - 3) // stride + 1


def _conv_block(y_prev, g_ref, w_ref, b_ref, pref, wait=None):
    """One 3x3 conv layer + ReLU.

    y_prev : (m_in_pad, cin) f32 value -- previous activation (row-padded)
    g_ref  : (9*m_out_pad, m_in_pad) bf16 VMEM ref -- stacked 0/1 im2col gather
    w_ref  : (9*cin, cout) bf16 VMEM ref -- conv weight, taps stacked along K
    b_ref  : (1, cout) f32 VMEM ref
    pref   : bf16 VMEM patch scratch (at least (9*m_out_pad, cin))
    wait   : optional callable, invoked between the gather and the conv (used
             to land this layer's prefetched weight as late as possible)
    """
    rows = g_ref.shape[0]
    cin = y_prev.shape[1]
    cout = w_ref.shape[1]
    m_out_pad = rows // 9
    assert w_ref.shape[0] == 9 * cin and cin % _K_SLICE == 0

    y_b = y_prev.astype(jnp.bfloat16)

    # Stacked im2col: one gather GEMM per M-chunk (the RHS y_b stays MXU
    # stationary within a chunk instead of being re-pushed 9x per layer),
    # written with full-tile aligned bf16 stores into the patch scratch.
    ch = min(rows, _GATHER_CHUNK)
    assert rows % ch == 0 and ch % 16 == 0
    for r in range(0, rows, ch):                                # static unroll
        p = jnp.dot(g_ref[r:r + ch, :], y_b,
                    preferred_element_type=jnp.float32)
        pref[r:r + ch, 0:cin] = p.astype(jnp.bfloat16)

    if wait is not None:
        wait()                              # land this layer's prefetched weight

    # Conv as K-sliced accumulating GEMMs: slices are read straight from the
    # VMEM refs so the large patch slab / weight never become whole-register
    # values (bounded vreg live set).
    z = jnp.zeros((m_out_pad, cout), jnp.float32)
    for t in range(9):                                          # static unroll
        for k in range(cin // _K_SLICE):
            lhs = pref[t * m_out_pad:(t + 1) * m_out_pad,
                       k * _K_SLICE:(k + 1) * _K_SLICE]
            rhs = w_ref[t * cin + k * _K_SLICE:t * cin + (k + 1) * _K_SLICE, :]
            z += jnp.dot(lhs, rhs, preferred_element_type=jnp.float32)
    return jnp.maximum(z + b_ref[...], 0.0)


def _fused_net_kernel(p1, w1, b1,
                      g2, w2, b2,
                      g3, w3, b3,
                      g4, w4_hbm, b4,
                      g5, w5_hbm, b5,
                      g6, w6_hbm, b6,
                      out_ref,
                      pref, w4v, w5v, w6v, sem):
    # Kick off the big late-layer weight DMAs immediately so ~3.9 MB of HBM
    # traffic streams behind layers 1-4 compute (the net is weight-DMA bound).
    cp4 = pltpu.make_async_copy(w4_hbm, w4v, sem.at[0])
    cp5 = pltpu.make_async_copy(w5_hbm, w5v, sem.at[1])
    cp6 = pltpu.make_async_copy(w6_hbm, w6v, sem.at[2])
    cp4.start()
    cp5.start()
    cp6.start()

    # Layer 1: im2col patches built in the wrapper (Cin=1) -> one K=9 GEMM,
    # Cout zero-padded 64 -> 128 so everything downstream is lane-aligned.
    y = jnp.dot(p1[...], w1[...], preferred_element_type=jnp.float32)
    y = jnp.maximum(y + b1[...], 0.0)

    # Layers 2-3: small weights, landed eagerly in VMEM by Pallas.
    y = _conv_block(y, g2, w2, b2, pref)
    y = _conv_block(y, g3, w3, b3, pref)

    # Layers 4-6: weights were prefetched above; each wait happens after that
    # layer's gather GEMM, right before its conv GEMMs.
    y = _conv_block(y, g4, w4v, b4, pref, wait=cp4.wait)
    y = _conv_block(y, g5, w5v, b5, pref, wait=cp5.wait)
    y = _conv_block(y, g6, w6v, b6, pref, wait=cp6.wait)

    # Rows beyond the real N*Ho*Wo are layout padding; drop them on the store.
    out_ref[...] = y[0:out_ref.shape[0], :].astype(out_ref.dtype)


def _stacked_gather(n, hin, win, ho, wo, stride, m_in_pad, m_out_pad):
    """(9*m_out_pad, m_in_pad) 0/1 bf16 matrix.  Block t (rows
    [t*m_out_pad, (t+1)*m_out_pad)) gathers, for each output pixel row, the
    input row feeding kernel tap t; all-zero rows encode padding."""
    g = np.zeros((9 * m_out_pad, m_in_pad), np.float32)
    for b in range(n):
        for oh in range(ho):
            for ow in range(wo):
                row = (b * ho + oh) * wo + ow
                for kh in range(3):
                    for kw in range(3):
                        ih = stride * oh + kh - 1
                        iw = stride * ow + kw - 1
                        if 0 <= ih < hin and 0 <= iw < win:
                            g[(kh * 3 + kw) * m_out_pad + row,
                              (b * hin + ih) * win + iw] = 1.0
    return jnp.asarray(g, jnp.bfloat16)


def pack_params(params, n, h, w):
    """One-time conversion of (OIHW weight, bias, stride) params into the
    kernel operand tuple (bf16 weights / gather matrices, f32 biases)."""
    spat = [(h, w)]
    for _, _, s in params:
        ph, pw = spat[-1]
        spat.append(_out_hw(ph, pw, s))

    m_real = [n * ho * wo for (ho, wo) in spat[1:]]
    m_pad = [_round16(m) for m in m_real]       # bf16 sublane-tile row padding

    # Layer 1: taps folded into K (K = 9); Cout zero-padded 64 -> 128.
    w1, b1, _ = params[0]
    cout1 = w1.shape[0]
    w1p = jnp.transpose(w1, (2, 3, 1, 0)).reshape(9, cout1)
    w1p = jnp.pad(w1p, ((0, 0), (0, 128 - cout1))).astype(jnp.bfloat16)
    b1p = jnp.pad(b1, (0, 128 - cout1)).reshape(1, 128).astype(jnp.float32)

    ops = [w1p, b1p]
    cin_pad_prev = 128
    for idx in range(1, len(params)):
        wl, bl, s = params[idx]
        cout, cin = wl.shape[0], wl.shape[1]
        if cin < cin_pad_prev:   # layer 2: zero-pad 64 -> 128 input channels
            wl = jnp.pad(wl, ((0, 0), (0, cin_pad_prev - cin), (0, 0), (0, 0)))
        wcat = jnp.transpose(wl, (2, 3, 1, 0)).reshape(9 * cin_pad_prev, cout)
        (hin, win), (ho, wo) = spat[idx], spat[idx + 1]
        g = _stacked_gather(n, hin, win, ho, wo, s,
                            m_in_pad=m_pad[idx - 1], m_out_pad=m_pad[idx])
        ops += [g, wcat.astype(jnp.bfloat16),
                bl.reshape(1, cout).astype(jnp.float32)]
        cin_pad_prev = cout

    meta = dict(out_hw=spat[-1], m1_pad=m_pad[0], m_out_real=m_real[-1],
                stride1=params[0][2])
    return tuple(ops), meta


def _layer1_patches(x_nhwc, stride, m_pad):
    """im2col of the 1-channel input -> (m_pad, 9) bf16 patch rows."""
    n, h, w, _ = x_nhwc.shape
    ho, wo = _out_hw(h, w, stride)
    xp = jnp.pad(x_nhwc[..., 0], ((0, 0), (1, 1), (1, 1)))
    taps = [xp[:, kh:kh + stride * (ho - 1) + 1:stride,
               kw:kw + stride * (wo - 1) + 1:stride]
            for kh in range(3) for kw in range(3)]
    p = jnp.stack(taps, axis=-1).reshape(n * ho * wo, 9)
    p = jnp.pad(p, ((0, m_pad - n * ho * wo), (0, 0)))
    return p.astype(jnp.bfloat16)


def low_level_net_fused(x_nhwc, ops, meta):
    n = x_nhwc.shape[0]
    p1 = _layer1_patches(x_nhwc, meta["stride1"], meta["m1_pad"])
    (w1, b1, g2, w2, b2, g3, w3, b3,
     g4, w4, b4, g5, w5, b5, g6, w6, b6) = ops

    g_list, w_list = (g2, g3, g4, g5, g6), (w2, w3, w4, w5, w6)
    patch_rows = max(g.shape[0] for g in g_list)            # 1152
    patch_cols = max(wc.shape[0] // 9 for wc in w_list)     # 256 (max Cin)
    m_out_real = meta["m_out_real"]
    cout_last = w6.shape[1]

    ins = (p1, w1, b1, g2, w2, b2, g3, w3, b3,
           g4, w4, b4, g5, w5, b5, g6, w6, b6)
    vmem = pl.BlockSpec(memory_space=pltpu.MemorySpace.VMEM)
    hbm = pl.BlockSpec(memory_space=pl.ANY)   # w4/w5/w6: manual prefetch
    in_specs = [hbm if i in (10, 13, 16) else vmem for i in range(len(ins))]

    # Advisory cost estimate for XLA's scheduler.
    flops = 2 * p1.shape[0] * 9 * w1.shape[1]
    for g, wc in zip(g_list, w_list):
        cin, cout = wc.shape[0] // 9, wc.shape[1]
        flops += 2 * g.shape[0] * g.shape[1] * cin            # gather GEMM
        flops += 2 * (g.shape[0] // 9) * (9 * cin) * cout     # conv GEMM
    bytes_accessed = sum(int(np.prod(a.shape)) * a.dtype.itemsize for a in ins)
    bytes_accessed += m_out_real * cout_last * 4

    out = pl.pallas_call(
        _fused_net_kernel,
        out_shape=jax.ShapeDtypeStruct((m_out_real, cout_last), jnp.float32),
        in_specs=in_specs,
        out_specs=vmem,
        scratch_shapes=[
            pltpu.VMEM((patch_rows, patch_cols), jnp.bfloat16),  # patch slab
            pltpu.VMEM(w4.shape, jnp.bfloat16),                  # prefetched w4
            pltpu.VMEM(w5.shape, jnp.bfloat16),                  # prefetched w5
            pltpu.VMEM(w6.shape, jnp.bfloat16),                  # prefetched w6
            pltpu.SemaphoreType.DMA((3,)),
        ],
        compiler_params=pltpu.CompilerParams(
            vmem_limit_bytes=32 * 1024 * 1024),
        cost_estimate=pl.CostEstimate(flops=int(flops), transcendentals=0,
                                      bytes_accessed=int(bytes_accessed)),
    )(*ins)
    return out.reshape(n, meta["out_hw"][0], meta["out_hw"][1], cout_last)


if __name__ == "__main__":
    key = jax.random.PRNGKey(0)
    xk, pk = jax.random.split(key)

    # Module takes 1-channel images: NCHW (2, 1, 16, 16) -> NHWC (2, 16, 16, 1)
    x_nchw = jax.random.normal(xk, (2, 1, 16, 16), jnp.float32)
    x = jnp.transpose(x_nchw, (0, 2, 3, 1))

    # (Cin, Cout, stride) per layer, matching LowLevelNet.__init__
    cfg = [(1, 64, 2), (64, 128, 1), (128, 128, 2),
           (128, 256, 1), (256, 256, 2), (256, 512, 1)]

    # Deterministic PyTorch-style uniform(-1/sqrt(fan_in), 1/sqrt(fan_in)) init.
    params = []
    for i, (cin, cout, s) in enumerate(cfg):
        wk, bk = jax.random.split(jax.random.fold_in(pk, i))
        bound = 1.0 / float((cin * 9) ** 0.5)
        w = jax.random.uniform(wk, (cout, cin, 3, 3), jnp.float32, -bound, bound)
        b = jax.random.uniform(bk, (cout,), jnp.float32, -bound, bound)
        params.append((w, b, s))

    # One-time packing (bf16 weights, stacked gather matrices) off the hot path.
    ops, meta = pack_params(params, n=2, h=16, w=16)

    fwd = jax.jit(lambda xx, oo: low_level_net_fused(xx, oo, meta))
    out = jax.block_until_ready(fwd(x, ops))
    assert out.shape == (2, 2, 2, 512), out.shape

    # Pure-JAX f32 reference (same NHWC layout) to validate the fused kernel.
    ref = x
    for w, b, s in params:
        ref = jax.lax.conv_general_dilated(
            ref, jnp.transpose(w, (2, 3, 1, 0)),  # OIHW -> HWIO
            window_strides=(s, s), padding=((1, 1), (1, 1)),
            dimension_numbers=("NHWC", "HWIO", "NHWC"),
            precision=jax.lax.Precision.HIGHEST)
        ref = jnp.maximum(ref + b, 0.0)
    ref = jax.block_until_ready(ref)

    assert jnp.allclose(out, ref, rtol=5e-3, atol=5e-3), \
        float(jnp.max(jnp.abs(out - ref)))
    print("KERNEL_OK")
</pallas_src>

<mosaic_0001>
module attributes {stable_mosaic.version = 11 : i64} {
  func.func @_fused_net_kernel(%arg0: memref<128x9xbf16, #tpu.memory_space<vmem>>, %arg1: memref<9x128xbf16, #tpu.memory_space<vmem>>, %arg2: memref<1x128xf32, #tpu.memory_space<vmem>>, %arg3: memref<1152x128xbf16, #tpu.memory_space<vmem>>, %arg4: memref<1152x128xbf16, #tpu.memory_space<vmem>>, %arg5: memref<1x128xf32, #tpu.memory_space<vmem>>, %arg6: memref<288x128xbf16, #tpu.memory_space<vmem>>, %arg7: memref<1152x128xbf16, #tpu.memory_space<vmem>>, %arg8: memref<1x128xf32, #tpu.memory_space<vmem>>, %arg9: memref<288x32xbf16, #tpu.memory_space<vmem>>, %arg10: memref<1152x256xbf16, #tpu.memory_space<any>>, %arg11: memref<1x256xf32, #tpu.memory_space<vmem>>, %arg12: memref<144x32xbf16, #tpu.memory_space<vmem>>, %arg13: memref<2304x256xbf16, #tpu.memory_space<any>>, %arg14: memref<1x256xf32, #tpu.memory_space<vmem>>, %arg15: memref<144x16xbf16, #tpu.memory_space<vmem>>, %arg16: memref<2304x512xbf16, #tpu.memory_space<any>>, %arg17: memref<1x512xf32, #tpu.memory_space<vmem>>, %arg18: memref<8x512xf32, #tpu.memory_space<vmem>>, %arg19: memref<1152x256xbf16, #tpu.memory_space<vmem>>, %arg20: memref<1152x256xbf16, #tpu.memory_space<vmem>>, %arg21: memref<2304x256xbf16, #tpu.memory_space<vmem>>, %arg22: memref<2304x512xbf16, #tpu.memory_space<vmem>>, %arg23: memref<3x!tpu.dma_semaphore, #tpu.memory_space<semaphore_mem>>) attributes {dimension_semantics = [], scalar_prefetch = 0 : i64, scratch_operands = 5 : i64, tpu.core_type = #tpu.core_type<tc>} {
    %c0_i32 = arith.constant 0 : i32
    %0 = tpu.memref_slice %arg23[%c0_i32] : memref<3x!tpu.dma_semaphore, #tpu.memory_space<semaphore_mem>> -> memref<1x!tpu.dma_semaphore, #tpu.memory_space<semaphore_mem>>
    %1 = tpu.memref_squeeze %0 : memref<1x!tpu.dma_semaphore, #tpu.memory_space<semaphore_mem>> -> memref<!tpu.dma_semaphore, #tpu.memory_space<semaphore_mem>>
    tpu.enqueue_dma source(%arg10 : memref<1152x256xbf16, #tpu.memory_space<any>>) target(%arg20 : memref<1152x256xbf16, #tpu.memory_space<vmem>>) target_semaphore(%1 : memref<!tpu.dma_semaphore, #tpu.memory_space<semaphore_mem>>)
    %c1_i32 = arith.constant 1 : i32
    %2 = tpu.memref_slice %arg23[%c1_i32] : memref<3x!tpu.dma_semaphore, #tpu.memory_space<semaphore_mem>> -> memref<1x!tpu.dma_semaphore, #tpu.memory_space<semaphore_mem>>
    %3 = tpu.memref_squeeze %2 : memref<1x!tpu.dma_semaphore, #tpu.memory_space<semaphore_mem>> -> memref<!tpu.dma_semaphore, #tpu.memory_space<semaphore_mem>>
    tpu.enqueue_dma source(%arg13 : memref<2304x256xbf16, #tpu.memory_space<any>>) target(%arg21 : memref<2304x256xbf16, #tpu.memory_space<vmem>>) target_semaphore(%3 : memref<!tpu.dma_semaphore, #tpu.memory_space<semaphore_mem>>)
    %c2_i32 = arith.constant 2 : i32
    %4 = tpu.memref_slice %arg23[%c2_i32] : memref<3x!tpu.dma_semaphore, #tpu.memory_space<semaphore_mem>> -> memref<1x!tpu.dma_semaphore, #tpu.memory_space<semaphore_mem>>
    %5 = tpu.memref_squeeze %4 : memref<1x!tpu.dma_semaphore, #tpu.memory_space<semaphore_mem>> -> memref<!tpu.dma_semaphore, #tpu.memory_space<semaphore_mem>>
    tpu.enqueue_dma source(%arg16 : memref<2304x512xbf16, #tpu.memory_space<any>>) target(%arg22 : memref<2304x512xbf16, #tpu.memory_space<vmem>>) target_semaphore(%5 : memref<!tpu.dma_semaphore, #tpu.memory_space<semaphore_mem>>)
    %c0 = arith.constant 0 : index
    %c0_0 = arith.constant 0 : index
    %6 = vector.load %arg0[%c0, %c0_0] : memref<128x9xbf16, #tpu.memory_space<vmem>>, vector<128x9xbf16>
    %c0_1 = arith.constant 0 : index
    %c0_2 = arith.constant 0 : index
    %7 = vector.load %arg1[%c0_1, %c0_2] : memref<9x128xbf16, #tpu.memory_space<vmem>>, vector<9x128xbf16>
    %cst = arith.constant dense<0.000000e+00> : vector<128x128xf32>
    %8 = tpu.matmul %6, %7, %cst {dimension_numbers = #tpu.dot_dimension_numbers<[1], [0], [0], [1], [0, 0, 1, 1], [], []>} : vector<128x9xbf16>, vector<9x128xbf16>, vector<128x128xf32> -> vector<128x128xf32>
    %c0_3 = arith.constant 0 : index
    %c0_4 = arith.constant 0 : index
    %9 = vector.load %arg2[%c0_3, %c0_4] : memref<1x128xf32, #tpu.memory_space<vmem>>, vector<1x128xf32>
    %10 = vector.broadcast %9 : vector<1x128xf32> to vector<128x128xf32>
    %11 = arith.addf %8, %10 : vector<128x128xf32>
    %cst_5 = arith.constant 0.000000e+00 : f32
    %12 = vector.broadcast %cst_5 : f32 to vector<128x128xf32>
    %13 = arith.maximumf %11, %12 : vector<128x128xf32>
    %14 = arith.truncf %13 : vector<128x128xf32> to vector<128x128xbf16>
    %c0_6 = arith.constant 0 : index
    %c0_7 = arith.constant 0 : index
    %15 = vector.load %arg3[%c0_6, %c0_7] : memref<1152x128xbf16, #tpu.memory_space<vmem>>, vector<288x128xbf16>
    %cst_8 = arith.constant dense<0.000000e+00> : vector<288x128xf32>
    %16 = tpu.matmul %15, %14, %cst_8 {dimension_numbers = #tpu.dot_dimension_numbers<[1], [0], [0], [1], [0, 0, 1, 1], [], []>} : vector<288x128xbf16>, vector<128x128xbf16>, vector<288x128xf32> -> vector<288x128xf32>
    %17 = arith.truncf %16 : vector<288x128xf32> to vector<288x128xbf16>
    %c0_9 = arith.constant 0 : index
    %c0_10 = arith.constant 0 : index
    %18 = vector.load %arg19[%c0_9, %c0_10] : memref<1152x256xbf16, #tpu.memory_space<vmem>>, vector<288x128xbf16>
    tpu.vector_store %arg19[%c0_9, %c0_10], %17 {strides = array<i32>} : memref<1152x256xbf16, #tpu.memory_space<vmem>>, vector<288x128xbf16>,
    %c288 = arith.constant 288 : index
    %c0_11 = arith.constant 0 : index
    %19 = vector.load %arg3[%c288, %c0_11] : memref<1152x128xbf16, #tpu.memory_space<vmem>>, vector<288x128xbf16>
    %cst_12 = arith.constant dense<0.000000e+00> : vector<288x128xf32>
    %20 = tpu.matmul %19, %14, %cst_12 {dimension_numbers = #tpu.dot_dimension_numbers<[1], [0], [0], [1], [0, 0, 1, 1], [], []>} : vector<288x128xbf16>, vector<128x128xbf16>, vector<288x128xf32> -> vector<288x128xf32>
    %21 = arith.truncf %20 : vector<288x128xf32> to vector<288x128xbf16>
    %c288_13 = arith.constant 288 : index
    %c0_14 = arith.constant 0 : index
    %22 = vector.load %arg19[%c288_13, %c0_14] : memref<1152x256xbf16, #tpu.memory_space<vmem>>, vector<288x128xbf16>
    tpu.vector_store %arg19[%c288_13, %c0_14], %21 {strides = array<i32>} : memref<1152x256xbf16, #tpu.memory_space<vmem>>, vector<288x128xbf16>,
    %c576 = arith.constant 576 : index
    %c0_15 = arith.constant 0 : index
    %23 = vector.load %arg3[%c576, %c0_15] : memref<1152x128xbf16, #tpu.memory_space<vmem>>, vector<288x128xbf16>
    %cst_16 = arith.constant dense<0.000000e+00> : vector<288x128xf32>
    %24 = tpu.matmul %23, %14, %cst_16 {dimension_numbers = #tpu.dot_dimension_numbers<[1], [0], [0], [1], [0, 0, 1, 1], [], []>} : vector<288x128xbf16>, vector<128x128xbf16>, vector<288x128xf32> -> vector<288x128xf32>
    %25 = arith.truncf %24 : vector<288x128xf32> to vector<288x128xbf16>
    %c576_17 = arith.constant 576 : index
    %c0_18 = arith.constant 0 : index
    %26 = vector.load %arg19[%c576_17, %c0_18] : memref<1152x256xbf16, #tpu.memory_space<vmem>>, vector<288x128xbf16>
    tpu.vector_store %arg19[%c576_17, %c0_18], %25 {strides = array<i32>} : memref<1152x256xbf16, #tpu.memory_space<vmem>>, vector<288x128xbf16>,
    %c864 = arith.constant 864 : index
    %c0_19 = arith.constant 0 : index
    %27 = vector.load %arg3[%c864, %c0_19] : memref<1152x128xbf16, #tpu.memory_space<vmem>>, vector<288x128xbf16>
    %cst_20 = arith.constant dense<0.000000e+00> : vector<288x128xf32>
    %28 = tpu.matmul %27, %14, %cst_20 {dimension_numbers = #tpu.dot_dimension_numbers<[1], [0], [0], [1], [0, 0, 1, 1], [], []>} : vector<288x128xbf16>, vector<128x128xbf16>, vector<288x128xf32> -> vector<288x128xf32>
    %29 = arith.truncf %28 : vector<288x128xf32> to vector<288x128xbf16>
    %c864_21 = arith.constant 864 : index
    %c0_22 = arith.constant 0 : index
    %30 = vector.load %arg19[%c864_21, %c0_22] : memref<1152x256xbf16, #tpu.memory_space<vmem>>, vector<288x128xbf16>
    tpu.vector_store %arg19[%c864_21, %c0_22], %29 {strides = array<i32>} : memref<1152x256xbf16, #tpu.memory_space<vmem>>, vector<288x128xbf16>,
    %cst_23 = arith.constant 0.000000e+00 : f32
    %31 = vector.broadcast %cst_23 : f32 to vector<128x128xf32>
    %c0_24 = arith.constant 0 : index
    %c0_25 = arith.constant 0 : index
    %32 = vector.load %arg19[%c0_24, %c0_25] : memref<1152x256xbf16, #tpu.memory_space<vmem>>, vector<128x128xbf16>
    %c0_26 = arith.constant 0 : index
    %c0_27 = arith.constant 0 : index
    %33 = vector.load %arg4[%c0_26, %c0_27] : memref<1152x128xbf16, #tpu.memory_space<vmem>>, vector<128x128xbf16>
    %cst_28 = arith.constant dense<0.000000e+00> : vector<128x128xf32>
    %34 = tpu.matmul %32, %33, %cst_28 {dimension_numbers = #tpu.dot_dimension_numbers<[1], [0], [0], [1], [0, 0, 1, 1], [], []>} : vector<128x128xbf16>, vector<128x128xbf16>, vector<128x128xf32> -> vector<128x128xf32>
    %35 = arith.addf %31, %34 : vector<128x128xf32>
    %c128 = arith.constant 128 : index
    %c0_29 = arith.constant 0 : index
    %36 = vector.load %arg19[%c128, %c0_29] : memref<1152x256xbf16, #tpu.memory_space<vmem>>, vector<128x128xbf16>
    %c128_30 = arith.constant 128 : index
    %c0_31 = arith.constant 0 : index
    %37 = vector.load %arg4[%c128_30, %c0_31] : memref<1152x128xbf16, #tpu.memory_space<vmem>>, vector<128x128xbf16>
    %cst_32 = arith.constant dense<0.000000e+00> : vector<128x128xf32>
    %38 = tpu.matmul %36, %37, %cst_32 {dimension_numbers = #tpu.dot_dimension_numbers<[1], [0], [0], [1], [0, 0, 1, 1], [], []>} : vector<128x128xbf16>, vector<128x128xbf16>, vector<128x128xf32> -> vector<128x128xf32>
    %39 = arith.addf %35, %38 : vector<128x128xf32>
    %c256 = arith.constant 256 : index
    %c0_33 = arith.constant 0 : index
    %40 = vector.load %arg19[%c256, %c0_33] : memref<1152x256xbf16, #tpu.memory_space<vmem>>, vector<128x128xbf16>
    %c256_34 = arith.constant 256 : index
    %c0_35 = arith.constant 0 : index
    %41 = vector.load %arg4[%c256_34, %c0_35] : memref<1152x128xbf16, #tpu.memory_space<vmem>>, vector<128x128xbf16>
    %cst_36 = arith.constant dense<0.000000e+00> : vector<128x128xf32>
    %42 = tpu.matmul %40, %41, %cst_36 {dimension_numbers = #tpu.dot_dimension_numbers<[1], [0], [0], [1], [0, 0, 1, 1], [], []>} : vector<128x128xbf16>, vector<128x128xbf16>, vector<128x128xf32> -> vector<128x128xf32>
    %43 = arith.addf %39, %42 : vector<128x128xf32>
    %c384 = arith.constant 384 : index
    %c0_37 = arith.constant 0 : index
    %44 = vector.load %arg19[%c384, %c0_37] : memref<1152x256xbf16, #tpu.memory_space<vmem>>, vector<128x128xbf16>
    %c384_38 = arith.constant 384 : index
    %c0_39 = arith.constant 0 : index
    %45 = vector.load %arg4[%c384_38, %c0_39] : memref<1152x128xbf16, #tpu.memory_space<vmem>>, vector<128x128xbf16>
    %cst_40 = arith.constant dense<0.000000e+00> : vector<128x128xf32>
    %46 = tpu.matmul %44, %45, %cst_40 {dimension_numbers = #tpu.dot_dimension_numbers<[1], [0], [0], [1], [0, 0, 1, 1], [], []>} : vector<128x128xbf16>, vector<128x128xbf16>, vector<128x128xf32> -> vector<128x128xf32>
    %47 = arith.addf %43, %46 : vector<128x128xf32>
    %c512 = arith.constant 512 : index
    %c0_41 = arith.constant 0 : index
    %48 = vector.load %arg19[%c512, %c0_41] : memref<1152x256xbf16, #tpu.memory_space<vmem>>, vector<128x128xbf16>
    %c512_42 = arith.constant 512 : index
    %c0_43 = arith.constant 0 : index
    %49 = vector.load %arg4[%c512_42, %c0_43] : memref<1152x128xbf16, #tpu.memory_space<vmem>>, vector<128x128xbf16>
    %cst_44 = arith.constant dense<0.000000e+00> : vector<128x128xf32>
    %50 = tpu.matmul %48, %49, %cst_44 {dimension_numbers = #tpu.dot_dimension_numbers<[1], [0], [0], [1], [0, 0, 1, 1], [], []>} : vector<128x128xbf16>, vector<128x128xbf16>, vector<128x128xf32> -> vector<128x128xf32>
    %51 = arith.addf %47, %50 : vector<128x128xf32>
    %c640 = arith.constant 640 : index
    %c0_45 = arith.constant 0 : index
    %52 = vector.load %arg19[%c640, %c0_45] : memref<1152x256xbf16, #tpu.memory_space<vmem>>, vector<128x128xbf16>
    %c640_46 = arith.constant 640 : index
    %c0_47 = arith.constant 0 : index
    %53 = vector.load %arg4[%c640_46, %c0_47] : memref<1152x128xbf16, #tpu.memory_space<vmem>>, vector<128x128xbf16>
    %cst_48 = arith.constant dense<0.000000e+00> : vector<128x128xf32>
    %54 = tpu.matmul %52, %53, %cst_48 {dimension_numbers = #tpu.dot_dimension_numbers<[1], [0], [0], [1], [0, 0, 1, 1], [], []>} : vector<128x128xbf16>, vector<128x128xbf16>, vector<128x128xf32> -> vector<128x128xf32>
    %55 = arith.addf %51, %54 : vector<128x128xf32>
    %c768 = arith.constant 768 : index
    %c0_49 = arith.constant 0 : index
    %56 = vector.load %arg19[%c768, %c0_49] : memref<1152x256xbf16, #tpu.memory_space<vmem>>, vector<128x128xbf16>
    %c768_50 = arith.constant 768 : index
    %c0_51 = arith.constant 0 : index
    %57 = vector.load %arg4[%c768_50, %c0_51] : memref<1152x128xbf16, #tpu.memory_space<vmem>>, vector<128x128xbf16>
    %cst_52 = arith.constant dense<0.000000e+00> : vector<128x128xf32>
    %58 = tpu.matmul %56, %57, %cst_52 {dimension_numbers = #tpu.dot_dimension_numbers<[1], [0], [0], [1], [0, 0, 1, 1], [], []>} : vector<128x128xbf16>, vector<128x128xbf16>, vector<128x128xf32> -> vector<128x128xf32>
    %59 = arith.addf %55, %58 : vector<128x128xf32>
    %c896 = arith.constant 896 : index
    %c0_53 = arith.constant 0 : index
    %60 = vector.load %arg19[%c896, %c0_53] : memref<1152x256xbf16, #tpu.memory_space<vmem>>, vector<128x128xbf16>
    %c896_54 = arith.constant 896 : index
    %c0_55 = arith.constant 0 : index
    %61 = vector.load %arg4[%c896_54, %c0_55] : memref<1152x128xbf16, #tpu.memory_space<vmem>>, vector<128x128xbf16>
    %cst_56 = arith.constant dense<0.000000e+00> : vector<128x128xf32>
    %62 = tpu.matmul %60, %61, %cst_56 {dimension_numbers = #tpu.dot_dimension_numbers<[1], [0], [0], [1], [0, 0, 1, 1], [], []>} : vector<128x128xbf16>, vector<128x128xbf16>, vector<128x128xf32> -> vector<128x128xf32>
    %63 = arith.addf %59, %62 : vector<128x128xf32>
    %c1024 = arith.constant 1024 : index
    %c0_57 = arith.constant 0 : index
    %64 = vector.load %arg19[%c1024, %c0_57] : memref<1152x256xbf16, #tpu.memory_space<vmem>>, vector<128x128xbf16>
    %c1024_58 = arith.constant 1024 : index
    %c0_59 = arith.constant 0 : index
    %65 = vector.load %arg4[%c1024_58, %c0_59] : memref<1152x128xbf16, #tpu.memory_space<vmem>>, vector<128x128xbf16>
    %cst_60 = arith.constant dense<0.000000e+00> : vector<128x128xf32>
    %66 = tpu.matmul %64, %65, %cst_60 {dimension_numbers = #tpu.dot_dimension_numbers<[1], [0], [0], [1], [0, 0, 1, 1], [], []>} : vector<128x128xbf16>, vector<128x128xbf16>, vector<128x128xf32> -> vector<128x128xf32>
    %67 = arith.addf %63, %66 : vector<128x128xf32>
    %c0_61 = arith.constant 0 : index
    %c0_62 = arith.constant 0 : index
    %68 = vector.load %arg5[%c0_61, %c0_62] : memref<1x128xf32, #tpu.memory_space<vmem>>, vector<1x128xf32>
    %69 = vector.broadcast %68 : vector<1x128xf32> to vector<128x128xf32>
    %70 = arith.addf %67, %69 : vector<128x128xf32>
    %cst_63 = arith.constant 0.000000e+00 : f32
    %71 = vector.broadcast %cst_63 : f32 to vector<128x128xf32>
    %72 = arith.maximumf %70, %71 : vector<128x128xf32>
    %73 = arith.truncf %72 : vector<128x128xf32> to vector<128x128xbf16>
    %c0_64 = arith.constant 0 : index
    %c0_65 = arith.constant 0 : index
    %74 = vector.load %arg6[%c0_64, %c0_65] : memref<288x128xbf16, #tpu.memory_space<vmem>>, vector<288x128xbf16>
    %cst_66 = arith.constant dense<0.000000e+00> : vector<288x128xf32>
    %75 = tpu.matmul %74, %73, %cst_66 {dimension_numbers = #tpu.dot_dimension_numbers<[1], [0], [0], [1], [0, 0, 1, 1], [], []>} : vector<288x128xbf16>, vector<128x128xbf16>, vector<288x128xf32> -> vector<288x128xf32>
    %76 = arith.truncf %75 : vector<288x128xf32> to vector<288x128xbf16>
    %c0_67 = arith.constant 0 : index
    %c0_68 = arith.constant 0 : index
    %77 = vector.load %arg19[%c0_67, %c0_68] : memref<1152x256xbf16, #tpu.memory_space<vmem>>, vector<288x128xbf16>
    tpu.vector_store %arg19[%c0_67, %c0_68], %76 {strides = array<i32>} : memref<1152x256xbf16, #tpu.memory_space<vmem>>, vector<288x128xbf16>,
    %cst_69 = arith.constant 0.000000e+00 : f32
    %78 = vector.broadcast %cst_69 : f32 to vector<32x128xf32>
    %c0_70 = arith.constant 0 : index
    %c0_71 = arith.constant 0 : index
    %79 = vector.load %arg19[%c0_70, %c0_71] : memref<1152x256xbf16, #tpu.memory_space<vmem>>, vector<32x128xbf16>
    %c0_72 = arith.constant 0 : index
    %c0_73 = arith.constant 0 : index
    %80 = vector.load %arg7[%c0_72, %c0_73] : memref<1152x128xbf16, #tpu.memory_space<vmem>>, vector<128x128xbf16>
    %cst_74 = arith.constant dense<0.000000e+00> : vector<32x128xf32>
    %81 = tpu.matmul %79, %80, %cst_74 {dimension_numbers = #tpu.dot_dimension_numbers<[1], [0], [0], [1], [0, 0, 1, 1], [], []>} : vector<32x128xbf16>, vector<128x128xbf16>, vector<32x128xf32> -> vector<32x128xf32>
    %82 = arith.addf %78, %81 : vector<32x128xf32>
    %c32 = arith.constant 32 : index
    %c0_75 = arith.constant 0 : index
    %83 = vector.load %arg19[%c32, %c0_75] : memref<1152x256xbf16, #tpu.memory_space<vmem>>, vector<32x128xbf16>
    %c128_76 = arith.constant 128 : index
    %c0_77 = arith.constant 0 : index
    %84 = vector.load %arg7[%c128_76, %c0_77] : memref<1152x128xbf16, #tpu.memory_space<vmem>>, vector<128x128xbf16>
    %cst_78 = arith.constant dense<0.000000e+00> : vector<32x128xf32>
    %85 = tpu.matmul %83, %84, %cst_78 {dimension_numbers = #tpu.dot_dimension_numbers<[1], [0], [0], [1], [0, 0, 1, 1], [], []>} : vector<32x128xbf16>, vector<128x128xbf16>, vector<32x128xf32> -> vector<32x128xf32>
    %86 = arith.addf %82, %85 : vector<32x128xf32>
    %c64 = arith.constant 64 : index
    %c0_79 = arith.constant 0 : index
    %87 = vector.load %arg19[%c64, %c0_79] : memref<1152x256xbf16, #tpu.memory_space<vmem>>, vector<32x128xbf16>
    %c256_80 = arith.constant 256 : index
    %c0_81 = arith.constant 0 : index
    %88 = vector.load %arg7[%c256_80, %c0_81] : memref<1152x128xbf16, #tpu.memory_space<vmem>>, vector<128x128xbf16>
    %cst_82 = arith.constant dense<0.000000e+00> : vector<32x128xf32>
    %89 = tpu.matmul %87, %88, %cst_82 {dimension_numbers = #tpu.dot_dimension_numbers<[1], [0], [0], [1], [0, 0, 1, 1], [], []>} : vector<32x128xbf16>, vector<128x128xbf16>, vector<32x128xf32> -> vector<32x128xf32>
    %90 = arith.addf %86, %89 : vector<32x128xf32>
    %c96 = arith.constant 96 : index
    %c0_83 = arith.constant 0 : index
    %91 = vector.load %arg19[%c96, %c0_83] : memref<1152x256xbf16, #tpu.memory_space<vmem>>, vector<32x128xbf16>
    %c384_84 = arith.constant 384 : index
    %c0_85 = arith.constant 0 : index
    %92 = vector.load %arg7[%c384_84, %c0_85] : memref<1152x128xbf16, #tpu.memory_space<vmem>>, vector<128x128xbf16>
    %cst_86 = arith.constant dense<0.000000e+00> : vector<32x128xf32>
    %93 = tpu.matmul %91, %92, %cst_86 {dimension_numbers = #tpu.dot_dimension_numbers<[1], [0], [0], [1], [0, 0, 1, 1], [], []>} : vector<32x128xbf16>, vector<128x128xbf16>, vector<32x128xf32> -> vector<32x128xf32>
    %94 = arith.addf %90, %93 : vector<32x128xf32>
    %c128_87 = arith.constant 128 : index
    %c0_88 = arith.constant 0 : index
    %95 = vector.load %arg19[%c128_87, %c0_88] : memref<1152x256xbf16, #tpu.memory_space<vmem>>, vector<32x128xbf16>
    %c512_89 = arith.constant 512 : index
    %c0_90 = arith.constant 0 : index
    %96 = vector.load %arg7[%c512_89, %c0_90] : memref<1152x128xbf16, #tpu.memory_space<vmem>>, vector<128x128xbf16>
    %cst_91 = arith.constant dense<0.000000e+00> : vector<32x128xf32>
    %97 = tpu.matmul %95, %96, %cst_91 {dimension_numbers = #tpu.dot_dimension_numbers<[1], [0], [0], [1], [0, 0, 1, 1], [], []>} : vector<32x128xbf16>, vector<128x128xbf16>, vector<32x128xf32> -> vector<32x128xf32>
    %98 = arith.addf %94, %97 : vector<32x128xf32>
    %c160 = arith.constant 160 : index
    %c0_92 = arith.constant 0 : index
    %99 = vector.load %arg19[%c160, %c0_92] : memref<1152x256xbf16, #tpu.memory_space<vmem>>, vector<32x128xbf16>
    %c640_93 = arith.constant 640 : index
    %c0_94 = arith.constant 0 : index
    %100 = vector.load %arg7[%c640_93, %c0_94] : memref<1152x128xbf16, #tpu.memory_space<vmem>>, vector<128x128xbf16>
    %cst_95 = arith.constant dense<0.000000e+00> : vector<32x128xf32>
    %101 = tpu.matmul %99, %100, %cst_95 {dimension_numbers = #tpu.dot_dimension_numbers<[1], [0], [0], [1], [0, 0, 1, 1], [], []>} : vector<32x128xbf16>, vector<128x128xbf16>, vector<32x128xf32> -> vector<32x128xf32>
    %102 = arith.addf %98, %101 : vector<32x128xf32>
    %c192 = arith.constant 192 : index
    %c0_96 = arith.constant 0 : index
    %103 = vector.load %arg19[%c192, %c0_96] : memref<1152x256xbf16, #tpu.memory_space<vmem>>, vector<32x128xbf16>
    %c768_97 = arith.constant 768 : index
    %c0_98 = arith.constant 0 : index
    %104 = vector.load %arg7[%c768_97, %c0_98] : memref<1152x128xbf16, #tpu.memory_space<vmem>>, vector<128x128xbf16>
    %cst_99 = arith.constant dense<0.000000e+00> : vector<32x128xf32>
    %105 = tpu.matmul %103, %104, %cst_99 {dimension_numbers = #tpu.dot_dimension_numbers<[1], [0], [0], [1], [0, 0, 1, 1], [], []>} : vector<32x128xbf16>, vector<128x128xbf16>, vector<32x128xf32> -> vector<32x128xf32>
    %106 = arith.addf %102, %105 : vector<32x128xf32>
    %c224 = arith.constant 224 : index
    %c0_100 = arith.constant 0 : index
    %107 = vector.load %arg19[%c224, %c0_100] : memref<1152x256xbf16, #tpu.memory_space<vmem>>, vector<32x128xbf16>
    %c896_101 = arith.constant 896 : index
    %c0_102 = arith.constant 0 : index
    %108 = vector.load %arg7[%c896_101, %c0_102] : memref<1152x128xbf16, #tpu.memory_space<vmem>>, vector<128x128xbf16>
    %cst_103 = arith.constant dense<0.000000e+00> : vector<32x128xf32>
    %109 = tpu.matmul %107, %108, %cst_103 {dimension_numbers = #tpu.dot_dimension_numbers<[1], [0], [0], [1], [0, 0, 1, 1], [], []>} : vector<32x128xbf16>, vector<128x128xbf16>, vector<32x128xf32> -> vector<32x128xf32>
    %110 = arith.addf %106, %109 : vector<32x128xf32>
    %c256_104 = arith.constant 256 : index
    %c0_105 = arith.constant 0 : index
    %111 = vector.load %arg19[%c256_104, %c0_105] : memref<1152x256xbf16, #tpu.memory_space<vmem>>, vector<32x128xbf16>
    %c1024_106 = arith.constant 1024 : index
    %c0_107 = arith.constant 0 : index
    %112 = vector.load %arg7[%c1024_106, %c0_107] : memref<1152x128xbf16, #tpu.memory_space<vmem>>, vector<128x128xbf16>
    %cst_108 = arith.constant dense<0.000000e+00> : vector<32x128xf32>
    %113 = tpu.matmul %111, %112, %cst_108 {dimension_numbers = #tpu.dot_dimension_numbers<[1], [0], [0], [1], [0, 0, 1, 1], [], []>} : vector<32x128xbf16>, vector<128x128xbf16>, vector<32x128xf32> -> vector<32x128xf32>
    %114 = arith.addf %110, %113 : vector<32x128xf32>
    %c0_109 = arith.constant 0 : index
    %c0_110 = arith.constant 0 : index
    %115 = vector.load %arg8[%c0_109, %c0_110] : memref<1x128xf32, #tpu.memory_space<vmem>>, vector<1x128xf32>
    %116 = vector.broadcast %115 : vector<1x128xf32> to vector<32x128xf32>
    %117 = arith.addf %114, %116 : vector<32x128xf32>
    %cst_111 = arith.constant 0.000000e+00 : f32
    %118 = vector.broadcast %cst_111 : f32 to vector<32x128xf32>
    %119 = arith.maximumf %117, %118 : vector<32x128xf32>
    %120 = arith.truncf %119 : vector<32x128xf32> to vector<32x128xbf16>
    %c0_112 = arith.constant 0 : index
    %c0_113 = arith.constant 0 : index
    %121 = vector.load %arg9[%c0_112, %c0_113] : memref<288x32xbf16, #tpu.memory_space<vmem>>, vector<288x32xbf16>
    %cst_114 = arith.constant dense<0.000000e+00> : vector<288x128xf32>
    %122 = tpu.matmul %121, %120, %cst_114 {dimension_numbers = #tpu.dot_dimension_numbers<[1], [0], [0], [1], [0, 0, 1, 1], [], []>} : vector<288x32xbf16>, vector<32x128xbf16>, vector<288x128xf32> -> vector<288x128xf32>
    %123 = arith.truncf %122 : vector<288x128xf32> to vector<288x128xbf16>
    %c0_115 = arith.constant 0 : index
    %c0_116 = arith.constant 0 : index
    %124 = vector.load %arg19[%c0_115, %c0_116] : memref<1152x256xbf16, #tpu.memory_space<vmem>>, vector<288x128xbf16>
    tpu.vector_store %arg19[%c0_115, %c0_116], %123 {strides = array<i32>} : memref<1152x256xbf16, #tpu.memory_space<vmem>>, vector<288x128xbf16>,
    %c0_i32_117 = arith.constant 0 : i32
    %125 = tpu.memref_slice %arg23[%c0_i32_117] : memref<3x!tpu.dma_semaphore, #tpu.memory_space<semaphore_mem>> -> memref<1x!tpu.dma_semaphore, #tpu.memory_space<semaphore_mem>>
    %126 = tpu.memref_squeeze %125 : memref<1x!tpu.dma_semaphore, #tpu.memory_space<semaphore_mem>> -> memref<!tpu.dma_semaphore, #tpu.memory_space<semaphore_mem>>
    tpu.wait_dma2 semaphore(%126 : memref<!tpu.dma_semaphore, #tpu.memory_space<semaphore_mem>>) src(%arg10 : memref<1152x256xbf16, #tpu.memory_space<any>>) dst(%arg20 : memref<1152x256xbf16, #tpu.memory_space<vmem>>)
    %cst_118 = arith.constant 0.000000e+00 : f32
    %127 = vector.broadcast %cst_118 : f32 to vector<32x256xf32>
    %c0_119 = arith.constant 0 : index
    %c0_120 = arith.constant 0 : index
    %128 = vector.load %arg19[%c0_119, %c0_120] : memref<1152x256xbf16, #tpu.memory_space<vmem>>, vector<32x128xbf16>
    %c0_121 = arith.constant 0 : index
    %c0_122 = arith.constant 0 : index
    %129 = vector.load %arg20[%c0_121, %c0_122] : memref<1152x256xbf16, #tpu.memory_space<vmem>>, vector<128x256xbf16>
    %cst_123 = arith.constant dense<0.000000e+00> : vector<32x256xf32>
    %130 = tpu.matmul %128, %129, %cst_123 {dimension_numbers = #tpu.dot_dimension_numbers<[1], [0], [0], [1], [0, 0, 1, 1], [], []>} : vector<32x128xbf16>, vector<128x256xbf16>, vector<32x256xf32> -> vector<32x256xf32>
    %131 = arith.addf %127, %130 : vector<32x256xf32>
    %c32_124 = arith.constant 32 : index
    %c0_125 = arith.constant 0 : index
    %132 = vector.load %arg19[%c32_124, %c0_125] : memref<1152x256xbf16, #tpu.memory_space<vmem>>, vector<32x128xbf16>
    %c128_126 = arith.constant 128 : index
    %c0_127 = arith.constant 0 : index
    %133 = vector.load %arg20[%c128_126, %c0_127] : memref<1152x256xbf16, #tpu.memory_space<vmem>>, vector<128x256xbf16>
    %cst_128 = arith.constant dense<0.000000e+00> : vector<32x256xf32>
    %134 = tpu.matmul %132, %133, %cst_128 {dimension_numbers = #tpu.dot_dimension_numbers<[1], [0], [0], [1], [0, 0, 1, 1], [], []>} : vector<32x128xbf16>, vector<128x256xbf16>, vector<32x256xf32> -> vector<32x256xf32>
    %135 = arith.addf %131, %134 : vector<32x256xf32>
    %c64_129 = arith.constant 64 : index
    %c0_130 = arith.constant 0 : index
    %136 = vector.load %arg19[%c64_129, %c0_130] : memref<1152x256xbf16, #tpu.memory_space<vmem>>, vector<32x128xbf16>
    %c256_131 = arith.constant 256 : index
    %c0_132 = arith.constant 0 : index
    %137 = vector.load %arg20[%c256_131, %c0_132] : memref<1152x256xbf16, #tpu.memory_space<vmem>>, vector<128x256xbf16>
    %cst_133 = arith.constant dense<0.000000e+00> : vector<32x256xf32>
    %138 = tpu.matmul %136, %137, %cst_133 {dimension_numbers = #tpu.dot_dimension_numbers<[1], [0], [0], [1], [0, 0, 1, 1], [], []>} : vector<32x128xbf16>, vector<128x256xbf16>, vector<32x256xf32> -> vector<32x256xf32>
    %139 = arith.addf %135, %138 : vector<32x256xf32>
    %c96_134 = arith.constant 96 : index
    %c0_135 = arith.constant 0 : index
    %140 = vector.load %arg19[%c96_134, %c0_135] : memref<1152x256xbf16, #tpu.memory_space<vmem>>, vector<32x128xbf16>
    %c384_136 = arith.constant 384 : index
    %c0_137 = arith.constant 0 : index
    %141 = vector.load %arg20[%c384_136, %c0_137] : memref<1152x256xbf16, #tpu.memory_space<vmem>>, vector<128x256xbf16>
    %cst_138 = arith.constant dense<0.000000e+00> : vector<32x256xf32>
    %142 = tpu.matmul %140, %141, %cst_138 {dimension_numbers = #tpu.dot_dimension_numbers<[1], [0], [0], [1], [0, 0, 1, 1], [], []>} : vector<32x128xbf16>, vector<128x256xbf16>, vector<32x256xf32> -> vector<32x256xf32>
    %143 = arith.addf %139, %142 : vector<32x256xf32>
    %c128_139 = arith.constant 128 : index
    %c0_140 = arith.constant 0 : index
    %144 = vector.load %arg19[%c128_139, %c0_140] : memref<1152x256xbf16, #tpu.memory_space<vmem>>, vector<32x128xbf16>
    %c512_141 = arith.constant 512 : index
    %c0_142 = arith.constant 0 : index
    %145 = vector.load %arg20[%c512_141, %c0_142] : memref<1152x256xbf16, #tpu.memory_space<vmem>>, vector<128x256xbf16>
    %cst_143 = arith.constant dense<0.000000e+00> : vector<32x256xf32>
    %146 = tpu.matmul %144, %145, %cst_143 {dimension_numbers = #tpu.dot_dimension_numbers<[1], [0], [0], [1], [0, 0, 1, 1], [], []>} : vector<32x128xbf16>, vector<128x256xbf16>, vector<32x256xf32> -> vector<32x256xf32>
    %147 = arith.addf %143, %146 : vector<32x256xf32>
    %c160_144 = arith.constant 160 : index
    %c0_145 = arith.constant 0 : index
    %148 = vector.load %arg19[%c160_144, %c0_145] : memref<1152x256xbf16, #tpu.memory_space<vmem>>, vector<32x128xbf16>
    %c640_146 = arith.constant 640 : index
    %c0_147 = arith.constant 0 : index
    %149 = vector.load %arg20[%c640_146, %c0_147] : memref<1152x256xbf16, #tpu.memory_space<vmem>>, vector<128x256xbf16>
    %cst_148 = arith.constant dense<0.000000e+00> : vector<32x256xf32>
    %150 = tpu.matmul %148, %149, %cst_148 {dimension_numbers = #tpu.dot_dimension_numbers<[1], [0], [0], [1], [0, 0, 1, 1], [], []>} : vector<32x128xbf16>, vector<128x256xbf16>, vector<32x256xf32> -> vector<32x256xf32>
    %151 = arith.addf %147, %150 : vector<32x256xf32>
    %c192_149 = arith.constant 192 : index
    %c0_150 = arith.constant 0 : index
    %152 = vector.load %arg19[%c192_149, %c0_150] : memref<1152x256xbf16, #tpu.memory_space<vmem>>, vector<32x128xbf16>
    %c768_151 = arith.constant 768 : index
    %c0_152 = arith.constant 0 : index
    %153 = vector.load %arg20[%c768_151, %c0_152] : memref<1152x256xbf16, #tpu.memory_space<vmem>>, vector<128x256xbf16>
    %cst_153 = arith.constant dense<0.000000e+00> : vector<32x256xf32>
    %154 = tpu.matmul %152, %153, %cst_153 {dimension_numbers = #tpu.dot_dimension_numbers<[1], [0], [0], [1], [0, 0, 1, 1], [], []>} : vector<32x128xbf16>, vector<128x256xbf16>, vector<32x256xf32> -> vector<32x256xf32>
    %155 = arith.addf %151, %154 : vector<32x256xf32>
    %c224_154 = arith.constant 224 : index
    %c0_155 = arith.constant 0 : index
    %156 = vector.load %arg19[%c224_154, %c0_155] : memref<1152x256xbf16, #tpu.memory_space<vmem>>, vector<32x128xbf16>
    %c896_156 = arith.constant 896 : index
    %c0_157 = arith.constant 0 : index
    %157 = vector.load %arg20[%c896_156, %c0_157] : memref<1152x256xbf16, #tpu.memory_space<vmem>>, vector<128x256xbf16>
    %cst_158 = arith.constant dense<0.000000e+00> : vector<32x256xf32>
    %158 = tpu.matmul %156, %157, %cst_158 {dimension_numbers = #tpu.dot_dimension_numbers<[1], [0], [0], [1], [0, 0, 1, 1], [], []>} : vector<32x128xbf16>, vector<128x256xbf16>, vector<32x256xf32> -> vector<32x256xf32>
    %159 = arith.addf %155, %158 : vector<32x256xf32>
    %c256_159 = arith.constant 256 : index
    %c0_160 = arith.constant 0 : index
    %160 = vector.load %arg19[%c256_159, %c0_160] : memref<1152x256xbf16, #tpu.memory_space<vmem>>, vector<32x128xbf16>
    %c1024_161 = arith.constant 1024 : index
    %c0_162 = arith.constant 0 : index
    %161 = vector.load %arg20[%c1024_161, %c0_162] : memref<1152x256xbf16, #tpu.memory_space<vmem>>, vector<128x256xbf16>
    %cst_163 = arith.constant dense<0.000000e+00> : vector<32x256xf32>
    %162 = tpu.matmul %160, %161, %cst_163 {dimension_numbers = #tpu.dot_dimension_numbers<[1], [0], [0], [1], [0, 0, 1, 1], [], []>} : vector<32x128xbf16>, vector<128x256xbf16>, vector<32x256xf32> -> vector<32x256xf32>
    %163 = arith.addf %159, %162 : vector<32x256xf32>
    %c0_164 = arith.constant 0 : index
    %c0_165 = arith.constant 0 : index
    %164 = vector.load %arg11[%c0_164, %c0_165] : memref<1x256xf32, #tpu.memory_space<vmem>>, vector<1x256xf32>
    %165 = vector.broadcast %164 : vector<1x256xf32> to vector<32x256xf32>
    %166 = arith.addf %163, %165 : vector<32x256xf32>
    %cst_166 = arith.constant 0.000000e+00 : f32
    %167 = vector.broadcast %cst_166 : f32 to vector<32x256xf32>
    %168 = arith.maximumf %166, %167 : vector<32x256xf32>
    %169 = arith.truncf %168 : vector<32x256xf32> to vector<32x256xbf16>
    %c0_167 = arith.constant 0 : index
    %c0_168 = arith.constant 0 : index
    %170 = vector.load %arg12[%c0_167, %c0_168] : memref<144x32xbf16, #tpu.memory_space<vmem>>, vector<144x32xbf16>
    %cst_169 = arith.constant dense<0.000000e+00> : vector<144x256xf32>
    %171 = tpu.matmul %170, %169, %cst_169 {dimension_numbers = #tpu.dot_dimension_numbers<[1], [0], [0], [1], [0, 0, 1, 1], [], []>} : vector<144x32xbf16>, vector<32x256xbf16>, vector<144x256xf32> -> vector<144x256xf32>
    %172 = arith.truncf %171 : vector<144x256xf32> to vector<144x256xbf16>
    %c0_170 = arith.constant 0 : index
    %c0_171 = arith.constant 0 : index
    %173 = vector.load %arg19[%c0_170, %c0_171] : memref<1152x256xbf16, #tpu.memory_space<vmem>>, vector<144x256xbf16>
    tpu.vector_store %arg19[%c0_170, %c0_171], %172 {strides = array<i32>} : memref<1152x256xbf16, #tpu.memory_space<vmem>>, vector<144x256xbf16>,
    %c1_i32_172 = arith.constant 1 : i32
    %174 = tpu.memref_slice %arg23[%c1_i32_172] : memref<3x!tpu.dma_semaphore, #tpu.memory_space<semaphore_mem>> -> memref<1x!tpu.dma_semaphore, #tpu.memory_space<semaphore_mem>>
    %175 = tpu.memref_squeeze %174 : memref<1x!tpu.dma_semaphore, #tpu.memory_space<semaphore_mem>> -> memref<!tpu.dma_semaphore, #tpu.memory_space<semaphore_mem>>
    tpu.wait_dma2 semaphore(%175 : memref<!tpu.dma_semaphore, #tpu.memory_space<semaphore_mem>>) src(%arg13 : memref<2304x256xbf16, #tpu.memory_space<any>>) dst(%arg21 : memref<2304x256xbf16, #tpu.memory_space<vmem>>)
    %cst_173 = arith.constant 0.000000e+00 : f32
    %176 = vector.broadcast %cst_173 : f32 to vector<16x256xf32>
    %c0_174 = arith.constant 0 : index
    %c0_175 = arith.constant 0 : index
    %177 = vector.load %arg19[%c0_174, %c0_175] : memref<1152x256xbf16, #tpu.memory_space<vmem>>, vector<16x128xbf16>
    %c0_176 = arith.constant 0 : index
    %c0_177 = arith.constant 0 : index
    %178 = vector.load %arg21[%c0_176, %c0_177] : memref<2304x256xbf16, #tpu.memory_space<vmem>>, vector<128x256xbf16>
    %cst_178 = arith.constant dense<0.000000e+00> : vector<16x256xf32>
    %179 = tpu.matmul %177, %178, %cst_178 {dimension_numbers = #tpu.dot_dimension_numbers<[1], [0], [0], [1], [0, 0, 1, 1], [], []>} : vector<16x128xbf16>, vector<128x256xbf16>, vector<16x256xf32> -> vector<16x256xf32>
    %180 = arith.addf %176, %179 : vector<16x256xf32>
    %c0_179 = arith.constant 0 : index
    %c128_180 = arith.constant 128 : index
    %181 = vector.load %arg19[%c0_179, %c128_180] : memref<1152x256xbf16, #tpu.memory_space<vmem>>, vector<16x128xbf16>
    %c128_181 = arith.constant 128 : index
    %c0_182 = arith.constant 0 : index
    %182 = vector.load %arg21[%c128_181, %c0_182] : memref<2304x256xbf16, #tpu.memory_space<vmem>>, vector<128x256xbf16>
    %cst_183 = arith.constant dense<0.000000e+00> : vector<16x256xf32>
    %183 = tpu.matmul %181, %182, %cst_183 {dimension_numbers = #tpu.dot_dimension_numbers<[1], [0], [0], [1], [0, 0, 1, 1], [], []>} : vector<16x128xbf16>, vector<128x256xbf16>, vector<16x256xf32> -> vector<16x256xf32>
    %184 = arith.addf %180, %183 : vector<16x256xf32>
    %c16 = arith.constant 16 : index
    %c0_184 = arith.constant 0 : index
    %185 = vector.load %arg19[%c16, %c0_184] : memref<1152x256xbf16, #tpu.memory_space<vmem>>, vector<16x128xbf16>
    %c256_185 = arith.constant 256 : index
    %c0_186 = arith.constant 0 : index
    %186 = vector.load %arg21[%c256_185, %c0_186] : memref<2304x256xbf16, #tpu.memory_space<vmem>>, vector<128x256xbf16>
    %cst_187 = arith.constant dense<0.000000e+00> : vector<16x256xf32>
    %187 = tpu.matmul %185, %186, %cst_187 {dimension_numbers = #tpu.dot_dimension_numbers<[1], [0], [0], [1], [0, 0, 1, 1], [], []>} : vector<16x128xbf16>, vector<128x256xbf16>, vector<16x256xf32> -> vector<16x256xf32>
    %188 = arith.addf %184, %187 : vector<16x256xf32>
    %c16_188 = arith.constant 16 : index
    %c128_189 = arith.constant 128 : index
    %189 = vector.load %arg19[%c16_188, %c128_189] : memref<1152x256xbf16, #tpu.memory_space<vmem>>, vector<16x128xbf16>
    %c384_190 = arith.constant 384 : index
    %c0_191 = arith.constant 0 : index
    %190 = vector.load %arg21[%c384_190, %c0_191] : memref<2304x256xbf16, #tpu.memory_space<vmem>>, vector<128x256xbf16>
    %cst_192 = arith.constant dense<0.000000e+00> : vector<16x256xf32>
    %191 = tpu.matmul %189, %190, %cst_192 {dimension_numbers = #tpu.dot_dimension_numbers<[1], [0], [0], [1], [0, 0, 1, 1], [], []>} : vector<16x128xbf16>, vector<128x256xbf16>, vector<16x256xf32> -> vector<16x256xf32>
    %192 = arith.addf %188, %191 : vector<16x256xf32>
    %c32_193 = arith.constant 32 : index
    %c0_194 = arith.constant 0 : index
    %193 = vector.load %arg19[%c32_193, %c0_194] : memref<1152x256xbf16, #tpu.memory_space<vmem>>, vector<16x128xbf16>
    %c512_195 = arith.constant 512 : index
    %c0_196 = arith.constant 0 : index
    %194 = vector.load %arg21[%c512_195, %c0_196] : memref<2304x256xbf16, #tpu.memory_space<vmem>>, vector<128x256xbf16>
    %cst_197 = arith.constant dense<0.000000e+00> : vector<16x256xf32>
    %195 = tpu.matmul %193, %194, %cst_197 {dimension_numbers = #tpu.dot_dimension_numbers<[1], [0], [0], [1], [0, 0, 1, 1], [], []>} : vector<16x128xbf16>, vector<128x256xbf16>, vector<16x256xf32> -> vector<16x256xf32>
    %196 = arith.addf %192, %195 : vector<16x256xf32>
    %c32_198 = arith.constant 32 : index
    %c128_199 = arith.constant 128 : index
    %197 = vector.load %arg19[%c32_198, %c128_199] : memref<1152x256xbf16, #tpu.memory_space<vmem>>, vector<16x128xbf16>
    %c640_200 = arith.constant 640 : index
    %c0_201 = arith.constant 0 : index
    %198 = vector.load %arg21[%c640_200, %c0_201] : memref<2304x256xbf16, #tpu.memory_space<vmem>>, vector<128x256xbf16>
    %cst_202 = arith.constant dense<0.000000e+00> : vector<16x256xf32>
    %199 = tpu.matmul %197, %198, %cst_202 {dimension_numbers = #tpu.dot_dimension_numbers<[1], [0], [0], [1], [0, 0, 1, 1], [], []>} : vector<16x128xbf16>, vector<128x256xbf16>, vector<16x256xf32> -> vector<16x256xf32>
    %200 = arith.addf %196, %199 : vector<16x256xf32>
    %c48 = arith.constant 48 : index
    %c0_203 = arith.constant 0 : index
    %201 = vector.load %arg19[%c48, %c0_203] : memref<1152x256xbf16, #tpu.memory_space<vmem>>, vector<16x128xbf16>
    %c768_204 = arith.constant 768 : index
    %c0_205 = arith.constant 0 : index
    %202 = vector.load %arg21[%c768_204, %c0_205] : memref<2304x256xbf16, #tpu.memory_space<vmem>>, vector<128x256xbf16>
    %cst_206 = arith.constant dense<0.000000e+00> : vector<16x256xf32>
    %203 = tpu.matmul %201, %202, %cst_206 {dimension_numbers = #tpu.dot_dimension_numbers<[1], [0], [0], [1], [0, 0, 1, 1], [], []>} : vector<16x128xbf16>, vector<128x256xbf16>, vector<16x256xf32> -> vector<16x256xf32>
    %204 = arith.addf %200, %203 : vector<16x256xf32>
    %c48_207 = arith.constant 48 : index
    %c128_208 = arith.constant 128 : index
    %205 = vector.load %arg19[%c48_207, %c128_208] : memref<1152x256xbf16, #tpu.memory_space<vmem>>, vector<16x128xbf16>
    %c896_209 = arith.constant 896 : index
    %c0_210 = arith.constant 0 : index
    %206 = vector.load %arg21[%c896_209, %c0_210] : memref<2304x256xbf16, #tpu.memory_space<vmem>>, vector<128x256xbf16>
    %cst_211 = arith.constant dense<0.000000e+00> : vector<16x256xf32>
    %207 = tpu.matmul %205, %206, %cst_211 {dimension_numbers = #tpu.dot_dimension_numbers<[1], [0], [0], [1], [0, 0, 1, 1], [], []>} : vector<16x128xbf16>, vector<128x256xbf16>, vector<16x256xf32> -> vector<16x256xf32>
    %208 = arith.addf %204, %207 : vector<16x256xf32>
    %c64_212 = arith.constant 64 : index
    %c0_213 = arith.constant 0 : index
    %209 = vector.load %arg19[%c64_212, %c0_213] : memref<1152x256xbf16, #tpu.memory_space<vmem>>, vector<16x128xbf16>
    %c1024_214 = arith.constant 1024 : index
    %c0_215 = arith.constant 0 : index
    %210 = vector.load %arg21[%c1024_214, %c0_215] : memref<2304x256xbf16, #tpu.memory_space<vmem>>, vector<128x256xbf16>
    %cst_216 = arith.constant dense<0.000000e+00> : vector<16x256xf32>
    %211 = tpu.matmul %209, %210, %cst_216 {dimension_numbers = #tpu.dot_dimension_numbers<[1], [0], [0], [1], [0, 0, 1, 1], [], []>} : vector<16x128xbf16>, vector<128x256xbf16>, vector<16x256xf32> -> vector<16x256xf32>
    %212 = arith.addf %208, %211 : vector<16x256xf32>
    %c64_217 = arith.constant 64 : index
    %c128_218 = arith.constant 128 : index
    %213 = vector.load %arg19[%c64_217, %c128_218] : memref<1152x256xbf16, #tpu.memory_space<vmem>>, vector<16x128xbf16>
    %c1152 = arith.constant 1152 : index
    %c0_219 = arith.constant 0 : index
    %214 = vector.load %arg21[%c1152, %c0_219] : memref<2304x256xbf16, #tpu.memory_space<vmem>>, vector<128x256xbf16>
    %cst_220 = arith.constant dense<0.000000e+00> : vector<16x256xf32>
    %215 = tpu.matmul %213, %214, %cst_220 {dimension_numbers = #tpu.dot_dimension_numbers<[1], [0], [0], [1], [0, 0, 1, 1], [], []>} : vector<16x128xbf16>, vector<128x256xbf16>, vector<16x256xf32> -> vector<16x256xf32>
    %216 = arith.addf %212, %215 : vector<16x256xf32>
    %c80 = arith.constant 80 : index
    %c0_221 = arith.constant 0 : index
    %217 = vector.load %arg19[%c80, %c0_221] : memref<1152x256xbf16, #tpu.memory_space<vmem>>, vector<16x128xbf16>
    %c1280 = arith.constant 1280 : index
    %c0_222 = arith.constant 0 : index
    %218 = vector.load %arg21[%c1280, %c0_222] : memref<2304x256xbf16, #tpu.memory_space<vmem>>, vector<128x256xbf16>
    %cst_223 = arith.constant dense<0.000000e+00> : vector<16x256xf32>
    %219 = tpu.matmul %217, %218, %cst_223 {dimension_numbers = #tpu.dot_dimension_numbers<[1], [0], [0], [1], [0, 0, 1, 1], [], []>} : vector<16x128xbf16>, vector<128x256xbf16>, vector<16x256xf32> -> vector<16x256xf32>
    %220 = arith.addf %216, %219 : vector<16x256xf32>
    %c80_224 = arith.constant 80 : index
    %c128_225 = arith.constant 128 : index
    %221 = vector.load %arg19[%c80_224, %c128_225] : memref<1152x256xbf16, #tpu.memory_space<vmem>>, vector<16x128xbf16>
    %c1408 = arith.constant 1408 : index
    %c0_226 = arith.constant 0 : index
    %222 = vector.load %arg21[%c1408, %c0_226] : memref<2304x256xbf16, #tpu.memory_space<vmem>>, vector<128x256xbf16>
    %cst_227 = arith.constant dense<0.000000e+00> : vector<16x256xf32>
    %223 = tpu.matmul %221, %222, %cst_227 {dimension_numbers = #tpu.dot_dimension_numbers<[1], [0], [0], [1], [0, 0, 1, 1], [], []>} : vector<16x128xbf16>, vector<128x256xbf16>, vector<16x256xf32> -> vector<16x256xf32>
    %224 = arith.addf %220, %223 : vector<16x256xf32>
    %c96_228 = arith.constant 96 : index
    %c0_229 = arith.constant 0 : index
    %225 = vector.load %arg19[%c96_228, %c0_229] : memref<1152x256xbf16, #tpu.memory_space<vmem>>, vector<16x128xbf16>
    %c1536 = arith.constant 1536 : index
    %c0_230 = arith.constant 0 : index
    %226 = vector.load %arg21[%c1536, %c0_230] : memref<2304x256xbf16, #tpu.memory_space<vmem>>, vector<128x256xbf16>
    %cst_231 = arith.constant dense<0.000000e+00> : vector<16x256xf32>
    %227 = tpu.matmul %225, %226, %cst_231 {dimension_numbers = #tpu.dot_dimension_numbers<[1], [0], [0], [1], [0, 0, 1, 1], [], []>} : vector<16x128xbf16>, vector<128x256xbf16>, vector<16x256xf32> -> vector<16x256xf32>
    %228 = arith.addf %224, %227 : vector<16x256xf32>
    %c96_232 = arith.constant 96 : index
    %c128_233 = arith.constant 128 : index
    %229 = vector.load %arg19[%c96_232, %c128_233] : memref<1152x256xbf16, #tpu.memory_space<vmem>>, vector<16x128xbf16>
    %c1664 = arith.constant 1664 : index
    %c0_234 = arith.constant 0 : index
    %230 = vector.load %arg21[%c1664, %c0_234] : memref<2304x256xbf16, #tpu.memory_space<vmem>>, vector<128x256xbf16>
    %cst_235 = arith.constant dense<0.000000e+00> : vector<16x256xf32>
    %231 = tpu.matmul %229, %230, %cst_235 {dimension_numbers = #tpu.dot_dimension_numbers<[1], [0], [0], [1], [0, 0, 1, 1], [], []>} : vector<16x128xbf16>, vector<128x256xbf16>, vector<16x256xf32> -> vector<16x256xf32>
    %232 = arith.addf %228, %231 : vector<16x256xf32>
    %c112 = arith.constant 112 : index
    %c0_236 = arith.constant 0 : index
    %233 = vector.load %arg19[%c112, %c0_236] : memref<1152x256xbf16, #tpu.memory_space<vmem>>, vector<16x128xbf16>
    %c1792 = arith.constant 1792 : index
    %c0_237 = arith.constant 0 : index
    %234 = vector.load %arg21[%c1792, %c0_237] : memref<2304x256xbf16, #tpu.memory_space<vmem>>, vector<128x256xbf16>
    %cst_238 = arith.constant dense<0.000000e+00> : vector<16x256xf32>
    %235 = tpu.matmul %233, %234, %cst_238 {dimension_numbers = #tpu.dot_dimension_numbers<[1], [0], [0], [1], [0, 0, 1, 1], [], []>} : vector<16x128xbf16>, vector<128x256xbf16>, vector<16x256xf32> -> vector<16x256xf32>
    %236 = arith.addf %232, %235 : vector<16x256xf32>
    %c112_239 = arith.constant 112 : index
    %c128_240 = arith.constant 128 : index
    %237 = vector.load %arg19[%c112_239, %c128_240] : memref<1152x256xbf16, #tpu.memory_space<vmem>>, vector<16x128xbf16>
    %c1920 = arith.constant 1920 : index
    %c0_241 = arith.constant 0 : index
    %238 = vector.load %arg21[%c1920, %c0_241] : memref<2304x256xbf16, #tpu.memory_space<vmem>>, vector<128x256xbf16>
    %cst_242 = arith.constant dense<0.000000e+00> : vector<16x256xf32>
    %239 = tpu.matmul %237, %238, %cst_242 {dimension_numbers = #tpu.dot_dimension_numbers<[1], [0], [0], [1], [0, 0, 1, 1], [], []>} : vector<16x128xbf16>, vector<128x256xbf16>, vector<16x256xf32> -> vector<16x256xf32>
    %240 = arith.addf %236, %239 : vector<16x256xf32>
    %c128_243 = arith.constant 128 : index
    %c0_244 = arith.constant 0 : index
    %241 = vector.load %arg19[%c128_243, %c0_244] : memref<1152x256xbf16, #tpu.memory_space<vmem>>, vector<16x128xbf16>
    %c2048 = arith.constant 2048 : index
    %c0_245 = arith.constant 0 : index
    %242 = vector.load %arg21[%c2048, %c0_245] : memref<2304x256xbf16, #tpu.memory_space<vmem>>, vector<128x256xbf16>
    %cst_246 = arith.constant dense<0.000000e+00> : vector<16x256xf32>
    %243 = tpu.matmul %241, %242, %cst_246 {dimension_numbers = #tpu.dot_dimension_numbers<[1], [0], [0], [1], [0, 0, 1, 1], [], []>} : vector<16x128xbf16>, vector<128x256xbf16>, vector<16x256xf32> -> vector<16x256xf32>
    %244 = arith.addf %240, %243 : vector<16x256xf32>
    %c128_247 = arith.constant 128 : index
    %c128_248 = arith.constant 128 : index
    %245 = vector.load %arg19[%c128_247, %c128_248] : memref<1152x256xbf16, #tpu.memory_space<vmem>>, vector<16x128xbf16>
    %c2176 = arith.constant 2176 : index
    %c0_249 = arith.constant 0 : index
    %246 = vector.load %arg21[%c2176, %c0_249] : memref<2304x256xbf16, #tpu.memory_space<vmem>>, vector<128x256xbf16>
    %cst_250 = arith.constant dense<0.000000e+00> : vector<16x256xf32>
    %247 = tpu.matmul %245, %246, %cst_250 {dimension_numbers = #tpu.dot_dimension_numbers<[1], [0], [0], [1], [0, 0, 1, 1], [], []>} : vector<16x128xbf16>, vector<128x256xbf16>, vector<16x256xf32> -> vector<16x256xf32>
    %248 = arith.addf %244, %247 : vector<16x256xf32>
    %c0_251 = arith.constant 0 : index
    %c0_252 = arith.constant 0 : index
    %249 = vector.load %arg14[%c0_251, %c0_252] : memref<1x256xf32, #tpu.memory_space<vmem>>, vector<1x256xf32>
    %250 = vector.broadcast %249 : vector<1x256xf32> to vector<16x256xf32>
    %251 = arith.addf %248, %250 : vector<16x256xf32>
    %cst_253 = arith.constant 0.000000e+00 : f32
    %252 = vector.broadcast %cst_253 : f32 to vector<16x256xf32>
    %253 = arith.maximumf %251, %252 : vector<16x256xf32>
    %254 = arith.truncf %253 : vector<16x256xf32> to vector<16x256xbf16>
    %c0_254 = arith.constant 0 : index
    %c0_255 = arith.constant 0 : index
    %255 = vector.load %arg15[%c0_254, %c0_255] : memref<144x16xbf16, #tpu.memory_space<vmem>>, vector<144x16xbf16>
    %cst_256 = arith.constant dense<0.000000e+00> : vector<144x256xf32>
    %256 = tpu.matmul %255, %254, %cst_256 {dimension_numbers = #tpu.dot_dimension_numbers<[1], [0], [0], [1], [0, 0, 1, 1], [], []>} : vector<144x16xbf16>, vector<16x256xbf16>, vector<144x256xf32> -> vector<144x256xf32>
    %257 = arith.truncf %256 : vector<144x256xf32> to vector<144x256xbf16>
    %c0_257 = arith.constant 0 : index
    %c0_258 = arith.constant 0 : index
    %258 = vector.load %arg19[%c0_257, %c0_258] : memref<1152x256xbf16, #tpu.memory_space<vmem>>, vector<144x256xbf16>
    tpu.vector_store %arg19[%c0_257, %c0_258], %257 {strides = array<i32>} : memref<1152x256xbf16, #tpu.memory_space<vmem>>, vector<144x256xbf16>,
    %c2_i32_259 = arith.constant 2 : i32
    %259 = tpu.memref_slice %arg23[%c2_i32_259] : memref<3x!tpu.dma_semaphore, #tpu.memory_space<semaphore_mem>> -> memref<1x!tpu.dma_semaphore, #tpu.memory_space<semaphore_mem>>
    %260 = tpu.memref_squeeze %259 : memref<1x!tpu.dma_semaphore, #tpu.memory_space<semaphore_mem>> -> memref<!tpu.dma_semaphore, #tpu.memory_space<semaphore_mem>>
    tpu.wait_dma2 semaphore(%260 : memref<!tpu.dma_semaphore, #tpu.memory_space<semaphore_mem>>) src(%arg16 : memref<2304x512xbf16, #tpu.memory_space<any>>) dst(%arg22 : memref<2304x512xbf16, #tpu.memory_space<vmem>>)
    %cst_260 = arith.constant 0.000000e+00 : f32
    %261 = vector.broadcast %cst_260 : f32 to vector<16x512xf32>
    %c0_261 = arith.constant 0 : index
    %c0_262 = arith.constant 0 : index
    %262 = vector.load %arg19[%c0_261, %c0_262] : memref<1152x256xbf16, #tpu.memory_space<vmem>>, vector<16x128xbf16>
    %c0_263 = arith.constant 0 : index
    %c0_264 = arith.constant 0 : index
    %263 = vector.load %arg22[%c0_263, %c0_264] : memref<2304x512xbf16, #tpu.memory_space<vmem>>, vector<128x512xbf16>
    %cst_265 = arith.constant dense<0.000000e+00> : vector<16x512xf32>
    %264 = tpu.matmul %262, %263, %cst_265 {dimension_numbers = #tpu.dot_dimension_numbers<[1], [0], [0], [1], [0, 0, 1, 1], [], []>} : vector<16x128xbf16>, vector<128x512xbf16>, vector<16x512xf32> -> vector<16x512xf32>
    %265 = arith.addf %261, %264 : vector<16x512xf32>
    %c0_266 = arith.constant 0 : index
    %c128_267 = arith.constant 128 : index
    %266 = vector.load %arg19[%c0_266, %c128_267] : memref<1152x256xbf16, #tpu.memory_space<vmem>>, vector<16x128xbf16>
    %c128_268 = arith.constant 128 : index
    %c0_269 = arith.constant 0 : index
    %267 = vector.load %arg22[%c128_268, %c0_269] : memref<2304x512xbf16, #tpu.memory_space<vmem>>, vector<128x512xbf16>
    %cst_270 = arith.constant dense<0.000000e+00> : vector<16x512xf32>
    %268 = tpu.matmul %266, %267, %cst_270 {dimension_numbers = #tpu.dot_dimension_numbers<[1], [0], [0], [1], [0, 0, 1, 1], [], []>} : vector<16x128xbf16>, vector<128x512xbf16>, vector<16x512xf32> -> vector<16x512xf32>
    %269 = arith.addf %265, %268 : vector<16x512xf32>
    %c16_271 = arith.constant 16 : index
    %c0_272 = arith.constant 0 : index
    %270 = vector.load %arg19[%c16_271, %c0_272] : memref<1152x256xbf16, #tpu.memory_space<vmem>>, vector<16x128xbf16>
    %c256_273 = arith.constant 256 : index
    %c0_274 = arith.constant 0 : index
    %271 = vector.load %arg22[%c256_273, %c0_274] : memref<2304x512xbf16, #tpu.memory_space<vmem>>, vector<128x512xbf16>
    %cst_275 = arith.constant dense<0.000000e+00> : vector<16x512xf32>
    %272 = tpu.matmul %270, %271, %cst_275 {dimension_numbers = #tpu.dot_dimension_numbers<[1], [0], [0], [1], [0, 0, 1, 1], [], []>} : vector<16x128xbf16>, vector<128x512xbf16>, vector<16x512xf32> -> vector<16x512xf32>
    %273 = arith.addf %269, %272 : vector<16x512xf32>
    %c16_276 = arith.constant 16 : index
    %c128_277 = arith.constant 128 : index
    %274 = vector.load %arg19[%c16_276, %c128_277] : memref<1152x256xbf16, #tpu.memory_space<vmem>>, vector<16x128xbf16>
    %c384_278 = arith.constant 384 : index
    %c0_279 = arith.constant 0 : index
    %275 = vector.load %arg22[%c384_278, %c0_279] : memref<2304x512xbf16, #tpu.memory_space<vmem>>, vector<128x512xbf16>
    %cst_280 = arith.constant dense<0.000000e+00> : vector<16x512xf32>
    %276 = tpu.matmul %274, %275, %cst_280 {dimension_numbers = #tpu.dot_dimension_numbers<[1], [0], [0], [1], [0, 0, 1, 1], [], []>} : vector<16x128xbf16>, vector<128x512xbf16>, vector<16x512xf32> -> vector<16x512xf32>
    %277 = arith.addf %273, %276 : vector<16x512xf32>
    %c32_281 = arith.constant 32 : index
    %c0_282 = arith.constant 0 : index
    %278 = vector.load %arg19[%c32_281, %c0_282] : memref<1152x256xbf16, #tpu.memory_space<vmem>>, vector<16x128xbf16>
    %c512_283 = arith.constant 512 : index
    %c0_284 = arith.constant 0 : index
    %279 = vector.load %arg22[%c512_283, %c0_284] : memref<2304x512xbf16, #tpu.memory_space<vmem>>, vector<128x512xbf16>
    %cst_285 = arith.constant dense<0.000000e+00> : vector<16x512xf32>
    %280 = tpu.matmul %278, %279, %cst_285 {dimension_numbers = #tpu.dot_dimension_numbers<[1], [0], [0], [1], [0, 0, 1, 1], [], []>} : vector<16x128xbf16>, vector<128x512xbf16>, vector<16x512xf32> -> vector<16x512xf32>
    %281 = arith.addf %277, %280 : vector<16x512xf32>
    %c32_286 = arith.constant 32 : index
    %c128_287 = arith.constant 128 : index
    %282 = vector.load %arg19[%c32_286, %c128_287] : memref<1152x256xbf16, #tpu.memory_space<vmem>>, vector<16x128xbf16>
    %c640_288 = arith.constant 640 : index
    %c0_289 = arith.constant 0 : index
    %283 = vector.load %arg22[%c640_288, %c0_289] : memref<2304x512xbf16, #tpu.memory_space<vmem>>, vector<128x512xbf16>
    %cst_290 = arith.constant dense<0.000000e+00> : vector<16x512xf32>
    %284 = tpu.matmul %282, %283, %cst_290 {dimension_numbers = #tpu.dot_dimension_numbers<[1], [0], [0], [1], [0, 0, 1, 1], [], []>} : vector<16x128xbf16>, vector<128x512xbf16>, vector<16x512xf32> -> vector<16x512xf32>
    %285 = arith.addf %281, %284 : vector<16x512xf32>
    %c48_291 = arith.constant 48 : index
    %c0_292 = arith.constant 0 : index
    %286 = vector.load %arg19[%c48_291, %c0_292] : memref<1152x256xbf16, #tpu.memory_space<vmem>>, vector<16x128xbf16>
    %c768_293 = arith.constant 768 : index
    %c0_294 = arith.constant 0 : index
    %287 = vector.load %arg22[%c768_293, %c0_294] : memref<2304x512xbf16, #tpu.memory_space<vmem>>, vector<128x512xbf16>
    %cst_295 = arith.constant dense<0.000000e+00> : vector<16x512xf32>
    %288 = tpu.matmul %286, %287, %cst_295 {dimension_numbers = #tpu.dot_dimension_numbers<[1], [0], [0], [1], [0, 0, 1, 1], [], []>} : vector<16x128xbf16>, vector<128x512xbf16>, vector<16x512xf32> -> vector<16x512xf32>
    %289 = arith.addf %285, %288 : vector<16x512xf32>
    %c48_296 = arith.constant 48 : index
    %c128_297 = arith.constant 128 : index
    %290 = vector.load %arg19[%c48_296, %c128_297] : memref<1152x256xbf16, #tpu.memory_space<vmem>>, vector<16x128xbf16>
    %c896_298 = arith.constant 896 : index
    %c0_299 = arith.constant 0 : index
    %291 = vector.load %arg22[%c896_298, %c0_299] : memref<2304x512xbf16, #tpu.memory_space<vmem>>, vector<128x512xbf16>
    %cst_300 = arith.constant dense<0.000000e+00> : vector<16x512xf32>
    %292 = tpu.matmul %290, %291, %cst_300 {dimension_numbers = #tpu.dot_dimension_numbers<[1], [0], [0], [1], [0, 0, 1, 1], [], []>} : vector<16x128xbf16>, vector<128x512xbf16>, vector<16x512xf32> -> vector<16x512xf32>
    %293 = arith.addf %289, %292 : vector<16x512xf32>
    %c64_301 = arith.constant 64 : index
    %c0_302 = arith.constant 0 : index
    %294 = vector.load %arg19[%c64_301, %c0_302] : memref<1152x256xbf16, #tpu.memory_space<vmem>>, vector<16x128xbf16>
    %c1024_303 = arith.constant 1024 : index
    %c0_304 = arith.constant 0 : index
    %295 = vector.load %arg22[%c1024_303, %c0_304] : memref<2304x512xbf16, #tpu.memory_space<vmem>>, vector<128x512xbf16>
    %cst_305 = arith.constant dense<0.000000e+00> : vector<16x512xf32>
    %296 = tpu.matmul %294, %295, %cst_305 {dimension_numbers = #tpu.dot_dimension_numbers<[1], [0], [0], [1], [0, 0, 1, 1], [], []>} : vector<16x128xbf16>, vector<128x512xbf16>, vector<16x512xf32> -> vector<16x512xf32>
    %297 = arith.addf %293, %296 : vector<16x512xf32>
    %c64_306 = arith.constant 64 : index
    %c128_307 = arith.constant 128 : index
    %298 = vector.load %arg19[%c64_306, %c128_307] : memref<1152x256xbf16, #tpu.memory_space<vmem>>, vector<16x128xbf16>
    %c1152_308 = arith.constant 1152 : index
    %c0_309 = arith.constant 0 : index
    %299 = vector.load %arg22[%c1152_308, %c0_309] : memref<2304x512xbf16, #tpu.memory_space<vmem>>, vector<128x512xbf16>
    %cst_310 = arith.constant dense<0.000000e+00> : vector<16x512xf32>
    %300 = tpu.matmul %298, %299, %cst_310 {dimension_numbers = #tpu.dot_dimension_numbers<[1], [0], [0], [1], [0, 0, 1, 1], [], []>} : vector<16x128xbf16>, vector<128x512xbf16>, vector<16x512xf32> -> vector<16x512xf32>
    %301 = arith.addf %297, %300 : vector<16x512xf32>
    %c80_311 = arith.constant 80 : index
    %c0_312 = arith.constant 0 : index
    %302 = vector.load %arg19[%c80_311, %c0_312] : memref<1152x256xbf16, #tpu.memory_space<vmem>>, vector<16x128xbf16>
    %c1280_313 = arith.constant 1280 : index
    %c0_314 = arith.constant 0 : index
    %303 = vector.load %arg22[%c1280_313, %c0_314] : memref<2304x512xbf16, #tpu.memory_space<vmem>>, vector<128x512xbf16>
    %cst_315 = arith.constant dense<0.000000e+00> : vector<16x512xf32>
    %304 = tpu.matmul %302, %303, %cst_315 {dimension_numbers = #tpu.dot_dimension_numbers<[1], [0], [0], [1], [0, 0, 1, 1], [], []>} : vector<16x128xbf16>, vector<128x512xbf16>, vector<16x512xf32> -> vector<16x512xf32>
    %305 = arith.addf %301, %304 : vector<16x512xf32>
    %c80_316 = arith.constant 80 : index
    %c128_317 = arith.constant 128 : index
    %306 = vector.load %arg19[%c80_316, %c128_317] : memref<1152x256xbf16, #tpu.memory_space<vmem>>, vector<16x128xbf16>
    %c1408_318 = arith.constant 1408 : index
    %c0_319 = arith.constant 0 : index
    %307 = vector.load %arg22[%c1408_318, %c0_319] : memref<2304x512xbf16, #tpu.memory_space<vmem>>, vector<128x512xbf16>
    %cst_320 = arith.constant dense<0.000000e+00> : vector<16x512xf32>
    %308 = tpu.matmul %306, %307, %cst_320 {dimension_numbers = #tpu.dot_dimension_numbers<[1], [0], [0], [1], [0, 0, 1, 1], [], []>} : vector<16x128xbf16>, vector<128x512xbf16>, vector<16x512xf32> -> vector<16x512xf32>
    %309 = arith.addf %305, %308 : vector<16x512xf32>
    %c96_321 = arith.constant 96 : index
    %c0_322 = arith.constant 0 : index
    %310 = vector.load %arg19[%c96_321, %c0_322] : memref<1152x256xbf16, #tpu.memory_space<vmem>>, vector<16x128xbf16>
    %c1536_323 = arith.constant 1536 : index
    %c0_324 = arith.constant 0 : index
    %311 = vector.load %arg22[%c1536_323, %c0_324] : memref<2304x512xbf16, #tpu.memory_space<vmem>>, vector<128x512xbf16>
    %cst_325 = arith.constant dense<0.000000e+00> : vector<16x512xf32>
    %312 = tpu.matmul %310, %311, %cst_325 {dimension_numbers = #tpu.dot_dimension_numbers<[1], [0], [0], [1], [0, 0, 1, 1], [], []>} : vector<16x128xbf16>, vector<128x512xbf16>, vector<16x512xf32> -> vector<16x512xf32>
    %313 = arith.addf %309, %312 : vector<16x512xf32>
    %c96_326 = arith.constant 96 : index
    %c128_327 = arith.constant 128 : index
    %314 = vector.load %arg19[%c96_326, %c128_327] : memref<1152x256xbf16, #tpu.memory_space<vmem>>, vector<16x128xbf16>
    %c1664_328 = arith.constant 1664 : index
    %c0_329 = arith.constant 0 : index
    %315 = vector.load %arg22[%c1664_328, %c0_329] : memref<2304x512xbf16, #tpu.memory_space<vmem>>, vector<128x512xbf16>
    %cst_330 = arith.constant dense<0.000000e+00> : vector<16x512xf32>
    %316 = tpu.matmul %314, %315, %cst_330 {dimension_numbers = #tpu.dot_dimension_numbers<[1], [0], [0], [1], [0, 0, 1, 1], [], []>} : vector<16x128xbf16>, vector<128x512xbf16>, vector<16x512xf32> -> vector<16x512xf32>
    %317 = arith.addf %313, %316 : vector<16x512xf32>
    %c112_331 = arith.constant 112 : index
    %c0_332 = arith.constant 0 : index
    %318 = vector.load %arg19[%c112_331, %c0_332] : memref<1152x256xbf16, #tpu.memory_space<vmem>>, vector<16x128xbf16>
    %c1792_333 = arith.constant 1792 : index
    %c0_334 = arith.constant 0 : index
    %319 = vector.load %arg22[%c1792_333, %c0_334] : memref<2304x512xbf16, #tpu.memory_space<vmem>>, vector<128x512xbf16>
    %cst_335 = arith.constant dense<0.000000e+00> : vector<16x512xf32>
    %320 = tpu.matmul %318, %319, %cst_335 {dimension_numbers = #tpu.dot_dimension_numbers<[1], [0], [0], [1], [0, 0, 1, 1], [], []>} : vector<16x128xbf16>, vector<128x512xbf16>, vector<16x512xf32> -> vector<16x512xf32>
    %321 = arith.addf %317, %320 : vector<16x512xf32>
    %c112_336 = arith.constant 112 : index
    %c128_337 = arith.constant 128 : index
    %322 = vector.load %arg19[%c112_336, %c128_337] : memref<1152x256xbf16, #tpu.memory_space<vmem>>, vector<16x128xbf16>
    %c1920_338 = arith.constant 1920 : index
    %c0_339 = arith.constant 0 : index
    %323 = vector.load %arg22[%c1920_338, %c0_339] : memref<2304x512xbf16, #tpu.memory_space<vmem>>, vector<128x512xbf16>
    %cst_340 = arith.constant dense<0.000000e+00> : vector<16x512xf32>
    %324 = tpu.matmul %322, %323, %cst_340 {dimension_numbers = #tpu.dot_dimension_numbers<[1], [0], [0], [1], [0, 0, 1, 1], [], []>} : vector<16x128xbf16>, vector<128x512xbf16>, vector<16x512xf32> -> vector<16x512xf32>
    %325 = arith.addf %321, %324 : vector<16x512xf32>
    %c128_341 = arith.constant 128 : index
    %c0_342 = arith.constant 0 : index
    %326 = vector.load %arg19[%c128_341, %c0_342] : memref<1152x256xbf16, #tpu.memory_space<vmem>>, vector<16x128xbf16>
    %c2048_343 = arith.constant 2048 : index
    %c0_344 = arith.constant 0 : index
    %327 = vector.load %arg22[%c2048_343, %c0_344] : memref<2304x512xbf16, #tpu.memory_space<vmem>>, vector<128x512xbf16>
    %cst_345 = arith.constant dense<0.000000e+00> : vector<16x512xf32>
    %328 = tpu.matmul %326, %327, %cst_345 {dimension_numbers = #tpu.dot_dimension_numbers<[1], [0], [0], [1], [0, 0, 1, 1], [], []>} : vector<16x128xbf16>, vector<128x512xbf16>, vector<16x512xf32> -> vector<16x512xf32>
    %329 = arith.addf %325, %328 : vector<16x512xf32>
    %c128_346 = arith.constant 128 : index
    %c128_347 = arith.constant 128 : index
    %330 = vector.load %arg19[%c128_346, %c128_347] : memref<1152x256xbf16, #tpu.memory_space<vmem>>, vector<16x128xbf16>
    %c2176_348 = arith.constant 2176 : index
    %c0_349 = arith.constant 0 : index
    %331 = vector.load %arg22[%c2176_348, %c0_349] : memref<2304x512xbf16, #tpu.memory_space<vmem>>, vector<128x512xbf16>
    %cst_350 = arith.constant dense<0.000000e+00> : vector<16x512xf32>
    %332 = tpu.matmul %330, %331, %cst_350 {dimension_numbers = #tpu.dot_dimension_numbers<[1], [0], [0], [1], [0, 0, 1, 1], [], []>} : vector<16x128xbf16>, vector<128x512xbf16>, vector<16x512xf32> -> vector<16x512xf32>
    %333 = arith.addf %329, %332 : vector<16x512xf32>
    %c0_351 = arith.constant 0 : index
    %c0_352 = arith.constant 0 : index
    %334 = vector.load %arg17[%c0_351, %c0_352] : memref<1x512xf32, #tpu.memory_space<vmem>>, vector<1x512xf32>
    %335 = vector.broadcast %334 : vector<1x512xf32> to vector<16x512xf32>
    %336 = arith.addf %333, %335 : vector<16x512xf32>
    %cst_353 = arith.constant 0.000000e+00 : f32
    %337 = vector.broadcast %cst_353 : f32 to vector<16x512xf32>
    %338 = arith.maximumf %336, %337 : vector<16x512xf32>
    %339 = vector.extract_strided_slice %338 {offsets = [0, 0], sizes = [8, 512], strides = [1, 1]} : vector<16x512xf32> to vector<8x512xf32>
    %c0_354 = arith.constant 0 : index
    %c0_355 = arith.constant 0 : index
    %340 = vector.load %arg18[%c0_354, %c0_355] : memref<8x512xf32, #tpu.memory_space<vmem>>, vector<8x512xf32>
    tpu.vector_store %arg18[%c0_354, %c0_355], %339 {strides = array<i32>} : memref<8x512xf32, #tpu.memory_space<vmem>>, vector<8x512xf32>,
    return
  }
}

</mosaic_0001>

<bundles_post_ra>
// kernel: _lambda_.1
= control target key start
LH: loop header
LB: loop body
LE: loop exit
PB: predicated region body
PF: predicated region fallthrough
CT: control target
= control target key end

     0   :  { %s23463_s0 = inlined_call_operand.vmem [shape: bf16[128,9], index: 0, kind: input, shape index: {}]   ;;  %s23464_s1 = inlined_call_operand.hbm [shape: bf16[9,128], index: 1, kind: input, shape index: {}]   ;;  %s23465_s2 = inlined_call_operand.hbm [shape: f32[1,128], index: 2, kind: input, shape index: {}]   ;;  %s23466_s3 = inlined_call_operand.hbm [shape: bf16[1152,128], index: 3, kind: input, shape index: {}]   ;;  %s23467_s4 = inlined_call_operand.hbm [shape: bf16[1152,128], index: 4, kind: input, shape index: {}]   ;;  %s23468_s5 = inlined_call_operand.hbm [shape: f32[1,128], index: 5, kind: input, shape index: {}]   ;;  %s23469_s6 = inlined_call_operand.hbm [shape: bf16[288,128], index: 6, kind: input, shape index: {}]   ;;  %s23470_s7 = inlined_call_operand.hbm [shape: bf16[1152,128], index: 7, kind: input, shape index: {}]   ;;  %s23471_s8 = inlined_call_operand.hbm [shape: f32[1,128], index: 8, kind: input, shape index: {}]   ;;  %s23472_s9 = inlined_call_operand.vmem [shape: bf16[288,32], index: 9, kind: input, shape index: {}]   ;;  %s23473_s10 = inlined_call_operand.hbm [shape: bf16[1152,256], index: 10, kind: input, shape index: {}]   ;;  %s23474_s11 = inlined_call_operand.hbm [shape: f32[1,256], index: 11, kind: input, shape index: {}]   ;;  %s23475_s12 = inlined_call_operand.vmem [shape: bf16[144,32], index: 12, kind: input, shape index: {}]   ;;  %s23476_s13 = inlined_call_operand.hbm [shape: bf16[2304,256], index: 13, kind: input, shape index: {}]   ;;  %s23477_s14 = inlined_call_operand.hbm [shape: f32[1,256], index: 14, kind: input, shape index: {}]   ;;  %s23478_s15 = inlined_call_operand.vmem [shape: bf16[144,16], index: 15, kind: input, shape index: {}]   ;;  %s23479_s16 = inlined_call_operand.hbm [shape: bf16[2304,512], index: 16, kind: input, shape index: {}]   ;;  %s23480_s17 = inlined_call_operand.hbm [shape: f32[1,512], index: 17, kind: input, shape index: {}]   ;;  %s23481_s18 = inlined_call_operand.vmem [shape: f32[8,512], index: 18, kind: output, shape index: {}]  }
   0x1   :  { %23487 = sst [smem:[#allocation48_spill]] %s23463_s0 }
   0x2   :  { %23488 = sst [smem:[#allocation49_spill]] %s23464_s1 }
   0x3   :  { %23489 = sst [smem:[#allocation50_spill]] %s23465_s2 }
   0x4   :  { %23 = vsyncpa [#allocation8], 0 }
   0x5   :  { %24 = vsyncpa [#allocation10], 0 }
   0x6   :  { %25 = vsyncpa [#allocation13], 0 }
   0x7   :  { %26 = vsyncpa [#allocation16], 0 }
   0x8   :  { %27 = vsyncpa [#allocation19], 0 }
   0x9   :  { %28 = vsyncpa [#allocation22], 0  ;;  %s22502_s27 = smov [#allocation9]  }
   0xa   :  { %s49_s28 = sshll.u32 %s22502_s27, 4  ;;  %s50_s28 = int_to_ptr.vmem [resolvable:$true] %s49_s28 }
   0xb   :  { %s22212_s29 = scalar_lea.vmem %s50_s28, 16  ;;  %s22216_s30 = scalar_lea.vmem %s50_s28, 32 }
   0xc   :  { %p22213_p0 = scmp.ne.s32.totalorder %s50_s28, %s22212_s29  ;;  %p22217_p1 = scmp.lt.s32.totalorder %s50_s28, %s50_s28 }
   0xd   :  { %p22218_p2 = scmp.lt.s32.totalorder %s22216_s30, %s22212_s29 }
   0xf   :  { %p22219_p3 = por %p22218_p2, %p22217_p1 }
  0x11   :  { %p22220_p4 = pnand %p22219_p3, %p22213_p0 }
  0x13   :  { %22223 = shalt.err (!%p22220_p4)
}
  0x14   :  { %s23490_s1 = sld [smem:[#allocation50_spill]]  ;;  %s22503_s20 = smov [#allocation12]  }
  0x15   :  { %s70_s21 = sshll.u32 %s22503_s20, 4  ;;  %s22504_s22 = smov [#allocation15]   ;;  %s71_s21 = int_to_ptr.vmem [resolvable:$true] %s70_s21 }
  0x16   :  { %s92_s2 = sshll.u32 %s22504_s22, 4  ;;  %s22232_s23 = scalar_lea.vmem %s71_s21, 9216  ;;  %s93_s2 = int_to_ptr.vmem [resolvable:$true] %s92_s2 }
  0x17   :  { %p22233_p5 = scmp.ne.s32.totalorder %s71_s21, %s22232_s23  ;;  %p22237_p6 = scmp.lt.s32.totalorder %s71_s21, %s71_s21 }
  0x18   :  { %p22238_p7 = scmp.lt.s32.totalorder %s22232_s23, %s22232_s23 }
  0x1a   :  { %52 = dma.hbm_to_vmem [thread:$0]  %s23490_s1, 16, %s50_s28, [#allocation10]  }
  0x1b   :  { %p22239_p8 = por %p22238_p7, %p22237_p6 }
  0x1d   :  { %p22240_p9 = pnand %p22239_p8, %p22233_p5 }
  0x1f   :  { %22243 = shalt.err (!%p22240_p9)
}
  0x20   :  { %s22505_s24 = smov 64   ;;  %s22506_s25 = smov 4  }
  0x21   :  { %76 = dma.hbm_to_vmem [thread:$0]  %s23467_s4, 9216, %s71_s21, [#allocation13], %s22505_s24, %s22505_s24, %s22506_s25  }
  0x22   :  { %s22252_s28 = scalar_lea.vmem %s93_s2, 2304  ;;  %p22257_p11 = scmp.lt.s32.totalorder %s93_s2, %s93_s2 }
  0x23   :  { %p22253_p10 = scmp.ne.s32.totalorder %s93_s2, %s22252_s28  ;;  %p22258_p12 = scmp.lt.s32.totalorder %s22252_s28, %s22252_s28 }
  0x25   :  { %p22259_p13 = por %p22258_p12, %p22257_p11 }
  0x27   :  { %p22260_p0 = pnand %p22259_p13, %p22253_p10 }
  0x29   :  { %22263 = shalt.err (!%p22260_p0)
}
  0x2a   :  { %98 = dma.hbm_to_vmem [thread:$0]  %s23469_s6, 2304, %s93_s2, [#allocation16], %s22505_s24, %s22505_s24, %s22506_s25  }
  0x2b   :  { %s22507_s0 = smov [#allocation18]   ;;  %s22508_s1 = smov [#allocation21]  }
  0x2c   :  { %s117_s19 = sshll.u32 %s22507_s0, 4  ;;  %s141_s4 = sshll.u32 %s22508_s1, 4  ;;  %s118_s19 = int_to_ptr.vmem [resolvable:$true] %s117_s19  ;;  %s142_s4 = int_to_ptr.vmem [resolvable:$true] %s141_s4 }
  0x2d   :  { %s22272_s20 = scalar_lea.vmem %s118_s19, 16  ;;  %s22276_s21 = scalar_lea.vmem %s118_s19, 32 }
  0x2e   :  { %p22273_p1 = scmp.ne.s32.totalorder %s118_s19, %s22272_s20  ;;  %p22277_p2 = scmp.lt.s32.totalorder %s118_s19, %s118_s19 }
  0x2f   :  { %p22278_p3 = scmp.lt.s32.totalorder %s22276_s21, %s22272_s20 }
  0x31   :  { %p22279_p4 = por %p22278_p3, %p22277_p2 }
  0x33   :  { %p22280_p5 = pnand %p22279_p4, %p22273_p1 }
  0x35   :  { %22283 = shalt.err (!%p22280_p5)
}
  0x36   :  { %120 = dma.hbm_to_vmem [thread:$0]  %s23471_s8, 16, %s118_s19, [#allocation19]  }
  0x37   :  { %s22292_s26 = scalar_lea.vmem %s142_s4, 32  ;;  %p22297_p7 = scmp.lt.s32.totalorder %s142_s4, %s142_s4 }
  0x38   :  { %p22293_p6 = scmp.ne.s32.totalorder %s142_s4, %s22292_s26  ;;  %p22298_p8 = scmp.lt.s32.totalorder %s22292_s26, %s22292_s26 }
  0x3a   :  { %p22299_p9 = por %p22298_p8, %p22297_p7 }
  0x3c   :  { %p22300_p10 = pnand %p22299_p9, %p22293_p6 }
  0x3e   :  { %22303 = shalt.err (!%p22300_p10)
}
  0x3f   :  { %144 = dma.hbm_to_vmem [thread:$0]  %s23477_s14, 32, %s142_s4, [#allocation22]  }
  0x40   :  { %s22509_s27 = smov [#allocation7]   ;;  %s22510_s29 = smov [#allocation11]  }
  0x41   :  { %s36_s28 = sshll.u32 %s22509_s27, 4  ;;  %s58_s30 = sshll.u32 %s22510_s29, 4  ;;  %s37_s28 = int_to_ptr.vmem [resolvable:$true] %s36_s28  ;;  %s59_s30 = int_to_ptr.vmem [resolvable:$true] %s58_s30 }
  0x42   :  { %s22312_s0 = scalar_lea.vmem %s37_s28, 128  ;;  %p22317_p12 = scmp.lt.s32.totalorder %s37_s28, %s37_s28 }
  0x43   :  { %p22313_p11 = scmp.ne.s32.totalorder %s37_s28, %s22312_s0  ;;  %p22318_p13 = scmp.lt.s32.totalorder %s22312_s0, %s22312_s0 }
  0x45   :  { %p22319_p0 = por %p22318_p13, %p22317_p12 }
  0x47   :  { %p22320_p1 = pnand %p22319_p0, %p22313_p11 }
  0x49   :  { %22323 = shalt.err (!%p22320_p1)
}
  0x4a   :  { %s23491_s1 = sld [smem:[#allocation49_spill]]  ;;  %s22332_s14 = scalar_lea.vmem %s59_s30, 9216 }
  0x4b   :  { %p22333_p2 = scmp.ne.s32.totalorder %s59_s30, %s22332_s14  ;;  %p22337_p3 = scmp.lt.s32.totalorder %s59_s30, %s59_s30 }
  0x4c   :  { %p22338_p4 = scmp.lt.s32.totalorder %s22332_s14, %s22332_s14 }
  0x4e   :  { %p22339_p5 = por %p22338_p4, %p22337_p3 }
  0x50   :  { %42 = dma.hbm_to_vmem [thread:$0]  %s23491_s1, 128, %s37_s28, [#allocation8], %s22505_s24, %s22505_s24, %s22506_s25  }
  0x51   :  { %p22340_p6 = pnand %p22339_p5, %p22333_p2 }
  0x53   :  { %22343 = shalt.err (!%p22340_p6)
}
  0x54   :  { %64 = dma.hbm_to_vmem [thread:$0]  %s23466_s3, 9216, %s59_s30, [#allocation10], %s22505_s24, %s22505_s24, %s22506_s25  }
  0x55   :  { %s22511_s21 = smov [#allocation14]   ;;  %s22512_s23 = smov [#allocation17]  }
  0x56   :  { %s83_s22 = sshll.u32 %s22511_s21, 4  ;;  %s104_s26 = sshll.u32 %s22512_s23, 4  ;;  %s84_s22 = int_to_ptr.vmem [resolvable:$true] %s83_s22  ;;  %s105_s26 = int_to_ptr.vmem [resolvable:$true] %s104_s26 }
  0x57   :  { %s22352_s6 = scalar_lea.vmem %s84_s22, 16  ;;  %s22356_s2 = scalar_lea.vmem %s84_s22, 32 }
  0x58   :  { %p22353_p7 = scmp.ne.s32.totalorder %s84_s22, %s22352_s6  ;;  %p22357_p8 = scmp.lt.s32.totalorder %s84_s22, %s84_s22 }
  0x59   :  { %p22358_p9 = scmp.lt.s32.totalorder %s22356_s2, %s22352_s6 }
  0x5b   :  { %p22359_p10 = por %p22358_p9, %p22357_p8 }
  0x5d   :  { %p22360_p11 = pnand %p22359_p10, %p22353_p7 }
  0x5f   :  { %22363 = shalt.err (!%p22360_p11)
}
  0x60   :  { %86 = dma.hbm_to_vmem [thread:$0]  %s23468_s5, 16, %s84_s22, [#allocation13]  }
  0x61   :  { %s22372_s29 = scalar_lea.vmem %s105_s26, 9216  ;;  %p22377_p13 = scmp.lt.s32.totalorder %s105_s26, %s105_s26 }
  0x62   :  { %p22373_p12 = scmp.ne.s32.totalorder %s105_s26, %s22372_s29  ;;  %p22378_p0 = scmp.lt.s32.totalorder %s22372_s29, %s22372_s29 }
  0x64   :  { %p22379_p1 = por %p22378_p0, %p22377_p13 }
  0x66   :  { %p22380_p2 = pnand %p22379_p1, %p22373_p12 }
  0x68   :  { %22383 = shalt.err (!%p22380_p2)
}
  0x69   :  { %110 = dma.hbm_to_vmem [thread:$0]  %s23470_s7, 9216, %s105_s26, [#allocation16], %s22505_s24, %s22505_s24, %s22506_s25  }
  0x6a   :  { %s22513_s0 = smov [#allocation20]   ;;  %s22514_s19 = smov [#allocation23]  }
  0x6b   :  { %s129_s8 = sshll.u32 %s22513_s0, 4  ;;  %s153_s5 = sshll.u32 %s22514_s19, 4  ;;  %s130_s8 = int_to_ptr.vmem [resolvable:$true] %s129_s8  ;;  %s154_s5 = int_to_ptr.vmem [resolvable:$true] %s153_s5 }
  0x6c   :  { %s22392_s1 = scalar_lea.vmem %s130_s8, 32  ;;  %p22397_p4 = scmp.lt.s32.totalorder %s130_s8, %s130_s8 }
  0x6d   :  { %p22393_p3 = scmp.ne.s32.totalorder %s130_s8, %s22392_s1  ;;  %p22398_p5 = scmp.lt.s32.totalorder %s22392_s1, %s22392_s1 }
  0x6f   :  { %p22399_p6 = por %p22398_p5, %p22397_p4 }
  0x71   :  { %p22400_p7 = pnand %p22399_p6, %p22393_p3 }
  0x73   :  { %22403 = shalt.err (!%p22400_p7)
}
  0x74   :  { %132 = dma.hbm_to_vmem [thread:$0]  %s23474_s11, 32, %s130_s8, [#allocation19]  }
  0x75   :  { %s22412_s20 = scalar_lea.vmem %s154_s5, 64  ;;  %p22417_p9 = scmp.lt.s32.totalorder %s154_s5, %s154_s5 }
  0x76   :  { %p22413_p8 = scmp.ne.s32.totalorder %s154_s5, %s22412_s20  ;;  %p22418_p10 = scmp.lt.s32.totalorder %s22412_s20, %s22412_s20 }
  0x78   :  { %p22419_p11 = por %p22418_p10, %p22417_p9 }
  0x7a   :  { %p22420_p12 = pnand %p22419_p11, %p22413_p8 }
  0x7c   :  { %22423 = shalt.err (!%p22420_p12)
}
  0x7d   :  { %156 = dma.hbm_to_vmem [thread:$0]  %s23480_s17, 64, %s154_s5, [#allocation22]  }
  0x7e   :  { %22484 = dma.done.wait [#allocation8], 128  }
  0x7f   :  { %22485 = vsyncadd [#allocation8], 4294967168 }
  0x80   :  { %22486 = dma.done.wait [#allocation10], 9232  }
  0x81   :  { %22487 = vsyncadd [#allocation10], 4294958064 }
  0x82   :  { %22488 = dma.done.wait [#allocation13], 9232  }
  0x83   :  { %22489 = vsyncadd [#allocation13], 4294958064 }
  0x84   :  { %22490 = dma.done.wait [#allocation16], 11520  }
  0x85   :  { %22491 = vsyncadd [#allocation16], 4294955776 }
  0x86   :  { %22492 = dma.done.wait [#allocation19], 48  }
  0x87   :  { %22493 = vsyncadd [#allocation19], 4294967248 }
  0x88   :  { %22494 = dma.done.wait [#allocation22], 96  }
  0x89   :  { %22495 = vsyncadd [#allocation22], 4294967200  ;;  %vm321_vm0 = vcmask 1043456   ;;  %vm322_vm1 = vcmask 1044480   ;;  %v22515_v0 = vmov 65535   ;;  %vm296_vm2 = vcmask 72704  }
  0x8a   :  { %v323_v1 = vsel %vm321_vm0, 4294967295, %v22515_v0  ;;  %v20269_v3 = vld [vmem:[#allocation7] sm:$0x1f]   ;;  %s23492_s25 = sld [smem:[#allocation48_spill]]  ;;  %v20278_v13 = vld [vmem:[#allocation11] sm:$0xff]   ;;  %vm6470_vm3 = vcmask 261120  }
  0x8b   :  { %v324_v2 = vsel %vm322_vm1, %v323_v1, 0  ;;  %v20280_v14 = vld [vmem:[#allocation11 + $0x90] sm:$0xff]   ;;  %19493 = vmatprep.mubr.bf16.mxu1 %v20278_v13  ;;  %v17081_v28 = vld [vmem:[#allocation9] ss:$0 sm:$0xff]  ;;  %v20291_v13 = vld [vmem:[#allocation11 + $0xa8] sm:$0xff]   ;;  %s22516_s23 = smov [#allocation3]  }
  0x8c   :  { %v326_v5 = vand.u32 %v20269_v3, %v324_v2  ;;  %s198_s26 = sshll.u32 %s22516_s23, 4  ;;  %s22517_s6 = smov [#allocation4]   ;;  %s199_s26 = int_to_ptr.vmem [resolvable:$true] %s198_s26 }
  0x8d   :  { %s210_s2 = sshll.u32 %s22517_s6, 4  ;;  %s22432_s27 = scalar_lea.vmem %s199_s26, 18432  ;;  %s211_s2 = int_to_ptr.vmem [resolvable:$true] %s210_s2 }
  0x8e   :  { %19459 = vmatprep.subr.bf16.mxu0 %v326_v5  ;;  %p22433_p13 = scmp.ne.s32.totalorder %s199_s26, %s22432_s27  ;;  %p22437_p0 = scmp.lt.s32.totalorder %s199_s26, %s199_s26 }
  0x8f   :  { %19460 = vmatpush3.bf16.msra.mxu0 %v326_v5  ;;  %p22438_p1 = scmp.lt.s32.totalorder %s22432_s27, %s22432_s27 }
  0x90   :  { %v20270_v4 = vld [vmem:[%s23492_s25] sm:$0xff]   ;;  %v20271_v6 = vld [vmem:[%s23492_s25 + $0x8] sm:$0xff]   ;;  %v20272_v7 = vld [vmem:[%s23492_s25 + $0x10] sm:$0xff]  }
  0x91   :  { %19461 = vmatprep.mubr.msk.bf16.mxu0 %vm296_vm2, %v20270_v4  ;;  %v20273_v8 = vld [vmem:[%s23492_s25 + $0x18] sm:$0xff]   ;;  %v20274_v9 = vld [vmem:[%s23492_s25 + $0x20] sm:$0xff]   ;;  %v20275_v10 = vld [vmem:[%s23492_s25 + $0x28] sm:$0xff]   ;;  %p22439_p2 = por %p22438_p1, %p22437_p0 }
  0x92   :  { %19462 = vmatmul.mubr.msk.bf16.vlgmr.msra.gmra.mxu0 %vm296_vm2, %v20271_v6  ;;  %v20276_v11 = vld [vmem:[%s23492_s25 + $0x30] sm:$0xff]   ;;  %v20277_v12 = vld [vmem:[%s23492_s25 + $0x38] sm:$0xff]  }
  0x93   :  { %19465 = vmatprep.mubr.msk.bf16.mxu0 %vm296_vm2, %v20272_v7  ;;  %p22440_p3 = pnand %p22439_p2, %p22433_p13 }
  0x9a   :  { %19466 = vmatmul.mubr.msk.bf16.gmra.mxu0 %vm296_vm2, %v20273_v8  ;;  %v20279_v8 = vld [vmem:[#allocation11 + $0x8] sm:$0xff]  }
  0x9b   :  { %19469 = vmatprep.mubr.msk.bf16.mxu0 %vm296_vm2, %v20274_v9  ;;  %v20281_v9 = vld [vmem:[#allocation11 + $0x98] sm:$0xff]  }
  0xa2   :  { %19470 = vmatmul.mubr.msk.bf16.gmra.mxu0 %vm296_vm2, %v20275_v10  ;;  %v20282_v10 = vld [vmem:[#allocation11 + $0x10] sm:$0xff]  }
  0xa3   :  { %19473 = vmatprep.mubr.msk.bf16.mxu0 %vm296_vm2, %v20276_v11  ;;  %v20290_v11 = vld [vmem:[#allocation11 + $0xa0] sm:$0xff]  }
  0xaa   :  { %19474 = vmatmul.mubr.msk.bf16.gmra.mxu0 %vm296_vm2, %v20277_v12  ;;  %v20283_v12 = vld [vmem:[#allocation11 + $0x18] sm:$0xff]  }
  0xab   :  { %19545 = vmatprep.mubr.bf16.mxu0 %v20280_v14  ;;  %v20284_v14 = vld [vmem:[#allocation11 + $0x20] sm:$0xff]  }
 0x152   :  { %v19463_v15 = vpop.f32.mrf.mxu0 }
 0x153   :  { %v371_v61 = vadd.f32 %v19463_v15, %v17081_v28  ;;  %v20294_v15 = vld [vmem:[#allocation11 + $0xb0] sm:$0xff]  }
 0x154   :  { %v22695_v16 = vpop.f32.mrf.mxu0 }
 0x155   :  { %v427_v2 = vmax.f32 %v371_v61, 0.0  ;;  %v363_v3 = vadd.f32 %v17081_v28, %v22695_v16  ;;  %v20285_v16 = vld [vmem:[#allocation11 + $0x28] sm:$0xff]   ;;  %v20361_v61 = vld [vmem:[#allocation12 + $0x58] sm:$0xff]  }
 0x156   :  { %v19464_v17 = vpop.f32.mrf.mxu0 }
 0x157   :  { %v374_v58 = vadd.f32 %v19464_v17, %v17081_v28  ;;  %v425_v6 = vmax.f32 %v363_v3, 0.0  ;;  %v20295_v17 = vld [vmem:[#allocation11 + $0xb8] sm:$0xff]   ;;  %v20360_v3 = vld [vmem:[#allocation12 + $0x8] sm:$0xff]  }
 0x158   :  { %v22697_v18 = vpop.f32.mrf.mxu0 }
 0x159   :  { %v428_v63 = vmax.f32 %v374_v58, 0.0  ;;  %v366_v0 = vadd.f32 %v17081_v28, %v22697_v18  ;;  %v20286_v18 = vld [vmem:[#allocation11 + $0x30] sm:$0xff]   ;;  %v20356_v58 = vld [vmem:[#allocation12 + $0x20] sm:$0xff]  }
 0x15a   :  { %v19467_v19 = vpop.f32.mrf.mxu0 }
 0x15b   :  { %v387_v51 = vadd.f32 %v19467_v19, %v17081_v28  ;;  %v22735_v4 = vpack.c.bf16 %v428_v63, %v427_v2  ;;  %v426_v5 = vmax.f32 %v366_v0, 0.0  ;;  %v20298_v19 = vld [vmem:[#allocation11 + $0xc0] sm:$0xff]   ;;  %v20333_v63 = vld [vmem:[#allocation11 + $0x1d8] sm:$0xff]   ;;  %v20318_v0 = vld [vmem:[#allocation11 + $0x150] sm:$0xff]  }
 0x15c   :  { %v378_v20 = vpop.f32.mrf.mxu0  ;;  %v20359_v2 = vld [vmem:[#allocation12 + $0x10] sm:$0xff]  }
 0x15d   :  { %v431_v56 = vmax.f32 %v387_v51, 0.0  ;;  %v379_v57 = vadd.f32 %v17081_v28, %v378_v20  ;;  %v22741_v7 = vpack.c.bf16 %v426_v5, %v425_v6  ;;  %v20287_v20 = vld [vmem:[#allocation11 + $0x38] sm:$0xff]   ;;  %v20353_v51 = vld [vmem:[#allocation12 + $0x30] sm:$0xff]   ;;  %v20337_v6 = vld [vmem:[#allocation11 + $0x1e8] sm:$0xff]  }
 0x15e   :  { %v19468_v21 = vpop.f32.mrf.mxu0  ;;  %v20319_v5 = vld [vmem:[#allocation11 + $0x158] sm:$0xff]  }
 0x15f   :  { %v390_v48 = vadd.f32 %v19468_v21, %v17081_v28  ;;  %v429_v62 = vmax.f32 %v379_v57, 0.0  ;;  %v20299_v21 = vld [vmem:[#allocation11 + $0xc8] sm:$0xff]   ;;  %v20332_v57 = vld [vmem:[#allocation11 + $0x1d0] sm:$0xff]  }
 0x160   :  { %v381_v22 = vpop.f32.mrf.mxu0 }
 0x161   :  { %v432_v53 = vmax.f32 %v390_v48, 0.0  ;;  %v382_v54 = vadd.f32 %v17081_v28, %v381_v22  ;;  %v20288_v22 = vld [vmem:[#allocation11 + $0x40] sm:$0xff]   ;;  %v20312_v48 = vld [vmem:[#allocation11 + $0x130] sm:$0xff]  }
 0x162   :  { %v19471_v23 = vpop.f32.mrf.mxu0 }
 0x163   :  { %v403_v39 = vadd.f32 %v19471_v23, %v17081_v28  ;;  %v22721_v59 = vpack.c.bf16 %v432_v53, %v431_v56  ;;  %v430_v60 = vmax.f32 %v382_v54, 0.0  ;;  %v20302_v23 = vld [vmem:[#allocation11 + $0xd0] sm:$0xff]   ;;  %v20355_v53 = vld [vmem:[#allocation12 + $0x68] sm:$0xff]   ;;  %v20313_v54 = vld [vmem:[#allocation11 + $0x138] sm:$0xff]  }
 0x164   :  { %v394_v24 = vpop.f32.mrf.mxu0  ;;  %v20314_v56 = vld [vmem:[#allocation11 + $0x140] sm:$0xff]  }
 0x165   :  { %v435_v46 = vmax.f32 %v403_v39, 0.0  ;;  %v395_v47 = vadd.f32 %v17081_v28, %v394_v24  ;;  %v22728_v1 = vpack.c.bf16 %v430_v60, %v429_v62  ;;  %v20348_v24 = vld [vmem:[#allocation12 + $0x78] sm:$0xff]   ;;  %v20317_v39 = vld [vmem:[#allocation11 + $0x108] sm:$0xff]  }
 0x166   :  { %v19472_v25 = vpop.f32.mrf.mxu0  ;;  %v20357_v60 = vld [vmem:[#allocation12 + $0x18] sm:$0xff]   ;;  %v20315_v62 = vld [vmem:[#allocation11 + $0x148] sm:$0xff]  }
 0x167   :  { %v406_v35 = vadd.f32 %v19472_v25, %v17081_v28  ;;  %v433_v52 = vmax.f32 %v395_v47, 0.0  ;;  %v20351_v25 = vld [vmem:[#allocation12 + $0x38] sm:$0xff]  }
 0x168   :  { %v397_v26 = vpop.f32.mrf.mxu0  ;;  %v20327_v47 = vld [vmem:[#allocation11 + $0x1b8] sm:$0xff]  }
 0x169   :  { %v436_v43 = vmax.f32 %v406_v35, 0.0  ;;  %v398_v44 = vadd.f32 %v17081_v28, %v397_v26  ;;  %v20289_v26 = vld [vmem:[#allocation11 + $0x48] sm:$0xff]   ;;  %v20311_v35 = vld [vmem:[#allocation11 + $0xf8] sm:$0xff]  }
 0x16a   :  { %v19475_v27 = vpop.f32.mrf.mxu0 }
 0x16b   :  { %v419_v30 = vadd.f32 %v19475_v27, %v17081_v28  ;;  %v22709_v49 = vpack.c.bf16 %v436_v43, %v435_v46  ;;  %v434_v50 = vmax.f32 %v398_v44, 0.0  ;;  %v20303_v27 = vld [vmem:[#allocation11 + $0xd8] sm:$0xff]   ;;  %v20308_v44 = vld [vmem:[#allocation11 + $0x120] sm:$0xff]   ;;  %v20309_v46 = vld [vmem:[#allocation11 + $0x128] sm:$0xff]  }
 0x16c   :  { %v410_v29 = vpop.f32.mrf.mxu0  ;;  %v20321_v43 = vld [vmem:[#allocation11 + $0x118] sm:$0xff]  }
 0x16d   :  { %v411_v32 = vadd.f32 %v17081_v28, %v410_v29  ;;  %v439_v36 = vmax.f32 %v419_v30, 0.0  ;;  %v22715_v55 = vpack.c.bf16 %v434_v50, %v433_v52  ;;  %v20306_v29 = vld [vmem:[#allocation11 + $0xe0] sm:$0xff]   ;;  %v20293_v30 = vld [vmem:[#allocation11 + $0x58] sm:$0xff]   ;;  %v20352_v50 = vld [vmem:[#allocation12 + $0x70] sm:$0xff]  }
 0x16e   :  { %v19476_v31 = vpop.f32.mrf.mxu0  ;;  %v20354_v52 = vld [vmem:[#allocation12 + $0x28] sm:$0xff]  }
 0x16f   :  { %v422_v33 = vadd.f32 %v19476_v31, %v17081_v28  ;;  %v437_v40 = vmax.f32 %v411_v32, 0.0  ;;  %v20307_v31 = vld [vmem:[#allocation11 + $0xe8] sm:$0xff]   ;;  %v20296_v32 = vld [vmem:[#allocation11 + $0x60] sm:$0xff]  }
 0x170   :  { %v413_v34 = vpop.f32.mrf.mxu0 }
 0x171   :  { %v440_v37 = vmax.f32 %v422_v33, 0.0  ;;  %v414_v38 = vadd.f32 %v17081_v28, %v413_v34  ;;  %v20292_v28 = vld [vmem:[#allocation11 + $0x50] sm:$0xff]   ;;  %v20297_v34 = vld [vmem:[#allocation11 + $0x68] sm:$0xff]  }
 0x172   :  { %v20310_v33 = vld [vmem:[#allocation11 + $0xf0] sm:$0xff]  }
 0x173   :  { %v22699_v41 = vpack.c.bf16 %v440_v37, %v439_v36  ;;  %v438_v42 = vmax.f32 %v414_v38, 0.0  ;;  %v20300_v36 = vld [vmem:[#allocation11 + $0x70] sm:$0xff]   ;;  %v20316_v37 = vld [vmem:[#allocation11 + $0x100] sm:$0xff]   ;;  %v20301_v38 = vld [vmem:[#allocation11 + $0x78] sm:$0xff]  }
 0x175   :  { %v22701_v45 = vpack.c.bf16 %v438_v42, %v437_v40  ;;  %19477 = vmatprep.subr.bf16.mxu1 %v22699_v41  ;;  %19529 = vmatprep.subr.bf16.mxu0 %v22699_v41  ;;  %v20304_v40 = vld [vmem:[#allocation11 + $0x80] sm:$0xff]   ;;  %v20305_v42 = vld [vmem:[#allocation11 + $0x88] sm:$0xff]  }
 0x176   :  { %19478 = vmatpush3.bf16.msra.mxu1 %v22699_v41  ;;  %19530 = vmatpush3.bf16.msra.mxu0 %v22699_v41 }
 0x177   :  { %19479 = vmatprep.subr.bf16.mxu1 %v22701_v45  ;;  %19531 = vmatprep.subr.bf16.mxu0 %v22701_v45 }
 0x17a   :  { %19480 = vmatpush3.bf16.msra.mxu1 %v22701_v45  ;;  %19532 = vmatpush3.bf16.msra.mxu0 %v22701_v45 }
 0x17b   :  { %19481 = vmatprep.subr.bf16.mxu1 %v22709_v49  ;;  %19533 = vmatprep.subr.bf16.mxu0 %v22709_v49 }
 0x17e   :  { %19482 = vmatpush3.bf16.msra.mxu1 %v22709_v49  ;;  %19534 = vmatpush3.bf16.msra.mxu0 %v22709_v49 }
 0x17f   :  { %19483 = vmatprep.subr.bf16.mxu1 %v22715_v55  ;;  %19535 = vmatprep.subr.bf16.mxu0 %v22715_v55 }
 0x182   :  { %19484 = vmatpush3.bf16.msra.mxu1 %v22715_v55  ;;  %19536 = vmatpush3.bf16.msra.mxu0 %v22715_v55 }
 0x183   :  { %19485 = vmatprep.subr.bf16.mxu1 %v22721_v59  ;;  %19537 = vmatprep.subr.bf16.mxu0 %v22721_v59 }
 0x186   :  { %19486 = vmatpush3.bf16.msra.mxu1 %v22721_v59  ;;  %19538 = vmatpush3.bf16.msra.mxu0 %v22721_v59 }
 0x187   :  { %19487 = vmatprep.subr.bf16.mxu1 %v22728_v1  ;;  %19539 = vmatprep.subr.bf16.mxu0 %v22728_v1 }
 0x18a   :  { %19488 = vmatpush3.bf16.msra.mxu1 %v22728_v1  ;;  %19540 = vmatpush3.bf16.msra.mxu0 %v22728_v1 }
 0x18b   :  { %19489 = vmatprep.subr.bf16.mxu1 %v22735_v4  ;;  %19541 = vmatprep.subr.bf16.mxu0 %v22735_v4 }
 0x18e   :  { %19490 = vmatpush3.bf16.msra.mxu1 %v22735_v4  ;;  %19542 = vmatpush3.bf16.msra.mxu0 %v22735_v4 }
 0x18f   :  { %19491 = vmatprep.subr.bf16.mxu1 %v22741_v7  ;;  %19543 = vmatprep.subr.bf16.mxu0 %v22741_v7 }
 0x192   :  { %19492 = vmatpush3.bf16.msra.mxu1 %v22741_v7  ;;  %19544 = vmatpush3.bf16.msra.mxu0 %v22741_v7 }
 0x193   :  { %19581 = vmatprep.subr.bf16.mxu1 %v22699_v41  ;;  %19633 = vmatprep.subr.bf16.mxu0 %v22699_v41 }
 0x195   :  { %19494 = vmatmul.mubr.bf16.vlgmr.msra.gmra.mxu1 %v20279_v8  ;;  %19546 = vmatmul.mubr.bf16.vlgmr.msra.gmra.mxu0 %v20281_v9  ;;  %v20340_v8 = vld [vmem:[#allocation11 + $0x1f0] sm:$0xff]   ;;  %v20362_v9 = vld [vmem:[#allocation12] sm:$0xff]  }
 0x196   :  { %19582 = vmatpush3.bf16.msra.mxu1 %v22699_v41  ;;  %19634 = vmatpush3.bf16.msra.mxu0 %v22699_v41  ;;  %v20320_v41 = vld [vmem:[#allocation11 + $0x110] sm:$0xff]  }
 0x197   :  { %19583 = vmatprep.subr.bf16.mxu1 %v22701_v45  ;;  %19635 = vmatprep.subr.bf16.mxu0 %v22701_v45 }
 0x198   :  { %19497 = vmatprep.mubr.bf16.mxu1 %v20282_v10  ;;  %19549 = vmatprep.mubr.bf16.mxu0 %v20290_v11  ;;  %v20323_v10 = vld [vmem:[#allocation11 + $0x168] sm:$0xff]   ;;  %v20341_v11 = vld [vmem:[#allocation11 + $0x1f8] sm:$0xff]  }
 0x19a   :  { %19584 = vmatpush3.bf16.msra.mxu1 %v22701_v45  ;;  %19636 = vmatpush3.bf16.msra.mxu0 %v22701_v45  ;;  %v20325_v45 = vld [vmem:[#allocation11 + $0x1b0] sm:$0xff]  }
 0x19b   :  { %19585 = vmatprep.subr.bf16.mxu1 %v22709_v49  ;;  %19637 = vmatprep.subr.bf16.mxu0 %v22709_v49 }
 0x19d   :  { %19498 = vmatmul.mubr.bf16.gmra.mxu1 %v20283_v12  ;;  %19550 = vmatmul.mubr.bf16.gmra.mxu0 %v20291_v13  ;;  %v22781_v12 = vld [vmem:[#allocation12 + $0xf8] sm:$0xff]   ;;  %v20324_v13 = vld [vmem:[#allocation11 + $0x170] sm:$0xff]  }
 0x19e   :  { %19586 = vmatpush3.bf16.msra.mxu1 %v22709_v49  ;;  %19638 = vmatpush3.bf16.msra.mxu0 %v22709_v49  ;;  %v20328_v49 = vld [vmem:[#allocation11 + $0x1c0] sm:$0xff]  }
 0x19f   :  { %19587 = vmatprep.subr.bf16.mxu1 %v22715_v55  ;;  %19639 = vmatprep.subr.bf16.mxu0 %v22715_v55 }
 0x1a0   :  { %19501 = vmatprep.mubr.bf16.mxu1 %v20284_v14  ;;  %19553 = vmatprep.mubr.bf16.mxu0 %v20294_v15  ;;  %v20342_v14 = vld [vmem:[#allocation11 + $0x200] sm:$0xff]   ;;  %v20368_v15 = vld [vmem:[#allocation12 + $0x48] sm:$0xff]  }
 0x1a2   :  { %19588 = vmatpush3.bf16.msra.mxu1 %v22715_v55  ;;  %19640 = vmatpush3.bf16.msra.mxu0 %v22715_v55  ;;  %v20329_v55 = vld [vmem:[#allocation11 + $0x1c8] sm:$0xff]  }
 0x1a3   :  { %19589 = vmatprep.subr.bf16.mxu1 %v22721_v59  ;;  %19641 = vmatprep.subr.bf16.mxu0 %v22721_v59 }
 0x1a5   :  { %19502 = vmatmul.mubr.bf16.gmra.mxu1 %v20285_v16  ;;  %19554 = vmatmul.mubr.bf16.gmra.mxu0 %v20295_v17  ;;  %v20326_v16 = vld [vmem:[#allocation11 + $0x178] sm:$0xff]   ;;  %v20343_v17 = vld [vmem:[#allocation11 + $0x208] sm:$0xff]  }
 0x1a6   :  { %19590 = vmatpush3.bf16.msra.mxu1 %v22721_v59  ;;  %19642 = vmatpush3.bf16.msra.mxu0 %v22721_v59  ;;  %v20358_v59 = vld [vmem:[#allocation12 + $0x60] sm:$0xff]  }
 0x1a7   :  { %19591 = vmatprep.subr.bf16.mxu1 %v22728_v1  ;;  %19643 = vmatprep.subr.bf16.mxu0 %v22728_v1 }
 0x1a8   :  { %19505 = vmatprep.mubr.bf16.mxu1 %v20286_v18  ;;  %19557 = vmatprep.mubr.bf16.mxu0 %v20298_v19  ;;  %v20330_v18 = vld [vmem:[#allocation11 + $0x180] sm:$0xff]   ;;  %v20344_v19 = vld [vmem:[#allocation11 + $0x210] sm:$0xff]  }
 0x1aa   :  { %19592 = vmatpush3.bf16.msra.mxu1 %v22728_v1  ;;  %19644 = vmatpush3.bf16.msra.mxu0 %v22728_v1  ;;  %v20336_v1 = vld [vmem:[#allocation11 + $0x1e0] sm:$0xff]  }
 0x1ab   :  { %19593 = vmatprep.subr.bf16.mxu1 %v22735_v4  ;;  %19645 = vmatprep.subr.bf16.mxu0 %v22735_v4 }
 0x1ad   :  { %19506 = vmatmul.mubr.bf16.gmra.mxu1 %v20287_v20  ;;  %19558 = vmatmul.mubr.bf16.gmra.mxu0 %v20299_v21  ;;  %v20372_v20 = vld [vmem:[#allocation12 + $0x40] sm:$0xff]   ;;  %v22784_v21 = vld [vmem:[#allocation12 + $0xb8] sm:$0xff]  }
 0x1ae   :  { %19594 = vmatpush3.bf16.msra.mxu1 %v22735_v4  ;;  %19646 = vmatpush3.bf16.msra.mxu0 %v22735_v4  ;;  %v20365_v4 = vld [vmem:[#allocation12 + $0x50] sm:$0xff]  }
 0x1af   :  { %19595 = vmatprep.subr.bf16.mxu1 %v22741_v7  ;;  %19647 = vmatprep.subr.bf16.mxu0 %v22741_v7 }
 0x1b0   :  { %19509 = vmatprep.mubr.bf16.mxu1 %v20288_v22  ;;  %19561 = vmatprep.mubr.bf16.mxu0 %v20302_v23  ;;  %v20331_v22 = vld [vmem:[#allocation11 + $0x188] sm:$0xff]   ;;  %v20345_v23 = vld [vmem:[#allocation11 + $0x218] sm:$0xff]  }
 0x1b2   :  { %19596 = vmatpush3.bf16.msra.mxu1 %v22741_v7  ;;  %19648 = vmatpush3.bf16.msra.mxu0 %v22741_v7  ;;  %v20322_v7 = vld [vmem:[#allocation11 + $0x160] sm:$0xff]  }
 0x1b3   :  { %19685 = vmatprep.subr.bf16.mxu1 %v20348_v24  ;;  %19717 = vmatprep.subr.bf16.mxu0 %v20351_v25 }
 0x1b5   :  { %19510 = vmatmul.mubr.bf16.gmra.mxu1 %v20289_v26  ;;  %19562 = vmatmul.mubr.bf16.gmra.mxu0 %v20303_v27  ;;  %v20335_v26 = vld [vmem:[#allocation11 + $0x198] sm:$0xff]   ;;  %v20347_v27 = vld [vmem:[#allocation11 + $0x228] sm:$0xff]  }
 0x1b6   :  { %19513 = vmatprep.mubr.bf16.mxu1 %v20292_v28  ;;  %19565 = vmatprep.mubr.bf16.mxu0 %v20306_v29  ;;  %v20338_v28 = vld [vmem:[#allocation11 + $0x1a0] sm:$0xff]   ;;  %v20349_v29 = vld [vmem:[#allocation11 + $0x230] sm:$0xff]  }
 0x1bd   :  { %19514 = vmatmul.mubr.bf16.gmra.mxu1 %v20293_v30  ;;  %19566 = vmatmul.mubr.bf16.gmra.mxu0 %v20307_v31  ;;  %v20339_v30 = vld [vmem:[#allocation11 + $0x1a8] sm:$0xff]   ;;  %v20350_v31 = vld [vmem:[#allocation11 + $0x238] sm:$0xff]  }
 0x1be   :  { %19517 = vmatprep.mubr.bf16.mxu1 %v20296_v32  ;;  %19569 = vmatprep.mubr.bf16.mxu0 %v20310_v33 }
 0x1c5   :  { %19518 = vmatmul.mubr.bf16.gmra.mxu1 %v20297_v34  ;;  %19570 = vmatmul.mubr.bf16.gmra.mxu0 %v20311_v35 }
 0x1c6   :  { %19521 = vmatprep.mubr.bf16.mxu1 %v20300_v36  ;;  %19573 = vmatprep.mubr.bf16.mxu0 %v20316_v37 }
 0x1cd   :  { %19522 = vmatmul.mubr.bf16.gmra.mxu1 %v20301_v38  ;;  %19574 = vmatmul.mubr.bf16.gmra.mxu0 %v20317_v39 }
 0x1ce   :  { %19525 = vmatprep.mubr.bf16.mxu1 %v20304_v40  ;;  %19577 = vmatprep.mubr.bf16.mxu0 %v20320_v41 }
 0x1d5   :  { %19526 = vmatmul.mubr.bf16.gmra.mxu1 %v20305_v42  ;;  %19578 = vmatmul.mubr.bf16.gmra.mxu0 %v20321_v43 }
 0x1d6   :  { %19597 = vmatprep.mubr.bf16.mxu1 %v20308_v44  ;;  %19649 = vmatprep.mubr.bf16.mxu0 %v20325_v45 }
 0x1dd   :  { %19598 = vmatmul.mubr.bf16.vlgmr.msra.gmra.mxu1 %v20309_v46  ;;  %19650 = vmatmul.mubr.bf16.vlgmr.msra.gmra.mxu0 %v20327_v47 }
 0x1de   :  { %19601 = vmatprep.mubr.bf16.mxu1 %v20312_v48  ;;  %19653 = vmatprep.mubr.bf16.mxu0 %v20328_v49 }
 0x1df   :  { %19686 = vmatpush3.bf16.msra.mxu1 %v20348_v24  ;;  %19718 = vmatpush3.bf16.msra.mxu0 %v20351_v25  ;;  %v20334_v24 = vld [vmem:[#allocation11 + $0x190] sm:$0xff]   ;;  %v20346_v25 = vld [vmem:[#allocation11 + $0x220] sm:$0xff]  }
 0x1e0   :  { %19687 = vmatprep.subr.bf16.mxu1 %v20352_v50  ;;  %19719 = vmatprep.subr.bf16.mxu0 %v20353_v51 }
 0x1e3   :  { %19688 = vmatpush3.bf16.msra.mxu1 %v20352_v50  ;;  %19720 = vmatpush3.bf16.msra.mxu0 %v20353_v51 }
 0x1e4   :  { %19721 = vmatprep.subr.bf16.mxu0 %v20354_v52  ;;  %19689 = vmatprep.subr.bf16.mxu1 %v20355_v53 }
 0x1e5   :  { %19602 = vmatmul.mubr.bf16.gmra.mxu1 %v20313_v54  ;;  %19654 = vmatmul.mubr.bf16.gmra.mxu0 %v20329_v55 }
 0x1e6   :  { %19605 = vmatprep.mubr.bf16.mxu1 %v20314_v56  ;;  %19657 = vmatprep.mubr.bf16.mxu0 %v20332_v57 }
 0x1e7   :  { %19722 = vmatpush3.bf16.msra.mxu0 %v20354_v52  ;;  %19690 = vmatpush3.bf16.msra.mxu1 %v20355_v53 }
 0x1e8   :  { %19723 = vmatprep.subr.bf16.mxu0 %v20356_v58  ;;  %19691 = vmatprep.subr.bf16.mxu1 %v20358_v59 }
 0x1eb   :  { %19724 = vmatpush3.bf16.msra.mxu0 %v20356_v58  ;;  %19692 = vmatpush3.bf16.msra.mxu1 %v20358_v59 }
 0x1ec   :  { %19725 = vmatprep.subr.bf16.mxu0 %v20357_v60  ;;  %19693 = vmatprep.subr.bf16.mxu1 %v20361_v61 }
 0x1ed   :  { %19606 = vmatmul.mubr.bf16.gmra.mxu1 %v20315_v62  ;;  %19658 = vmatmul.mubr.bf16.gmra.mxu0 %v20333_v63 }
 0x1ee   :  { %19609 = vmatprep.mubr.bf16.mxu1 %v20318_v0  ;;  %19661 = vmatprep.mubr.bf16.mxu0 %v20336_v1 }
 0x1ef   :  { %19726 = vmatpush3.bf16.msra.mxu0 %v20357_v60  ;;  %19694 = vmatpush3.bf16.msra.mxu1 %v20361_v61 }
 0x1f0   :  { %19727 = vmatprep.subr.bf16.mxu0 %v20359_v2  ;;  %19695 = vmatprep.subr.bf16.mxu1 %v20365_v4 }
 0x1f3   :  { %19728 = vmatpush3.bf16.msra.mxu0 %v20359_v2  ;;  %19696 = vmatpush3.bf16.msra.mxu1 %v20365_v4 }
 0x1f4   :  { %19729 = vmatprep.subr.bf16.mxu0 %v20360_v3  ;;  %19697 = vmatprep.subr.bf16.mxu1 %v20368_v15 }
 0x1f5   :  { %19610 = vmatmul.mubr.bf16.gmra.mxu1 %v20319_v5  ;;  %19662 = vmatmul.mubr.bf16.gmra.mxu0 %v20337_v6  ;;  %v20374_v6 = vld [vmem:[#allocation12 + $0xf0] sm:$0xff]  }
 0x1f6   :  { %19613 = vmatprep.mubr.bf16.mxu1 %v20322_v7  ;;  %19665 = vmatprep.mubr.bf16.mxu0 %v20340_v8 }
 0x1f7   :  { %19730 = vmatpush3.bf16.msra.mxu0 %v20360_v3  ;;  %19698 = vmatpush3.bf16.msra.mxu1 %v20368_v15 }
 0x1f8   :  { %19731 = vmatprep.subr.bf16.mxu0 %v20362_v9  ;;  %19699 = vmatprep.subr.bf16.mxu1 %v20372_v20 }
 0x1fb   :  { %19732 = vmatpush3.bf16.msra.mxu0 %v20362_v9  ;;  %19700 = vmatpush3.bf16.msra.mxu1 %v20372_v20 }
 0x1fc   :  { %19781 = vmatprep.subr.bf16.mxu0 %v22781_v12  ;;  %19749 = vmatprep.subr.bf16.mxu1 %v22784_v21 }
 0x1fd   :  { %19614 = vmatmul.mubr.bf16.gmra.mxu1 %v20323_v10  ;;  %19666 = vmatmul.mubr.bf16.gmra.mxu0 %v20341_v11 }
 0x1fe   :  { %19617 = vmatprep.mubr.bf16.mxu1 %v20324_v13  ;;  %19669 = vmatprep.mubr.bf16.mxu0 %v20342_v14 }
 0x205   :  { %19618 = vmatmul.mubr.bf16.gmra.mxu1 %v20326_v16  ;;  %19670 = vmatmul.mubr.bf16.gmra.mxu0 %v20343_v17  ;;  %v20376_v16 = vld [vmem:[#allocation12 + $0xe8] sm:$0xff]  }
 0x206   :  { %19621 = vmatprep.mubr.bf16.mxu1 %v20330_v18  ;;  %19673 = vmatprep.mubr.bf16.mxu0 %v20344_v19 }
 0x20d   :  { %19622 = vmatmul.mubr.bf16.gmra.mxu1 %v20331_v22  ;;  %19674 = vmatmul.mubr.bf16.gmra.mxu0 %v20345_v23 }
 0x20e   :  { %19625 = vmatprep.mubr.bf16.mxu1 %v20334_v24  ;;  %19677 = vmatprep.mubr.bf16.mxu0 %v20346_v25 }
 0x215   :  { %19626 = vmatmul.mubr.bf16.gmra.mxu1 %v20335_v26  ;;  %19678 = vmatmul.mubr.bf16.gmra.mxu0 %v20347_v27  ;;  %v20378_v27 = vld [vmem:[#allocation12 + $0xe0] sm:$0xff]  }
 0x216   :  { %19629 = vmatprep.mubr.bf16.mxu1 %v20338_v28  ;;  %19681 = vmatprep.mubr.bf16.mxu0 %v20349_v29 }
 0x21d   :  { %19630 = vmatmul.mubr.bf16.gmra.mxu1 %v20339_v30  ;;  %19682 = vmatmul.mubr.bf16.gmra.mxu0 %v20350_v31 }
 0x255   :  { %v19495_v32 = vpop.f32.mrf.mxu1  ;;  %v19547_v33 = vpop.f32.mrf.mxu0 }
 0x256   :  { %v18816_v34 = vpack.c.bf16 %v19495_v32, %v19495_v32  ;;  %v18852_v35 = vpack.c.bf16 %v19547_v33, %v19547_v33 }
 0x257   :  { %v627_v36 = vpop.f32.mrf.mxu1  ;;  %v1128_v37 = vpop.f32.mrf.mxu0 }
 0x258   :  { %916 = vst [vmem:[#allocation2 + $0x10] sm:$0xf] %v18816_v34  ;;  %v18814_v38 = vpack.c.bf16 %v627_v36, %v627_v36  ;;  %1417 = vst [vmem:[#allocation2 + $0x130] sm:$0xf] %v18852_v35  ;;  %v18850_v39 = vpack.c.bf16 %v1128_v37, %v1128_v37  ;;  %v20381_v36 = vld [vmem:[#allocation12 + $0xd8] sm:$0xff]  }
 0x259   :  { %v19496_v40 = vpop.f32.mrf.mxu1  ;;  %v19548_v41 = vpop.f32.mrf.mxu0 }
 0x25a   :  { %914 = vst [vmem:[#allocation2] sm:$0xf] %v18814_v38  ;;  %v18817_v42 = vpack.c.bf16 %v19496_v40, %v19496_v40  ;;  %1415 = vst [vmem:[#allocation2 + $0x120] sm:$0xf] %v18850_v39  ;;  %v18853_v43 = vpack.c.bf16 %v19548_v41, %v19548_v41 }
 0x25b   :  { %v630_v44 = vpop.f32.mrf.mxu1  ;;  %v1131_v45 = vpop.f32.mrf.mxu0 }
 0x25c   :  { %917 = vst [vmem:[#allocation2 + $0x18] sm:$0xf] %v18817_v42  ;;  %v18815_v46 = vpack.c.bf16 %v630_v44, %v630_v44  ;;  %1418 = vst [vmem:[#allocation2 + $0x138] sm:$0xf] %v18853_v43  ;;  %v18851_v47 = vpack.c.bf16 %v1131_v45, %v1131_v45 }
 0x25d   :  { %v19499_v48 = vpop.f32.mrf.mxu1  ;;  %v19551_v49 = vpop.f32.mrf.mxu0 }
 0x25e   :  { %915 = vst [vmem:[#allocation2 + $0x8] sm:$0xf] %v18815_v46  ;;  %v18820_v50 = vpack.c.bf16 %v19499_v48, %v19499_v48  ;;  %1416 = vst [vmem:[#allocation2 + $0x128] sm:$0xf] %v18851_v47  ;;  %v18856_v51 = vpack.c.bf16 %v19551_v49, %v19551_v49  ;;  %v20384_v47 = vld [vmem:[#allocation12 + $0xd0] sm:$0xff]  }
 0x25f   :  { %v643_v52 = vpop.f32.mrf.mxu1  ;;  %v1144_v53 = vpop.f32.mrf.mxu0 }
 0x260   :  { %920 = vst [vmem:[#allocation2 + $0x30] sm:$0xf] %v18820_v50  ;;  %v18818_v54 = vpack.c.bf16 %v643_v52, %v643_v52  ;;  %1421 = vst [vmem:[#allocation2 + $0x150] sm:$0xf] %v18856_v51  ;;  %v18854_v55 = vpack.c.bf16 %v1144_v53, %v1144_v53 }
 0x261   :  { %v19500_v56 = vpop.f32.mrf.mxu1  ;;  %v19552_v57 = vpop.f32.mrf.mxu0 }
 0x262   :  { %918 = vst [vmem:[#allocation2 + $0x20] sm:$0xf] %v18818_v54  ;;  %v18821_v58 = vpack.c.bf16 %v19500_v56, %v19500_v56  ;;  %1419 = vst [vmem:[#allocation2 + $0x140] sm:$0xf] %v18854_v55  ;;  %v18857_v59 = vpack.c.bf16 %v19552_v57, %v19552_v57  ;;  %v20387_v56 = vld [vmem:[#allocation12 + $0xc8] sm:$0xff]  }
 0x263   :  { %v646_v60 = vpop.f32.mrf.mxu1  ;;  %v1147_v61 = vpop.f32.mrf.mxu0  ;;  %v20364_v4 = vld [vmem:[#allocation2 + $0x10] ss:$8 sps:$4 sm:$0xff]  }
 0x264   :  { %921 = vst [vmem:[#allocation2 + $0x38] sm:$0xf] %v18821_v58  ;;  %v18819_v62 = vpack.c.bf16 %v646_v60, %v646_v60  ;;  %1422 = vst [vmem:[#allocation2 + $0x158] sm:$0xf] %v18857_v59  ;;  %v18855_v63 = vpack.c.bf16 %v1147_v61, %v1147_v61 }
 0x265   :  { %v19503_v0 = vpop.f32.mrf.mxu1  ;;  %v20363_v1 = vld [vmem:[#allocation2] ss:$8 sps:$4 sm:$0xff]   ;;  %v19555_v2 = vpop.f32.mrf.mxu0 }
 0x266   :  { %919 = vst [vmem:[#allocation2 + $0x28] sm:$0xf] %v18819_v62  ;;  %v18824_v3 = vpack.c.bf16 %v19503_v0, %v19503_v0  ;;  %1420 = vst [vmem:[#allocation2 + $0x148] sm:$0xf] %v18855_v63  ;;  %v18860_v5 = vpack.c.bf16 %v19555_v2, %v19555_v2  ;;  %19733 = vmatprep.mubr.bf16.mxu0 %v20363_v1 }
 0x267   :  { %v659_v7 = vpop.f32.mrf.mxu1  ;;  %v1160_v8 = vpop.f32.mrf.mxu0  ;;  %19734 = vmatmul.mubr.bf16.vlgmr.msra.gmra.mxu0 %v20364_v4 }
 0x268   :  { %924 = vst [vmem:[#allocation2 + $0x50] sm:$0xf] %v18824_v3  ;;  %v18822_v9 = vpack.c.bf16 %v659_v7, %v659_v7  ;;  %1425 = vst [vmem:[#allocation2 + $0x170] sm:$0xf] %v18860_v5  ;;  %v18858_v10 = vpack.c.bf16 %v1160_v8, %v1160_v8  ;;  %19782 = vmatpush3.bf16.msra.mxu0 %v22781_v12  ;;  %v20390_v3 = vld [vmem:[#allocation12 + $0xc0] sm:$0xff]  }
 0x269   :  { %v19504_v11 = vpop.f32.mrf.mxu1  ;;  %v19556_v13 = vpop.f32.mrf.mxu0  ;;  %19783 = vmatprep.subr.bf16.mxu0 %v20374_v6 }
 0x26a   :  { %922 = vst [vmem:[#allocation2 + $0x40] sm:$0xf] %v18822_v9  ;;  %v18825_v14 = vpack.c.bf16 %v19504_v11, %v19504_v11  ;;  %1423 = vst [vmem:[#allocation2 + $0x160] sm:$0xf] %v18858_v10  ;;  %v18861_v15 = vpack.c.bf16 %v19556_v13, %v19556_v13 }
 0x26b   :  { %v662_v17 = vpop.f32.mrf.mxu1  ;;  %v1163_v18 = vpop.f32.mrf.mxu0  ;;  %v20367_v12 = vld [vmem:[#allocation2 + $0x30] ss:$8 sps:$4 sm:$0xff]  }
 0x26c   :  { %925 = vst [vmem:[#allocation2 + $0x58] sm:$0xf] %v18825_v14  ;;  %v18823_v19 = vpack.c.bf16 %v662_v17, %v662_v17  ;;  %1426 = vst [vmem:[#allocation2 + $0x178] sm:$0xf] %v18861_v15  ;;  %v18859_v20 = vpack.c.bf16 %v1163_v18, %v1163_v18  ;;  %19784 = vmatpush3.bf16.msra.mxu0 %v20374_v6  ;;  %v20399_v14 = vld [vmem:[#allocation12 + $0x178] sm:$0xff]  }
 0x26d   :  { %v19507_v22 = vpop.f32.mrf.mxu1  ;;  %v20366_v23 = vld [vmem:[#allocation2 + $0x20] ss:$8 sps:$4 sm:$0xff]   ;;  %v19559_v24 = vpop.f32.mrf.mxu0  ;;  %19785 = vmatprep.subr.bf16.mxu0 %v20376_v16 }
 0x26e   :  { %923 = vst [vmem:[#allocation2 + $0x48] sm:$0xf] %v18823_v19  ;;  %v18828_v25 = vpack.c.bf16 %v19507_v22, %v19507_v22  ;;  %1424 = vst [vmem:[#allocation2 + $0x168] sm:$0xf] %v18859_v20  ;;  %v18864_v26 = vpack.c.bf16 %v19559_v24, %v19559_v24  ;;  %19737 = vmatprep.mubr.bf16.mxu0 %v20366_v23 }
 0x26f   :  { %v675_v28 = vpop.f32.mrf.mxu1  ;;  %v1176_v29 = vpop.f32.mrf.mxu0  ;;  %19738 = vmatmul.mubr.bf16.gmra.mxu0 %v20367_v12  ;;  %v20382_v12 = vld [vmem:[#allocation12 + $0xb0] sm:$0xff]  }
 0x270   :  { %928 = vst [vmem:[#allocation2 + $0x70] sm:$0xf] %v18828_v25  ;;  %v18826_v30 = vpack.c.bf16 %v675_v28, %v675_v28  ;;  %1429 = vst [vmem:[#allocation2 + $0x190] sm:$0xf] %v18864_v26  ;;  %v18862_v31 = vpack.c.bf16 %v1176_v29, %v1176_v29  ;;  %19786 = vmatpush3.bf16.msra.mxu0 %v20376_v16 }
 0x271   :  { %v19508_v32 = vpop.f32.mrf.mxu1  ;;  %v19560_v33 = vpop.f32.mrf.mxu0  ;;  %19787 = vmatprep.subr.bf16.mxu0 %v20378_v27 }
 0x272   :  { %926 = vst [vmem:[#allocation2 + $0x60] sm:$0xf] %v18826_v30  ;;  %v18829_v34 = vpack.c.bf16 %v19508_v32, %v19508_v32  ;;  %1427 = vst [vmem:[#allocation2 + $0x180] sm:$0xf] %v18862_v31  ;;  %v18865_v35 = vpack.c.bf16 %v19560_v33, %v19560_v33  ;;  %v20403_v30 = vld [vmem:[#allocation12 + $0x170] sm:$0xff]  }
 0x273   :  { %v678_v37 = vpop.f32.mrf.mxu1  ;;  %v1179_v38 = vpop.f32.mrf.mxu0  ;;  %v20370_v45 = vld [vmem:[#allocation2 + $0x50] ss:$8 sps:$4 sm:$0xff]  }
 0x274   :  { %929 = vst [vmem:[#allocation2 + $0x78] sm:$0xf] %v18829_v34  ;;  %v18827_v39 = vpack.c.bf16 %v678_v37, %v678_v37  ;;  %1430 = vst [vmem:[#allocation2 + $0x198] sm:$0xf] %v18865_v35  ;;  %v18863_v40 = vpack.c.bf16 %v1179_v38, %v1179_v38  ;;  %19788 = vmatpush3.bf16.msra.mxu0 %v20378_v27  ;;  %v20407_v38 = vld [vmem:[#allocation12 + $0x168] sm:$0xff]  }
 0x275   :  { %v19511_v41 = vpop.f32.mrf.mxu1  ;;  %v20369_v42 = vld [vmem:[#allocation2 + $0x40] ss:$8 sps:$4 sm:$0xff]   ;;  %v19563_v43 = vpop.f32.mrf.mxu0  ;;  %19789 = vmatprep.subr.bf16.mxu0 %v20381_v36 }
 0x276   :  { %927 = vst [vmem:[#allocation2 + $0x68] sm:$0xf] %v18827_v39  ;;  %v18832_v44 = vpack.c.bf16 %v19511_v41, %v19511_v41  ;;  %1428 = vst [vmem:[#allocation2 + $0x188] sm:$0xf] %v18863_v40  ;;  %v18868_v46 = vpack.c.bf16 %v19563_v43, %v19563_v43  ;;  %19741 = vmatprep.mubr.bf16.mxu0 %v20369_v42 }
 0x277   :  { %v691_v48 = vpop.f32.mrf.mxu1  ;;  %v1192_v49 = vpop.f32.mrf.mxu0  ;;  %19742 = vmatmul.mubr.bf16.gmra.mxu0 %v20370_v45 }
 0x278   :  { %932 = vst [vmem:[#allocation2 + $0x90] sm:$0xf] %v18832_v44  ;;  %v18830_v50 = vpack.c.bf16 %v691_v48, %v691_v48  ;;  %1433 = vst [vmem:[#allocation2 + $0x1b0] sm:$0xf] %v18868_v46  ;;  %v18866_v51 = vpack.c.bf16 %v1192_v49, %v1192_v49  ;;  %19790 = vmatpush3.bf16.msra.mxu0 %v20381_v36  ;;  %v20386_v36 = vld [vmem:[#allocation12 + $0xa8] sm:$0xff]   ;;  %v20388_v48 = vld [vmem:[#allocation12 + $0xa0] sm:$0xff]  }
 0x279   :  { %v19512_v52 = vpop.f32.mrf.mxu1  ;;  %v19564_v53 = vpop.f32.mrf.mxu0  ;;  %19791 = vmatprep.subr.bf16.mxu0 %v20384_v47 }
 0x27a   :  { %930 = vst [vmem:[#allocation2 + $0x80] sm:$0xf] %v18830_v50  ;;  %v18833_v54 = vpack.c.bf16 %v19512_v52, %v19512_v52  ;;  %1431 = vst [vmem:[#allocation2 + $0x1a0] sm:$0xf] %v18866_v51  ;;  %v18869_v55 = vpack.c.bf16 %v19564_v53, %v19564_v53  ;;  %v20412_v52 = vld [vmem:[#allocation12 + $0x160] sm:$0xff]  }
 0x27b   :  { %v694_v57 = vpop.f32.mrf.mxu1  ;;  %v1195_v58 = vpop.f32.mrf.mxu0  ;;  %v20375_v1 = vld [vmem:[#allocation2 + $0x70] ss:$8 sps:$4 sm:$0xff]  }
 0x27c   :  { %933 = vst [vmem:[#allocation2 + $0x98] sm:$0xf] %v18833_v54  ;;  %v18831_v59 = vpack.c.bf16 %v694_v57, %v694_v57  ;;  %1434 = vst [vmem:[#allocation2 + $0x1b8] sm:$0xf] %v18869_v55  ;;  %v18867_v60 = vpack.c.bf16 %v1195_v58, %v1195_v58  ;;  %19792 = vmatpush3.bf16.msra.mxu0 %v20384_v47  ;;  %v20394_v18 = vld [vmem:[#allocation2 + $0x190] ss:$8 sps:$4 sm:$0xff]  }
 0x27d   :  { %v19515_v61 = vpop.f32.mrf.mxu1  ;;  %v20373_v62 = vld [vmem:[#allocation2 + $0x60] ss:$8 sps:$4 sm:$0xff]   ;;  %v19567_v63 = vpop.f32.mrf.mxu0  ;;  %19793 = vmatprep.subr.bf16.mxu0 %v20387_v56 }
 0x27e   :  { %931 = vst [vmem:[#allocation2 + $0x88] sm:$0xf] %v18831_v59  ;;  %v18836_v0 = vpack.c.bf16 %v19515_v61, %v19515_v61  ;;  %1432 = vst [vmem:[#allocation2 + $0x1a8] sm:$0xf] %v18867_v60  ;;  %v18872_v2 = vpack.c.bf16 %v19567_v63, %v19567_v63  ;;  %v20393_v4 = vld [vmem:[#allocation2 + $0x180] ss:$8 sps:$4 sm:$0xff]   ;;  %19745 = vmatprep.mubr.bf16.mxu0 %v20373_v62 }
 0x27f   :  { %v707_v5 = vpop.f32.mrf.mxu1  ;;  %v1208_v6 = vpop.f32.mrf.mxu0  ;;  %19746 = vmatmul.mubr.bf16.gmra.mxu0 %v20375_v1  ;;  %v20392_v59 = vld [vmem:[#allocation12 + $0x98] sm:$0xff]  }
 0x280   :  { %936 = vst [vmem:[#allocation2 + $0xb0] sm:$0xf] %v18836_v0  ;;  %v18834_v7 = vpack.c.bf16 %v707_v5, %v707_v5  ;;  %1437 = vst [vmem:[#allocation2 + $0x1d0] sm:$0xf] %v18872_v2  ;;  %v18870_v8 = vpack.c.bf16 %v1208_v6, %v1208_v6  ;;  %19794 = vmatpush3.bf16.msra.mxu0 %v20387_v56  ;;  %19797 = vmatprep.mubr.bf16.mxu0 %v20393_v4  ;;  %v20415_v60 = vld [vmem:[#allocation12 + $0x158] sm:$0xff]  }
 0x281   :  { %v19516_v9 = vpop.f32.mrf.mxu1  ;;  %v19568_v10 = vpop.f32.mrf.mxu0  ;;  %19795 = vmatprep.subr.bf16.mxu0 %v20390_v3 }
 0x282   :  { %934 = vst [vmem:[#allocation2 + $0xa0] sm:$0xf] %v18834_v7  ;;  %v18837_v11 = vpack.c.bf16 %v19516_v9, %v19516_v9  ;;  %1435 = vst [vmem:[#allocation2 + $0x1c0] sm:$0xf] %v18870_v8  ;;  %v18873_v13 = vpack.c.bf16 %v19568_v10, %v19568_v10  ;;  %v20395_v8 = vld [vmem:[#allocation12 + $0x90] sm:$0xff]  }
 0x283   :  { %v710_v15 = vpop.f32.mrf.mxu1  ;;  %v1211_v16 = vpop.f32.mrf.mxu0  ;;  %v20379_v25 = vld [vmem:[#allocation2 + $0x90] ss:$8 sps:$4 sm:$0xff]  }
 0x284   :  { %937 = vst [vmem:[#allocation2 + $0xb8] sm:$0xf] %v18837_v11  ;;  %v18835_v17 = vpack.c.bf16 %v710_v15, %v710_v15  ;;  %1438 = vst [vmem:[#allocation2 + $0x1d8] sm:$0xf] %v18873_v13  ;;  %v18871_v19 = vpack.c.bf16 %v1211_v16, %v1211_v16  ;;  %19796 = vmatpush3.bf16.msra.mxu0 %v20390_v3  ;;  %v20401_v42 = vld [vmem:[#allocation2 + $0x1b0] ss:$8 sps:$4 sm:$0xff]  }
 0x285   :  { %v19519_v20 = vpop.f32.mrf.mxu1  ;;  %v20377_v22 = vld [vmem:[#allocation2 + $0x80] ss:$8 sps:$4 sm:$0xff]   ;;  %v19571_v23 = vpop.f32.mrf.mxu0  ;;  %19845 = vmatprep.subr.bf16.mxu0 %v20399_v14 }
 0x286   :  { %935 = vst [vmem:[#allocation2 + $0xa8] sm:$0xf] %v18835_v17  ;;  %v18840_v24 = vpack.c.bf16 %v19519_v20, %v19519_v20  ;;  %1436 = vst [vmem:[#allocation2 + $0x1c8] sm:$0xf] %v18871_v19  ;;  %v18876_v26 = vpack.c.bf16 %v19571_v23, %v19571_v23  ;;  %v20400_v27 = vld [vmem:[#allocation2 + $0x1a0] ss:$8 sps:$4 sm:$0xff]   ;;  %19701 = vmatprep.mubr.bf16.mxu1 %v20377_v22 }
 0x287   :  { %v723_v28 = vpop.f32.mrf.mxu1  ;;  %v1224_v29 = vpop.f32.mrf.mxu0  ;;  %19702 = vmatmul.mubr.bf16.vlgmr.msra.gmra.mxu1 %v20379_v25  ;;  %19798 = vmatmul.mubr.bf16.vlgmr.msra.gmra.mxu0 %v20394_v18  ;;  %v20420_v13 = vld [vmem:[#allocation12 + $0x150] sm:$0xff]   ;;  %v20398_v20 = vld [vmem:[#allocation12 + $0x88] sm:$0xff]  }
 0x288   :  { %940 = vst [vmem:[#allocation2 + $0xd0] sm:$0xf] %v18840_v24  ;;  %v18838_v31 = vpack.c.bf16 %v723_v28, %v723_v28  ;;  %1441 = vst [vmem:[#allocation2 + $0x1f0] sm:$0xf] %v18876_v26  ;;  %v18874_v32 = vpack.c.bf16 %v1224_v29, %v1224_v29  ;;  %19750 = vmatpush3.bf16.msra.mxu1 %v22784_v21  ;;  %19846 = vmatpush3.bf16.msra.mxu0 %v20399_v14  ;;  %v20423_v22 = vld [vmem:[#allocation12 + $0x148] sm:$0xff]  }
 0x289   :  { %v19520_v33 = vpop.f32.mrf.mxu1  ;;  %v19572_v34 = vpop.f32.mrf.mxu0  ;;  %19751 = vmatprep.subr.bf16.mxu1 %v20382_v12  ;;  %19801 = vmatprep.mubr.bf16.mxu0 %v20400_v27 }
 0x28a   :  { %938 = vst [vmem:[#allocation2 + $0xc0] sm:$0xf] %v18838_v31  ;;  %v18841_v35 = vpack.c.bf16 %v19520_v33, %v19520_v33  ;;  %1439 = vst [vmem:[#allocation2 + $0x1e0] sm:$0xf] %v18874_v32  ;;  %v18877_v37 = vpack.c.bf16 %v19572_v34, %v19572_v34  ;;  %19847 = vmatprep.subr.bf16.mxu0 %v20403_v30  ;;  %v20402_v33 = vld [vmem:[#allocation12 + $0x80] sm:$0xff]  }
 0x28b   :  { %v726_v39 = vpop.f32.mrf.mxu1  ;;  %v1227_v40 = vpop.f32.mrf.mxu0  ;;  %v20385_v47 = vld [vmem:[#allocation2 + $0xb0] ss:$8 sps:$4 sm:$0xff]  }
 0x28c   :  { %941 = vst [vmem:[#allocation2 + $0xd8] sm:$0xf] %v18841_v35  ;;  %v18839_v41 = vpack.c.bf16 %v726_v39, %v726_v39  ;;  %1442 = vst [vmem:[#allocation2 + $0x1f8] sm:$0xf] %v18877_v37  ;;  %v18875_v43 = vpack.c.bf16 %v1227_v40, %v1227_v40  ;;  %19752 = vmatpush3.bf16.msra.mxu1 %v20382_v12  ;;  %19848 = vmatpush3.bf16.msra.mxu0 %v20403_v30  ;;  %v20410_v1 = vld [vmem:[#allocation2 + $0x1d0] ss:$8 sps:$4 sm:$0xff]  }
 0x28d   :  { %v19523_v44 = vpop.f32.mrf.mxu1  ;;  %v20383_v21 = vld [vmem:[#allocation2 + $0xa0] ss:$8 sps:$4 sm:$0xff]   ;;  %v19575_v45 = vpop.f32.mrf.mxu0  ;;  %19753 = vmatprep.subr.bf16.mxu1 %v20386_v36  ;;  %19849 = vmatprep.subr.bf16.mxu0 %v20407_v38 }
 0x28e   :  { %939 = vst [vmem:[#allocation2 + $0xc8] sm:$0xf] %v18839_v41  ;;  %v18844_v46 = vpack.c.bf16 %v19523_v44, %v19523_v44  ;;  %1440 = vst [vmem:[#allocation2 + $0x1e8] sm:$0xf] %v18875_v43  ;;  %v20409_v49 = vld [vmem:[#allocation2 + $0x1c0] ss:$8 sps:$4 sm:$0xff]   ;;  %v18880_v50 = vpack.c.bf16 %v19575_v45, %v19575_v45  ;;  %19705 = vmatprep.mubr.bf16.mxu1 %v20383_v21 }
 0x28f   :  { %v739_v51 = vpop.f32.mrf.mxu1  ;;  %v1240_v53 = vpop.f32.mrf.mxu0  ;;  %19706 = vmatmul.mubr.bf16.gmra.mxu1 %v20385_v47  ;;  %19802 = vmatmul.mubr.bf16.gmra.mxu0 %v20401_v42  ;;  %v20426_v34 = vld [vmem:[#allocation12 + $0x140] sm:$0xff]   ;;  %v20406_v43 = vld [vmem:[#allocation12 + $0x138] sm:$0xff]  }
 0x290   :  { %944 = vst [vmem:[#allocation2 + $0xf0] sm:$0xf] %v18844_v46  ;;  %v18842_v54 = vpack.c.bf16 %v739_v51, %v739_v51  ;;  %1445 = vst [vmem:[#allocation2 + $0x210] sm:$0xf] %v18880_v50  ;;  %v18878_v55 = vpack.c.bf16 %v1240_v53, %v1240_v53  ;;  %19754 = vmatpush3.bf16.msra.mxu1 %v20386_v36  ;;  %19850 = vmatpush3.bf16.msra.mxu0 %v20407_v38  ;;  %v22789_v44 = vld [vmem:[#allocation12 + $0x1f8] sm:$0xff]  }
 0x291   :  { %v19524_v56 = vpop.f32.mrf.mxu1  ;;  %v19576_v57 = vpop.f32.mrf.mxu0  ;;  %19755 = vmatprep.subr.bf16.mxu1 %v20388_v48  ;;  %19805 = vmatprep.mubr.bf16.mxu0 %v20409_v49 }
 0x292   :  { %942 = vst [vmem:[#allocation2 + $0xe0] sm:$0xf] %v18842_v54  ;;  %v18845_v58 = vpack.c.bf16 %v19524_v56, %v19524_v56  ;;  %1443 = vst [vmem:[#allocation2 + $0x200] sm:$0xf] %v18878_v55  ;;  %v18881_v61 = vpack.c.bf16 %v19576_v57, %v19576_v57  ;;  %19851 = vmatprep.subr.bf16.mxu0 %v20412_v52  ;;  %v20411_v54 = vld [vmem:[#allocation12 + $0x130] sm:$0xff]  }
 0x293   :  { %v742_v62 = vpop.f32.mrf.mxu1  ;;  %v1243_v63 = vpop.f32.mrf.mxu0  ;;  %v20391_v7 = vld [vmem:[#allocation2 + $0xd0] ss:$8 sps:$4 sm:$0xff]   ;;  %v20408_v57 = vld [vmem:[#allocation2 + $0x120] ss:$8 sps:$4 sm:$0xff]  }
 0x294   :  { %945 = vst [vmem:[#allocation2 + $0xf8] sm:$0xf] %v18845_v58  ;;  %v18843_v0 = vpack.c.bf16 %v742_v62, %v742_v62  ;;  %1446 = vst [vmem:[#allocation2 + $0x218] sm:$0xf] %v18881_v61  ;;  %v18879_v2 = vpack.c.bf16 %v1243_v63, %v1243_v63  ;;  %19756 = vmatpush3.bf16.msra.mxu1 %v20388_v48  ;;  %19852 = vmatpush3.bf16.msra.mxu0 %v20412_v52  ;;  %v20418_v26 = vld [vmem:[#allocation2 + $0x1f0] ss:$8 sps:$4 sm:$0xff]  }
 0x295   :  { %v19527_v3 = vpop.f32.mrf.mxu1  ;;  %v20389_v4 = vld [vmem:[#allocation2 + $0xc0] ss:$8 sps:$4 sm:$0xff]   ;;  %v19579_v5 = vpop.f32.mrf.mxu0  ;;  %19757 = vmatprep.subr.bf16.mxu1 %v20392_v59  ;;  %19853 = vmatprep.subr.bf16.mxu0 %v20415_v60 }
 0x296   :  { %943 = vst [vmem:[#allocation2 + $0xe8] sm:$0xf] %v18843_v0  ;;  %v18848_v6 = vpack.c.bf16 %v19527_v3, %v19527_v3  ;;  %v20417_v9 = vld [vmem:[#allocation2 + $0x1e0] ss:$8 sps:$4 sm:$0xff]   ;;  %1444 = vst [vmem:[#allocation2 + $0x208] sm:$0xf] %v18879_v2  ;;  %v18884_v10 = vpack.c.bf16 %v19579_v5, %v19579_v5  ;;  %19709 = vmatprep.mubr.bf16.mxu1 %v20389_v4 }
 0x297   :  { %v755_v11 = vpop.f32.mrf.mxu1  ;;  %v1256_v14 = vpop.f32.mrf.mxu0  ;;  %19710 = vmatmul.mubr.bf16.gmra.mxu1 %v20391_v7  ;;  %19806 = vmatmul.mubr.bf16.gmra.mxu0 %v20410_v1  ;;  %v20414_v0 = vld [vmem:[#allocation12 + $0x128] sm:$0xff]  }
 0x298   :  { %948 = vst [vmem:[#allocation2 + $0x110] sm:$0xf] %v18848_v6  ;;  %v18846_v15 = vpack.c.bf16 %v755_v11, %v755_v11  ;;  %1449 = vst [vmem:[#allocation2 + $0x230] sm:$0xf] %v18884_v10  ;;  %v18882_v16 = vpack.c.bf16 %v1256_v14, %v1256_v14  ;;  %19758 = vmatpush3.bf16.msra.mxu1 %v20392_v59  ;;  %19854 = vmatpush3.bf16.msra.mxu0 %v20415_v60  ;;  %v20419_v10 = vld [vmem:[#allocation12 + $0x120] sm:$0xff]  }
 0x299   :  { %v19528_v17 = vpop.f32.mrf.mxu1  ;;  %v19580_v18 = vpop.f32.mrf.mxu0  ;;  %19759 = vmatprep.subr.bf16.mxu1 %v20395_v8  ;;  %19809 = vmatprep.mubr.bf16.mxu0 %v20417_v9  ;;  %v20413_v9 = vld [vmem:[#allocation2 + $0x130] ss:$8 sps:$4 sm:$0xff]   ;;  %v20416_v14 = vld [vmem:[#allocation2 + $0x140] ss:$8 sps:$4 sm:$0xff]  }
 0x29a   :  { %946 = vst [vmem:[#allocation2 + $0x100] sm:$0xf] %v18846_v15  ;;  %v18849_v19 = vpack.c.bf16 %v19528_v17, %v19528_v17  ;;  %1447 = vst [vmem:[#allocation2 + $0x220] sm:$0xf] %v18882_v16  ;;  %v18885_v23 = vpack.c.bf16 %v19580_v18, %v19580_v18  ;;  %19855 = vmatprep.subr.bf16.mxu0 %v20420_v13 }
 0x29b   :  { %v758_v24 = vpop.f32.mrf.mxu1  ;;  %v1259_v25 = vpop.f32.mrf.mxu0  ;;  %v20397_v32 = vld [vmem:[#allocation2 + $0xf0] ss:$8 sps:$4 sm:$0xff]  }
 0x29c   :  { %949 = vst [vmem:[#allocation2 + $0x118] sm:$0xf] %v18849_v19  ;;  %v18847_v12 = vpack.c.bf16 %v758_v24, %v758_v24  ;;  %1450 = vst [vmem:[#allocation2 + $0x238] sm:$0xf] %v18885_v23  ;;  %v18883_v27 = vpack.c.bf16 %v1259_v25, %v1259_v25  ;;  %19760 = vmatpush3.bf16.msra.mxu1 %v20395_v8  ;;  %19856 = vmatpush3.bf16.msra.mxu0 %v20420_v13 }
 0x29d   :  { %v19599_v28 = vpop.f32.mrf.mxu1  ;;  %v20396_v29 = vld [vmem:[#allocation2 + $0xe0] ss:$8 sps:$4 sm:$0xff]   ;;  %v19651_v30 = vpop.f32.mrf.mxu0  ;;  %19761 = vmatprep.subr.bf16.mxu1 %v20398_v20  ;;  %19857 = vmatprep.subr.bf16.mxu0 %v20423_v22 }
 0x29e   :  { %947 = vst [vmem:[#allocation2 + $0x108] sm:$0xf] %v18847_v12  ;;  %v18888_v31 = vpack.c.bf16 %v19599_v28, %v19599_v28  ;;  %1448 = vst [vmem:[#allocation2 + $0x228] sm:$0xf] %v18883_v27  ;;  %v18924_v35 = vpack.c.bf16 %v19651_v30, %v19651_v30  ;;  %19713 = vmatprep.mubr.bf16.mxu1 %v20396_v29  ;;  %v20421_v30 = vld [vmem:[#allocation2 + $0x150] ss:$8 sps:$4 sm:$0xff]  }
 0x29f   :  { %v1629_v36 = vpop.f32.mrf.mxu1  ;;  %v2130_v37 = vpop.f32.mrf.mxu0  ;;  %19714 = vmatmul.mubr.bf16.gmra.mxu1 %v20397_v32  ;;  %19810 = vmatmul.mubr.bf16.gmra.mxu0 %v20418_v26 }
 0x2a0   :  { %1918 = vst [vmem:[#allocation2 + $0x250] sm:$0xf] %v18888_v31  ;;  %v18886_v38 = vpack.c.bf16 %v1629_v36, %v1629_v36  ;;  %2419 = vst [vmem:[#allocation2 + $0x370] sm:$0xf] %v18924_v35  ;;  %v18922_v39 = vpack.c.bf16 %v2130_v37, %v2130_v37  ;;  %19762 = vmatpush3.bf16.msra.mxu1 %v20398_v20  ;;  %19858 = vmatpush3.bf16.msra.mxu0 %v20423_v22  ;;  %v20422_v22 = vld [vmem:[#allocation12 + $0x118] sm:$0xff]   ;;  %v20425_v31 = vld [vmem:[#allocation12 + $0x110] sm:$0xff]  }
 0x2a1   :  { %v19600_v40 = vpop.f32.mrf.mxu1  ;;  %v19652_v41 = vpop.f32.mrf.mxu0  ;;  %19763 = vmatprep.subr.bf16.mxu1 %v20402_v33  ;;  %19859 = vmatprep.subr.bf16.mxu0 %v20426_v34 }
 0x2a2   :  { %1916 = vst [vmem:[#allocation2 + $0x240] sm:$0xf] %v18886_v38  ;;  %v18889_v42 = vpack.c.bf16 %v19600_v40, %v19600_v40  ;;  %2417 = vst [vmem:[#allocation2 + $0x360] sm:$0xf] %v18922_v39  ;;  %v18925_v21 = vpack.c.bf16 %v19652_v41, %v19652_v41  ;;  %v20429_v41 = vld [vmem:[#allocation12 + $0x108] sm:$0xff]  }
 0x2a3   :  { %v1632_v45 = vpop.f32.mrf.mxu1  ;;  %v2133_v46 = vpop.f32.mrf.mxu0  ;;  %v20405_v53 = vld [vmem:[#allocation2 + $0x110] ss:$8 sps:$4 sm:$0xff]  }
 0x2a4   :  { %1919 = vst [vmem:[#allocation2 + $0x258] sm:$0xf] %v18889_v42  ;;  %v18887_v47 = vpack.c.bf16 %v1632_v45, %v1632_v45  ;;  %2420 = vst [vmem:[#allocation2 + $0x378] sm:$0xf] %v18925_v21  ;;  %v18923_v48 = vpack.c.bf16 %v2133_v46, %v2133_v46  ;;  %19764 = vmatpush3.bf16.msra.mxu1 %v20402_v33  ;;  %19860 = vmatpush3.bf16.msra.mxu0 %v20426_v34  ;;  %v20424_v34 = vld [vmem:[#allocation2 + $0x160] ss:$8 sps:$4 sm:$0xff]  }
 0x2a5   :  { %v19603_v49 = vpop.f32.mrf.mxu1  ;;  %v20404_v50 = vld [vmem:[#allocation2 + $0x100] ss:$8 sps:$4 sm:$0xff]   ;;  %v19655_v51 = vpop.f32.mrf.mxu0  ;;  %19813 = vmatprep.subr.bf16.mxu1 %v20406_v43  ;;  %19909 = vmatprep.subr.bf16.mxu0 %v22789_v44 }
 0x2a6   :  { %1917 = vst [vmem:[#allocation2 + $0x248] sm:$0xf] %v18887_v47  ;;  %v18892_v52 = vpack.c.bf16 %v19603_v49, %v19603_v49  ;;  %2418 = vst [vmem:[#allocation2 + $0x368] sm:$0xf] %v18923_v48  ;;  %v18928_v55 = vpack.c.bf16 %v19655_v51, %v19655_v51  ;;  %19765 = vmatprep.mubr.bf16.mxu1 %v20404_v50  ;;  %v20432_v47 = vld [vmem:[#allocation2 + $0x200] ss:$8 sps:$4 sm:$0xff]  }
 0x2a7   :  { %v1645_v56 = vpop.f32.mrf.mxu1  ;;  %v2146_v58 = vpop.f32.mrf.mxu0  ;;  %19766 = vmatmul.mubr.bf16.vlgmr.msra.gmra.mxu1 %v20405_v53  ;;  %v20428_v53 = vld [vmem:[#allocation2 + $0x170] ss:$8 sps:$4 sm:$0xff]  }
 0x2a8   :  { %1922 = vst [vmem:[#allocation2 + $0x270] sm:$0xf] %v18892_v52  ;;  %v18890_v59 = vpack.c.bf16 %v1645_v56, %v1645_v56  ;;  %2423 = vst [vmem:[#allocation2 + $0x390] sm:$0xf] %v18928_v55  ;;  %v18926_v60 = vpack.c.bf16 %v2146_v58, %v2146_v58  ;;  %19769 = vmatprep.mubr.bf16.mxu1 %v20408_v57  ;;  %19814 = vmatpush3.bf16.msra.mxu1 %v20406_v43  ;;  %v20434_v57 = vld [vmem:[#allocation12 + $0x1f0] sm:$0xff]  }
 0x2a9   :  { %v19604_v61 = vpop.f32.mrf.mxu1  ;;  %v19656_v62 = vpop.f32.mrf.mxu0  ;;  %19815 = vmatprep.subr.bf16.mxu1 %v20411_v54 }
 0x2aa   :  { %1920 = vst [vmem:[#allocation2 + $0x260] sm:$0xf] %v18890_v59  ;;  %v18893_v63 = vpack.c.bf16 %v19604_v61, %v19604_v61  ;;  %2421 = vst [vmem:[#allocation2 + $0x380] sm:$0xf] %v18926_v60  ;;  %v18929_v1 = vpack.c.bf16 %v19656_v62, %v19656_v62 }
 0x2ab   :  { %v1648_v2 = vpop.f32.mrf.mxu1  ;;  %v2149_v3 = vpop.f32.mrf.mxu0 }
 0x2ac   :  { %1923 = vst [vmem:[#allocation2 + $0x278] sm:$0xf] %v18893_v63  ;;  %v18891_v4 = vpack.c.bf16 %v1648_v2, %v1648_v2  ;;  %2424 = vst [vmem:[#allocation2 + $0x398] sm:$0xf] %v18929_v1  ;;  %v18927_v5 = vpack.c.bf16 %v2149_v3, %v2149_v3  ;;  %19816 = vmatpush3.bf16.msra.mxu1 %v20411_v54  ;;  %v20433_v54 = vld [vmem:[#allocation12 + $0x100] sm:$0xff]   ;;  %v20439_v3 = vld [vmem:[#allocation12 + $0x1e8] sm:$0xff]  }
 0x2ad   :  { %v19607_v6 = vpop.f32.mrf.mxu1  ;;  %v19659_v7 = vpop.f32.mrf.mxu0  ;;  %19817 = vmatprep.subr.bf16.mxu1 %v20414_v0 }
 0x2ae   :  { %1921 = vst [vmem:[#allocation2 + $0x268] sm:$0xf] %v18891_v4  ;;  %v18896_v8 = vpack.c.bf16 %v19607_v6, %v19607_v6  ;;  %2422 = vst [vmem:[#allocation2 + $0x388] sm:$0xf] %v18927_v5  ;;  %v18932_v11 = vpack.c.bf16 %v19659_v7, %v19659_v7  ;;  %v20440_v7 = vld [vmem:[#allocation2 + $0x220] ss:$8 sps:$4 sm:$0xff]  }
 0x2af   :  { %v1661_v13 = vpop.f32.mrf.mxu1  ;;  %v2162_v15 = vpop.f32.mrf.mxu0  ;;  %19770 = vmatmul.mubr.bf16.gmra.mxu1 %v20413_v9 }
 0x2b0   :  { %1926 = vst [vmem:[#allocation2 + $0x290] sm:$0xf] %v18896_v8  ;;  %v18894_v16 = vpack.c.bf16 %v1661_v13, %v1661_v13  ;;  %2427 = vst [vmem:[#allocation2 + $0x3b0] sm:$0xf] %v18932_v11  ;;  %v18930_v17 = vpack.c.bf16 %v2162_v15, %v2162_v15  ;;  %19773 = vmatprep.mubr.bf16.mxu1 %v20416_v14  ;;  %19818 = vmatpush3.bf16.msra.mxu1 %v20414_v0  ;;  %v20438_v0 = vld [vmem:[#allocation12 + $0x1b8] sm:$0xff]   ;;  %v20441_v14 = vld [vmem:[#allocation12 + $0x1b0] sm:$0xff]  }
 0x2b1   :  { %v19608_v18 = vpop.f32.mrf.mxu1  ;;  %v19660_v19 = vpop.f32.mrf.mxu0  ;;  %19819 = vmatprep.subr.bf16.mxu1 %v20419_v10  ;;  %v20436_v13 = vld [vmem:[#allocation2 + $0x210] ss:$8 sps:$4 sm:$0xff]  }
 0x2b2   :  { %1924 = vst [vmem:[#allocation2 + $0x280] sm:$0xf] %v18894_v16  ;;  %v18897_v20 = vpack.c.bf16 %v19608_v18, %v19608_v18  ;;  %2425 = vst [vmem:[#allocation2 + $0x3a0] sm:$0xf] %v18930_v17  ;;  %v18933_v23 = vpack.c.bf16 %v19660_v19, %v19660_v19  ;;  %v20442_v17 = vld [vmem:[#allocation12 + $0x1e0] sm:$0xff]  }
 0x2b3   :  { %v1664_v24 = vpop.f32.mrf.mxu1  ;;  %v2165_v25 = vpop.f32.mrf.mxu0 }
 0x2b4   :  { %1927 = vst [vmem:[#allocation2 + $0x298] sm:$0xf] %v18897_v20  ;;  %v18895_v12 = vpack.c.bf16 %v1664_v24, %v1664_v24  ;;  %2428 = vst [vmem:[#allocation2 + $0x3b8] sm:$0xf] %v18933_v23  ;;  %v18931_v26 = vpack.c.bf16 %v2165_v25, %v2165_v25  ;;  %19820 = vmatpush3.bf16.msra.mxu1 %v20419_v10  ;;  %v20446_v25 = vld [vmem:[#allocation12 + $0x1a8] sm:$0xff]  }
 0x2b5   :  { %v19611_v27 = vpop.f32.mrf.mxu1  ;;  %v19663_v28 = vpop.f32.mrf.mxu0  ;;  %19821 = vmatprep.subr.bf16.mxu1 %v20422_v22 }
 0x2b6   :  { %1925 = vst [vmem:[#allocation2 + $0x288] sm:$0xf] %v18895_v12  ;;  %v18900_v29 = vpack.c.bf16 %v19611_v27, %v19611_v27  ;;  %2426 = vst [vmem:[#allocation2 + $0x3a8] sm:$0xf] %v18931_v26  ;;  %v18936_v32 = vpack.c.bf16 %v19663_v28, %v19663_v28  ;;  %v20447_v27 = vld [vmem:[#allocation12 + $0x1d8] sm:$0xff]  }
 0x2b7   :  { %v1677_v33 = vpop.f32.mrf.mxu1  ;;  %v2178_v35 = vpop.f32.mrf.mxu0  ;;  %19774 = vmatmul.mubr.bf16.gmra.mxu1 %v20421_v30 }
 0x2b8   :  { %1930 = vst [vmem:[#allocation2 + $0x2b0] sm:$0xf] %v18900_v29  ;;  %v18898_v36 = vpack.c.bf16 %v1677_v33, %v1677_v33  ;;  %2431 = vst [vmem:[#allocation2 + $0x3d0] sm:$0xf] %v18936_v32  ;;  %v18934_v37 = vpack.c.bf16 %v2178_v35, %v2178_v35  ;;  %19777 = vmatprep.mubr.bf16.mxu1 %v20424_v34  ;;  %19822 = vmatpush3.bf16.msra.mxu1 %v20422_v22 }
 0x2b9   :  { %v19612_v38 = vpop.f32.mrf.mxu1  ;;  %v19664_v39 = vpop.f32.mrf.mxu0  ;;  %19823 = vmatprep.subr.bf16.mxu1 %v20425_v31 }
 0x2ba   :  { %1928 = vst [vmem:[#allocation2 + $0x2a0] sm:$0xf] %v18898_v36  ;;  %v18901_v40 = vpack.c.bf16 %v19612_v38, %v19612_v38  ;;  %2429 = vst [vmem:[#allocation2 + $0x3c0] sm:$0xf] %v18934_v37  ;;  %v18937_v42 = vpack.c.bf16 %v19664_v39, %v19664_v39  ;;  %v20444_v36 = vld [vmem:[#allocation2 + $0x230] ss:$8 sps:$4 sm:$0xff]  }
 0x2bb   :  { %v1680_v43 = vpop.f32.mrf.mxu1  ;;  %v2181_v21 = vpop.f32.mrf.mxu0  ;;  %v20430_v46 = vld [vmem:[#allocation2 + $0x290] ss:$8 sps:$4 sm:$0xff]  }
 0x2bc   :  { %1931 = vst [vmem:[#allocation2 + $0x2b8] sm:$0xf] %v18901_v40  ;;  %v18899_v45 = vpack.c.bf16 %v1680_v43, %v1680_v43  ;;  %2432 = vst [vmem:[#allocation2 + $0x3d8] sm:$0xf] %v18937_v42  ;;  %v18935_v48 = vpack.c.bf16 %v2181_v21, %v2181_v21  ;;  %19824 = vmatpush3.bf16.msra.mxu1 %v20425_v31  ;;  %v20449_v37 = vld [vmem:[#allocation12 + $0x1a0] sm:$0xff]   ;;  %v20450_v38 = vld [vmem:[#allocation12 + $0x1d0] sm:$0xff]  }
 0x2bd   :  { %v19615_v49 = vpop.f32.mrf.mxu1  ;;  %v20427_v50 = vld [vmem:[#allocation2 + $0x280] ss:$8 sps:$4 sm:$0xff]   ;;  %v19667_v51 = vpop.f32.mrf.mxu0  ;;  %19825 = vmatprep.subr.bf16.mxu1 %v20429_v41 }
 0x2be   :  { %1929 = vst [vmem:[#allocation2 + $0x2a8] sm:$0xf] %v18899_v45  ;;  %v18904_v52 = vpack.c.bf16 %v19615_v49, %v19615_v49  ;;  %2430 = vst [vmem:[#allocation2 + $0x3c8] sm:$0xf] %v18935_v48  ;;  %v18940_v55 = vpack.c.bf16 %v19667_v51, %v19667_v51  ;;  %19861 = vmatprep.mubr.bf16.mxu0 %v20427_v50  ;;  %v20454_v48 = vld [vmem:[#allocation12 + $0x198] sm:$0xff]   ;;  %v20455_v51 = vld [vmem:[#allocation12 + $0x1c8] sm:$0xff]  }
 0x2bf   :  { %v1693_v56 = vpop.f32.mrf.mxu1  ;;  %v2194_v58 = vpop.f32.mrf.mxu0  ;;  %19778 = vmatmul.mubr.bf16.gmra.mxu1 %v20428_v53  ;;  %19862 = vmatmul.mubr.bf16.vlgmr.msra.gmra.mxu0 %v20430_v46 }
 0x2c0   :  { %1934 = vst [vmem:[#allocation2 + $0x2d0] sm:$0xf] %v18904_v52  ;;  %v18902_v59 = vpack.c.bf16 %v1693_v56, %v1693_v56  ;;  %2435 = vst [vmem:[#allocation2 + $0x3f0] sm:$0xf] %v18940_v55  ;;  %v18938_v60 = vpack.c.bf16 %v2194_v58, %v2194_v58  ;;  %19826 = vmatpush3.bf16.msra.mxu1 %v20429_v41  ;;  %19829 = vmatprep.mubr.bf16.mxu1 %v20432_v47  ;;  %v20448_v41 = vld [vmem:[#allocation2 + $0x240] ss:$8 sps:$4 sm:$0xff]  }
 0x2c1   :  { %v19616_v61 = vpop.f32.mrf.mxu1  ;;  %v19668_v62 = vpop.f32.mrf.mxu0  ;;  %19910 = vmatpush3.bf16.msra.mxu0 %v22789_v44  ;;  %19827 = vmatprep.subr.bf16.mxu1 %v20433_v54  ;;  %v20457_v55 = vld [vmem:[#allocation12 + $0x190] sm:$0xff]  }
 0x2c2   :  { %1932 = vst [vmem:[#allocation2 + $0x2c0] sm:$0xf] %v18902_v59  ;;  %v18905_v63 = vpack.c.bf16 %v19616_v61, %v19616_v61  ;;  %2433 = vst [vmem:[#allocation2 + $0x3e0] sm:$0xf] %v18938_v60  ;;  %v18941_v1 = vpack.c.bf16 %v19668_v62, %v19668_v62  ;;  %19911 = vmatprep.subr.bf16.mxu0 %v20434_v57  ;;  %v20452_v61 = vld [vmem:[#allocation2 + $0x250] ss:$8 sps:$4 sm:$0xff]  }
 0x2c3   :  { %v1696_v2 = vpop.f32.mrf.mxu1  ;;  %v2197_v4 = vpop.f32.mrf.mxu0  ;;  %v20437_v6 = vld [vmem:[#allocation2 + $0x2b0] ss:$8 sps:$4 sm:$0xff]   ;;  %v20456_v62 = vld [vmem:[#allocation2 + $0x260] ss:$8 sps:$4 sm:$0xff]  }
 0x2c4   :  { %1935 = vst [vmem:[#allocation2 + $0x2d8] sm:$0xf] %v18905_v63  ;;  %v18903_v5 = vpack.c.bf16 %v1696_v2, %v1696_v2  ;;  %2436 = vst [vmem:[#allocation2 + $0x3f8] sm:$0xf] %v18941_v1  ;;  %v18939_v8 = vpack.c.bf16 %v2197_v4, %v2197_v4  ;;  %19828 = vmatpush3.bf16.msra.mxu1 %v20433_v54  ;;  %v20458_v63 = vld [vmem:[#allocation12 + $0x1c0] sm:$0xff]  }
 0x2c5   :  { %v19619_v9 = vpop.f32.mrf.mxu1  ;;  %v20435_v10 = vld [vmem:[#allocation2 + $0x2a0] ss:$8 sps:$4 sm:$0xff]   ;;  %v19671_v11 = vpop.f32.mrf.mxu0  ;;  %19912 = vmatpush3.bf16.msra.mxu0 %v20434_v57  ;;  %19877 = vmatprep.subr.bf16.mxu1 %v20438_v0 }
 0x2c6   :  { %1933 = vst [vmem:[#allocation2 + $0x2c8] sm:$0xf] %v18903_v5  ;;  %v18908_v44 = vpack.c.bf16 %v19619_v9, %v19619_v9  ;;  %2434 = vst [vmem:[#allocation2 + $0x3e8] sm:$0xf] %v18939_v8  ;;  %v18944_v15 = vpack.c.bf16 %v19671_v11, %v19671_v11  ;;  %19865 = vmatprep.mubr.bf16.mxu0 %v20435_v10  ;;  %19913 = vmatprep.subr.bf16.mxu0 %v20439_v3  ;;  %v20459_v2 = vld [vmem:[#allocation2 + $0x380] ss:$8 sps:$4 sm:$0xff]  }
 0x2c7   :  { %v1709_v16 = vpop.f32.mrf.mxu1  ;;  %v2210_v18 = vpop.f32.mrf.mxu0  ;;  %19830 = vmatmul.mubr.bf16.vlgmr.msra.gmra.mxu1 %v20436_v13  ;;  %19866 = vmatmul.mubr.bf16.gmra.mxu0 %v20437_v6  ;;  %v20461_v9 = vld [vmem:[#allocation12 + $0x188] sm:$0xff]  }
 0x2c8   :  { %1938 = vst [vmem:[#allocation2 + $0x2f0] sm:$0xf] %v18908_v44  ;;  %v18906_v19 = vpack.c.bf16 %v1709_v16, %v1709_v16  ;;  %2439 = vst [vmem:[#allocation2 + $0x410] sm:$0xf] %v18944_v15  ;;  %v18942_v20 = vpack.c.bf16 %v2210_v18, %v2210_v18  ;;  %19833 = vmatprep.mubr.bf16.mxu1 %v20440_v7  ;;  %19878 = vmatpush3.bf16.msra.mxu1 %v20438_v0  ;;  %v20462_v16 = vld [vmem:[#allocation2 + $0x390] ss:$8 sps:$4 sm:$0xff]  }
 0x2c9   :  { %v19620_v22 = vpop.f32.mrf.mxu1  ;;  %v19672_v23 = vpop.f32.mrf.mxu0  ;;  %19914 = vmatpush3.bf16.msra.mxu0 %v20439_v3  ;;  %19879 = vmatprep.subr.bf16.mxu1 %v20441_v14 }
 0x2ca   :  { %1936 = vst [vmem:[#allocation2 + $0x2e0] sm:$0xf] %v18906_v19  ;;  %v18909_v24 = vpack.c.bf16 %v19620_v22, %v19620_v22  ;;  %2437 = vst [vmem:[#allocation2 + $0x400] sm:$0xf] %v18942_v20  ;;  %v18945_v12 = vpack.c.bf16 %v19672_v23, %v19672_v23  ;;  %19915 = vmatprep.subr.bf16.mxu0 %v20442_v17  ;;  %v20460_v19 = vld [vmem:[#allocation2 + $0x270] ss:$8 sps:$4 sm:$0xff]  }
 0x2cb   :  { %v1712_v26 = vpop.f32.mrf.mxu1  ;;  %v2213_v28 = vpop.f32.mrf.mxu0  ;;  %v20445_v30 = vld [vmem:[#allocation2 + $0x2d0] ss:$8 sps:$4 sm:$0xff]  }
 0x2cc   :  { %1939 = vst [vmem:[#allocation2 + $0x2f8] sm:$0xf] %v18909_v24  ;;  %v18907_v29 = vpack.c.bf16 %v1712_v26, %v1712_v26  ;;  %2440 = vst [vmem:[#allocation2 + $0x418] sm:$0xf] %v18945_v12  ;;  %v18943_v31 = vpack.c.bf16 %v2213_v28, %v2213_v28  ;;  %19880 = vmatpush3.bf16.msra.mxu1 %v20441_v14  ;;  %v20464_v22 = vld [vmem:[#allocation12 + $0x180] sm:$0xff]  }
 0x2cd   :  { %v19623_v32 = vpop.f32.mrf.mxu1  ;;  %v20443_v33 = vld [vmem:[#allocation2 + $0x2c0] ss:$8 sps:$4 sm:$0xff]   ;;  %v19675_v34 = vpop.f32.mrf.mxu0  ;;  %19916 = vmatpush3.bf16.msra.mxu0 %v20442_v17  ;;  %19881 = vmatprep.subr.bf16.mxu1 %v20446_v25 }
 0x2ce   :  { %1937 = vst [vmem:[#allocation2 + $0x2e8] sm:$0xf] %v18907_v29  ;;  %v18912_v35 = vpack.c.bf16 %v19623_v32, %v19623_v32  ;;  %2438 = vst [vmem:[#allocation2 + $0x408] sm:$0xf] %v18943_v31  ;;  %v18948_v39 = vpack.c.bf16 %v19675_v34, %v19675_v34  ;;  %19869 = vmatprep.mubr.bf16.mxu0 %v20443_v33  ;;  %19917 = vmatprep.subr.bf16.mxu0 %v20447_v27  ;;  %v20468_v31 = vld [vmem:[#allocation12 + $0x238] sm:$0xff]  }
 0x2cf   :  { %v1725_v40 = vpop.f32.mrf.mxu1  ;;  %v2226_v42 = vpop.f32.mrf.mxu0  ;;  %19834 = vmatmul.mubr.bf16.gmra.mxu1 %v20444_v36  ;;  %19870 = vmatmul.mubr.bf16.gmra.mxu0 %v20445_v30  ;;  %v20467_v36 = vld [vmem:[#allocation2 + $0x3b0] ss:$8 sps:$4 sm:$0xff]  }
 0x2d0   :  { %1942 = vst [vmem:[#allocation2 + $0x310] sm:$0xf] %v18912_v35  ;;  %v18910_v43 = vpack.c.bf16 %v1725_v40, %v1725_v40  ;;  %2443 = vst [vmem:[#allocation2 + $0x430] sm:$0xf] %v18948_v39  ;;  %v18946_v21 = vpack.c.bf16 %v2226_v42, %v2226_v42  ;;  %19837 = vmatprep.mubr.bf16.mxu1 %v20448_v41  ;;  %19882 = vmatpush3.bf16.msra.mxu1 %v20446_v25  ;;  %v20465_v25 = vld [vmem:[#allocation2 + $0x3a0] ss:$8 sps:$4 sm:$0xff]  }
 0x2d1   :  { %v19624_v45 = vpop.f32.mrf.mxu1  ;;  %v19676_v46 = vpop.f32.mrf.mxu0  ;;  %19918 = vmatpush3.bf16.msra.mxu0 %v20447_v27  ;;  %19883 = vmatprep.subr.bf16.mxu1 %v20449_v37  ;;  %v20471_v40 = vld [vmem:[#allocation2 + $0x3c0] ss:$8 sps:$4 sm:$0xff]   ;;  %v20474_v42 = vld [vmem:[#allocation12 + $0x228] sm:$0xff]  }
 0x2d2   :  { %1940 = vst [vmem:[#allocation2 + $0x300] sm:$0xf] %v18910_v43  ;;  %v18913_v47 = vpack.c.bf16 %v19624_v45, %v19624_v45  ;;  %2441 = vst [vmem:[#allocation2 + $0x420] sm:$0xf] %v18946_v21  ;;  %v18949_v49 = vpack.c.bf16 %v19676_v46, %v19676_v46  ;;  %19919 = vmatprep.subr.bf16.mxu0 %v20450_v38  ;;  %v20470_v41 = vld [vmem:[#allocation12 + $0x230] sm:$0xff]  }
 0x2d3   :  { %v1728_v50 = vpop.f32.mrf.mxu1  ;;  %v2229_v52 = vpop.f32.mrf.mxu0  ;;  %v20453_v54 = vld [vmem:[#allocation2 + $0x2f0] ss:$8 sps:$4 sm:$0xff]   ;;  %v20477_v46 = vld [vmem:[#allocation2 + $0x3e0] ss:$8 sps:$4 sm:$0xff]  }
 0x2d4   :  { %1943 = vst [vmem:[#allocation2 + $0x318] sm:$0xf] %v18913_v47  ;;  %v18911_v53 = vpack.c.bf16 %v1728_v50, %v1728_v50  ;;  %2444 = vst [vmem:[#allocation2 + $0x438] sm:$0xf] %v18949_v49  ;;  %v18947_v56 = vpack.c.bf16 %v2229_v52, %v2229_v52  ;;  %19884 = vmatpush3.bf16.msra.mxu1 %v20449_v37  ;;  %v20473_v43 = vld [vmem:[#allocation2 + $0x3d0] ss:$8 sps:$4 sm:$0xff]  }
 0x2d5   :  { %v19627_v57 = vpop.f32.mrf.mxu1  ;;  %v20451_v58 = vld [vmem:[#allocation2 + $0x2e0] ss:$8 sps:$4 sm:$0xff]   ;;  %v19679_v59 = vpop.f32.mrf.mxu0  ;;  %19920 = vmatpush3.bf16.msra.mxu0 %v20450_v38  ;;  %19885 = vmatprep.subr.bf16.mxu1 %v20454_v48  ;;  %v20479_v49 = vld [vmem:[#allocation2 + $0x3f0] ss:$8 sps:$4 sm:$0xff]  }
 0x2d6   :  { %1941 = vst [vmem:[#allocation2 + $0x308] sm:$0xf] %v18911_v53  ;;  %v18916_v60 = vpack.c.bf16 %v19627_v57, %v19627_v57  ;;  %2442 = vst [vmem:[#allocation2 + $0x428] sm:$0xf] %v18947_v56  ;;  %v18952_v0 = vpack.c.bf16 %v19679_v59, %v19679_v59  ;;  %19873 = vmatprep.mubr.bf16.mxu0 %v20451_v58  ;;  %19921 = vmatprep.subr.bf16.mxu0 %v20455_v51  ;;  %v20476_v47 = vld [vmem:[#allocation12 + $0x220] sm:$0xff]   ;;  %v20482_v52 = vld [vmem:[#allocation12 + $0x210] sm:$0xff]  }
 0x2d7   :  { %v1741_v1 = vpop.f32.mrf.mxu1  ;;  %v2242_v3 = vpop.f32.mrf.mxu0  ;;  %19838 = vmatmul.mubr.bf16.gmra.mxu1 %v20452_v61  ;;  %19874 = vmatmul.mubr.bf16.gmra.mxu0 %v20453_v54  ;;  %v20484_v53 = vld [vmem:[#allocation12 + $0x208] sm:$0xff]   ;;  %v20485_v54 = vld [vmem:[#allocation2 + $0x400] ss:$8 sps:$4 sm:$0xff]  }
 0x2d8   :  { %1946 = vst [vmem:[#allocation2 + $0x330] sm:$0xf] %v18916_v60  ;;  %v18914_v4 = vpack.c.bf16 %v1741_v1, %v1741_v1  ;;  %2447 = vst [vmem:[#allocation2 + $0x450] sm:$0xf] %v18952_v0  ;;  %v18950_v5 = vpack.c.bf16 %v2242_v3, %v2242_v3  ;;  %19841 = vmatprep.mubr.bf16.mxu1 %v20456_v62  ;;  %19886 = vmatpush3.bf16.msra.mxu1 %v20454_v48  ;;  %v20480_v48 = vld [vmem:[#allocation12 + $0x218] sm:$0xff]   ;;  %v20486_v56 = vld [vmem:[#allocation12 + $0x200] sm:$0xff]  }
 0x2d9   :  { %v19628_v6 = vpop.f32.mrf.mxu1  ;;  %v19680_v7 = vpop.f32.mrf.mxu0  ;;  %19922 = vmatpush3.bf16.msra.mxu0 %v20455_v51  ;;  %19887 = vmatprep.subr.bf16.mxu1 %v20457_v55  ;;  %v20481_v51 = vld [vmem:[#allocation2 + $0x360] ss:$8 sps:$4 sm:$0xff]   ;;  %v20487_v58 = vld [vmem:[#allocation2 + $0x410] ss:$8 sps:$4 sm:$0xff]  }
 0x2da   :  { %1944 = vst [vmem:[#allocation2 + $0x320] sm:$0xf] %v18914_v4  ;;  %v18917_v8 = vpack.c.bf16 %v19628_v6, %v19628_v6  ;;  %2445 = vst [vmem:[#allocation2 + $0x440] sm:$0xf] %v18950_v5  ;;  %v18953_v10 = vpack.c.bf16 %v19680_v7, %v19680_v7  ;;  %19923 = vmatprep.subr.bf16.mxu0 %v20458_v63  ;;  %19925 = vmatprep.mubr.bf16.mxu0 %v20459_v2 }
 0x2db   :  { %v1744_v11 = vpop.f32.mrf.mxu1  ;;  %v2245_v44 = vpop.f32.mrf.mxu0  ;;  %v20466_v39 = vld [vmem:[#allocation2 + $0x310] ss:$8 sps:$4 sm:$0xff]  }
 0x2dc   :  { %1947 = vst [vmem:[#allocation2 + $0x338] sm:$0xf] %v18917_v8  ;;  %v18915_v13 = vpack.c.bf16 %v1744_v11, %v1744_v11  ;;  %2448 = vst [vmem:[#allocation2 + $0x458] sm:$0xf] %v18953_v10  ;;  %v18951_v14 = vpack.c.bf16 %v2245_v44, %v2245_v44  ;;  %19888 = vmatpush3.bf16.msra.mxu1 %v20457_v55  ;;  %v20483_v55 = vld [vmem:[#allocation2 + $0x370] ss:$8 sps:$4 sm:$0xff]  }
 0x2dd   :  { %v19631_v15 = vpop.f32.mrf.mxu1  ;;  %v19683_v17 = vpop.f32.mrf.mxu0  ;;  %19924 = vmatpush3.bf16.msra.mxu0 %v20458_v63  ;;  %19889 = vmatprep.subr.bf16.mxu1 %v20461_v9  ;;  %v20463_v20 = vld [vmem:[#allocation2 + $0x300] ss:$8 sps:$4 sm:$0xff]   ;;  %v20489_v60 = vld [vmem:[#allocation2 + $0x430] ss:$8 sps:$4 sm:$0xff]  }
 0x2de   :  { %1945 = vst [vmem:[#allocation2 + $0x328] sm:$0xf] %v18915_v13  ;;  %v18920_v18 = vpack.c.bf16 %v19631_v15, %v19631_v15  ;;  %2446 = vst [vmem:[#allocation2 + $0x448] sm:$0xf] %v18951_v14  ;;  %v18956_v23 = vpack.c.bf16 %v19683_v17, %v19683_v17  ;;  %v20488_v57 = vld [vmem:[#allocation2 + $0x420] ss:$8 sps:$4 sm:$0xff]  }
 0x2df   :  { %v1757_v24 = vpop.f32.mrf.mxu1  ;;  %v2258_v12 = vpop.f32.mrf.mxu0  ;;  %19842 = vmatmul.mubr.bf16.gmra.mxu1 %v20460_v19 }
 0x2e0   :  { %1950 = vst [vmem:[#allocation2 + $0x350] sm:$0xf] %v18920_v18  ;;  %v18918_v26 = vpack.c.bf16 %v1757_v24, %v1757_v24  ;;  %2451 = vst [vmem:[#allocation2 + $0x470] sm:$0xf] %v18956_v23  ;;  %v18954_v27 = vpack.c.bf16 %v2258_v12, %v2258_v12  ;;  %19926 = vmatmul.mubr.bf16.vlgmr.msra.gmra.mxu0 %v20462_v16  ;;  %19890 = vmatpush3.bf16.msra.mxu1 %v20461_v9 }
 0x2e1   :  { %v19632_v28 = vpop.f32.mrf.mxu1  ;;  %v19684_v29 = vpop.f32.mrf.mxu0  ;;  %19893 = vmatprep.mubr.bf16.mxu1 %v20463_v20  ;;  %19891 = vmatprep.subr.bf16.mxu1 %v20464_v22 }
 0x2e2   :  { %1948 = vst [vmem:[#allocation2 + $0x340] sm:$0xf] %v18918_v26  ;;  %v18921_v30 = vpack.c.bf16 %v19632_v28, %v19632_v28  ;;  %2449 = vst [vmem:[#allocation2 + $0x460] sm:$0xf] %v18954_v27  ;;  %v18957_v32 = vpack.c.bf16 %v19684_v29, %v19684_v29  ;;  %19929 = vmatprep.mubr.bf16.mxu0 %v20465_v25 }
 0x2e3   :  { %v1760_v33 = vpop.f32.mrf.mxu1  ;;  %v2261_v34 = vpop.f32.mrf.mxu0  ;;  %v20472_v45 = vld [vmem:[#allocation2 + $0x330] ss:$8 sps:$4 sm:$0xff]  }
 0x2e4   :  { %1951 = vst [vmem:[#allocation2 + $0x358] sm:$0xf] %v18921_v30  ;;  %v18919_v35 = vpack.c.bf16 %v1760_v33, %v1760_v33  ;;  %2452 = vst [vmem:[#allocation2 + $0x478] sm:$0xf] %v18957_v32  ;;  %v18955_v37 = vpack.c.bf16 %v2261_v34, %v2261_v34  ;;  %19892 = vmatpush3.bf16.msra.mxu1 %v20464_v22  ;;  %v20491_v62 = vld [vmem:[#allocation2 + $0x450] ss:$8 sps:$4 sm:$0xff]  }
 0x2e5   :  { %v20469_v38 = vld [vmem:[#allocation2 + $0x320] ss:$8 sps:$4 sm:$0xff]   ;;  %19941 = vmatprep.subr.bf16.mxu1 %v20468_v31 }
 0x2e6   :  { %1949 = vst [vmem:[#allocation2 + $0x348] sm:$0xf] %v18919_v35  ;;  %2450 = vst [vmem:[#allocation2 + $0x468] sm:$0xf] %v18955_v37  ;;  %v20490_v59 = vld [vmem:[#allocation2 + $0x440] ss:$8 sps:$4 sm:$0xff]  }
 0x2e7   :  { %19894 = vmatmul.mubr.bf16.vlgmr.msra.gmra.mxu1 %v20466_v39 }
 0x2e8   :  { %19930 = vmatmul.mubr.bf16.gmra.mxu0 %v20467_v36  ;;  %19897 = vmatprep.mubr.bf16.mxu1 %v20469_v38 }
 0x2e9   :  { %19942 = vmatpush3.bf16.msra.mxu1 %v20468_v31  ;;  %19933 = vmatprep.mubr.bf16.mxu0 %v20471_v40 }
 0x2ea   :  { %19943 = vmatprep.subr.bf16.mxu1 %v20470_v41 }
 0x2eb   :  { %v20478_v50 = vld [vmem:[#allocation2 + $0x350] ss:$8 sps:$4 sm:$0xff]  }
 0x2ec   :  { %v20493_v63 = vld [vmem:[#allocation2 + $0x470] ss:$8 sps:$4 sm:$0xff]  }
 0x2ed   :  { %v20475_v21 = vld [vmem:[#allocation2 + $0x340] ss:$8 sps:$4 sm:$0xff]   ;;  %19944 = vmatpush3.bf16.msra.mxu1 %v20470_v41 }
 0x2ee   :  { %19945 = vmatprep.subr.bf16.mxu1 %v20474_v42  ;;  %v20492_v61 = vld [vmem:[#allocation2 + $0x460] ss:$8 sps:$4 sm:$0xff]  }
 0x2ef   :  { %19898 = vmatmul.mubr.bf16.gmra.mxu1 %v20472_v45 }
 0x2f0   :  { %19934 = vmatmul.mubr.bf16.gmra.mxu0 %v20473_v43  ;;  %19901 = vmatprep.mubr.bf16.mxu1 %v20475_v21 }
 0x2f1   :  { %19946 = vmatpush3.bf16.msra.mxu1 %v20474_v42  ;;  %19937 = vmatprep.mubr.bf16.mxu0 %v20477_v46 }
 0x2f2   :  { %19947 = vmatprep.subr.bf16.mxu1 %v20476_v47 }
 0x2f5   :  { %19948 = vmatpush3.bf16.msra.mxu1 %v20476_v47 }
 0x2f6   :  { %19949 = vmatprep.subr.bf16.mxu1 %v20480_v48 }
 0x2f7   :  { %19902 = vmatmul.mubr.bf16.gmra.mxu1 %v20478_v50 }
 0x2f8   :  { %19938 = vmatmul.mubr.bf16.gmra.mxu0 %v20479_v49  ;;  %19905 = vmatprep.mubr.bf16.mxu1 %v20481_v51 }
 0x2f9   :  { %19950 = vmatpush3.bf16.msra.mxu1 %v20480_v48 }
 0x2fa   :  { %19951 = vmatprep.subr.bf16.mxu1 %v20482_v52 }
 0x2fd   :  { %19952 = vmatpush3.bf16.msra.mxu1 %v20482_v52 }
 0x2fe   :  { %19953 = vmatprep.subr.bf16.mxu1 %v20484_v53 }
 0x2ff   :  { %19906 = vmatmul.mubr.bf16.gmra.mxu1 %v20483_v55 }
 0x300   :  { %19957 = vmatprep.mubr.bf16.mxu1 %v20485_v54 }
 0x301   :  { %19954 = vmatpush3.bf16.msra.mxu1 %v20484_v53 }
 0x302   :  { %19955 = vmatprep.subr.bf16.mxu1 %v20486_v56 }
 0x305   :  { %19956 = vmatpush3.bf16.msra.mxu1 %v20486_v56 }
 0x308   :  { %19958 = vmatmul.mubr.bf16.vlgmr.msra.gmra.mxu1 %v20487_v58 }
 0x309   :  { %19961 = vmatprep.mubr.bf16.mxu1 %v20488_v57 }
 0x310   :  { %19962 = vmatmul.mubr.bf16.gmra.mxu1 %v20489_v60 }
 0x311   :  { %19965 = vmatprep.mubr.bf16.mxu1 %v20490_v59 }
 0x318   :  { %19966 = vmatmul.mubr.bf16.gmra.mxu1 %v20491_v62 }
 0x319   :  { %19969 = vmatprep.mubr.bf16.mxu1 %v20492_v61 }
 0x320   :  { %19970 = vmatmul.mubr.bf16.gmra.mxu1 %v20493_v63 }
 0x327   :  { %v19735_v0 = vpop.f32.mrf.mxu0 }
 0x329   :  { %v2840_v1 = vpop.f32.mrf.mxu0 }
 0x32b   :  { %v19736_v2 = vpop.f32.mrf.mxu0 }
 0x32d   :  { %v22793_v3 = vpop.f32.mrf.mxu0 }
 0x32f   :  { %v19739_v4 = vpop.f32.mrf.mxu0 }
 0x331   :  { %v2856_v5 = vpop.f32.mrf.mxu0 }
 0x333   :  { %v19740_v6 = vpop.f32.mrf.mxu0 }
 0x335   :  { %v22795_v7 = vpop.f32.mrf.mxu0 }
 0x337   :  { %v19743_v8 = vpop.f32.mrf.mxu0 }
 0x339   :  { %v2872_v9 = vpop.f32.mrf.mxu0 }
 0x33b   :  { %v19744_v10 = vpop.f32.mrf.mxu0 }
 0x33d   :  { %v22797_v11 = vpop.f32.mrf.mxu0 }
 0x33f   :  { %v19747_v44 = vpop.f32.mrf.mxu0 }
 0x341   :  { %v2888_v13 = vpop.f32.mrf.mxu0 }
 0x343   :  { %v19748_v14 = vpop.f32.mrf.mxu0 }
 0x345   :  { %v22799_v15 = vpop.f32.mrf.mxu0 }
 0x347   :  { %v19703_v16 = vpop.f32.mrf.mxu1  ;;  %v19799_v17 = vpop.f32.mrf.mxu0 }
 0x348   :  { %v2849_v18 = vadd.f32 %v19735_v0, %v19703_v16 }
 0x349   :  { %v2647_v19 = vpop.f32.mrf.mxu1  ;;  %v3306_v20 = vpop.f32.mrf.mxu0 }
 0x34a   :  { %v2841_v22 = vadd.f32 %v2840_v1, %v2647_v19 }
 0x34b   :  { %v19704_v23 = vpop.f32.mrf.mxu1  ;;  %v19800_v24 = vpop.f32.mrf.mxu0 }
 0x34c   :  { %v2852_v25 = vadd.f32 %v19736_v2, %v19704_v23 }
 0x34d   :  { %v22801_v12 = vpop.f32.mrf.mxu1  ;;  %v22803_v26 = vpop.f32.mrf.mxu0 }
 0x34f   :  { %v19707_v27 = vpop.f32.mrf.mxu1  ;;  %v19803_v30 = vpop.f32.mrf.mxu0 }
 0x350   :  { %v2865_v28 = vadd.f32 %v19739_v4, %v19707_v27 }
 0x351   :  { %v2663_v29 = vpop.f32.mrf.mxu1  ;;  %v3322_v35 = vpop.f32.mrf.mxu0 }
 0x352   :  { %v2857_v31 = vadd.f32 %v2856_v5, %v2663_v29 }
 0x353   :  { %v19708_v32 = vpop.f32.mrf.mxu1  ;;  %v19804_v39 = vpop.f32.mrf.mxu0 }
 0x354   :  { %v2868_v33 = vadd.f32 %v19740_v6, %v19708_v32 }
 0x355   :  { %v2666_v34 = vpop.f32.mrf.mxu1  ;;  %v22805_v21 = vpop.f32.mrf.mxu0 }
 0x357   :  { %v19711_v36 = vpop.f32.mrf.mxu1  ;;  %v19807_v48 = vpop.f32.mrf.mxu0 }
 0x358   :  { %v2881_v37 = vadd.f32 %v19743_v8, %v19711_v36 }
 0x359   :  { %v2679_v38 = vpop.f32.mrf.mxu1  ;;  %v3338_v53 = vpop.f32.mrf.mxu0 }
 0x35a   :  { %v2873_v40 = vadd.f32 %v2872_v9, %v2679_v38 }
 0x35b   :  { %v19712_v41 = vpop.f32.mrf.mxu1  ;;  %v19808_v57 = vpop.f32.mrf.mxu0 }
 0x35c   :  { %v2884_v42 = vadd.f32 %v19744_v10, %v19712_v41 }
 0x35d   :  { %v2682_v43 = vpop.f32.mrf.mxu1  ;;  %v3341_v0 = vpop.f32.mrf.mxu0 }
 0x35e   :  { %v2876_v29 = vadd.f32 %v22797_v11, %v2682_v43 }
 0x35f   :  { %v19715_v45 = vpop.f32.mrf.mxu1  ;;  %v22807_v6 = vpop.f32.mrf.mxu0 }
 0x360   :  { %v2897_v46 = vadd.f32 %v19747_v44, %v19715_v45  ;;  %v2860_v44 = vadd.f32 %v22795_v7, %v2666_v34 }
 0x361   :  { %v2695_v47 = vpop.f32.mrf.mxu1  ;;  %v22810_v16 = vpop.f32.mrf.mxu0 }
 0x362   :  { %v2889_v49 = vadd.f32 %v2888_v13, %v2695_v47 }
 0x363   :  { %v19716_v50 = vpop.f32.mrf.mxu1  ;;  %v22812_v23 = vpop.f32.mrf.mxu0 }
 0x364   :  { %v2900_v51 = vadd.f32 %v19748_v14, %v19716_v50  ;;  %v2844_v50 = vadd.f32 %v22793_v3, %v22801_v12 }
 0x365   :  { %v2698_v52 = vpop.f32.mrf.mxu1  ;;  %v22815_v7 = vpop.f32.mrf.mxu0 }
 0x366   :  { %v2892_v11 = vadd.f32 %v22799_v15, %v2698_v52 }
 0x367   :  { %v19767_v54 = vpop.f32.mrf.mxu1 }
 0x368   :  { %v3130_v55 = vadd.f32 %v19767_v54, %v2849_v18 }
 0x369   :  { %v3065_v56 = vpop.f32.mrf.mxu1 }
 0x36a   :  { %v3128_v58 = vadd.f32 %v3065_v56, %v2841_v22  ;;  %v3371_v59 = vadd.f32 %v19799_v17, %v3130_v55 }
 0x36b   :  { %v19768_v60 = vpop.f32.mrf.mxu1 }
 0x36c   :  { %v3131_v61 = vadd.f32 %v19768_v60, %v2852_v25  ;;  %v3369_v62 = vadd.f32 %v3306_v20, %v3128_v58 }
 0x36d   :  { %v3068_v63 = vpop.f32.mrf.mxu1 }
 0x36e   :  { %v3372_v1 = vadd.f32 %v19800_v24, %v3131_v61  ;;  %v3129_v55 = vadd.f32 %v3068_v63, %v2844_v50  ;;  %v20494_v61 = vld [vmem:[#allocation15] sm:$0xff]  }
 0x36f   :  { %v19771_v2 = vpop.f32.mrf.mxu1  ;;  %19989 = vmatprep.mubr.bf16.mxu0 %v20494_v61 }
 0x370   :  { %v3134_v4 = vadd.f32 %v19771_v2, %v2865_v28 }
 0x371   :  { %v3081_v5 = vpop.f32.mrf.mxu1 }
 0x372   :  { %v3132_v8 = vadd.f32 %v3081_v5, %v2857_v31  ;;  %v3375_v9 = vadd.f32 %v19803_v30, %v3134_v4 }
 0x373   :  { %v19772_v10 = vpop.f32.mrf.mxu1 }
 0x374   :  { %v3135_v13 = vadd.f32 %v19772_v10, %v2868_v33  ;;  %v3373_v14 = vadd.f32 %v3322_v35, %v3132_v8 }
 0x375   :  { %v3084_v17 = vpop.f32.mrf.mxu1 }
 0x376   :  { %v3133_v18 = vadd.f32 %v3084_v17, %v2860_v44  ;;  %v3376_v19 = vadd.f32 %v19804_v39, %v3135_v13 }
 0x377   :  { %v19775_v20 = vpop.f32.mrf.mxu1 }
 0x378   :  { %v3138_v22 = vadd.f32 %v19775_v20, %v2881_v37  ;;  %v3374_v20 = vadd.f32 %v22805_v21, %v3133_v18 }
 0x379   :  { %v3097_v24 = vpop.f32.mrf.mxu1 }
 0x37a   :  { %v3136_v25 = vadd.f32 %v3097_v24, %v2873_v40  ;;  %v3379_v27 = vadd.f32 %v19807_v48, %v3138_v22 }
 0x37b   :  { %v19776_v28 = vpop.f32.mrf.mxu1 }
 0x37c   :  { %v3139_v30 = vadd.f32 %v19776_v28, %v2884_v42  ;;  %v3377_v31 = vadd.f32 %v3338_v53, %v3136_v25 }
 0x37d   :  { %v3100_v32 = vpop.f32.mrf.mxu1 }
 0x37e   :  { %v3137_v33 = vadd.f32 %v3100_v32, %v2876_v29  ;;  %v3380_v34 = vadd.f32 %v19808_v57, %v3139_v30 }
 0x37f   :  { %v19779_v35 = vpop.f32.mrf.mxu1  ;;  %v19863_v36 = vpop.f32.mrf.mxu0 }
 0x380   :  { %v22817_v38 = vadd.f32 %v19779_v35, %v2897_v46  ;;  %v3378_v37 = vadd.f32 %v3341_v0, %v3137_v33  ;;  %v3370_v0 = vadd.f32 %v22803_v26, %v3129_v55 }
 0x381   :  { %v3113_v39 = vpop.f32.mrf.mxu1  ;;  %v3788_v41 = vpop.f32.mrf.mxu0 }
 0x382   :  { %v22819_v45 = vadd.f32 %v3113_v39, %v2889_v49 }
 0x383   :  { %v19780_v40 = vpop.f32.mrf.mxu1  ;;  %v19864_v47 = vpop.f32.mrf.mxu0 }
 0x384   :  { %v22822_v42 = vadd.f32 %v19780_v40, %v2900_v51 }
 0x385   :  { %v3116_v43 = vpop.f32.mrf.mxu1  ;;  %v3791_v48 = vpop.f32.mrf.mxu0 }
 0x386   :  { %v22826_v53 = vadd.f32 %v3116_v43, %v2892_v11 }
 0x387   :  { %v19831_v46 = vpop.f32.mrf.mxu1  ;;  %v22828_v54 = vpop.f32.mrf.mxu0 }
 0x388   :  { %v3612_v56 = vadd.f32 %v19831_v46, %v3371_v59 }
 0x389   :  { %v3547_v49 = vpop.f32.mrf.mxu1  ;;  %v3804_v57 = vpop.f32.mrf.mxu0 }
 0x38a   :  { %v3610_v58 = vadd.f32 %v3547_v49, %v3369_v62  ;;  %v3853_v60 = vadd.f32 %v19863_v36, %v3612_v56 }
 0x38b   :  { %v19832_v15 = vpop.f32.mrf.mxu1  ;;  %v22830_v51 = vpop.f32.mrf.mxu0 }
 0x38c   :  { %v3613_v52 = vadd.f32 %v19832_v15, %v3372_v1  ;;  %v3851_v2 = vadd.f32 %v3788_v41, %v3610_v58 }
 0x38d   :  { %v3550_v3 = vpop.f32.mrf.mxu1  ;;  %v22833_v12 = vpop.f32.mrf.mxu0 }
 0x38e   :  { %v3611_v4 = vadd.f32 %v3550_v3, %v3370_v0  ;;  %v3854_v5 = vadd.f32 %v19864_v47, %v3613_v52 }
 0x38f   :  { %v19835_v63 = vpop.f32.mrf.mxu1  ;;  %v22835_v59 = vpop.f32.mrf.mxu0 }
 0x390   :  { %v3616_v8 = vadd.f32 %v19835_v63, %v3375_v9  ;;  %v3852_v62 = vadd.f32 %v3791_v48, %v3611_v4 }
 0x391   :  { %v3563_v10 = vpop.f32.mrf.mxu1  ;;  %v22837_v44 = vpop.f32.mrf.mxu0 }
 0x392   :  { %v3614_v13 = vadd.f32 %v3563_v10, %v3373_v14 }
 0x393   :  { %v19836_v17 = vpop.f32.mrf.mxu1  ;;  %v22839_v1 = vpop.f32.mrf.mxu0 }
 0x394   :  { %v22841_v26 = vadd.f32 %v19836_v17, %v3376_v19  ;;  %v3855_v22 = vadd.f32 %v3804_v57, %v3614_v13 }
 0x395   :  { %v3566_v24 = vpop.f32.mrf.mxu1  ;;  %v22844_v25 = vpop.f32.mrf.mxu0 }
 0x396   :  { %v22846_v28 = vadd.f32 %v3566_v24, %v3374_v20 }
 0x397   :  { %v19839_v29 = vpop.f32.mrf.mxu1  ;;  %v22850_v30 = vpop.f32.mrf.mxu0 }
 0x398   :  { %v22848_v9 = vadd.f32 %v19839_v29, %v3379_v27 }
 0x399   :  { %v3579_v32 = vpop.f32.mrf.mxu1  ;;  %v22854_v35 = vpop.f32.mrf.mxu0 }
 0x39a   :  { %v22852_v14 = vadd.f32 %v3579_v32, %v3377_v31  ;;  %23493 = vst [vmem:[#allocation41_spill] sm:$0xff] %v22854_v35  ;;  %v20513_v35 = vld [vmem:[#allocation17 + $0x78] sm:$0xff]  }
 0x39b   :  { %v19840_v33 = vpop.f32.mrf.mxu1  ;;  %v22862_v39 = vpop.f32.mrf.mxu0  ;;  %20025 = vmatprep.subr.bf16.mxu1 %v20513_v35 }
 0x39c   :  { %v22856_v19 = vadd.f32 %v19840_v33, %v3380_v34  ;;  %23494 = vst [vmem:[#allocation42_spill] sm:$0xff] %v22862_v39  ;;  %v3857_v33 = vadd.f32 %v22828_v54, %v3616_v8  ;;  %v3856_v8 = vadd.f32 %v22833_v12, %v22846_v28  ;;  %20026 = vmatpush3.bf16.msra.mxu1 %v20513_v35 }
 0x39d   :  { %v3582_v21 = vpop.f32.mrf.mxu1  ;;  %v22868_v40 = vpop.f32.mrf.mxu0 }
 0x39e   :  { %v22858_v18 = vadd.f32 %v3582_v21, %v3378_v37  ;;  %23495 = vst [vmem:[#allocation43_spill] sm:$0xff] %v22868_v40 }
 0x39f   :  { %v22860_v36 = vpop.f32.mrf.mxu1 }
 0x3a0   :  { %v19927_v11 = vpop.f32.mrf.mxu0 }
 0x3a1   :  { %v22864_v41 = vpop.f32.mrf.mxu1 }
 0x3a2   :  { %v4270_v37 = vpop.f32.mrf.mxu0 }
 0x3a3   :  { %v22866_v27 = vpop.f32.mrf.mxu1 }
 0x3a4   :  { %v19928_v57 = vpop.f32.mrf.mxu0 }
 0x3a5   :  { %v22870_v31 = vpop.f32.mrf.mxu1 }
 0x3a6   :  { %v4273_v52 = vpop.f32.mrf.mxu0 }
 0x3a7   :  { %v19895_v47 = vpop.f32.mrf.mxu1 }
 0x3a8   :  { %v4094_v43 = vadd.f32 %v19895_v47, %v3853_v60  ;;  %v19931_v4 = vpop.f32.mrf.mxu0 }
 0x3a9   :  { %v4029_v34 = vpop.f32.mrf.mxu1 }
 0x3aa   :  { %v4092_v48 = vadd.f32 %v4029_v34, %v3851_v2  ;;  %v4286_v60 = vpop.f32.mrf.mxu0  ;;  %v4335_v24 = vadd.f32 %v19927_v11, %v4094_v43  ;;  %v22887_v34 = vld [vmem:[#allocation14] ss:$0 sm:$0xff] }
 0x3ab   :  { %v19896_v50 = vpop.f32.mrf.mxu1 }
 0x3ac   :  { %v4095_v46 = vadd.f32 %v19896_v50, %v3854_v5  ;;  %v19932_v5 = vpop.f32.mrf.mxu0  ;;  %v4333_v47 = vadd.f32 %v4270_v37, %v4092_v48 }
 0x3ad   :  { %v4032_v55 = vpop.f32.mrf.mxu1 }
 0x3ae   :  { %v4093_v56 = vadd.f32 %v4032_v55, %v3852_v62  ;;  %v4289_v20 = vpop.f32.mrf.mxu0  ;;  %v4336_v40 = vadd.f32 %v19928_v57, %v4095_v46 }
 0x3af   :  { %v19899_v49 = vpop.f32.mrf.mxu1 }
 0x3b0   :  { %v22884_v29 = vpop.f32.mrf.mxu0  ;;  %v4098_v55 = vadd.f32 %v19899_v49, %v3857_v33 }
 0x3b1   :  { %v4045_v58 = vpop.f32.mrf.mxu1 }
 0x3b2   :  { %v4096_v61 = vadd.f32 %v4045_v58, %v3855_v22  ;;  %v4302_v39 = vpop.f32.mrf.mxu0  ;;  %v4339_v57 = vadd.f32 %v19931_v4, %v4098_v55  ;;  %v3381_v4 = vadd.f32 %v22810_v16, %v22819_v45  ;;  %v3862_v16 = vadd.f32 %v22839_v1, %v22856_v19 }
 0x3b3   :  { %v19900_v15 = vpop.f32.mrf.mxu1 }
 0x3b5   :  { %v4048_v0 = vpop.f32.mrf.mxu1 }
 0x3b7   :  { %v19903_v3 = vpop.f32.mrf.mxu1 }
 0x3b9   :  { %v4061_v63 = vpop.f32.mrf.mxu1 }
 0x3bb   :  { %v22872_v10 = vpop.f32.mrf.mxu1 }
 0x3bd   :  { %v22874_v13 = vpop.f32.mrf.mxu1 }
 0x3bf   :  { %v22876_v2 = vpop.f32.mrf.mxu1 }
 0x3c0   :  { %23496 = vst [vmem:[#allocation44_spill] sm:$0xff] %v22876_v2  ;;  %v20514_v2 = vld [vmem:[#allocation17 + $0x70] sm:$0xff]  }
 0x3c1   :  { %v22878_v17 = vpop.f32.mrf.mxu1  ;;  %20027 = vmatprep.subr.bf16.mxu1 %v20514_v2 }
 0x3c2   :  { %23497 = vst [vmem:[#allocation45_spill] sm:$0xff] %v22878_v17  ;;  %20028 = vmatpush3.bf16.msra.mxu1 %v20514_v2 }
 0x3c3   :  { %v22880_v62 = vpop.f32.mrf.mxu1 }
 0x3c4   :  { %23498 = vst [vmem:[#allocation46_spill] sm:$0xff] %v22880_v62  ;;  %v3858_v62 = vadd.f32 %v22830_v51, %v22841_v26  ;;  %v3383_v51 = vadd.f32 %v22807_v6, %v22817_v38  ;;  %v19936_v26 = vpop.f32.mrf.mxu0  ;;  %v3859_v6 = vadd.f32 %v22837_v44, %v22852_v14 }
 0x3c5   :  { %v22882_v22 = vpop.f32.mrf.mxu1 }
 0x3c6   :  { %23499 = vst [vmem:[#allocation47_spill] sm:$0xff] %v22882_v22  ;;  %v4334_v22 = vadd.f32 %v4273_v52, %v4093_v56  ;;  %v4099_v54 = vadd.f32 %v19900_v15, %v3858_v62  ;;  %v3861_v56 = vadd.f32 %v22835_v59, %v22848_v9  ;;  %v4337_v52 = vadd.f32 %v4286_v60, %v4096_v61 }
 0x3c7   :  { %v3624_v35 = vadd.f32 %v22860_v36, %v3383_v51  ;;  %v3384_v60 = vadd.f32 %v22812_v23, %v22822_v42  ;;  %v4100_v33 = vadd.f32 %v4061_v63, %v3859_v6  ;;  %v3382_v36 = vadd.f32 %v22815_v7, %v22826_v53  ;;  %v23503_v51 = vld [vmem:[#allocation42_spill] sm:$0xff] }
 0x3c8   :  { %v19959_v32 = vpop.f32.mrf.mxu1  ;;  %v4103_v23 = vadd.f32 %v22872_v10, %v3862_v16  ;;  %v3860_v42 = vadd.f32 %v22844_v25, %v22858_v18 }
 0x3c9   :  { %v4576_v21 = vadd.f32 %v19959_v32, %v4335_v24  ;;  %v4305_v32 = vpop.f32.mrf.mxu0  ;;  %v3865_v7 = vadd.f32 %v22850_v30, %v3624_v35  ;;  %v4341_v10 = vadd.f32 %v4302_v39, %v4100_v33 }
 0x3ca   :  { %v4511_v50 = vpop.f32.mrf.mxu1 }
 0x3cb   :  { %v4574_v58 = vadd.f32 %v4511_v50, %v4333_v47  ;;  %v4599_v11 = vadd.f32 %v22887_v34, %v4576_v21  ;;  %v3622_v21 = vadd.f32 %v22864_v41, %v3381_v4  ;;  %v3625_v47 = vadd.f32 %v22866_v27, %v3384_v60  ;;  %v19939_v50 = vpop.f32.mrf.mxu0 }
 0x3cc   :  { %v19960_v17 = vpop.f32.mrf.mxu1  ;;  %v4101_v41 = vadd.f32 %v22874_v13, %v3860_v42  ;;  %v4344_v27 = vadd.f32 %v19936_v26, %v4103_v23 }
 0x3cd   :  { %v4577_v43 = vadd.f32 %v19960_v17, %v4336_v40  ;;  %v4597_v37 = vadd.f32 %v22887_v34, %v4574_v58  ;;  %v4097_v40 = vadd.f32 %v4048_v0, %v3856_v8  ;;  %v4615_v12 = vmax.f32 %v4599_v11, 0.0  ;;  %v23501_v8 = vld [vmem:[#allocation41_spill] sm:$0xff]  ;;  %v4318_v30 = vpop.f32.mrf.mxu0 }
 0x3ce   :  { %v4514_v48 = vpop.f32.mrf.mxu1  ;;  %v4340_v0 = vadd.f32 %v19932_v5, %v4099_v54  ;;  %v3623_v11 = vadd.f32 %v22870_v31, %v3382_v36  ;;  %v4342_v31 = vadd.f32 %v4305_v32, %v4101_v41 }
 0x3cf   :  { %v4600_v46 = vadd.f32 %v22887_v34, %v4577_v43  ;;  %v4575_v49 = vadd.f32 %v4514_v48, %v4334_v22  ;;  %v4102_v22 = vadd.f32 %v19903_v3, %v3861_v56  ;;  %v4613_v24 = vmax.f32 %v4597_v37, 0.0  ;;  %v23500_v43 = vld [vmem:[#allocation44_spill] sm:$0xff] }
 0x3d0   :  { %v19963_v15 = vpop.f32.mrf.mxu1  ;;  %v4338_v3 = vadd.f32 %v4289_v20, %v4097_v40  ;;  %v4106_v54 = vadd.f32 %v23500_v43, %v3865_v7  ;;  %v3866_v40 = vadd.f32 %v23503_v51, %v3625_v47  ;;  %v20495_v43 = vld [vmem:[#allocation15 + $0x8] sm:$0xff]   ;;  %v20509_v51 = vld [vmem:[#allocation15 + $0x78] sm:$0xff]  }
 0x3d1   :  { %v4616_v28 = vmax.f32 %v4600_v46, 0.0  ;;  %v4598_v17 = vadd.f32 %v22887_v34, %v4575_v49  ;;  %v4580_v62 = vadd.f32 %v19963_v15, %v4339_v57  ;;  %v4343_v20 = vadd.f32 %v22884_v29, %v4102_v22  ;;  %v23502_v57 = vld [vmem:[#allocation45_spill] sm:$0xff] }
 0x3d2   :  { %v4527_v38 = vpop.f32.mrf.mxu1  ;;  %v3863_v29 = vadd.f32 %v23501_v8, %v3622_v21  ;;  %v20515_v8 = vld [vmem:[#allocation17 + $0xb0] sm:$0xff]  }
 0x3d3   :  { %v4614_v59 = vmax.f32 %v4598_v17, 0.0  ;;  %v4578_v9 = vadd.f32 %v4527_v38, %v4337_v52  ;;  %v22905_v61 = vpack.c.bf16 %v4616_v28, %v4615_v12  ;;  %v4603_v44 = vadd.f32 %v22887_v34, %v4580_v62  ;;  %v23504_v28 = vld [vmem:[#allocation46_spill] sm:$0xff]  ;;  %v23505_v62 = vld [vmem:[#allocation43_spill] sm:$0xff] }
 0x3d4   :  { %v19964_v45 = vpop.f32.mrf.mxu1  ;;  %v4104_v39 = vadd.f32 %v23502_v57, %v3863_v29  ;;  %v4107_v17 = vadd.f32 %v23504_v28, %v3866_v40  ;;  %v3864_v4 = vadd.f32 %v23505_v62, %v3623_v11  ;;  %v20497_v29 = vld [vmem:[#allocation15 + $0x18] sm:$0xff]   ;;  %v20507_v57 = vld [vmem:[#allocation15 + $0x68] sm:$0xff]   ;;  %v20510_v40 = vld [vmem:[#allocation15 + $0x80] sm:$0xff]  }
 0x3d5   :  { %v4581_v14 = vadd.f32 %v19964_v45, %v4340_v0  ;;  %v22913_v5 = vpack.c.bf16 %v4614_v59, %v4613_v24  ;;  %v4601_v1 = vadd.f32 %v22887_v34, %v4578_v9  ;;  %v4619_v55 = vmax.f32 %v4603_v44, 0.0  ;;  %v19940_v24 = vpop.f32.mrf.mxu0  ;;  %v23506_v59 = vld [vmem:[#allocation47_spill] sm:$0xff]  ;;  %v20520_v28 = vld [vmem:[#allocation17 + $0x50] sm:$0xff]  }
 0x3d6   :  { %v4530_v63 = vpop.f32.mrf.mxu1  ;;  %v4347_v0 = vadd.f32 %v19939_v50, %v4106_v54  ;;  %v4105_v9 = vadd.f32 %v23506_v59, %v3864_v4  ;;  %v4345_v60 = vadd.f32 %v4318_v30, %v4104_v39  ;;  %v20496_v54 = vld [vmem:[#allocation15 + $0x10] sm:$0xff]   ;;  %v20506_v30 = vld [vmem:[#allocation15 + $0x60] sm:$0xff]  }
 0x3d7   :  { %v4604_v19 = vadd.f32 %v22887_v34, %v4581_v14  ;;  %v4579_v2 = vadd.f32 %v4530_v63, %v4338_v3  ;;  %v4617_v37 = vmax.f32 %v4601_v1, 0.0  ;;  %v4348_v14 = vadd.f32 %v19940_v24, %v4107_v17  ;;  %v4321_v42 = vpop.f32.mrf.mxu0  ;;  %v20508_v39 = vld [vmem:[#allocation15 + $0x70] sm:$0xff]   ;;  %v20522_v17 = vld [vmem:[#allocation17 + $0x48] sm:$0xff]   ;;  %v22948_v24 = vld [vmem:[#allocation17 + $0x138] sm:$0xff]  }
 0x3d8   :  { %v19967_v53 = vpop.f32.mrf.mxu1  ;;  %v20521_v62 = vld [vmem:[#allocation17 + $0xa0] sm:$0xff]  }
 0x3d9   :  { %v4620_v58 = vmax.f32 %v4604_v19, 0.0  ;;  %v4602_v25 = vadd.f32 %v22887_v34, %v4579_v2  ;;  %v4584_v18 = vadd.f32 %v19967_v53, %v4343_v20  ;;  %v4346_v2 = vadd.f32 %v4321_v42, %v4105_v9  ;;  %v20523_v4 = vld [vmem:[#allocation17 + $0x40] sm:$0xff]  }
 0x3da   :  { %v4543_v48 = vpop.f32.mrf.mxu1 }
 0x3db   :  { %v4618_v46 = vmax.f32 %v4602_v25, 0.0  ;;  %v4582_v13 = vadd.f32 %v4543_v48, %v4341_v10  ;;  %v4632_v49 = vpack.c.bf16 %v4620_v58, %v4619_v55  ;;  %v4607_v15 = vadd.f32 %v22887_v34, %v4584_v18  ;;  %v20498_v48 = vld [vmem:[#allocation15 + $0x20] sm:$0xff]  }
 0x3dc   :  { %v19968_v56 = vpop.f32.mrf.mxu1 }
 0x3dd   :  { %v4585_v52 = vadd.f32 %v19968_v56, %v4344_v27  ;;  %v4631_v12 = vpack.c.bf16 %v4618_v46, %v4617_v37  ;;  %v4605_v22 = vadd.f32 %v22887_v34, %v4582_v13  ;;  %v4623_v33 = vmax.f32 %v4607_v15, 0.0  ;;  %v20499_v27 = vld [vmem:[#allocation15 + $0x28] sm:$0xff]   ;;  %v20501_v37 = vld [vmem:[#allocation15 + $0x38] sm:$0xff]   ;;  %v20502_v46 = vld [vmem:[#allocation15 + $0x40] sm:$0xff]  }
 0x3de   :  { %v4546_v26 = vpop.f32.mrf.mxu1  ;;  %v20504_v13 = vld [vmem:[#allocation15 + $0x50] sm:$0xff]   ;;  %v20511_v56 = vld [vmem:[#allocation15 + $0x88] sm:$0xff]   ;;  %v20516_v15 = vld [vmem:[#allocation17 + $0x68] sm:$0xff]  }
 0x3df   :  { %v4608_v6 = vadd.f32 %v22887_v34, %v4585_v52  ;;  %v4583_v38 = vadd.f32 %v4546_v26, %v4342_v31  ;;  %v4621_v3 = vmax.f32 %v4605_v22, 0.0  ;;  %20029 = vmatprep.subr.bf16.mxu1 %v20516_v15  ;;  %v20517_v52 = vld [vmem:[#allocation17 + $0x60] sm:$0xff]   ;;  %v20519_v31 = vld [vmem:[#allocation17 + $0x58] sm:$0xff]  }
 0x3e0   :  { %v19971_v35 = vpop.f32.mrf.mxu1  ;;  %20030 = vmatpush3.bf16.msra.mxu1 %v20516_v15  ;;  %v20524_v26 = vld [vmem:[#allocation17 + $0x98] sm:$0xff]  }
 0x3e1   :  { %v4624_v16 = vmax.f32 %v4608_v6, 0.0  ;;  %v4606_v32 = vadd.f32 %v22887_v34, %v4583_v38  ;;  %v4588_v45 = vadd.f32 %v19971_v35, %v4347_v0  ;;  %20031 = vmatprep.subr.bf16.mxu1 %v20517_v52  ;;  %v20526_v22 = vld [vmem:[#allocation17 + $0x38] sm:$0xff]   ;;  %v20531_v6 = vld [vmem:[#allocation17 + $0x90] sm:$0xff]   ;;  %v20533_v38 = vld [vmem:[#allocation17 + $0x88] sm:$0xff]  }
 0x3e2   :  { %v4559_v44 = vpop.f32.mrf.mxu1  ;;  %v20535_v0 = vld [vmem:[#allocation17 + $0x80] sm:$0xff]  }
 0x3e3   :  { %v4622_v21 = vmax.f32 %v4606_v32, 0.0  ;;  %v4586_v36 = vadd.f32 %v4559_v44, %v4345_v60  ;;  %v4634_v23 = vpack.c.bf16 %v4624_v16, %v4623_v33  ;;  %v4611_v1 = vadd.f32 %v22887_v34, %v4588_v45 }
 0x3e4   :  { %v19972_v63 = vpop.f32.mrf.mxu1  ;;  %20032 = vmatpush3.bf16.msra.mxu1 %v20517_v52 }
 0x3e5   :  { %v4589_v19 = vadd.f32 %v19972_v63, %v4348_v14  ;;  %v4633_v20 = vpack.c.bf16 %v4622_v21, %v4621_v3  ;;  %v4609_v50 = vadd.f32 %v22887_v34, %v4586_v36  ;;  %v4627_v53 = vmax.f32 %v4611_v1, 0.0  ;;  %20033 = vmatprep.subr.bf16.mxu1 %v20519_v31 }
 0x3e6   :  { %v4562_v47 = vpop.f32.mrf.mxu1 }
 0x3e7   :  { %v4612_v41 = vadd.f32 %v22887_v34, %v4589_v19  ;;  %v4587_v7 = vadd.f32 %v4562_v47, %v4346_v2  ;;  %v4625_v58 = vmax.f32 %v4609_v50, 0.0 }
 0x3e8   :  { %20034 = vmatpush3.bf16.msra.mxu1 %v20519_v31  ;;  %v20536_v31 = vld [vmem:[#allocation17 + $0x10] sm:$0xff]  }
 0x3e9   :  { %v4628_v10 = vmax.f32 %v4612_v41, 0.0  ;;  %v4610_v55 = vadd.f32 %v22887_v34, %v4587_v7  ;;  %v20512_v34 = vld [vmem:[#allocation17 + $0xb8] sm:$0xff]   ;;  %20035 = vmatprep.subr.bf16.mxu1 %v20520_v28 }
 0x3eb   :  { %v4626_v25 = vmax.f32 %v4610_v55, 0.0  ;;  %v4636_v18 = vpack.c.bf16 %v4628_v10, %v4627_v53 }
 0x3ec   :  { %20036 = vmatpush3.bf16.msra.mxu1 %v20520_v28 }
 0x3ed   :  { %19973 = vmatprep.subr.bf16.mxu0 %v4636_v18  ;;  %v4635_v11 = vpack.c.bf16 %v4626_v25, %v4625_v58  ;;  %20037 = vmatprep.subr.bf16.mxu1 %v20522_v17  ;;  %v20529_v58 = vld [vmem:[#allocation17 + $0x30] sm:$0xff]  }
 0x3ee   :  { %19974 = vmatpush3.bf16.msra.mxu0 %v4636_v18 }
 0x3ef   :  { %19975 = vmatprep.subr.bf16.mxu0 %v4635_v11 }
 0x3f0   :  { %20038 = vmatpush3.bf16.msra.mxu1 %v20522_v17 }
 0x3f1   :  { %20039 = vmatprep.subr.bf16.mxu1 %v20523_v4 }
 0x3f2   :  { %19976 = vmatpush3.bf16.msra.mxu0 %v4635_v11 }
 0x3f3   :  { %19977 = vmatprep.subr.bf16.mxu0 %v4634_v23 }
 0x3f4   :  { %20040 = vmatpush3.bf16.msra.mxu1 %v20523_v4 }
 0x3f5   :  { %20045 = vmatprep.subr.bf16.mxu1 %v20526_v22 }
 0x3f6   :  { %19978 = vmatpush3.bf16.msra.mxu0 %v4634_v23 }
 0x3f7   :  { %19979 = vmatprep.subr.bf16.mxu0 %v4633_v20 }
 0x3fa   :  { %19980 = vmatpush3.bf16.msra.mxu0 %v4633_v20 }
 0x3fb   :  { %19981 = vmatprep.subr.bf16.mxu0 %v4632_v49 }
 0x3fe   :  { %19982 = vmatpush3.bf16.msra.mxu0 %v4632_v49  ;;  %v20505_v49 = vld [vmem:[#allocation15 + $0x58] sm:$0xff]  }
 0x3ff   :  { %19983 = vmatprep.subr.bf16.mxu0 %v4631_v12 }
 0x402   :  { %19984 = vmatpush3.bf16.msra.mxu0 %v4631_v12  ;;  %v20518_v12 = vld [vmem:[#allocation17 + $0xa8] sm:$0xff]  }
 0x403   :  { %19985 = vmatprep.subr.bf16.mxu0 %v22905_v61 }
 0x406   :  { %19986 = vmatpush3.bf16.msra.mxu0 %v22905_v61  ;;  %v20500_v61 = vld [vmem:[#allocation15 + $0x30] sm:$0xff]  }
 0x407   :  { %19987 = vmatprep.subr.bf16.mxu0 %v22913_v5 }
 0x40a   :  { %19988 = vmatpush3.bf16.msra.mxu0 %v22913_v5  ;;  %v20503_v5 = vld [vmem:[#allocation15 + $0x48] sm:$0xff]  }
 0x40b   :  { %20065 = vmatprep.subr.bf16.mxu0 %v20512_v34 }
 0x40d   :  { %19990 = vmatmul.mubr.bf16.vlgmr.msra.gmra.mxu0 %v20495_v43 }
 0x40e   :  { %19993 = vmatprep.mubr.bf16.mxu0 %v20496_v54  ;;  %20066 = vmatpush3.bf16.msra.mxu0 %v20512_v34  ;;  %v20530_v54 = vld [vmem:[#allocation17 + $0x28] sm:$0xff]  }
 0x40f   :  { %20067 = vmatprep.subr.bf16.mxu0 %v20515_v8 }
 0x412   :  { %20068 = vmatpush3.bf16.msra.mxu0 %v20515_v8 }
 0x413   :  { %20069 = vmatprep.subr.bf16.mxu0 %v20518_v12 }
 0x415   :  { %19994 = vmatmul.mubr.bf16.gmra.mxu0 %v20497_v29 }
 0x416   :  { %19997 = vmatprep.mubr.bf16.mxu0 %v20498_v48  ;;  %20070 = vmatpush3.bf16.msra.mxu0 %v20518_v12  ;;  %v20546_v12 = vld [vmem:[#allocation17 + $0x120] sm:$0xff]  }
 0x417   :  { %20071 = vmatprep.subr.bf16.mxu0 %v20521_v62 }
 0x41a   :  { %20072 = vmatpush3.bf16.msra.mxu0 %v20521_v62 }
 0x41b   :  { %20073 = vmatprep.subr.bf16.mxu0 %v20524_v26 }
 0x41d   :  { %19998 = vmatmul.mubr.bf16.gmra.mxu0 %v20499_v27 }
 0x41e   :  { %20001 = vmatprep.mubr.bf16.mxu0 %v20500_v61  ;;  %20074 = vmatpush3.bf16.msra.mxu0 %v20524_v26  ;;  %v20540_v26 = vld [vmem:[#allocation17 + $0x8] sm:$0xff]  }
 0x41f   :  { %20075 = vmatprep.subr.bf16.mxu0 %v20531_v6 }
 0x422   :  { %20076 = vmatpush3.bf16.msra.mxu0 %v20531_v6 }
 0x423   :  { %20077 = vmatprep.subr.bf16.mxu0 %v20533_v38 }
 0x425   :  { %20002 = vmatmul.mubr.bf16.gmra.mxu0 %v20501_v37 }
 0x426   :  { %20005 = vmatprep.mubr.bf16.mxu0 %v20502_v46  ;;  %20078 = vmatpush3.bf16.msra.mxu0 %v20533_v38  ;;  %v20532_v46 = vld [vmem:[#allocation17 + $0x20] sm:$0xff]  }
 0x427   :  { %20079 = vmatprep.subr.bf16.mxu0 %v20535_v0 }
 0x42a   :  { %20080 = vmatpush3.bf16.msra.mxu0 %v20535_v0 }
 0x42b   :  { %20105 = vmatprep.subr.bf16.mxu0 %v22948_v24 }
 0x42d   :  { %20006 = vmatmul.mubr.bf16.gmra.mxu0 %v20503_v5  ;;  %v20541_v5 = vld [vmem:[#allocation17 + $0x130] sm:$0xff]  }
 0x42e   :  { %20009 = vmatprep.mubr.bf16.mxu0 %v20504_v13 }
 0x435   :  { %20010 = vmatmul.mubr.bf16.gmra.mxu0 %v20505_v49 }
 0x436   :  { %20013 = vmatprep.mubr.bf16.mxu0 %v20506_v30 }
 0x43d   :  { %20014 = vmatmul.mubr.bf16.gmra.mxu0 %v20507_v57 }
 0x43e   :  { %20017 = vmatprep.mubr.bf16.mxu0 %v20508_v39  ;;  %v20534_v39 = vld [vmem:[#allocation17 + $0x18] sm:$0xff]  }
 0x445   :  { %20018 = vmatmul.mubr.bf16.gmra.mxu0 %v20509_v51  ;;  %v20543_v51 = vld [vmem:[#allocation17 + $0x128] sm:$0xff]  }
 0x446   :  { %20021 = vmatprep.mubr.bf16.mxu0 %v20510_v40 }
 0x44d   :  { %20022 = vmatmul.mubr.bf16.gmra.mxu0 %v20511_v56 }
 0x4cd   :  { %v19991_v59 = vpop.f32.mrf.mxu0 }
 0x4ce   :  { %v18960_v9 = vpack.c.bf16 %v19991_v59, %v19991_v59 }
 0x4cf   :  { %v4815_v35 = vpop.f32.mrf.mxu0 }
 0x4d0   :  { %5104 = vst [vmem:[#allocation2 + $0x10] sm:$0xf] %v18960_v9  ;;  %v18958_v60 = vpack.c.bf16 %v4815_v35, %v4815_v35  ;;  %v20542_v9 = vld [vmem:[#allocation17] sm:$0xff]   ;;  %v20550_v35 = vld [vmem:[#allocation17 + $0x110] sm:$0xff]  }
 0x4d1   :  { %v19992_v33 = vpop.f32.mrf.mxu0 }
 0x4d2   :  { %5102 = vst [vmem:[#allocation2] sm:$0xf] %v18958_v60  ;;  %v18961_v16 = vpack.c.bf16 %v19992_v33, %v19992_v33 }
 0x4d3   :  { %v4818_v32 = vpop.f32.mrf.mxu0 }
 0x4d4   :  { %5105 = vst [vmem:[#allocation2 + $0x18] sm:$0xf] %v18961_v16  ;;  %v18959_v45 = vpack.c.bf16 %v4818_v32, %v4818_v32 }
 0x4d5   :  { %v19995_v44 = vpop.f32.mrf.mxu0 }
 0x4d6   :  { %5103 = vst [vmem:[#allocation2 + $0x8] sm:$0xf] %v18959_v45  ;;  %v18964_v14 = vpack.c.bf16 %v19995_v44, %v19995_v44  ;;  %v20545_v45 = vld [vmem:[#allocation17 + $0xf8] sm:$0xff]   ;;  %v20552_v44 = vld [vmem:[#allocation17 + $0x108] sm:$0xff]  }
 0x4d7   :  { %v4831_v3 = vpop.f32.mrf.mxu0 }
 0x4d8   :  { %5108 = vst [vmem:[#allocation2 + $0x30] sm:$0xf] %v18964_v14  ;;  %v18962_v21 = vpack.c.bf16 %v4831_v3, %v4831_v3 }
 0x4d9   :  { %v19996_v36 = vpop.f32.mrf.mxu0 }
 0x4da   :  { %5106 = vst [vmem:[#allocation2 + $0x20] sm:$0xf] %v18962_v21  ;;  %v18965_v23 = vpack.c.bf16 %v19996_v36, %v19996_v36 }
 0x4db   :  { %v4834_v42 = vpop.f32.mrf.mxu0 }
 0x4dc   :  { %5109 = vst [vmem:[#allocation2 + $0x38] sm:$0xf] %v18965_v23  ;;  %v18963_v63 = vpack.c.bf16 %v4834_v42, %v4834_v42  ;;  %v20544_v23 = vld [vmem:[#allocation2 + $0x10] ss:$8 sps:$4 sm:$0xff]  }
 0x4dd   :  { %v19999_v1 = vpop.f32.mrf.mxu0  ;;  %v20528_v18 = vld [vmem:[#allocation2] ss:$8 sps:$4 sm:$0xff]   ;;  %v20547_v42 = vld [vmem:[#allocation17 + $0xf0] sm:$0xff]  }
 0x4de   :  { %5107 = vst [vmem:[#allocation2 + $0x28] sm:$0xf] %v18963_v63  ;;  %v18968_v19 = vpack.c.bf16 %v19999_v1, %v19999_v1  ;;  %v20554_v63 = vld [vmem:[#allocation17 + $0x100] sm:$0xff]  }
 0x4df   :  { %v4847_v2 = vpop.f32.mrf.mxu0 }
 0x4e0   :  { %5112 = vst [vmem:[#allocation2 + $0x50] sm:$0xf] %v18968_v19  ;;  %v18966_v20 = vpack.c.bf16 %v4847_v2, %v4847_v2 }
 0x4e1   :  { %v20000_v47 = vpop.f32.mrf.mxu0 }
 0x4e2   :  { %5110 = vst [vmem:[#allocation2 + $0x40] sm:$0xf] %v18966_v20  ;;  %v18969_v50 = vpack.c.bf16 %v20000_v47, %v20000_v47 }
 0x4e3   :  { %v4850_v41 = vpop.f32.mrf.mxu0  ;;  %v20527_v55 = vld [vmem:[#allocation2 + $0x30] ss:$8 sps:$4 sm:$0xff]  }
 0x4e4   :  { %5113 = vst [vmem:[#allocation2 + $0x58] sm:$0xf] %v18969_v50  ;;  %v18967_v7 = vpack.c.bf16 %v4850_v41, %v4850_v41  ;;  %v20549_v50 = vld [vmem:[#allocation17 + $0xe8] sm:$0xff]   ;;  %v20558_v41 = vld [vmem:[#allocation17 + $0x1b8] sm:$0xff]  }
 0x4e5   :  { %v20525_v53 = vld [vmem:[#allocation2 + $0x20] ss:$8 sps:$4 sm:$0xff]   ;;  %v20003_v10 = vpop.f32.mrf.mxu0 }
 0x4e6   :  { %5111 = vst [vmem:[#allocation2 + $0x48] sm:$0xf] %v18967_v7  ;;  %v18972_v25 = vpack.c.bf16 %v20003_v10, %v20003_v10  ;;  %20041 = vmatprep.mubr.bf16.mxu1 %v20525_v53 }
 0x4e7   :  { %v4863_v11 = vpop.f32.mrf.mxu0  ;;  %20042 = vmatmul.mubr.bf16.vlgmr.msra.gmra.mxu1 %v20527_v55 }
 0x4e8   :  { %5116 = vst [vmem:[#allocation2 + $0x70] sm:$0xf] %v18972_v25  ;;  %v18970_v34 = vpack.c.bf16 %v4863_v11, %v4863_v11  ;;  %20046 = vmatpush3.bf16.msra.mxu1 %v20526_v22  ;;  %20061 = vmatprep.mubr.bf16.mxu1 %v20528_v18  ;;  %v20548_v22 = vld [vmem:[#allocation17 + $0x118] sm:$0xff]   ;;  %v20551_v25 = vld [vmem:[#allocation17 + $0xe0] sm:$0xff]   ;;  %v20561_v18 = vld [vmem:[#allocation17 + $0x1b0] sm:$0xff]  }
 0x4e9   :  { %v20004_v43 = vpop.f32.mrf.mxu0  ;;  %20047 = vmatprep.subr.bf16.mxu1 %v20529_v58 }
 0x4ea   :  { %5114 = vst [vmem:[#allocation2 + $0x60] sm:$0xf] %v18970_v34  ;;  %v18973_v8 = vpack.c.bf16 %v20004_v43, %v20004_v43 }
 0x4eb   :  { %v4866_v29 = vpop.f32.mrf.mxu0  ;;  %v20539_v48 = vld [vmem:[#allocation2 + $0x50] ss:$8 sps:$4 sm:$0xff]  }
 0x4ec   :  { %5117 = vst [vmem:[#allocation2 + $0x78] sm:$0xf] %v18973_v8  ;;  %v18971_v27 = vpack.c.bf16 %v4866_v29, %v4866_v29  ;;  %20048 = vmatpush3.bf16.msra.mxu1 %v20529_v58  ;;  %v20553_v29 = vld [vmem:[#allocation17 + $0xd8] sm:$0xff]  }
 0x4ed   :  { %v20537_v61 = vld [vmem:[#allocation2 + $0x40] ss:$8 sps:$4 sm:$0xff]   ;;  %v20007_v37 = vpop.f32.mrf.mxu0  ;;  %20049 = vmatprep.subr.bf16.mxu1 %v20530_v54 }
 0x4ee   :  { %5115 = vst [vmem:[#allocation2 + $0x68] sm:$0xf] %v18971_v27  ;;  %v18976_v13 = vpack.c.bf16 %v20007_v37, %v20007_v37  ;;  %20081 = vmatprep.mubr.bf16.mxu0 %v20537_v61 }
 0x4ef   :  { %v4879_v49 = vpop.f32.mrf.mxu0  ;;  %20082 = vmatmul.mubr.bf16.vlgmr.msra.gmra.mxu0 %v20539_v48  ;;  %v20563_v48 = vld [vmem:[#allocation17 + $0x1a8] sm:$0xff]  }
 0x4f0   :  { %5120 = vst [vmem:[#allocation2 + $0x90] sm:$0xf] %v18976_v13  ;;  %v18974_v30 = vpack.c.bf16 %v4879_v49, %v4879_v49  ;;  %20050 = vmatpush3.bf16.msra.mxu1 %v20530_v54  ;;  %20106 = vmatpush3.bf16.msra.mxu0 %v22948_v24  ;;  %v20560_v13 = vld [vmem:[#allocation17 + $0xc8] sm:$0xff]   ;;  %v20568_v49 = vld [vmem:[#allocation17 + $0x198] sm:$0xff]  }
 0x4f1   :  { %v20008_v57 = vpop.f32.mrf.mxu0  ;;  %20051 = vmatprep.subr.bf16.mxu1 %v20532_v46  ;;  %20107 = vmatprep.subr.bf16.mxu0 %v20541_v5 }
 0x4f2   :  { %5118 = vst [vmem:[#allocation2 + $0x80] sm:$0xf] %v18974_v30  ;;  %v18977_v40 = vpack.c.bf16 %v20008_v57, %v20008_v57  ;;  %v20562_v30 = vld [vmem:[#allocation17 + $0xc0] sm:$0xff]   ;;  %v20570_v57 = vld [vmem:[#allocation17 + $0x190] sm:$0xff]  }
 0x4f3   :  { %v4882_v56 = vpop.f32.mrf.mxu0 }
 0x4f4   :  { %5121 = vst [vmem:[#allocation2 + $0x98] sm:$0xf] %v18977_v40  ;;  %v18975_v15 = vpack.c.bf16 %v4882_v56, %v4882_v56  ;;  %20052 = vmatpush3.bf16.msra.mxu1 %v20532_v46  ;;  %20108 = vmatpush3.bf16.msra.mxu0 %v20541_v5  ;;  %v20555_v46 = vld [vmem:[#allocation17 + $0xd0] sm:$0xff]   ;;  %v20566_v5 = vld [vmem:[#allocation17 + $0x1a0] sm:$0xff]  }
 0x4f5   :  { %v20011_v52 = vpop.f32.mrf.mxu0  ;;  %20053 = vmatprep.subr.bf16.mxu1 %v20534_v39  ;;  %20109 = vmatprep.subr.bf16.mxu0 %v20543_v51  ;;  %v20556_v19 = vld [vmem:[#allocation2 + $0x60] ss:$8 sps:$4 sm:$0xff]   ;;  %v20564_v40 = vld [vmem:[#allocation2 + $0x70] ss:$8 sps:$4 sm:$0xff]  }
 0x4f6   :  { %5119 = vst [vmem:[#allocation2 + $0x88] sm:$0xf] %v18975_v15  ;;  %v18980_v28 = vpack.c.bf16 %v20011_v52, %v20011_v52  ;;  %v20567_v56 = vld [vmem:[#allocation17 + $0x170] sm:$0xff]   ;;  %v20574_v15 = vld [vmem:[#allocation17 + $0x180] sm:$0xff]  }
 0x4f7   :  { %v4895_v17 = vpop.f32.mrf.mxu0 }
 0x4f8   :  { %5124 = vst [vmem:[#allocation2 + $0xb0] sm:$0xf] %v18980_v28  ;;  %v18978_v62 = vpack.c.bf16 %v4895_v17, %v4895_v17  ;;  %20054 = vmatpush3.bf16.msra.mxu1 %v20534_v39  ;;  %20110 = vmatpush3.bf16.msra.mxu0 %v20543_v51  ;;  %v20565_v39 = vld [vmem:[#allocation17 + $0x178] sm:$0xff]   ;;  %v20572_v51 = vld [vmem:[#allocation17 + $0x188] sm:$0xff]   ;;  %v20571_v17 = vld [vmem:[#allocation17 + $0x160] sm:$0xff]  }
 0x4f9   :  { %v20012_v4 = vpop.f32.mrf.mxu0  ;;  %20055 = vmatprep.subr.bf16.mxu1 %v20536_v31  ;;  %20111 = vmatprep.subr.bf16.mxu0 %v20546_v12 }
 0x4fa   :  { %5122 = vst [vmem:[#allocation2 + $0xa0] sm:$0xf] %v18978_v62  ;;  %v18981_v6 = vpack.c.bf16 %v20012_v4, %v20012_v4  ;;  %v20581_v62 = vld [vmem:[#allocation17 + $0x230] sm:$0xff]  }
 0x4fb   :  { %v4898_v38 = vpop.f32.mrf.mxu0  ;;  %v20559_v10 = vld [vmem:[#allocation2 + $0x90] ss:$8 sps:$4 sm:$0xff]  }
 0x4fc   :  { %5125 = vst [vmem:[#allocation2 + $0xb8] sm:$0xf] %v18981_v6  ;;  %v18979_v0 = vpack.c.bf16 %v4898_v38, %v4898_v38  ;;  %20056 = vmatpush3.bf16.msra.mxu1 %v20536_v31  ;;  %20112 = vmatpush3.bf16.msra.mxu0 %v20546_v12  ;;  %v20569_v31 = vld [vmem:[#allocation17 + $0x168] sm:$0xff]   ;;  %v20578_v12 = vld [vmem:[#allocation17 + $0x238] sm:$0xff]   ;;  %v20575_v6 = vld [vmem:[#allocation17 + $0x150] sm:$0xff]  }
 0x4fd   :  { %v20557_v24 = vld [vmem:[#allocation2 + $0x80] ss:$8 sps:$4 sm:$0xff]   ;;  %v20015_v59 = vpop.f32.mrf.mxu0  ;;  %20057 = vmatprep.subr.bf16.mxu1 %v20540_v26  ;;  %20113 = vmatprep.subr.bf16.mxu0 %v20548_v22 }
 0x4fe   :  { %5123 = vst [vmem:[#allocation2 + $0xa8] sm:$0xf] %v18979_v0  ;;  %v18984_v60 = vpack.c.bf16 %v20015_v59, %v20015_v59  ;;  %20121 = vmatprep.mubr.bf16.mxu0 %v20557_v24  ;;  %v20586_v38 = vld [vmem:[#allocation17 + $0x220] sm:$0xff]   ;;  %v20580_v0 = vld [vmem:[#allocation17 + $0x148] sm:$0xff]   ;;  %v20588_v24 = vld [vmem:[#allocation17 + $0x218] sm:$0xff]  }
 0x4ff   :  { %v4911_v33 = vpop.f32.mrf.mxu0  ;;  %v20582_v59 = vld [vmem:[#allocation17 + $0x140] sm:$0xff]  }
 0x500   :  { %5128 = vst [vmem:[#allocation2 + $0xd0] sm:$0xf] %v18984_v60  ;;  %v18982_v16 = vpack.c.bf16 %v4911_v33, %v4911_v33  ;;  %20058 = vmatpush3.bf16.msra.mxu1 %v20540_v26  ;;  %20114 = vmatpush3.bf16.msra.mxu0 %v20548_v22  ;;  %v20573_v26 = vld [vmem:[#allocation17 + $0x158] sm:$0xff]   ;;  %v20583_v22 = vld [vmem:[#allocation17 + $0x228] sm:$0xff]  }
 0x501   :  { %v20016_v32 = vpop.f32.mrf.mxu0  ;;  %20059 = vmatprep.subr.bf16.mxu1 %v20542_v9  ;;  %20115 = vmatprep.subr.bf16.mxu0 %v20550_v35  ;;  %v20592_v60 = vld [vmem:[#allocation17 + $0x208] sm:$0xff]  }
 0x502   :  { %5126 = vst [vmem:[#allocation2 + $0xc0] sm:$0xf] %v18982_v16  ;;  %v18985_v14 = vpack.c.bf16 %v20016_v32, %v20016_v32  ;;  %v20587_v16 = vld [vmem:[#allocation17 + $0x1f0] sm:$0xff]   ;;  %v20594_v32 = vld [vmem:[#allocation17 + $0x200] sm:$0xff]  }
 0x503   :  { %v4914_v3 = vpop.f32.mrf.mxu0  ;;  %v20584_v33 = vld [vmem:[#allocation2 + $0xb0] ss:$8 sps:$4 sm:$0xff]  }
 0x504   :  { %5129 = vst [vmem:[#allocation2 + $0xd8] sm:$0xf] %v18985_v14  ;;  %v18983_v21 = vpack.c.bf16 %v4914_v3, %v4914_v3  ;;  %20060 = vmatpush3.bf16.msra.mxu1 %v20542_v9  ;;  %20116 = vmatpush3.bf16.msra.mxu0 %v20550_v35  ;;  %v20590_v9 = vld [vmem:[#allocation17 + $0x210] sm:$0xff]   ;;  %v20585_v35 = vld [vmem:[#allocation17 + $0x1f8] sm:$0xff]   ;;  %v20591_v3 = vld [vmem:[#allocation17 + $0x1e0] sm:$0xff]  }
 0x505   :  { %v20019_v36 = vpop.f32.mrf.mxu0  ;;  %20085 = vmatprep.subr.bf16.mxu1 %v20545_v45  ;;  %20117 = vmatprep.subr.bf16.mxu0 %v20552_v44  ;;  %v20576_v52 = vld [vmem:[#allocation2 + $0xa0] ss:$8 sps:$4 sm:$0xff]  }
 0x506   :  { %5127 = vst [vmem:[#allocation2 + $0xc8] sm:$0xf] %v18983_v21  ;;  %v18988_v1 = vpack.c.bf16 %v20019_v36, %v20019_v36  ;;  %v20593_v21 = vld [vmem:[#allocation17 + $0x1d8] sm:$0xff]   ;;  %v20596_v36 = vld [vmem:[#allocation17 + $0x1d0] sm:$0xff]  }
 0x507   :  { %v4927_v2 = vpop.f32.mrf.mxu0  ;;  %20062 = vmatmul.mubr.bf16.vlgmr.msra.gmra.mxu1 %v20544_v23  ;;  %v20599_v23 = vld [vmem:[#allocation17 + $0x1c8] sm:$0xff]  }
 0x508   :  { %5132 = vst [vmem:[#allocation2 + $0xf0] sm:$0xf] %v18988_v1  ;;  %v18986_v20 = vpack.c.bf16 %v4927_v2, %v4927_v2  ;;  %20086 = vmatpush3.bf16.msra.mxu1 %v20545_v45  ;;  %20118 = vmatpush3.bf16.msra.mxu0 %v20552_v44  ;;  %v20589_v44 = vld [vmem:[#allocation17 + $0x1e8] sm:$0xff]  }
 0x509   :  { %v20020_v47 = vpop.f32.mrf.mxu0  ;;  %20087 = vmatprep.subr.bf16.mxu1 %v20547_v42  ;;  %20119 = vmatprep.subr.bf16.mxu0 %v20554_v63  ;;  %v20602_v1 = vld [vmem:[%s23472_s9] sm:$0xff]  }
 0x50a   :  { %5130 = vst [vmem:[#allocation2 + $0xe0] sm:$0xf] %v18986_v20  ;;  %v18989_v7 = vpack.c.bf16 %v20020_v47, %v20020_v47  ;;  %20101 = vmatprep.mubr.bf16.mxu1 %v20556_v19  ;;  %v20604_v19 = vld [vmem:[%s23472_s9 + $0x50] sm:$0xff]  }
 0x50b   :  { %v4930_v53 = vpop.f32.mrf.mxu0  ;;  %v20579_v28 = vld [vmem:[#allocation2 + $0xd0] ss:$8 sps:$4 sm:$0xff]  }
 0x50c   :  { %5133 = vst [vmem:[#allocation2 + $0xf8] sm:$0xf] %v18989_v7  ;;  %v18987_v55 = vpack.c.bf16 %v4930_v53, %v4930_v53  ;;  %20088 = vmatpush3.bf16.msra.mxu1 %v20547_v42  ;;  %20120 = vmatpush3.bf16.msra.mxu0 %v20554_v63  ;;  %v20600_v42 = vld [vmem:[#allocation17 + $0x1c0] sm:$0xff]  }
 0x50d   :  { %v20023_v58 = vpop.f32.mrf.mxu0  ;;  %20089 = vmatprep.subr.bf16.mxu1 %v20549_v50  ;;  %20145 = vmatprep.subr.bf16.mxu0 %v20558_v41  ;;  %v20577_v34 = vld [vmem:[#allocation2 + $0xc0] ss:$8 sps:$4 sm:$0xff]  }
 0x50e   :  { %5131 = vst [vmem:[#allocation2 + $0xe8] sm:$0xf] %v18987_v55  ;;  %v18992_v11 = vpack.c.bf16 %v20023_v58, %v20023_v58 }
 0x50f   :  { %v4943_v43 = vpop.f32.mrf.mxu0  ;;  %20122 = vmatmul.mubr.bf16.vlgmr.msra.gmra.mxu0 %v20559_v10 }
 0x510   :  { %5136 = vst [vmem:[#allocation2 + $0x110] sm:$0xf] %v18992_v11  ;;  %v18990_v54 = vpack.c.bf16 %v4943_v43, %v4943_v43  ;;  %20090 = vmatpush3.bf16.msra.mxu1 %v20549_v50  ;;  %20146 = vmatpush3.bf16.msra.mxu0 %v20558_v41 }
 0x511   :  { %v20024_v8 = vpop.f32.mrf.mxu0  ;;  %20091 = vmatprep.subr.bf16.mxu1 %v20551_v25  ;;  %20147 = vmatprep.subr.bf16.mxu0 %v20561_v18 }
 0x512   :  { %5134 = vst [vmem:[#allocation2 + $0x100] sm:$0xf] %v18990_v54  ;;  %v18993_v27 = vpack.c.bf16 %v20024_v8, %v20024_v8  ;;  %20161 = vmatprep.mubr.bf16.mxu0 %v20577_v34 }
 0x513   :  { %v4946_v61 = vpop.f32.mrf.mxu0  ;;  %v20601_v63 = vld [vmem:[#allocation2 + $0xf0] ss:$8 sps:$4 sm:$0xff]  }
 0x514   :  { %5137 = vst [vmem:[#allocation2 + $0x118] sm:$0xf] %v18993_v27  ;;  %v18991_v37 = vpack.c.bf16 %v4946_v61, %v4946_v61  ;;  %20092 = vmatpush3.bf16.msra.mxu1 %v20551_v25  ;;  %20148 = vmatpush3.bf16.msra.mxu0 %v20561_v18 }
 0x515   :  { %20093 = vmatprep.subr.bf16.mxu1 %v20553_v29  ;;  %20149 = vmatprep.subr.bf16.mxu0 %v20563_v48  ;;  %v20595_v45 = vld [vmem:[#allocation2 + $0xe0] ss:$8 sps:$4 sm:$0xff]  }
 0x516   :  { %5135 = vst [vmem:[#allocation2 + $0x108] sm:$0xf] %v18991_v37 }
 0x518   :  { %20094 = vmatpush3.bf16.msra.mxu1 %v20553_v29  ;;  %20150 = vmatpush3.bf16.msra.mxu0 %v20563_v48 }
 0x519   :  { %20095 = vmatprep.subr.bf16.mxu1 %v20555_v46  ;;  %20151 = vmatprep.subr.bf16.mxu0 %v20566_v5 }
 0x51b   :  { %v20598_v14 = vld [vmem:[#allocation2 + $0x110] ss:$8 sps:$4 sm:$0xff]  }
 0x51c   :  { %20096 = vmatpush3.bf16.msra.mxu1 %v20555_v46  ;;  %20152 = vmatpush3.bf16.msra.mxu0 %v20566_v5 }
 0x51d   :  { %20097 = vmatprep.subr.bf16.mxu1 %v20560_v13  ;;  %20153 = vmatprep.subr.bf16.mxu0 %v20568_v49  ;;  %v20597_v4 = vld [vmem:[#allocation2 + $0x100] ss:$8 sps:$4 sm:$0xff]  }
 0x520   :  { %20098 = vmatpush3.bf16.msra.mxu1 %v20560_v13  ;;  %20154 = vmatpush3.bf16.msra.mxu0 %v20568_v49 }
 0x521   :  { %20099 = vmatprep.subr.bf16.mxu1 %v20562_v30  ;;  %20155 = vmatprep.subr.bf16.mxu0 %v20570_v57 }
 0x524   :  { %20100 = vmatpush3.bf16.msra.mxu1 %v20562_v30  ;;  %20156 = vmatpush3.bf16.msra.mxu0 %v20570_v57 }
 0x525   :  { %20125 = vmatprep.subr.bf16.mxu1 %v20565_v39  ;;  %20157 = vmatprep.subr.bf16.mxu0 %v20572_v51 }
 0x527   :  { %20102 = vmatmul.mubr.bf16.vlgmr.msra.gmra.mxu1 %v20564_v40 }
 0x528   :  { %20126 = vmatpush3.bf16.msra.mxu1 %v20565_v39  ;;  %20158 = vmatpush3.bf16.msra.mxu0 %v20572_v51 }
 0x529   :  { %20127 = vmatprep.subr.bf16.mxu1 %v20567_v56  ;;  %20159 = vmatprep.subr.bf16.mxu0 %v20574_v15 }
 0x52a   :  { %20141 = vmatprep.mubr.bf16.mxu1 %v20576_v52 }
 0x52c   :  { %20128 = vmatpush3.bf16.msra.mxu1 %v20567_v56  ;;  %20160 = vmatpush3.bf16.msra.mxu0 %v20574_v15 }
 0x52d   :  { %20129 = vmatprep.subr.bf16.mxu1 %v20569_v31  ;;  %20185 = vmatprep.subr.bf16.mxu0 %v20578_v12 }
 0x52f   :  { %20162 = vmatmul.mubr.bf16.vlgmr.msra.gmra.mxu0 %v20579_v28 }
 0x530   :  { %20130 = vmatpush3.bf16.msra.mxu1 %v20569_v31  ;;  %20186 = vmatpush3.bf16.msra.mxu0 %v20578_v12 }
 0x531   :  { %20131 = vmatprep.subr.bf16.mxu1 %v20571_v17  ;;  %20187 = vmatprep.subr.bf16.mxu0 %v20581_v62 }
 0x532   :  { %20201 = vmatprep.mubr.bf16.mxu0 %v20597_v4 }
 0x534   :  { %20132 = vmatpush3.bf16.msra.mxu1 %v20571_v17  ;;  %20188 = vmatpush3.bf16.msra.mxu0 %v20581_v62 }
 0x535   :  { %20133 = vmatprep.subr.bf16.mxu1 %v20573_v26  ;;  %20189 = vmatprep.subr.bf16.mxu0 %v20583_v22 }
 0x538   :  { %20134 = vmatpush3.bf16.msra.mxu1 %v20573_v26  ;;  %20190 = vmatpush3.bf16.msra.mxu0 %v20583_v22 }
 0x539   :  { %20135 = vmatprep.subr.bf16.mxu1 %v20575_v6  ;;  %20191 = vmatprep.subr.bf16.mxu0 %v20586_v38 }
 0x53c   :  { %20136 = vmatpush3.bf16.msra.mxu1 %v20575_v6  ;;  %20192 = vmatpush3.bf16.msra.mxu0 %v20586_v38 }
 0x53d   :  { %20137 = vmatprep.subr.bf16.mxu1 %v20580_v0  ;;  %20193 = vmatprep.subr.bf16.mxu0 %v20588_v24 }
 0x540   :  { %20138 = vmatpush3.bf16.msra.mxu1 %v20580_v0  ;;  %20194 = vmatpush3.bf16.msra.mxu0 %v20588_v24 }
 0x541   :  { %20139 = vmatprep.subr.bf16.mxu1 %v20582_v59  ;;  %20195 = vmatprep.subr.bf16.mxu0 %v20590_v9 }
 0x544   :  { %20140 = vmatpush3.bf16.msra.mxu1 %v20582_v59  ;;  %20196 = vmatpush3.bf16.msra.mxu0 %v20590_v9 }
 0x545   :  { %20165 = vmatprep.subr.bf16.mxu1 %v20585_v35  ;;  %20197 = vmatprep.subr.bf16.mxu0 %v20592_v60 }
 0x547   :  { %20142 = vmatmul.mubr.bf16.vlgmr.msra.gmra.mxu1 %v20584_v33 }
 0x548   :  { %20166 = vmatpush3.bf16.msra.mxu1 %v20585_v35  ;;  %20198 = vmatpush3.bf16.msra.mxu0 %v20592_v60 }
 0x549   :  { %20167 = vmatprep.subr.bf16.mxu1 %v20587_v16  ;;  %20199 = vmatprep.subr.bf16.mxu0 %v20594_v32 }
 0x54a   :  { %20181 = vmatprep.mubr.bf16.mxu1 %v20595_v45 }
 0x54c   :  { %20168 = vmatpush3.bf16.msra.mxu1 %v20587_v16  ;;  %20200 = vmatpush3.bf16.msra.mxu0 %v20594_v32 }
 0x54d   :  { %20169 = vmatprep.subr.bf16.mxu1 %v20589_v44 }
 0x54f   :  { %20202 = vmatmul.mubr.bf16.vlgmr.msra.gmra.mxu0 %v20598_v14 }
 0x550   :  { %20170 = vmatpush3.bf16.msra.mxu1 %v20589_v44  ;;  %20209 = vmatprep.mubr.msk.bf16.mxu0 %vm6470_vm3, %v20602_v1 }
 0x551   :  { %20171 = vmatprep.subr.bf16.mxu1 %v20591_v3 }
 0x554   :  { %20172 = vmatpush3.bf16.msra.mxu1 %v20591_v3 }
 0x555   :  { %20173 = vmatprep.subr.bf16.mxu1 %v20593_v21 }
 0x558   :  { %20174 = vmatpush3.bf16.msra.mxu1 %v20593_v21 }
 0x559   :  { %20175 = vmatprep.subr.bf16.mxu1 %v20596_v36 }
 0x55c   :  { %20176 = vmatpush3.bf16.msra.mxu1 %v20596_v36 }
 0x55d   :  { %20177 = vmatprep.subr.bf16.mxu1 %v20599_v23 }
 0x560   :  { %20178 = vmatpush3.bf16.msra.mxu1 %v20599_v23  ;;  %v17604_v23 = vld [vmem:[#allocation18] ss:$0 sm:$0xff] }
 0x561   :  { %20179 = vmatprep.subr.bf16.mxu1 %v20600_v42 }
 0x564   :  { %20180 = vmatpush3.bf16.msra.mxu1 %v20600_v42 }
 0x567   :  { %20182 = vmatmul.mubr.bf16.vlgmr.msra.gmra.mxu1 %v20601_v63 }
 0x568   :  { %20229 = vmatprep.mubr.msk.bf16.mxu1 %vm6470_vm3, %v20604_v19 }
 0x5a7   :  { %v20043_v2 = vpop.f32.mrf.mxu1 }
 0x5a9   :  { %v5272_v20 = vpop.f32.mrf.mxu1 }
 0x5ab   :  { %v20044_v47 = vpop.f32.mrf.mxu1 }
 0x5ad   :  { %v5275_v41 = vpop.f32.mrf.mxu1 }
 0x5af   :  { %v20083_v50 = vpop.f32.mrf.mxu0 }
 0x5b1   :  { %v5510_v7 = vpop.f32.mrf.mxu0 }
 0x5b3   :  { %v20084_v10 = vpop.f32.mrf.mxu0 }
 0x5b5   :  { %v5513_v58 = vpop.f32.mrf.mxu0 }
 0x5c7   :  { %v20063_v53 = vpop.f32.mrf.mxu1 }
 0x5c8   :  { %v5390_v61 = vadd.f32 %v20063_v53, %v20043_v2 }
 0x5c9   :  { %v5381_v55 = vpop.f32.mrf.mxu1 }
 0x5ca   :  { %v5382_v46 = vadd.f32 %v5381_v55, %v5272_v20  ;;  %v5527_v30 = vadd.f32 %v20083_v50, %v5390_v61  ;;  %v20609_v61 = vld [vmem:[%s23472_s9 + $0x68] sm:$0xff]  }
 0x5cb   :  { %v20064_v25 = vpop.f32.mrf.mxu1 }
 0x5cc   :  { %v5393_v49 = vadd.f32 %v20064_v25, %v20044_v47  ;;  %v5525_v51 = vadd.f32 %v5510_v7, %v5382_v46  ;;  %v20612_v46 = vld [vmem:[%s23472_s9 + $0x70] sm:$0xff]  }
 0x5cd   :  { %v5384_v11 = vpop.f32.mrf.mxu1 }
 0x5ce   :  { %v5385_v57 = vadd.f32 %v5384_v11, %v5275_v41  ;;  %v5528_v52 = vadd.f32 %v20084_v10, %v5393_v49  ;;  %v20614_v49 = vld [vmem:[%s23472_s9 + $0x30] sm:$0xff]  }
 0x5cf   :  { %v20123_v18 = vpop.f32.mrf.mxu0 }
 0x5d0   :  { %v5526_v12 = vadd.f32 %v5513_v58, %v5385_v57  ;;  %v20615_v57 = vld [vmem:[%s23472_s9 + $0x38] sm:$0xff]  }
 0x5d1   :  { %v5776_v34 = vpop.f32.mrf.mxu0 }
 0x5d3   :  { %v20124_v54 = vpop.f32.mrf.mxu0 }
 0x5d5   :  { %v5779_v29 = vpop.f32.mrf.mxu0 }
 0x5e7   :  { %v20103_v43 = vpop.f32.mrf.mxu1 }
 0x5e8   :  { %v5660_v39 = vadd.f32 %v20103_v43, %v5527_v30  ;;  %v20616_v30 = vld [vmem:[%s23472_s9 + $0x80] sm:$0xff]  }
 0x5e9   :  { %v5643_v8 = vpop.f32.mrf.mxu1 }
 0x5ea   :  { %v5658_v15 = vadd.f32 %v5643_v8, %v5525_v51  ;;  %v5793_v28 = vadd.f32 %v20123_v18, %v5660_v39  ;;  %v20605_v8 = vld [vmem:[%s23472_s9 + $0x58] sm:$0xff]   ;;  %v20617_v39 = vld [vmem:[%s23472_s9 + $0x88] sm:$0xff]   ;;  %v20618_v51 = vld [vmem:[%s23472_s9 + $0x40] sm:$0xff]  }
 0x5eb   :  { %v20104_v48 = vpop.f32.mrf.mxu1 }
 0x5ec   :  { %v5661_v31 = vadd.f32 %v20104_v48, %v5528_v52  ;;  %v5791_v22 = vadd.f32 %v5776_v34, %v5658_v15  ;;  %v20608_v48 = vld [vmem:[%s23472_s9 + $0x60] sm:$0xff]  }
 0x5ed   :  { %v5646_v37 = vpop.f32.mrf.mxu1 }
 0x5ee   :  { %v5659_v4 = vadd.f32 %v5646_v37, %v5526_v12  ;;  %v5794_v0 = vadd.f32 %v20124_v54, %v5661_v31  ;;  %v20603_v54 = vld [vmem:[%s23472_s9 + $0x8] sm:$0xff]   ;;  %v20610_v37 = vld [vmem:[%s23472_s9 + $0x20] sm:$0xff]  }
 0x5ef   :  { %v20163_v27 = vpop.f32.mrf.mxu0 }
 0x5f0   :  { %v5792_v9 = vadd.f32 %v5779_v29, %v5659_v4  ;;  %v20606_v29 = vld [vmem:[%s23472_s9 + $0x10] sm:$0xff]  }
 0x5f1   :  { %v6042_v5 = vpop.f32.mrf.mxu0 }
 0x5f3   :  { %v20164_v40 = vpop.f32.mrf.mxu0 }
 0x5f5   :  { %v6045_v17 = vpop.f32.mrf.mxu0 }
 0x607   :  { %v20143_v13 = vpop.f32.mrf.mxu1 }
 0x608   :  { %v5926_v26 = vadd.f32 %v20143_v13, %v5793_v28  ;;  %v20613_v13 = vld [vmem:[%s23472_s9 + $0x78] sm:$0xff]  }
 0x609   :  { %v5909_v56 = vpop.f32.mrf.mxu1 }
 0x60a   :  { %v5924_v38 = vadd.f32 %v5909_v56, %v5791_v22  ;;  %v6059_v35 = vadd.f32 %v20163_v27, %v5926_v26  ;;  %v20607_v27 = vld [vmem:[%s23472_s9 + $0x18] sm:$0xff]  }
 0x60b   :  { %v20144_v62 = vpop.f32.mrf.mxu1 }
 0x60c   :  { %v5927_v59 = vadd.f32 %v20144_v62, %v5794_v0  ;;  %v6057_v45 = vadd.f32 %v6042_v5, %v5924_v38  ;;  %v20611_v5 = vld [vmem:[%s23472_s9 + $0x28] sm:$0xff]  }
 0x60d   :  { %v5912_v24 = vpop.f32.mrf.mxu1 }
 0x60e   :  { %v5925_v16 = vadd.f32 %v5912_v24, %v5792_v9  ;;  %v6060_v21 = vadd.f32 %v20164_v40, %v5927_v59  ;;  %v20619_v40 = vld [vmem:[%s23472_s9 + $0x48] sm:$0xff]  }
 0x60f   :  { %v20203_v6 = vpop.f32.mrf.mxu0 }
 0x610   :  { %v6058_v19 = vadd.f32 %v6045_v17, %v5925_v16 }
 0x611   :  { %v6308_v60 = vpop.f32.mrf.mxu0 }
 0x613   :  { %v20204_v36 = vpop.f32.mrf.mxu0 }
 0x615   :  { %v6311_v41 = vpop.f32.mrf.mxu0 }
 0x627   :  { %v20183_v33 = vpop.f32.mrf.mxu1 }
 0x628   :  { %v6192_v32 = vadd.f32 %v20183_v33, %v6059_v35 }
 0x629   :  { %v6175_v44 = vpop.f32.mrf.mxu1 }
 0x62a   :  { %v6325_v14 = vadd.f32 %v20203_v6, %v6192_v32  ;;  %v6190_v3 = vadd.f32 %v6175_v44, %v6057_v45 }
 0x62b   :  { %v20184_v42 = vpop.f32.mrf.mxu1 }
 0x62c   :  { %v6323_v63 = vadd.f32 %v6308_v60, %v6190_v3  ;;  %v6193_v1 = vadd.f32 %v20184_v42, %v6060_v21  ;;  %v6336_v20 = vadd.f32 %v17604_v23, %v6325_v14 }
 0x62d   :  { %v6178_v2 = vpop.f32.mrf.mxu1 }
 0x62e   :  { %v6326_v47 = vadd.f32 %v20204_v36, %v6193_v1  ;;  %v6191_v50 = vadd.f32 %v6178_v2, %v6058_v19  ;;  %v6334_v7 = vadd.f32 %v17604_v23, %v6323_v63  ;;  %v6340_v55 = vmax.f32 %v6336_v20, 0.0 }
 0x630   :  { %v6337_v53 = vadd.f32 %v17604_v23, %v6326_v47  ;;  %v6324_v10 = vadd.f32 %v6311_v41, %v6191_v50  ;;  %v6338_v18 = vmax.f32 %v6334_v7, 0.0 }
 0x632   :  { %v6341_v58 = vmax.f32 %v6337_v53, 0.0  ;;  %v6335_v25 = vadd.f32 %v17604_v23, %v6324_v10 }
 0x634   :  { %v6343_v11 = vpack.c.bf16 %v6341_v58, %v6340_v55  ;;  %v6339_v34 = vmax.f32 %v6335_v25, 0.0 }
 0x636   :  { %v6342_v43 = vpack.c.bf16 %v6339_v34, %v6338_v18  ;;  %20205 = vmatprep.subr.bf16.mxu0 %v6343_v11  ;;  %20245 = vmatprep.subr.bf16.mxu1 %v6343_v11 }
 0x637   :  { %20206 = vmatpush3.bf16.msra.mxu0 %v6343_v11  ;;  %20247 = vmatpush3.bf16.msra.mxu1 %v6343_v11 }
 0x638   :  { %20207 = vmatprep.subr.bf16.mxu0 %v6342_v43  ;;  %20246 = vmatprep.subr.bf16.mxu1 %v6342_v43 }
 0x63b   :  { %20208 = vmatpush3.bf16.msra.mxu0 %v6342_v43  ;;  %20248 = vmatpush3.bf16.msra.mxu1 %v6342_v43 }
 0x63e   :  { %20210 = vmatmul.mubr.msk.bf16.vlgmr.msra.gmra.mxu0 %vm6470_vm3, %v20603_v54  ;;  %20230 = vmatmul.mubr.msk.bf16.vlgmr.msra.gmra.mxu1 %vm6470_vm3, %v20605_v8 }
 0x63f   :  { %20213 = vmatprep.mubr.msk.bf16.mxu0 %vm6470_vm3, %v20606_v29  ;;  %20233 = vmatprep.mubr.msk.bf16.mxu1 %vm6470_vm3, %v20608_v48 }
 0x646   :  { %20214 = vmatmul.mubr.msk.bf16.gmra.mxu0 %vm6470_vm3, %v20607_v27  ;;  %20234 = vmatmul.mubr.msk.bf16.gmra.mxu1 %vm6470_vm3, %v20609_v61 }
 0x647   :  { %20217 = vmatprep.mubr.msk.bf16.mxu0 %vm6470_vm3, %v20610_v37  ;;  %20237 = vmatprep.mubr.msk.bf16.mxu1 %vm6470_vm3, %v20612_v46 }
 0x64e   :  { %20218 = vmatmul.mubr.msk.bf16.gmra.mxu0 %vm6470_vm3, %v20611_v5  ;;  %20238 = vmatmul.mubr.msk.bf16.gmra.mxu1 %vm6470_vm3, %v20613_v13 }
 0x64f   :  { %20221 = vmatprep.mubr.msk.bf16.mxu0 %vm6470_vm3, %v20614_v49  ;;  %20241 = vmatprep.mubr.msk.bf16.mxu1 %vm6470_vm3, %v20616_v30 }
 0x656   :  { %20222 = vmatmul.mubr.msk.bf16.gmra.mxu0 %vm6470_vm3, %v20615_v57  ;;  %20242 = vmatmul.mubr.msk.bf16.gmra.mxu1 %vm6470_vm3, %v20617_v39 }
 0x657   :  { %20225 = vmatprep.mubr.msk.bf16.mxu0 %vm6470_vm3, %v20618_v51 }
 0x65e   :  { %20226 = vmatmul.mubr.msk.bf16.gmra.mxu0 %vm6470_vm3, %v20619_v40 }
 0x65f   :  { %22443 = shalt.err (!%p22440_p3)  }
 0x660   :  { %201 = dma.hbm_to_vmem [thread:$0]  %s23473_s10, 18432, %s199_s26, [#allocation6] }
 0x661   :  { %s22452_s9 = scalar_lea.vmem %s211_s2, 36864  ;;  %p22457_p5 = scmp.lt.s32.totalorder %s211_s2, %s211_s2 }
 0x662   :  { %p22453_p4 = scmp.ne.s32.totalorder %s211_s2, %s22452_s9  ;;  %p22458_p6 = scmp.lt.s32.totalorder %s22452_s9, %s22452_s9 }
 0x664   :  { %p22459_p7 = por %p22458_p6, %p22457_p5 }
 0x666   :  { %p22460_p8 = pnand %p22459_p7, %p22453_p4 }
 0x668   :  { %22463 = shalt.err (!%p22460_p8)  }
 0x669   :  { %213 = dma.hbm_to_vmem [thread:$0]  %s23476_s13, 36864, %s211_s2, [#allocation6 + $0x1] }
 0x66a   :  { %s22518_s0 = smov [#allocation5]  }
 0x66b   :  { %s222_s8 = sshll.u32 %s22518_s0, 4  ;;  %s223_s8 = int_to_ptr.vmem [resolvable:$true] %s222_s8 }
 0x66c   :  { %s22472_s19 = scalar_lea.vmem %s223_s8, 73728  ;;  %p22477_p10 = scmp.lt.s32.totalorder %s223_s8, %s223_s8 }
 0x66d   :  { %p22473_p9 = scmp.ne.s32.totalorder %s223_s8, %s22472_s19  ;;  %p22478_p11 = scmp.lt.s32.totalorder %s22472_s19, %s22472_s19 }
 0x66f   :  { %p22479_p12 = por %p22478_p11, %p22477_p10 }
 0x671   :  { %p22480_p13 = pnand %p22479_p12, %p22473_p9 }
 0x673   :  { %22483 = shalt.err (!%p22480_p13)  }
 0x674   :  { %225 = dma.hbm_to_vmem [thread:$0]  %s23479_s16, 73728, %s223_s8, [#allocation6 + $0x2] }
 0x6fe   :  { %v20211_v56 = vpop.f32.mrf.mxu0  ;;  %v20231_v15 = vpop.f32.mrf.mxu1 }
 0x6ff   :  { %v18996_v52 = vpack.c.bf16 %v20211_v56, %v20211_v56  ;;  %v19016_v31 = vpack.c.bf16 %v20231_v15, %v20231_v15 }
 0x700   :  { %v6559_v12 = vpop.f32.mrf.mxu0  ;;  %v6639_v28 = vpop.f32.mrf.mxu1 }
 0x701   :  { %6848 = vst [vmem:[#allocation2 + $0x10] sm:$0xf] %v18996_v52  ;;  %v18994_v17 = vpack.c.bf16 %v6559_v12, %v6559_v12  ;;  %6868 = vst [vmem:[#allocation2 + $0xb0] sm:$0xf] %v19016_v31  ;;  %v19014_v62 = vpack.c.bf16 %v6639_v28, %v6639_v28 }
 0x702   :  { %v20212_v4 = vpop.f32.mrf.mxu0  ;;  %v20232_v26 = vpop.f32.mrf.mxu1 }
 0x703   :  { %6846 = vst [vmem:[#allocation2] sm:$0xf] %v18994_v17  ;;  %v18997_v22 = vpack.c.bf16 %v20212_v4, %v20212_v4  ;;  %6866 = vst [vmem:[#allocation2 + $0xa0] sm:$0xf] %v19014_v62  ;;  %v19017_v6 = vpack.c.bf16 %v20232_v26, %v20232_v26 }
 0x704   :  { %v6562_v38 = vpop.f32.mrf.mxu0  ;;  %v6642_v0 = vpop.f32.mrf.mxu1 }
 0x705   :  { %6849 = vst [vmem:[#allocation2 + $0x18] sm:$0xf] %v18997_v22  ;;  %v18995_v24 = vpack.c.bf16 %v6562_v38, %v6562_v38  ;;  %6869 = vst [vmem:[#allocation2 + $0xb8] sm:$0xf] %v19017_v6  ;;  %v19015_v59 = vpack.c.bf16 %v6642_v0, %v6642_v0 }
 0x706   :  { %v20215_v9 = vpop.f32.mrf.mxu0  ;;  %v20235_v35 = vpop.f32.mrf.mxu1 }
 0x707   :  { %6847 = vst [vmem:[#allocation2 + $0x8] sm:$0xf] %v18995_v24  ;;  %v19000_v60 = vpack.c.bf16 %v20215_v9, %v20215_v9  ;;  %6867 = vst [vmem:[#allocation2 + $0xa8] sm:$0xf] %v19015_v59  ;;  %v19020_v33 = vpack.c.bf16 %v20235_v35, %v20235_v35 }
 0x708   :  { %v6575_v16 = vpop.f32.mrf.mxu0  ;;  %v6655_v32 = vpop.f32.mrf.mxu1 }
 0x709   :  { %6852 = vst [vmem:[#allocation2 + $0x30] sm:$0xf] %v19000_v60  ;;  %v18998_v45 = vpack.c.bf16 %v6575_v16, %v6575_v16  ;;  %6872 = vst [vmem:[#allocation2 + $0xd0] sm:$0xf] %v19020_v33  ;;  %v19018_v44 = vpack.c.bf16 %v6655_v32, %v6655_v32 }
 0x70a   :  { %v20216_v14 = vpop.f32.mrf.mxu0  ;;  %v20236_v3 = vpop.f32.mrf.mxu1 }
 0x70b   :  { %6850 = vst [vmem:[#allocation2 + $0x20] sm:$0xf] %v18998_v45  ;;  %v19001_v21 = vpack.c.bf16 %v20216_v14, %v20216_v14  ;;  %6870 = vst [vmem:[#allocation2 + $0xc0] sm:$0xf] %v19018_v44  ;;  %v19021_v36 = vpack.c.bf16 %v20236_v3, %v20236_v3 }
 0x70c   :  { %v6578_v23 = vpop.f32.mrf.mxu0  ;;  %v6658_v42 = vpop.f32.mrf.mxu1 }
 0x70d   :  { %6853 = vst [vmem:[#allocation2 + $0x38] sm:$0xf] %v19001_v21  ;;  %v18999_v63 = vpack.c.bf16 %v6578_v23, %v6578_v23  ;;  %6873 = vst [vmem:[#allocation2 + $0xd8] sm:$0xf] %v19021_v36  ;;  %v19019_v1 = vpack.c.bf16 %v6658_v42, %v6658_v42 }
 0x70e   :  { %v20219_v19 = vpop.f32.mrf.mxu0  ;;  %v20239_v2 = vpop.f32.mrf.mxu1 }
 0x70f   :  { %6851 = vst [vmem:[#allocation2 + $0x28] sm:$0xf] %v18999_v63  ;;  %v19004_v20 = vpack.c.bf16 %v20219_v19, %v20219_v19  ;;  %6871 = vst [vmem:[#allocation2 + $0xc8] sm:$0xf] %v19019_v1  ;;  %v19024_v47 = vpack.c.bf16 %v20239_v2, %v20239_v2 }
 0x710   :  { %v6591_v50 = vpop.f32.mrf.mxu0  ;;  %v6671_v41 = vpop.f32.mrf.mxu1 }
 0x711   :  { %6856 = vst [vmem:[#allocation2 + $0x50] sm:$0xf] %v19004_v20  ;;  %v19002_v7 = vpack.c.bf16 %v6591_v50, %v6591_v50  ;;  %6876 = vst [vmem:[#allocation2 + $0xf0] sm:$0xf] %v19024_v47  ;;  %v19022_v53 = vpack.c.bf16 %v6671_v41, %v6671_v41 }
 0x712   :  { %v20220_v10 = vpop.f32.mrf.mxu0  ;;  %v20240_v55 = vpop.f32.mrf.mxu1 }
 0x713   :  { %6854 = vst [vmem:[#allocation2 + $0x40] sm:$0xf] %v19002_v7  ;;  %v19005_v58 = vpack.c.bf16 %v20220_v10, %v20220_v10  ;;  %6874 = vst [vmem:[#allocation2 + $0xe0] sm:$0xf] %v19022_v53  ;;  %v19025_v25 = vpack.c.bf16 %v20240_v55, %v20240_v55 }
 0x714   :  { %v6594_v18 = vpop.f32.mrf.mxu0  ;;  %v6674_v11 = vpop.f32.mrf.mxu1 }
 0x715   :  { %6857 = vst [vmem:[#allocation2 + $0x58] sm:$0xf] %v19005_v58  ;;  %v19003_v34 = vpack.c.bf16 %v6594_v18, %v6594_v18  ;;  %6877 = vst [vmem:[#allocation2 + $0xf8] sm:$0xf] %v19025_v25  ;;  %v19023_v43 = vpack.c.bf16 %v6674_v11, %v6674_v11 }
 0x716   :  { %v20223_v54 = vpop.f32.mrf.mxu0  ;;  %v20243_v8 = vpop.f32.mrf.mxu1 }
 0x717   :  { %6855 = vst [vmem:[#allocation2 + $0x48] sm:$0xf] %v19003_v34  ;;  %v19008_v29 = vpack.c.bf16 %v20223_v54, %v20223_v54  ;;  %6875 = vst [vmem:[#allocation2 + $0xe8] sm:$0xf] %v19023_v43  ;;  %v19028_v48 = vpack.c.bf16 %v20243_v8, %v20243_v8 }
 0x718   :  { %v6607_v27 = vpop.f32.mrf.mxu0  ;;  %v6687_v61 = vpop.f32.mrf.mxu1 }
 0x719   :  { %6860 = vst [vmem:[#allocation2 + $0x70] sm:$0xf] %v19008_v29  ;;  %v19006_v37 = vpack.c.bf16 %v6607_v27, %v6607_v27  ;;  %6880 = vst [vmem:[#allocation2 + $0x110] sm:$0xf] %v19028_v48  ;;  %v19026_v46 = vpack.c.bf16 %v6687_v61, %v6687_v61 }
 0x71a   :  { %v20224_v5 = vpop.f32.mrf.mxu0  ;;  %v20244_v13 = vpop.f32.mrf.mxu1 }
 0x71b   :  { %6858 = vst [vmem:[#allocation2 + $0x60] sm:$0xf] %v19006_v37  ;;  %v19009_v49 = vpack.c.bf16 %v20224_v5, %v20224_v5  ;;  %6878 = vst [vmem:[#allocation2 + $0x100] sm:$0xf] %v19026_v46  ;;  %v19029_v30 = vpack.c.bf16 %v20244_v13, %v20244_v13 }
 0x71c   :  { %v6610_v57 = vpop.f32.mrf.mxu0  ;;  %v6690_v39 = vpop.f32.mrf.mxu1 }
 0x71d   :  { %6861 = vst [vmem:[#allocation2 + $0x78] sm:$0xf] %v19009_v49  ;;  %v19007_v51 = vpack.c.bf16 %v6610_v57, %v6610_v57  ;;  %6881 = vst [vmem:[#allocation2 + $0x118] sm:$0xf] %v19029_v30  ;;  %v19027_v40 = vpack.c.bf16 %v6690_v39, %v6690_v39 }
 0x71e   :  { %v20227_v56 = vpop.f32.mrf.mxu0 }
 0x71f   :  { %6859 = vst [vmem:[#allocation2 + $0x68] sm:$0xf] %v19007_v51  ;;  %v19012_v15 = vpack.c.bf16 %v20227_v56, %v20227_v56  ;;  %6879 = vst [vmem:[#allocation2 + $0x108] sm:$0xf] %v19027_v40 }
 0x720   :  { %v6623_v52 = vpop.f32.mrf.mxu0 }
 0x721   :  { %6864 = vst [vmem:[#allocation2 + $0x90] sm:$0xf] %v19012_v15  ;;  %v19010_v31 = vpack.c.bf16 %v6623_v52, %v6623_v52 }
 0x722   :  { %v20228_v12 = vpop.f32.mrf.mxu0 }
 0x723   :  { %6862 = vst [vmem:[#allocation2 + $0x80] sm:$0xf] %v19010_v31  ;;  %v19013_v28 = vpack.c.bf16 %v20228_v12, %v20228_v12 }
 0x724   :  { %v6626_v17 = vpop.f32.mrf.mxu0 }
 0x725   :  { %6865 = vst [vmem:[#allocation2 + $0x98] sm:$0xf] %v19013_v28  ;;  %v19011_v62 = vpack.c.bf16 %v6626_v17, %v6626_v17 }
 0x727   :  { %6863 = vst [vmem:[#allocation2 + $0x88] sm:$0xf] %v19011_v62 }
 0x728   :  { %22496 = dma.done.wait [#allocation6], 18432 }
 0x729   :  { %22497 = vsyncadd [#allocation6], 4294948864  ;;  %v23483_v4 = vmov 0   ;;  %v20620_v26 = vld [vmem:[#allocation3 + $0xf4] ss:$8 sps:$4 sm:$0xff]  }
 0x72a   :  { %7050 = vmatprep.mubr.bf16.mxu0 %v23483_v4  ;;  %7360 = vmatprep.mubr.bf16.mxu1 %v23483_v4  ;;  %v20622_v22 = vld [vmem:[#allocation3 + $0xf0] ss:$8 sps:$4 sm:$0xff]   ;;  %v20623_v6 = vld [vmem:[#allocation3 + $0xe4] ss:$8 sps:$4 sm:$0xff]   ;;  %v20625_v38 = vld [vmem:[#allocation3 + $0xe0] ss:$8 sps:$4 sm:$0xff]  }
 0x72b   :  { %7018 = vmatprep.subr.bf16.mxu0 %v20620_v26  ;;  %v20626_v0 = vld [vmem:[#allocation3 + $0xd4] ss:$8 sps:$4 sm:$0xff]   ;;  %v20628_v24 = vld [vmem:[#allocation3 + $0xd0] ss:$8 sps:$4 sm:$0xff]   ;;  %v20629_v59 = vld [vmem:[#allocation3 + $0xc4] ss:$8 sps:$4 sm:$0xff]  }
 0x72c   :  { %7019 = vmatpush1.bf16.msra.mxu0 %v20622_v22  ;;  %v20631_v9 = vld [vmem:[#allocation3 + $0xc0] ss:$8 sps:$4 sm:$0xff]   ;;  %v20643_v35 = vld [vmem:[#allocation3 + $0x174] ss:$8 sps:$4 sm:$0xff]   ;;  %v20646_v60 = vld [vmem:[#allocation3 + $0x170] ss:$8 sps:$4 sm:$0xff]  }
 0x72d   :  { %7020 = vmatprep.subr.bf16.mxu0 %v20623_v6  ;;  %v20632_v33 = vld [vmem:[#allocation3 + $0xb4] ss:$8 sps:$4 sm:$0xff]   ;;  %7328 = vmatprep.subr.bf16.mxu1 %v20643_v35  ;;  %v20634_v16 = vld [vmem:[#allocation3 + $0xb0] ss:$8 sps:$4 sm:$0xff]   ;;  %v20651_v32 = vld [vmem:[#allocation3 + $0x164] ss:$8 sps:$4 sm:$0xff]  }
 0x72e   :  { %7329 = vmatpush1.bf16.msra.mxu1 %v20646_v60  ;;  %v20653_v45 = vld [vmem:[#allocation3 + $0x160] ss:$8 sps:$4 sm:$0xff]   ;;  %v20635_v44 = vld [vmem:[#allocation3 + $0xa4] ss:$8 sps:$4 sm:$0xff]   ;;  %v20657_v14 = vld [vmem:[#allocation3 + $0x154] ss:$8 sps:$4 sm:$0xff]  }
 0x72f   :  { %7330 = vmatprep.subr.bf16.mxu1 %v20651_v32  ;;  %v20659_v3 = vld [vmem:[#allocation3 + $0x150] ss:$8 sps:$4 sm:$0xff]   ;;  %v20637_v21 = vld [vmem:[#allocation3 + $0xa0] ss:$8 sps:$4 sm:$0xff]   ;;  %v20638_v36 = vld [vmem:[#allocation3 + $0x94] ss:$8 sps:$4 sm:$0xff]  }
 0x730   :  { %7021 = vmatpush1.bf16.msra.mxu0 %v20625_v38  ;;  %v20663_v23 = vld [vmem:[#allocation3 + $0x144] ss:$8 sps:$4 sm:$0xff]   ;;  %v20665_v42 = vld [vmem:[#allocation3 + $0x140] ss:$8 sps:$4 sm:$0xff]   ;;  %v20640_v63 = vld [vmem:[#allocation3 + $0x90] ss:$8 sps:$4 sm:$0xff]  }
 0x731   :  { %7022 = vmatprep.subr.bf16.mxu0 %v20626_v0  ;;  %v20669_v1 = vld [vmem:[#allocation3 + $0x134] ss:$8 sps:$4 sm:$0xff]   ;;  %v20641_v19 = vld [vmem:[#allocation3 + $0x84] ss:$8 sps:$4 sm:$0xff]   ;;  %v20645_v2 = vld [vmem:[#allocation3 + $0x80] ss:$8 sps:$4 sm:$0xff]  }
 0x732   :  { %7331 = vmatpush1.bf16.msra.mxu1 %v20653_v45  ;;  %v20671_v20 = vld [vmem:[#allocation3 + $0x130] ss:$8 sps:$4 sm:$0xff]   ;;  %v20675_v47 = vld [vmem:[#allocation3 + $0x124] ss:$8 sps:$4 sm:$0xff]   ;;  %v20650_v50 = vld [vmem:[#allocation3 + $0x74] ss:$8 sps:$4 sm:$0xff]  }
 0x733   :  { %7332 = vmatprep.subr.bf16.mxu1 %v20657_v14  ;;  %v20647_v41 = vld [vmem:[#allocation2 + $0x20] ss:$8 sps:$4 sm:$0xff]   ;;  %v20648_v53 = vld [vmem:[#allocation3 + $0x70] ss:$8 sps:$4 sm:$0xff]   ;;  %v20656_v10 = vld [vmem:[#allocation3 + $0x64] ss:$8 sps:$4 sm:$0xff]  }
 0x734   :  { %7023 = vmatpush1.bf16.msra.mxu0 %v20628_v24  ;;  %v20677_v7 = vld [vmem:[#allocation3 + $0x120] ss:$8 sps:$4 sm:$0xff]   ;;  %v20682_v55 = vld [vmem:[#allocation3 + $0x114] ss:$8 sps:$4 sm:$0xff]   ;;  %v20684_v25 = vld [vmem:[#allocation3 + $0x110] ss:$8 sps:$4 sm:$0xff]  }
 0x735   :  { %7024 = vmatprep.subr.bf16.mxu0 %v20629_v59  ;;  %v20654_v58 = vld [vmem:[#allocation3 + $0x60] ss:$8 sps:$4 sm:$0xff]   ;;  %v20688_v18 = vld [vmem:[#allocation3 + $0x104] ss:$8 sps:$4 sm:$0xff]   ;;  %v20662_v11 = vld [vmem:[#allocation3 + $0x54] ss:$8 sps:$4 sm:$0xff]  }
 0x736   :  { %7333 = vmatpush1.bf16.msra.mxu1 %v20659_v3  ;;  %v20678_v34 = vld [vmem:[#allocation2 + $0x30] ss:$8 sps:$4 sm:$0xff]   ;;  %v20690_v43 = vld [vmem:[#allocation3 + $0x100] ss:$8 sps:$4 sm:$0xff]   ;;  %v20696_v8 = vld [vmem:[#allocation3 + $0x274] ss:$8 sps:$4 sm:$0xff]  }
 0x737   :  { %7334 = vmatprep.subr.bf16.mxu1 %v20663_v23  ;;  %v20660_v54 = vld [vmem:[#allocation3 + $0x50] ss:$8 sps:$4 sm:$0xff]   ;;  %v20668_v29 = vld [vmem:[#allocation3 + $0x44] ss:$8 sps:$4 sm:$0xff]   ;;  %v20697_v48 = vld [vmem:[#allocation2 + $0x40] ss:$8 sps:$4 sm:$0xff]  }
 0x738   :  { %7025 = vmatpush1.bf16.msra.mxu0 %v20631_v9  ;;  %v20666_v27 = vld [vmem:[#allocation3 + $0x40] ss:$8 sps:$4 sm:$0xff]   ;;  %v20694_v61 = vld [vmem:[#allocation3 + $0x270] ss:$8 sps:$4 sm:$0xff]   ;;  %v20704_v37 = vld [vmem:[#allocation3 + $0x264] ss:$8 sps:$4 sm:$0xff]  }
 0x739   :  { %7026 = vmatprep.subr.bf16.mxu0 %v20632_v33  ;;  %v20674_v46 = vld [vmem:[#allocation3 + $0x34] ss:$8 sps:$4 sm:$0xff]   ;;  %v20672_v5 = vld [vmem:[#allocation3 + $0x30] ss:$8 sps:$4 sm:$0xff]   ;;  %v20702_v13 = vld [vmem:[#allocation3 + $0x260] ss:$8 sps:$4 sm:$0xff]  }
 0x73a   :  { %7335 = vmatpush1.bf16.msra.mxu1 %v20665_v42  ;;  %v20710_v49 = vld [vmem:[#allocation3 + $0x254] ss:$8 sps:$4 sm:$0xff]   ;;  %v20681_v30 = vld [vmem:[#allocation3 + $0x24] ss:$8 sps:$4 sm:$0xff]   ;;  %v20679_v57 = vld [vmem:[#allocation3 + $0x20] ss:$8 sps:$4 sm:$0xff]  }
 0x73b   :  { %7336 = vmatprep.subr.bf16.mxu1 %v20669_v1  ;;  %v20718_v39 = vld [vmem:[#allocation2 + $0x50] ss:$8 sps:$4 sm:$0xff]   ;;  %v20717_v40 = vld [vmem:[#allocation3 + $0x244] ss:$8 sps:$4 sm:$0xff]   ;;  %v20687_v56 = vld [vmem:[#allocation3 + $0x14] ss:$8 sps:$4 sm:$0xff]  }
 0x73c   :  { %7027 = vmatpush1.bf16.msra.mxu0 %v20634_v16  ;;  %v20708_v51 = vld [vmem:[#allocation3 + $0x250] ss:$8 sps:$4 sm:$0xff]   ;;  %v20715_v52 = vld [vmem:[#allocation3 + $0x240] ss:$8 sps:$4 sm:$0xff]   ;;  %v20724_v31 = vld [vmem:[#allocation3 + $0x234] ss:$8 sps:$4 sm:$0xff]  }
 0x73d   :  { %7028 = vmatprep.subr.bf16.mxu0 %v20635_v44  ;;  %v20685_v15 = vld [vmem:[#allocation3 + $0x10] ss:$8 sps:$4 sm:$0xff]   ;;  %v20693_v12 = vld [vmem:[#allocation3 + $0x4] ss:$8 sps:$4 sm:$0xff]   ;;  %v20691_v28 = vld [vmem:[#allocation3] ss:$8 sps:$4 sm:$0xff]  }
 0x73e   :  { %7337 = vmatpush1.bf16.msra.mxu1 %v20671_v20  ;;  %v20722_v17 = vld [vmem:[#allocation3 + $0x230] ss:$8 sps:$4 sm:$0xff]   ;;  %v20730_v62 = vld [vmem:[#allocation3 + $0x224] ss:$8 sps:$4 sm:$0xff]   ;;  %v20701_v26 = vld [vmem:[#allocation3 + $0x1f4] ss:$8 sps:$4 sm:$0xff]  }
 0x73f   :  { %7338 = vmatprep.subr.bf16.mxu1 %v20675_v47  ;;  %v20698_v22 = vld [vmem:[#allocation2] ss:$8 sps:$4 sm:$0xff]   ;;  %v20699_v38 = vld [vmem:[#allocation3 + $0x1f0] ss:$8 sps:$4 sm:$0xff]   ;;  %v20707_v0 = vld [vmem:[#allocation3 + $0x1e4] ss:$8 sps:$4 sm:$0xff]  }
 0x740   :  { %7029 = vmatpush1.bf16.msra.mxu0 %v20637_v21  ;;  %v20728_v6 = vld [vmem:[#allocation3 + $0x220] ss:$8 sps:$4 sm:$0xff]   ;;  %v20736_v24 = vld [vmem:[#allocation3 + $0x214] ss:$8 sps:$4 sm:$0xff]   ;;  %v20734_v59 = vld [vmem:[#allocation3 + $0x210] ss:$8 sps:$4 sm:$0xff]  }
 0x741   :  { %7030 = vmatprep.subr.bf16.mxu0 %v20638_v36  ;;  %v20705_v9 = vld [vmem:[#allocation3 + $0x1e0] ss:$8 sps:$4 sm:$0xff]   ;;  %v20742_v35 = vld [vmem:[#allocation3 + $0x204] ss:$8 sps:$4 sm:$0xff]   ;;  %v20714_v60 = vld [vmem:[#allocation3 + $0x1d4] ss:$8 sps:$4 sm:$0xff]  }
 0x742   :  { %7339 = vmatpush1.bf16.msra.mxu1 %v20677_v7  ;;  %v20711_v33 = vld [vmem:[#allocation2 + $0x10] ss:$8 sps:$4 sm:$0xff]   ;;  %v20740_v16 = vld [vmem:[#allocation3 + $0x200] ss:$8 sps:$4 sm:$0xff]   ;;  %v20748_v45 = vld [vmem:[#allocation3 + $0x374] ss:$8 sps:$4 sm:$0xff]  }
 0x743   :  { %7340 = vmatprep.subr.bf16.mxu1 %v20682_v55  ;;  %v20712_v32 = vld [vmem:[#allocation3 + $0x1d0] ss:$8 sps:$4 sm:$0xff]   ;;  %v20721_v44 = vld [vmem:[#allocation3 + $0x1c4] ss:$8 sps:$4 sm:$0xff]   ;;  %v20719_v14 = vld [vmem:[#allocation3 + $0x1c0] ss:$8 sps:$4 sm:$0xff]  }
 0x744   :  { %7031 = vmatpush1.bf16.msra.mxu0 %v20640_v63  ;;  %v20749_v3 = vld [vmem:[#allocation2 + $0x80] ss:$8 sps:$4 sm:$0xff]   ;;  %v20746_v21 = vld [vmem:[#allocation3 + $0x370] ss:$8 sps:$4 sm:$0xff]   ;;  %v20756_v36 = vld [vmem:[#allocation3 + $0x364] ss:$8 sps:$4 sm:$0xff]  }
 0x745   :  { %7032 = vmatprep.subr.bf16.mxu0 %v20641_v19  ;;  %v20727_v23 = vld [vmem:[#allocation3 + $0x1b4] ss:$8 sps:$4 sm:$0xff]   ;;  %v20725_v42 = vld [vmem:[#allocation3 + $0x1b0] ss:$8 sps:$4 sm:$0xff]   ;;  %v20754_v63 = vld [vmem:[#allocation3 + $0x360] ss:$8 sps:$4 sm:$0xff]  }
 0x746   :  { %7341 = vmatpush1.bf16.msra.mxu1 %v20684_v25  ;;  %v20762_v1 = vld [vmem:[#allocation3 + $0x354] ss:$8 sps:$4 sm:$0xff]   ;;  %v20733_v19 = vld [vmem:[#allocation3 + $0x1a4] ss:$8 sps:$4 sm:$0xff]   ;;  %v20770_v20 = vld [vmem:[#allocation2 + $0x90] ss:$8 sps:$4 sm:$0xff]  }
 0x747   :  { %7342 = vmatprep.subr.bf16.mxu1 %v20688_v18  ;;  %v20760_v47 = vld [vmem:[#allocation3 + $0x350] ss:$8 sps:$4 sm:$0xff]   ;;  %v20745_v55 = vld [vmem:[#allocation3 + $0x184] ss:$8 sps:$4 sm:$0xff]   ;;  %v20743_v25 = vld [vmem:[#allocation3 + $0x180] ss:$8 sps:$4 sm:$0xff]  }
 0x748   :  { %7033 = vmatpush1.bf16.msra.mxu0 %v20645_v2  ;;  %v20731_v2 = vld [vmem:[#allocation3 + $0x1a0] ss:$8 sps:$4 sm:$0xff]   ;;  %v20737_v7 = vld [vmem:[#allocation3 + $0x190] ss:$8 sps:$4 sm:$0xff]   ;;  %v20782_v18 = vld [vmem:[#allocation3 + $0x324] ss:$8 sps:$4 sm:$0xff]  }
 0x749   :  { %7163 = vmatprep.subr.bf16.mxu0 %v20650_v50  ;;  %v20769_v50 = vld [vmem:[#allocation3 + $0x344] ss:$8 sps:$4 sm:$0xff]  }
 0x74a   :  { %7343 = vmatpush1.bf16.msra.mxu1 %v20690_v43  ;;  %v20780_v43 = vld [vmem:[#allocation3 + $0x320] ss:$8 sps:$4 sm:$0xff]  }
 0x74b   :  { %7051 = vmatmul.mubr.bf16.vlgmr.msra.gmra.mxu0 %v20647_v41  ;;  %7674 = vmatprep.subr.bf16.mxu1 %v20696_v8  ;;  %v20739_v41 = vld [vmem:[#allocation3 + $0x194] ss:$8 sps:$4 sm:$0xff]   ;;  %v20759_v8 = vld [vmem:[#allocation3 + $0x2e4] ss:$8 sps:$4 sm:$0xff]  }
 0x74c   :  { %7164 = vmatpush1.bf16.msra.mxu0 %v20648_v53  ;;  %7060 = vmatprep.mubr.bf16.mxu0 %v23483_v4  ;;  %v20767_v53 = vld [vmem:[#allocation3 + $0x340] ss:$8 sps:$4 sm:$0xff]  }
 0x74d   :  { %7165 = vmatprep.subr.bf16.mxu0 %v20656_v10  ;;  %7361 = vmatmul.mubr.bf16.vlgmr.msra.gmra.mxu1 %v20697_v48  ;;  %v20776_v10 = vld [vmem:[#allocation3 + $0x334] ss:$8 sps:$4 sm:$0xff]   ;;  %v20757_v48 = vld [vmem:[#allocation3 + $0x2e0] ss:$8 sps:$4 sm:$0xff]  }
 0x74e   :  { %7675 = vmatpush1.bf16.msra.mxu1 %v20694_v61  ;;  %7370 = vmatprep.mubr.bf16.mxu1 %v23483_v4  ;;  %v20794_v61 = vld [vmem:[#allocation3 + $0x304] ss:$8 sps:$4 sm:$0xff]  }
 0x74f   :  { %7676 = vmatprep.subr.bf16.mxu1 %v20704_v37  ;;  %v20766_v37 = vld [vmem:[#allocation3 + $0x2d4] ss:$8 sps:$4 sm:$0xff]  }
 0x750   :  { %7166 = vmatpush1.bf16.msra.mxu0 %v20654_v58  ;;  %v20774_v58 = vld [vmem:[#allocation3 + $0x330] ss:$8 sps:$4 sm:$0xff]  }
 0x751   :  { %7167 = vmatprep.subr.bf16.mxu0 %v20662_v11  ;;  %v20753_v11 = vld [vmem:[#allocation3 + $0x2f4] ss:$8 sps:$4 sm:$0xff]  }
 0x752   :  { %7677 = vmatpush1.bf16.msra.mxu1 %v20702_v13  ;;  %v20792_v13 = vld [vmem:[#allocation3 + $0x300] ss:$8 sps:$4 sm:$0xff]  }
 0x753   :  { %7061 = vmatmul.mubr.bf16.gmra.mxu0 %v20678_v34  ;;  %7678 = vmatprep.subr.bf16.mxu1 %v20710_v49  ;;  %v20750_v34 = vld [vmem:[#allocation2 + $0x60] ss:$8 sps:$4 sm:$0xff]   ;;  %v20800_v49 = vld [vmem:[#allocation3 + $0x474] ss:$8 sps:$4 sm:$0xff]  }
 0x754   :  { %7168 = vmatpush1.bf16.msra.mxu0 %v20660_v54  ;;  %7195 = vmatprep.mubr.bf16.mxu0 %v23483_v4  ;;  %v20751_v54 = vld [vmem:[#allocation3 + $0x2f0] ss:$8 sps:$4 sm:$0xff]  }
 0x755   :  { %7169 = vmatprep.subr.bf16.mxu0 %v20668_v29  ;;  %7371 = vmatmul.mubr.bf16.gmra.mxu1 %v20718_v39  ;;  %v20788_v29 = vld [vmem:[#allocation3 + $0x314] ss:$8 sps:$4 sm:$0xff]   ;;  %v20801_v39 = vld [vmem:[#allocation2 + $0xc0] ss:$8 sps:$4 sm:$0xff]  }
 0x756   :  { %7679 = vmatpush1.bf16.msra.mxu1 %v20708_v51  ;;  %7706 = vmatprep.mubr.bf16.mxu1 %v23483_v4  ;;  %v20798_v51 = vld [vmem:[#allocation3 + $0x470] ss:$8 sps:$4 sm:$0xff]  }
 0x757   :  { %7680 = vmatprep.subr.bf16.mxu1 %v20717_v40  ;;  %v20808_v40 = vld [vmem:[#allocation3 + $0x464] ss:$8 sps:$4 sm:$0xff]  }
 0x758   :  { %7170 = vmatpush1.bf16.msra.mxu0 %v20666_v27  ;;  %v20786_v27 = vld [vmem:[#allocation3 + $0x310] ss:$8 sps:$4 sm:$0xff]  }
 0x759   :  { %7171 = vmatprep.subr.bf16.mxu0 %v20674_v46  ;;  %v20763_v46 = vld [vmem:[#allocation2 + $0x70] ss:$8 sps:$4 sm:$0xff]  }
 0x75a   :  { %7681 = vmatpush1.bf16.msra.mxu1 %v20715_v52  ;;  %v20785_v52 = vld [vmem:[#allocation3 + $0x2a4] ss:$8 sps:$4 sm:$0xff]  }
 0x75b   :  { %7682 = vmatprep.subr.bf16.mxu1 %v20724_v31  ;;  %v20806_v31 = vld [vmem:[#allocation3 + $0x460] ss:$8 sps:$4 sm:$0xff]  }
 0x75c   :  { %7172 = vmatpush1.bf16.msra.mxu0 %v20672_v5  ;;  %v20764_v5 = vld [vmem:[#allocation3 + $0x2d0] ss:$8 sps:$4 sm:$0xff]  }
 0x75d   :  { %7173 = vmatprep.subr.bf16.mxu0 %v20681_v30  ;;  %v20773_v30 = vld [vmem:[#allocation3 + $0x2c4] ss:$8 sps:$4 sm:$0xff]  }
 0x75e   :  { %7683 = vmatpush1.bf16.msra.mxu1 %v20722_v17  ;;  %v20783_v17 = vld [vmem:[#allocation3 + $0x2a0] ss:$8 sps:$4 sm:$0xff]  }
 0x75f   :  { %7684 = vmatprep.subr.bf16.mxu1 %v20730_v62  ;;  %v20821_v62 = vld [vmem:[#allocation3 + $0x444] ss:$8 sps:$4 sm:$0xff]  }
 0x760   :  { %7174 = vmatpush1.bf16.msra.mxu0 %v20679_v57  ;;  %v20771_v57 = vld [vmem:[#allocation3 + $0x2c0] ss:$8 sps:$4 sm:$0xff]  }
 0x761   :  { %7175 = vmatprep.subr.bf16.mxu0 %v20687_v56  ;;  %v20779_v56 = vld [vmem:[#allocation3 + $0x2b4] ss:$8 sps:$4 sm:$0xff]  }
 0x762   :  { %7685 = vmatpush1.bf16.msra.mxu1 %v20728_v6  ;;  %v20819_v6 = vld [vmem:[#allocation3 + $0x440] ss:$8 sps:$4 sm:$0xff]  }
 0x763   :  { %7686 = vmatprep.subr.bf16.mxu1 %v20736_v24  ;;  %v20797_v24 = vld [vmem:[#allocation3 + $0x284] ss:$8 sps:$4 sm:$0xff]  }
 0x764   :  { %7176 = vmatpush1.bf16.msra.mxu0 %v20685_v15  ;;  %v20777_v15 = vld [vmem:[#allocation3 + $0x2b0] ss:$8 sps:$4 sm:$0xff]  }
 0x765   :  { %7177 = vmatprep.subr.bf16.mxu0 %v20693_v12  ;;  %v20814_v12 = vld [vmem:[#allocation3 + $0x454] ss:$8 sps:$4 sm:$0xff]  }
 0x766   :  { %7687 = vmatpush1.bf16.msra.mxu1 %v20734_v59  ;;  %v20826_v59 = vld [vmem:[#allocation3 + $0x430] ss:$8 sps:$4 sm:$0xff]  }
 0x767   :  { %7688 = vmatprep.subr.bf16.mxu1 %v20742_v35  ;;  %v20834_v35 = vld [vmem:[#allocation3 + $0x424] ss:$8 sps:$4 sm:$0xff]  }
 0x768   :  { %7178 = vmatpush1.bf16.msra.mxu0 %v20691_v28  ;;  %v20812_v28 = vld [vmem:[#allocation3 + $0x450] ss:$8 sps:$4 sm:$0xff]  }
 0x769   :  { %7501 = vmatprep.subr.bf16.mxu0 %v20701_v26  ;;  %v20822_v26 = vld [vmem:[#allocation2 + $0xd0] ss:$8 sps:$4 sm:$0xff]  }
 0x76a   :  { %7689 = vmatpush1.bf16.msra.mxu1 %v20740_v16  ;;  %v20832_v16 = vld [vmem:[#allocation3 + $0x420] ss:$8 sps:$4 sm:$0xff]  }
 0x76b   :  { %7196 = vmatmul.mubr.bf16.vlgmr.msra.gmra.mxu0 %v20698_v22  ;;  %8020 = vmatprep.subr.bf16.mxu1 %v20748_v45  ;;  %v20791_v22 = vld [vmem:[#allocation3 + $0x294] ss:$8 sps:$4 sm:$0xff]   ;;  %v20811_v45 = vld [vmem:[#allocation3 + $0x3e4] ss:$8 sps:$4 sm:$0xff]  }
 0x76c   :  { %7502 = vmatpush1.bf16.msra.mxu0 %v20699_v38  ;;  %7205 = vmatprep.mubr.bf16.mxu0 %v23483_v4  ;;  %v20789_v38 = vld [vmem:[#allocation3 + $0x290] ss:$8 sps:$4 sm:$0xff]  }
 0x76d   :  { %7503 = vmatprep.subr.bf16.mxu0 %v20707_v0  ;;  %7707 = vmatmul.mubr.bf16.vlgmr.msra.gmra.mxu1 %v20749_v3  ;;  %v20828_v0 = vld [vmem:[#allocation3 + $0x434] ss:$8 sps:$4 sm:$0xff]   ;;  %v20809_v3 = vld [vmem:[#allocation3 + $0x3e0] ss:$8 sps:$4 sm:$0xff]  }
 0x76e   :  { %8021 = vmatpush1.bf16.msra.mxu1 %v20746_v21  ;;  %7716 = vmatprep.mubr.bf16.mxu1 %v23483_v4  ;;  %v20846_v21 = vld [vmem:[#allocation3 + $0x404] ss:$8 sps:$4 sm:$0xff]  }
 0x76f   :  { %8022 = vmatprep.subr.bf16.mxu1 %v20756_v36  ;;  %v20818_v36 = vld [vmem:[#allocation3 + $0x3d4] ss:$8 sps:$4 sm:$0xff]  }
 0x770   :  { %7504 = vmatpush1.bf16.msra.mxu0 %v20705_v9  ;;  %v20795_v9 = vld [vmem:[#allocation3 + $0x280] ss:$8 sps:$4 sm:$0xff]  }
 0x771   :  { %7505 = vmatprep.subr.bf16.mxu0 %v20714_v60  ;;  %v20805_v60 = vld [vmem:[#allocation3 + $0x3f4] ss:$8 sps:$4 sm:$0xff]  }
 0x772   :  { %8023 = vmatpush1.bf16.msra.mxu1 %v20754_v63  ;;  %v20816_v63 = vld [vmem:[#allocation3 + $0x3d0] ss:$8 sps:$4 sm:$0xff]  }
 0x773   :  { %7206 = vmatmul.mubr.bf16.gmra.mxu0 %v20711_v33  ;;  %8024 = vmatprep.subr.bf16.mxu1 %v20762_v1  ;;  %v20802_v33 = vld [vmem:[#allocation2 + $0xa0] ss:$8 sps:$4 sm:$0xff]   ;;  %v20825_v1 = vld [vmem:[#allocation3 + $0x3c4] ss:$8 sps:$4 sm:$0xff]  }
 0x774   :  { %7506 = vmatpush1.bf16.msra.mxu0 %v20712_v32  ;;  %7533 = vmatprep.mubr.bf16.mxu0 %v23483_v4  ;;  %v20803_v32 = vld [vmem:[#allocation3 + $0x3f0] ss:$8 sps:$4 sm:$0xff]  }
 0x775   :  { %7507 = vmatprep.subr.bf16.mxu0 %v20721_v44  ;;  %7717 = vmatmul.mubr.bf16.gmra.mxu1 %v20770_v20  ;;  %v20840_v44 = vld [vmem:[#allocation3 + $0x414] ss:$8 sps:$4 sm:$0xff]  }
 0x776   :  { %8025 = vmatpush1.bf16.msra.mxu1 %v20760_v47  ;;  %8052 = vmatprep.mubr.bf16.mxu1 %v23483_v4  ;;  %v20831_v20 = vld [vmem:[#allocation3 + $0x3b4] ss:$8 sps:$4 sm:$0xff]   ;;  %v20829_v47 = vld [vmem:[#allocation3 + $0x3b0] ss:$8 sps:$4 sm:$0xff]  }
 0x777   :  { %8026 = vmatprep.subr.bf16.mxu1 %v20769_v50  ;;  %v20837_v50 = vld [vmem:[#allocation3 + $0x3a4] ss:$8 sps:$4 sm:$0xff]  }
 0x778   :  { %7508 = vmatpush1.bf16.msra.mxu0 %v20719_v14  ;;  %v20838_v14 = vld [vmem:[#allocation3 + $0x410] ss:$8 sps:$4 sm:$0xff]  }
 0x779   :  { %7509 = vmatprep.subr.bf16.mxu0 %v20727_v23  ;;  %v20815_v23 = vld [vmem:[#allocation2 + $0xb0] ss:$8 sps:$4 sm:$0xff]  }
 0x77a   :  { %8027 = vmatpush1.bf16.msra.mxu1 %v20767_v53  ;;  %v20843_v53 = vld [vmem:[#allocation3 + $0x394] ss:$8 sps:$4 sm:$0xff]  }
 0x77b   :  { %8028 = vmatprep.subr.bf16.mxu1 %v20776_v10  ;;  %v20841_v10 = vld [vmem:[#allocation3 + $0x390] ss:$8 sps:$4 sm:$0xff]  }
 0x77c   :  { %7510 = vmatpush1.bf16.msra.mxu0 %v20725_v42  ;;  %v20844_v42 = vld [vmem:[#allocation3 + $0x400] ss:$8 sps:$4 sm:$0xff]  }
 0x77d   :  { %7511 = vmatprep.subr.bf16.mxu0 %v20733_v19  ;;  %v20850_v19 = vld [vmem:[#allocation2 + $0x100] ss:$8 sps:$4 sm:$0xff]  }
 0x77e   :  { %8029 = vmatpush1.bf16.msra.mxu1 %v20774_v58  ;;  %v20847_v58 = vld [vmem:[#allocation3 + $0x380] ss:$8 sps:$4 sm:$0xff]  }
 0x77f   :  { %8030 = vmatprep.subr.bf16.mxu1 %v20782_v18  ;;  %v20853_v18 = vld [vmem:[#allocation2 + $0xf0] ss:$8 sps:$4 sm:$0xff]  }
 0x780   :  { %7512 = vmatpush1.bf16.msra.mxu0 %v20731_v2  ;;  %v20823_v2 = vld [vmem:[#allocation3 + $0x3c0] ss:$8 sps:$4 sm:$0xff]  }
 0x781   :  { %7513 = vmatprep.subr.bf16.mxu0 %v20739_v41  ;;  %v20852_v41 = vld [vmem:[#allocation2 + $0x110] ss:$8 sps:$4 sm:$0xff]  }
 0x782   :  { %8031 = vmatpush1.bf16.msra.mxu1 %v20780_v43 }
 0x783   :  { %8032 = vmatprep.subr.bf16.mxu1 %v20788_v29 }
 0x784   :  { %7514 = vmatpush1.bf16.msra.mxu0 %v20737_v7  ;;  %v20835_v7 = vld [vmem:[#allocation3 + $0x3a0] ss:$8 sps:$4 sm:$0xff]  }
 0x785   :  { %7515 = vmatprep.subr.bf16.mxu0 %v20745_v55  ;;  %v20849_v55 = vld [vmem:[#allocation3 + $0x384] ss:$8 sps:$4 sm:$0xff]  }
 0x786   :  { %8033 = vmatpush1.bf16.msra.mxu1 %v20786_v27 }
 0x787   :  { %8034 = vmatprep.subr.bf16.mxu1 %v20794_v61 }
 0x788   :  { %7516 = vmatpush1.bf16.msra.mxu0 %v20743_v25  ;;  %v20851_v25 = vld [vmem:[#allocation2 + $0xe0] ss:$8 sps:$4 sm:$0xff]  }
 0x789   :  { %7847 = vmatprep.subr.bf16.mxu0 %v20753_v11 }
 0x78a   :  { %8035 = vmatpush1.bf16.msra.mxu1 %v20792_v13 }
 0x78b   :  { %7534 = vmatmul.mubr.bf16.vlgmr.msra.gmra.mxu0 %v20750_v34  ;;  %8366 = vmatprep.subr.bf16.mxu1 %v20800_v49 }
 0x78c   :  { %7848 = vmatpush1.bf16.msra.mxu0 %v20751_v54  ;;  %7543 = vmatprep.mubr.bf16.mxu0 %v23483_v4 }
 0x78d   :  { %7849 = vmatprep.subr.bf16.mxu0 %v20759_v8  ;;  %8053 = vmatmul.mubr.bf16.vlgmr.msra.gmra.mxu1 %v20801_v39 }
 0x78e   :  { %8367 = vmatpush1.bf16.msra.mxu1 %v20798_v51  ;;  %8062 = vmatprep.mubr.bf16.mxu1 %v23483_v4 }
 0x78f   :  { %8368 = vmatprep.subr.bf16.mxu1 %v20808_v40 }
 0x790   :  { %7850 = vmatpush1.bf16.msra.mxu0 %v20757_v48 }
 0x791   :  { %7851 = vmatprep.subr.bf16.mxu0 %v20766_v37 }
 0x792   :  { %8369 = vmatpush1.bf16.msra.mxu1 %v20806_v31 }
 0x793   :  { %7544 = vmatmul.mubr.bf16.gmra.mxu0 %v20763_v46  ;;  %8370 = vmatprep.subr.bf16.mxu1 %v20814_v12 }
 0x794   :  { %7852 = vmatpush1.bf16.msra.mxu0 %v20764_v5  ;;  %7879 = vmatprep.mubr.bf16.mxu0 %v23483_v4 }
 0x795   :  { %7853 = vmatprep.subr.bf16.mxu0 %v20773_v30  ;;  %8063 = vmatmul.mubr.bf16.gmra.mxu1 %v20822_v26 }
 0x796   :  { %8371 = vmatpush1.bf16.msra.mxu1 %v20812_v28  ;;  %8398 = vmatprep.mubr.bf16.mxu1 %v23483_v4 }
 0x797   :  { %8372 = vmatprep.subr.bf16.mxu1 %v20821_v62 }
 0x798   :  { %7854 = vmatpush1.bf16.msra.mxu0 %v20771_v57 }
 0x799   :  { %7855 = vmatprep.subr.bf16.mxu0 %v20779_v56 }
 0x79a   :  { %8373 = vmatpush1.bf16.msra.mxu1 %v20819_v6 }
 0x79b   :  { %8374 = vmatprep.subr.bf16.mxu1 %v20828_v0 }
 0x79c   :  { %7856 = vmatpush1.bf16.msra.mxu0 %v20777_v15 }
 0x79d   :  { %7857 = vmatprep.subr.bf16.mxu0 %v20785_v52 }
 0x79e   :  { %8375 = vmatpush1.bf16.msra.mxu1 %v20826_v59 }
 0x79f   :  { %8376 = vmatprep.subr.bf16.mxu1 %v20834_v35 }
 0x7a0   :  { %7858 = vmatpush1.bf16.msra.mxu0 %v20783_v17 }
 0x7a1   :  { %7859 = vmatprep.subr.bf16.mxu0 %v20791_v22 }
 0x7a2   :  { %8377 = vmatpush1.bf16.msra.mxu1 %v20832_v16 }
 0x7a3   :  { %8378 = vmatprep.subr.bf16.mxu1 %v20840_v44 }
 0x7a4   :  { %7860 = vmatpush1.bf16.msra.mxu0 %v20789_v38 }
 0x7a5   :  { %7861 = vmatprep.subr.bf16.mxu0 %v20797_v24 }
 0x7a6   :  { %8379 = vmatpush1.bf16.msra.mxu1 %v20838_v14 }
 0x7a7   :  { %8380 = vmatprep.subr.bf16.mxu1 %v20846_v21 }
 0x7a8   :  { %7862 = vmatpush1.bf16.msra.mxu0 %v20795_v9 }
 0x7a9   :  { %8193 = vmatprep.subr.bf16.mxu0 %v20805_v60 }
 0x7aa   :  { %8381 = vmatpush1.bf16.msra.mxu1 %v20844_v42 }
 0x7ab   :  { %7880 = vmatmul.mubr.bf16.vlgmr.msra.gmra.mxu0 %v20802_v33 }
 0x7ac   :  { %8194 = vmatpush1.bf16.msra.mxu0 %v20803_v32  ;;  %7889 = vmatprep.mubr.bf16.mxu0 %v23483_v4 }
 0x7ad   :  { %8195 = vmatprep.subr.bf16.mxu0 %v20811_v45  ;;  %8399 = vmatmul.mubr.bf16.vlgmr.msra.gmra.mxu1 %v20850_v19 }
 0x7ae   :  { %8408 = vmatprep.mubr.bf16.mxu1 %v23483_v4 }
 0x7b0   :  { %8196 = vmatpush1.bf16.msra.mxu0 %v20809_v3 }
 0x7b1   :  { %8197 = vmatprep.subr.bf16.mxu0 %v20818_v36 }
 0x7b3   :  { %7890 = vmatmul.mubr.bf16.gmra.mxu0 %v20815_v23 }
 0x7b4   :  { %8198 = vmatpush1.bf16.msra.mxu0 %v20816_v63  ;;  %8225 = vmatprep.mubr.bf16.mxu0 %v23483_v4 }
 0x7b5   :  { %8199 = vmatprep.subr.bf16.mxu0 %v20825_v1  ;;  %8409 = vmatmul.mubr.bf16.gmra.mxu1 %v20852_v41 }
 0x7b8   :  { %8200 = vmatpush1.bf16.msra.mxu0 %v20823_v2 }
 0x7b9   :  { %8201 = vmatprep.subr.bf16.mxu0 %v20831_v20 }
 0x7bc   :  { %8202 = vmatpush1.bf16.msra.mxu0 %v20829_v47 }
 0x7bd   :  { %8203 = vmatprep.subr.bf16.mxu0 %v20837_v50 }
 0x7c0   :  { %8204 = vmatpush1.bf16.msra.mxu0 %v20835_v7 }
 0x7c1   :  { %8205 = vmatprep.subr.bf16.mxu0 %v20843_v53 }
 0x7c4   :  { %8206 = vmatpush1.bf16.msra.mxu0 %v20841_v10  ;;  %v8429_v10 = vlaneseq }
 0x7c5   :  { %8207 = vmatprep.subr.bf16.mxu0 %v20849_v55 }
 0x7c8   :  { %8208 = vmatpush1.bf16.msra.mxu0 %v20847_v58 }
 0x7cb   :  { %8226 = vmatmul.mubr.bf16.vlgmr.msra.gmra.mxu0 %v20851_v25 }
 0x7cc   :  { %8235 = vmatprep.mubr.bf16.mxu0 %v23483_v4 }
 0x7d3   :  { %8236 = vmatmul.mubr.bf16.gmra.mxu0 %v20853_v18 }
 0x7d4   :  { %8581 = vmatprep.mubr.bf16.mxu0 %v23483_v4 }
 0x80b   :  { %v7052_v11 = vpop.f32.mrf.mxu0 }
 0x80d   :  { %v7054_v34 = vpop.f32.mrf.mxu0  ;;  %v7362_v27 = vpop.f32.mrf.mxu1 }
 0x80f   :  { %v7056_v43 = vpop.f32.mrf.mxu0  ;;  %v23056_v37 = vpop.f32.mrf.mxu1 }
 0x811   :  { %v7058_v54 = vpop.f32.mrf.mxu0  ;;  %v7366_v5 = vpop.f32.mrf.mxu1 }
 0x813   :  { %v7062_v8 = vpop.f32.mrf.mxu0  ;;  %v7368_v49 = vpop.f32.mrf.mxu1 }
 0x815   :  { %v7064_v29 = vpop.f32.mrf.mxu0  ;;  %v7372_v57 = vpop.f32.mrf.mxu1 }
 0x817   :  { %v23052_v48 = vpop.f32.mrf.mxu0  ;;  %v7374_v51 = vpop.f32.mrf.mxu1 }
 0x819   :  { %v23054_v61 = vpop.f32.mrf.mxu0  ;;  %v23058_v56 = vpop.f32.mrf.mxu1 }
 0x81b   :  { %v23060_v52 = vpop.f32.mrf.mxu1 }
 0x82b   :  { %v7197_v46 = vpop.f32.mrf.mxu0 }
 0x82c   :  { %v7198_v2 = vadd.f32 %v7197_v46, %v7052_v11 }
 0x82d   :  { %v7199_v13 = vpop.f32.mrf.mxu0  ;;  %v7708_v31 = vpop.f32.mrf.mxu1 }
 0x82e   :  { %v7381_v41 = vadd.f32 %v7362_v27, %v7198_v2  ;;  %v7200_v18 = vadd.f32 %v7199_v13, %v7054_v34 }
 0x82f   :  { %v7201_v30 = vpop.f32.mrf.mxu0  ;;  %v23062_v28 = vpop.f32.mrf.mxu1 }
 0x830   :  { %v7202_v50 = vadd.f32 %v7201_v30, %v7056_v43 }
 0x831   :  { %v7203_v39 = vpop.f32.mrf.mxu0  ;;  %v7712_v26 = vpop.f32.mrf.mxu1 }
 0x832   :  { %v7204_v58 = vadd.f32 %v7203_v39, %v7058_v54  ;;  %v7383_v25 = vadd.f32 %v7366_v5, %v7202_v50 }
 0x833   :  { %v7207_v40 = vpop.f32.mrf.mxu0  ;;  %v23064_v6 = vpop.f32.mrf.mxu1 }
 0x834   :  { %v7208_v4 = vadd.f32 %v7207_v40, %v7062_v8  ;;  %v7384_v46 = vadd.f32 %v7368_v49, %v7204_v58  ;;  %v8427_v49 = vld [vmem:[#allocation20] sm:$0x3] }
 0x835   :  { %v7209_v15 = vpop.f32.mrf.mxu0  ;;  %v23066_v38 = vpop.f32.mrf.mxu1 }
 0x836   :  { %v7385_v43 = vadd.f32 %v7372_v57, %v7208_v4 }
 0x837   :  { %v7211_v12 = vpop.f32.mrf.mxu0  ;;  %v23068_v24 = vpop.f32.mrf.mxu1 }
 0x838   :  { %v7212_v27 = vadd.f32 %v7211_v12, %v23052_v48 }
 0x839   :  { %v7213_v17 = vpop.f32.mrf.mxu0  ;;  %v23070_v9 = vpop.f32.mrf.mxu1 }
 0x83a   :  { %v7214_v34 = vadd.f32 %v7213_v17, %v23054_v61  ;;  %v7387_v48 = vadd.f32 %v23058_v56, %v7212_v27 }
 0x83b   :  { %v23072_v60 = vpop.f32.mrf.mxu1 }
 0x84b   :  { %v7535_v62 = vpop.f32.mrf.mxu0 }
 0x84c   :  { %v7554_v53 = vadd.f32 %v7535_v62, %v7381_v41  ;;  %v7382_v62 = vadd.f32 %v23056_v37, %v7200_v18  ;;  %v7388_v37 = vadd.f32 %v23060_v52, %v7214_v34 }
 0x84d   :  { %v7537_v22 = vpop.f32.mrf.mxu0  ;;  %v8054_v16 = vpop.f32.mrf.mxu1 }
 0x84e   :  { %v7555_v13 = vadd.f32 %v7537_v22, %v7382_v62 }
 0x84f   :  { %v7539_v0 = vpop.f32.mrf.mxu0  ;;  %v23074_v45 = vpop.f32.mrf.mxu1 }
 0x850   :  { %23507 = vst [vmem:[#allocation44_spill] sm:$0xff] %v23074_v45  ;;  %v7210_v45 = vadd.f32 %v7209_v15, %v7064_v29 }
 0x851   :  { %v7541_v59 = vpop.f32.mrf.mxu0  ;;  %v8058_v14 = vpop.f32.mrf.mxu1 }
 0x852   :  { %v7386_v30 = vadd.f32 %v7374_v51, %v7210_v45  ;;  %v7557_v8 = vadd.f32 %v7541_v59, %v7384_v46  ;;  %v7728_v59 = vadd.f32 %v23062_v28, %v7555_v13 }
 0x853   :  { %v7545_v35 = vpop.f32.mrf.mxu0  ;;  %v23076_v21 = vpop.f32.mrf.mxu1 }
 0x854   :  { %23508 = vst [vmem:[#allocation41_spill] sm:$0xff] %v23076_v21  ;;  %v7727_v21 = vadd.f32 %v7708_v31, %v7554_v53  ;;  %v7558_v39 = vadd.f32 %v7545_v35, %v7385_v43  ;;  %v7730_v61 = vadd.f32 %v23064_v6, %v7557_v8 }
 0x855   :  { %v7547_v33 = vpop.f32.mrf.mxu0  ;;  %v23078_v23 = vpop.f32.mrf.mxu1 }
 0x856   :  { %23509 = vst [vmem:[#allocation45_spill] sm:$0xff] %v23078_v23  ;;  %v7559_v40 = vadd.f32 %v7547_v33, %v7386_v30 }
 0x857   :  { %v7549_v32 = vpop.f32.mrf.mxu0  ;;  %v23080_v63 = vpop.f32.mrf.mxu1 }
 0x858   :  { %23510 = vst [vmem:[#allocation42_spill] sm:$0xff] %v23080_v63  ;;  %v7556_v63 = vadd.f32 %v7539_v0, %v7383_v25  ;;  %v7560_v22 = vadd.f32 %v7549_v32, %v7387_v48  ;;  %v7732_v0 = vadd.f32 %v23068_v24, %v7559_v40 }
 0x859   :  { %v7551_v44 = vpop.f32.mrf.mxu0  ;;  %v23082_v19 = vpop.f32.mrf.mxu1 }
 0x85a   :  { %23511 = vst [vmem:[#allocation46_spill] sm:$0xff] %v23082_v19  ;;  %v23088_v19 = vshrl.u32 %v8429_v10, 7  ;;  %v7729_v29 = vadd.f32 %v7712_v26, %v7556_v63  ;;  %v7731_v26 = vadd.f32 %v23066_v38, %v7558_v39  ;;  %v7561_v33 = vadd.f32 %v7551_v44, %v7388_v37 }
 0x85b   :  { %v23084_v47 = vpop.f32.mrf.mxu1  ;;  %v7733_v2 = vadd.f32 %v23070_v9, %v7560_v22  ;;  %v23514_v50 = vld [vmem:[#allocation41_spill] sm:$0xff] }
 0x85c   :  { %23512 = vst [vmem:[#allocation43_spill] sm:$0xff] %v23084_v47  ;;  %23513 = vst [vmem:[#allocation47_spill] sm:$0xff] %v23088_v19  ;;  %v23094_v5 = vsub.s32 0, %v23088_v19  ;;  %v7734_v38 = vadd.f32 %v23072_v60, %v7561_v33  ;;  %v23110_v9 = vsub.s32 1, %v23088_v19 }
 0x85d   :  { %v23515_v41 = vld [vmem:[#allocation45_spill] sm:$0xff] }
 0x85e   :  { %v8432_v17 = vrot.slane %v8427_v49, %v23094_v5 }
 0x85f   :  { %v23517_v53 = vld [vmem:[#allocation42_spill] sm:$0xff] }
 0x861   :  { %v23518_v62 = vld [vmem:[#allocation46_spill] sm:$0xff] }
 0x863   :  { %v23519_v8 = vld [vmem:[#allocation43_spill] sm:$0xff] }
 0x86b   :  { %v7881_v3 = vpop.f32.mrf.mxu0 }
 0x86c   :  { %v7900_v47 = vadd.f32 %v7881_v3, %v7727_v21 }
 0x86d   :  { %v7883_v36 = vpop.f32.mrf.mxu0  ;;  %v8400_v7 = vpop.f32.mrf.mxu1 }
 0x86e   :  { %v8073_v4 = vadd.f32 %v8054_v16, %v7900_v47  ;;  %v7901_v3 = vadd.f32 %v7883_v36, %v7728_v59 }
 0x86f   :  { %v7885_v42 = vpop.f32.mrf.mxu0  ;;  %v23086_v23 = vpop.f32.mrf.mxu1 }
 0x870   :  { %v7902_v31 = vadd.f32 %v7885_v42, %v7729_v29 }
 0x871   :  { %v7887_v1 = vpop.f32.mrf.mxu0  ;;  %v8404_v54 = vpop.f32.mrf.mxu1 }
 0x872   :  { %v7903_v16 = vadd.f32 %v7887_v1, %v7730_v61  ;;  %v8075_v45 = vadd.f32 %v8058_v14, %v7902_v31 }
 0x873   :  { %v7891_v20 = vpop.f32.mrf.mxu0  ;;  %v8406_v51 = vpop.f32.mrf.mxu1 }
 0x874   :  { %v7904_v21 = vadd.f32 %v7891_v20, %v7731_v26  ;;  %v8076_v28 = vadd.f32 %v23514_v50, %v7903_v16  ;;  %v20861_v50 = vld [vmem:[%s23475_s12 + $0x38] sm:$0xff]  }
 0x875   :  { %v7893_v55 = vpop.f32.mrf.mxu0  ;;  %v8410_v42 = vpop.f32.mrf.mxu1 }
 0x876   :  { %v7905_v6 = vadd.f32 %v7893_v55, %v7732_v0  ;;  %v8077_v44 = vadd.f32 %v23515_v41, %v7904_v21 }
 0x877   :  { %v7895_v11 = vpop.f32.mrf.mxu0  ;;  %v8412_v36 = vpop.f32.mrf.mxu1 }
 0x878   :  { %v7906_v1 = vadd.f32 %v7895_v11, %v7733_v2  ;;  %v8078_v10 = vadd.f32 %v23517_v53, %v7905_v6  ;;  %v20854_v6 = vld [vmem:[%s23475_s12] sm:$0xff]   ;;  %v20856_v2 = vld [vmem:[%s23475_s12 + $0x10] sm:$0xff]  }
 0x879   :  { %v7897_v15 = vpop.f32.mrf.mxu0 }
 0x87a   :  { %v7907_v55 = vadd.f32 %v7897_v15, %v7734_v38  ;;  %v8079_v11 = vadd.f32 %v23518_v62, %v7906_v1  ;;  %v20858_v38 = vld [vmem:[%s23475_s12 + $0x20] sm:$0xff]  }
 0x87c   :  { %v8080_v29 = vadd.f32 %v23519_v8, %v7907_v55 }
 0x88b   :  { %v8227_v57 = vpop.f32.mrf.mxu0 }
 0x88c   :  { %v8246_v12 = vadd.f32 %v8227_v57, %v8073_v4  ;;  %v8436_v57 = vrot.slane %v8427_v49, %v23110_v9 }
 0x88d   :  { %v8229_v35 = vpop.f32.mrf.mxu0 }
 0x88e   :  { %v8419_v56 = vadd.f32 %v8400_v7, %v8246_v12  ;;  %v23516_v7 = vld [vmem:[#allocation44_spill] sm:$0xff] }
 0x88f   :  { %v8231_v52 = vpop.f32.mrf.mxu0  ;;  %v8074_v14 = vadd.f32 %v23516_v7, %v7901_v3 }
 0x890   :  { %v8248_v63 = vadd.f32 %v8231_v52, %v8075_v45  ;;  %v8439_v32 = vadd.f32 %v8432_v17, %v8419_v56 }
 0x891   :  { %v8233_v47 = vpop.f32.mrf.mxu0  ;;  %v8247_v43 = vadd.f32 %v8229_v35, %v8074_v14 }
 0x892   :  { %v8421_v24 = vadd.f32 %v8404_v54, %v8248_v63  ;;  %v8249_v25 = vadd.f32 %v8233_v47, %v8076_v28  ;;  %v8447_v46 = vmax.f32 %v8439_v32, 0.0  ;;  %v8414_v54 = vpop.f32.mrf.mxu1  ;;  %v20855_v63 = vld [vmem:[%s23475_s12 + $0x8] sm:$0xff]   ;;  %v20857_v47 = vld [vmem:[%s23475_s12 + $0x18] sm:$0xff]   ;;  %v20862_v28 = vld [vmem:[%s23475_s12 + $0x40] sm:$0xff]  }
 0x893   :  { %v8237_v20 = vpop.f32.mrf.mxu0  ;;  %v8420_v48 = vadd.f32 %v23086_v23, %v8247_v43  ;;  %v20859_v32 = vld [vmem:[%s23475_s12 + $0x28] sm:$0xff]  }
 0x894   :  { %v8441_v58 = vadd.f32 %v8432_v17, %v8421_v24  ;;  %v8250_v60 = vadd.f32 %v8237_v20, %v8077_v44  ;;  %v8422_v39 = vadd.f32 %v8406_v51, %v8249_v25  ;;  %v8416_v61 = vpop.f32.mrf.mxu1  ;;  %v20860_v24 = vld [vmem:[%s23475_s12 + $0x30] sm:$0xff]  }
 0x895   :  { %v8239_v18 = vpop.f32.mrf.mxu0  ;;  %v8440_v33 = vadd.f32 %v8436_v57, %v8420_v48 }
 0x896   :  { %v8449_v27 = vmax.f32 %v8441_v58, 0.0  ;;  %v8251_v30 = vadd.f32 %v8239_v18, %v8078_v10  ;;  %v8423_v15 = vadd.f32 %v8410_v42, %v8250_v60  ;;  %v8442_v26 = vadd.f32 %v8436_v57, %v8422_v39 }
 0x897   :  { %v8241_v34 = vpop.f32.mrf.mxu0  ;;  %v8448_v52 = vmax.f32 %v8440_v33, 0.0 }
 0x898   :  { %v8455_v13 = vpack.c.bf16 %v8449_v27, %v8447_v46  ;;  %v8424_v40 = vadd.f32 %v8412_v36, %v8251_v30  ;;  %v8252_v31 = vadd.f32 %v8241_v34, %v8079_v11  ;;  %v8443_v59 = vadd.f32 %v8432_v17, %v8423_v15 }
 0x899   :  { %v8243_v4 = vpop.f32.mrf.mxu0  ;;  %v8450_v51 = vmax.f32 %v8442_v26, 0.0 }
 0x89a   :  { %v8253_v37 = vadd.f32 %v8243_v4, %v8080_v29  ;;  %v8425_v12 = vadd.f32 %v8414_v54, %v8252_v31  ;;  %v8444_v22 = vadd.f32 %v8436_v57, %v8424_v40  ;;  %v8451_v21 = vmax.f32 %v8443_v59, 0.0 }
 0x89b   :  { %v8456_v49 = vpack.c.bf16 %v8450_v51, %v8448_v52 }
 0x89c   :  { %v8426_v0 = vadd.f32 %v8416_v61, %v8253_v37  ;;  %v8445_v35 = vadd.f32 %v8432_v17, %v8425_v12  ;;  %v8452_v45 = vmax.f32 %v8444_v22, 0.0  ;;  %v23520_v17 = vmov 0  }
 0x89e   :  { %v8446_v16 = vadd.f32 %v8436_v57, %v8426_v0  ;;  %v8453_v56 = vmax.f32 %v8445_v35, 0.0 }
 0x8a0   :  { %v8454_v3 = vmax.f32 %v8446_v16, 0.0  ;;  %v8457_v23 = vpack.c.bf16 %v8453_v56, %v8451_v21 }
 0x8a2   :  { %v8458_v42 = vpack.c.bf16 %v8454_v3, %v8452_v45 }
 0x8a4   :  { %8561 = vmatprep.subr.bf16.mxu0 %v8458_v42 }
 0x8a5   :  { %8562 = vmatpush1.bf16.msra.mxu0 %v8457_v23 }
 0x8a6   :  { %8563 = vmatprep.subr.bf16.mxu0 %v8456_v49 }
 0x8a9   :  { %8564 = vmatpush1.bf16.msra.mxu0 %v8455_v13 }
 0x8ac   :  { %17848 = vmatmul.mubr.msk.bf16.vlgmr.msra.gmra.mxu0 %vm6470_vm3, %v20854_v6 }
 0x8ad   :  { %8591 = vmatprep.mubr.bf16.mxu0 %v23520_v17 }
 0x8b4   :  { %17849 = vmatmul.mubr.msk.bf16.gmra.mxu0 %vm6470_vm3, %v20855_v63 }
 0x8b5   :  { %8601 = vmatprep.mubr.bf16.mxu0 %v23520_v17 }
 0x8bc   :  { %17850 = vmatmul.mubr.msk.bf16.gmra.mxu0 %vm6470_vm3, %v20856_v2 }
 0x8bd   :  { %8611 = vmatprep.mubr.bf16.mxu0 %v23520_v17 }
 0x8c4   :  { %17851 = vmatmul.mubr.msk.bf16.gmra.mxu0 %vm6470_vm3, %v20857_v47 }
 0x8c5   :  { %8621 = vmatprep.mubr.bf16.mxu0 %v23520_v17 }
 0x8cc   :  { %17852 = vmatmul.mubr.msk.bf16.gmra.mxu0 %vm6470_vm3, %v20858_v38 }
 0x8cd   :  { %8631 = vmatprep.mubr.bf16.mxu0 %v23520_v17 }
 0x8d4   :  { %17853 = vmatmul.mubr.msk.bf16.gmra.mxu0 %vm6470_vm3, %v20859_v32 }
 0x8d5   :  { %8641 = vmatprep.mubr.bf16.mxu0 %v23520_v17 }
 0x8dc   :  { %17854 = vmatmul.mubr.msk.bf16.gmra.mxu0 %vm6470_vm3, %v20860_v24 }
 0x8dd   :  { %8651 = vmatprep.mubr.bf16.mxu0 %v23520_v17 }
 0x8e4   :  { %17855 = vmatmul.mubr.msk.bf16.gmra.mxu0 %vm6470_vm3, %v20861_v50 }
 0x8e5   :  { %8661 = vmatprep.mubr.bf16.mxu0 %v23520_v17 }
 0x8ec   :  { %17856 = vmatmul.mubr.msk.bf16.gmra.mxu0 %vm6470_vm3, %v20862_v28 }
 0x96c   :  { %v8583_v41 = vpop.f32.mrf.mxu0 }
 0x96e   :  { %v8585_v44 = vpop.f32.mrf.mxu0 }
 0x96f   :  { %v19030_v1 = vpack.c.bf16 %v8585_v44, %v8583_v41 }
 0x970   :  { %v8587_v7 = vpop.f32.mrf.mxu0 }
 0x971   :  { %8780 = vst [vmem:[#allocation2] sm:$0xff] %v19030_v1 }
 0x972   :  { %v8589_v14 = vpop.f32.mrf.mxu0 }
 0x973   :  { %v19031_v36 = vpack.c.bf16 %v8589_v14, %v8587_v7 }
 0x974   :  { %v8593_v20 = vpop.f32.mrf.mxu0 }
 0x975   :  { %8781 = vst [vmem:[#allocation2 + $0x8] sm:$0xff] %v19031_v36 }
 0x976   :  { %v8595_v53 = vpop.f32.mrf.mxu0 }
 0x977   :  { %v19032_v10 = vpack.c.bf16 %v8595_v53, %v8593_v20 }
 0x978   :  { %v8597_v55 = vpop.f32.mrf.mxu0 }
 0x979   :  { %8782 = vst [vmem:[#allocation2 + $0x10] sm:$0xff] %v19032_v10 }
 0x97a   :  { %v8599_v58 = vpop.f32.mrf.mxu0 }
 0x97b   :  { %v19033_v25 = vpack.c.bf16 %v8599_v58, %v8597_v55 }
 0x97c   :  { %v8603_v60 = vpop.f32.mrf.mxu0 }
 0x97d   :  { %8783 = vst [vmem:[#allocation2 + $0x18] sm:$0xff] %v19033_v25 }
 0x97e   :  { %v8605_v18 = vpop.f32.mrf.mxu0 }
 0x97f   :  { %v19034_v46 = vpack.c.bf16 %v8605_v18, %v8603_v60 }
 0x980   :  { %v8607_v43 = vpop.f32.mrf.mxu0 }
 0x981   :  { %8784 = vst [vmem:[#allocation2 + $0x20] sm:$0xff] %v19034_v46 }
 0x982   :  { %v8609_v27 = vpop.f32.mrf.mxu0 }
 0x983   :  { %v19035_v30 = vpack.c.bf16 %v8609_v27, %v8607_v43 }
 0x984   :  { %v8613_v62 = vpop.f32.mrf.mxu0 }
 0x985   :  { %8785 = vst [vmem:[#allocation2 + $0x28] sm:$0xff] %v19035_v30 }
 0x986   :  { %v8615_v11 = vpop.f32.mrf.mxu0 }
 0x987   :  { %v19036_v54 = vpack.c.bf16 %v8615_v11, %v8613_v62 }
 0x988   :  { %v8617_v34 = vpop.f32.mrf.mxu0 }
 0x989   :  { %8786 = vst [vmem:[#allocation2 + $0x30] sm:$0xff] %v19036_v54 }
 0x98a   :  { %v8619_v8 = vpop.f32.mrf.mxu0 }
 0x98b   :  { %v19037_v29 = vpack.c.bf16 %v8619_v8, %v8617_v34 }
 0x98c   :  { %v8623_v13 = vpop.f32.mrf.mxu0 }
 0x98d   :  { %8787 = vst [vmem:[#allocation2 + $0x38] sm:$0xff] %v19037_v29 }
 0x98e   :  { %v8625_v39 = vpop.f32.mrf.mxu0 }
 0x98f   :  { %v19038_v40 = vpack.c.bf16 %v8625_v39, %v8623_v13 }
 0x990   :  { %v8627_v15 = vpop.f32.mrf.mxu0 }
 0x991   :  { %8788 = vst [vmem:[#allocation2 + $0x40] sm:$0xff] %v19038_v40 }
 0x992   :  { %v8629_v31 = vpop.f32.mrf.mxu0 }
 0x993   :  { %v19039_v4 = vpack.c.bf16 %v8629_v31, %v8627_v15 }
 0x994   :  { %v8633_v48 = vpop.f32.mrf.mxu0 }
 0x995   :  { %8789 = vst [vmem:[#allocation2 + $0x48] sm:$0xff] %v19039_v4 }
 0x996   :  { %v8635_v57 = vpop.f32.mrf.mxu0 }
 0x997   :  { %v19040_v37 = vpack.c.bf16 %v8635_v57, %v8633_v48 }
 0x998   :  { %v8637_v61 = vpop.f32.mrf.mxu0 }
 0x999   :  { %8790 = vst [vmem:[#allocation2 + $0x50] sm:$0xff] %v19040_v37 }
 0x99a   :  { %v8639_v12 = vpop.f32.mrf.mxu0 }
 0x99b   :  { %v19041_v26 = vpack.c.bf16 %v8639_v12, %v8637_v61 }
 0x99c   :  { %v8643_v22 = vpop.f32.mrf.mxu0 }
 0x99d   :  { %8791 = vst [vmem:[#allocation2 + $0x58] sm:$0xff] %v19041_v26 }
 0x99e   :  { %v8645_v0 = vpop.f32.mrf.mxu0 }
 0x99f   :  { %v19042_v59 = vpack.c.bf16 %v8645_v0, %v8643_v22 }
 0x9a0   :  { %v8647_v35 = vpop.f32.mrf.mxu0 }
 0x9a1   :  { %8792 = vst [vmem:[#allocation2 + $0x60] sm:$0xff] %v19042_v59 }
 0x9a2   :  { %v8649_v33 = vpop.f32.mrf.mxu0 }
 0x9a3   :  { %v19043_v16 = vpack.c.bf16 %v8649_v33, %v8647_v35 }
 0x9a4   :  { %v8653_v56 = vpop.f32.mrf.mxu0 }
 0x9a5   :  { %8793 = vst [vmem:[#allocation2 + $0x68] sm:$0xff] %v19043_v16 }
 0x9a6   :  { %v8655_v51 = vpop.f32.mrf.mxu0 }
 0x9a7   :  { %v19044_v45 = vpack.c.bf16 %v8655_v51, %v8653_v56 }
 0x9a8   :  { %v8657_v3 = vpop.f32.mrf.mxu0 }
 0x9a9   :  { %8794 = vst [vmem:[#allocation2 + $0x70] sm:$0xff] %v19044_v45 }
 0x9aa   :  { %v8659_v21 = vpop.f32.mrf.mxu0 }
 0x9ab   :  { %v19045_v52 = vpack.c.bf16 %v8659_v21, %v8657_v3 }
 0x9ac   :  { %v8663_v42 = vpop.f32.mrf.mxu0 }
 0x9ad   :  { %8795 = vst [vmem:[#allocation2 + $0x78] sm:$0xff] %v19045_v52 }
 0x9ae   :  { %v8665_v23 = vpop.f32.mrf.mxu0 }
 0x9af   :  { %v19046_v49 = vpack.c.bf16 %v8665_v23, %v8663_v42 }
 0x9b0   :  { %v8667_v6 = vpop.f32.mrf.mxu0 }
 0x9b1   :  { %8796 = vst [vmem:[#allocation2 + $0x80] sm:$0xff] %v19046_v49 }
 0x9b2   :  { %v8669_v63 = vpop.f32.mrf.mxu0 }
 0x9b3   :  { %v19047_v2 = vpack.c.bf16 %v8669_v63, %v8667_v6 }
 0x9b5   :  { %8797 = vst [vmem:[#allocation2 + $0x88] sm:$0xff] %v19047_v2 }
 0x9b6   :  { %22498 = dma.done.wait [#allocation6 + $0x1], 36864 }
 0x9b7   :  { %22499 = vsyncadd [#allocation6 + $0x1], 4294930432  ;;  %8956 = vmatprep.mubr.bf16.mxu1 %v23520_v17  ;;  %9232 = vmatprep.mubr.bf16.mxu0 %v23520_v17  ;;  %v20863_v47 = vld [vmem:[#allocation4 + $0xf4] ss:$8 sps:$4 sm:$0xff]   ;;  %v20865_v38 = vld [vmem:[#allocation4 + $0xf0] ss:$8 sps:$4 sm:$0xff]  }
 0x9b8   :  { %8924 = vmatprep.subr.bf16.mxu1 %v20863_v47  ;;  %v20866_v32 = vld [vmem:[#allocation4 + $0xe4] ss:$8 sps:$4 sm:$0xff]   ;;  %v20868_v24 = vld [vmem:[#allocation4 + $0xe0] ss:$8 sps:$4 sm:$0xff]   ;;  %v20869_v50 = vld [vmem:[#allocation4 + $0xd4] ss:$8 sps:$4 sm:$0xff]  }
 0x9b9   :  { %8925 = vmatpush1.bf16.msra.mxu1 %v20865_v38  ;;  %v20871_v28 = vld [vmem:[#allocation4 + $0xd0] ss:$8 sps:$4 sm:$0xff]   ;;  %v20872_v41 = vld [vmem:[#allocation4 + $0xc4] ss:$8 sps:$4 sm:$0xff]   ;;  %v20874_v44 = vld [vmem:[#allocation4 + $0xc0] ss:$8 sps:$4 sm:$0xff]  }
 0x9ba   :  { %8926 = vmatprep.subr.bf16.mxu1 %v20866_v32  ;;  %v20875_v1 = vld [vmem:[#allocation4 + $0xb4] ss:$8 sps:$4 sm:$0xff]   ;;  %v20893_v14 = vld [vmem:[#allocation4 + $0x170] ss:$8 sps:$4 sm:$0xff]   ;;  %v20878_v20 = vld [vmem:[#allocation4 + $0xa4] ss:$8 sps:$4 sm:$0xff]  }
 0x9bb   :  { %v20891_v7 = vld [vmem:[#allocation4 + $0x174] ss:$8 sps:$4 sm:$0xff]   ;;  %v20877_v36 = vld [vmem:[#allocation4 + $0xb0] ss:$8 sps:$4 sm:$0xff]   ;;  %v20897_v53 = vld [vmem:[#allocation4 + $0x164] ss:$8 sps:$4 sm:$0xff]  }
 0x9bc   :  { %9200 = vmatprep.subr.bf16.mxu0 %v20891_v7  ;;  %v20899_v10 = vld [vmem:[#allocation4 + $0x160] ss:$8 sps:$4 sm:$0xff]   ;;  %v20903_v58 = vld [vmem:[#allocation4 + $0x154] ss:$8 sps:$4 sm:$0xff]   ;;  %v20905_v60 = vld [vmem:[#allocation4 + $0x150] ss:$8 sps:$4 sm:$0xff]  }
 0x9bd   :  { %8927 = vmatpush1.bf16.msra.mxu1 %v20868_v24  ;;  %9201 = vmatpush1.bf16.msra.mxu0 %v20893_v14  ;;  %v20880_v55 = vld [vmem:[#allocation4 + $0xa0] ss:$8 sps:$4 sm:$0xff]   ;;  %v20881_v25 = vld [vmem:[#allocation4 + $0x94] ss:$8 sps:$4 sm:$0xff]   ;;  %v20909_v18 = vld [vmem:[#allocation4 + $0x144] ss:$8 sps:$4 sm:$0xff]  }
 0x9be   :  { %8928 = vmatprep.subr.bf16.mxu1 %v20869_v50  ;;  %9202 = vmatprep.subr.bf16.mxu0 %v20897_v53  ;;  %v20883_v46 = vld [vmem:[#allocation4 + $0x90] ss:$8 sps:$4 sm:$0xff]   ;;  %v20884_v43 = vld [vmem:[#allocation4 + $0x84] ss:$8 sps:$4 sm:$0xff]   ;;  %v20911_v27 = vld [vmem:[#allocation4 + $0x140] ss:$8 sps:$4 sm:$0xff]  }
 0x9bf   :  { %v20915_v30 = vld [vmem:[#allocation4 + $0x134] ss:$8 sps:$4 sm:$0xff]   ;;  %v20886_v62 = vld [vmem:[#allocation4 + $0x80] ss:$8 sps:$4 sm:$0xff]   ;;  %v20917_v54 = vld [vmem:[#allocation4 + $0x130] ss:$8 sps:$4 sm:$0xff]  }
 0x9c0   :  { %v20890_v11 = vld [vmem:[#allocation4 + $0x74] ss:$8 sps:$4 sm:$0xff]   ;;  %v20921_v34 = vld [vmem:[#allocation4 + $0x124] ss:$8 sps:$4 sm:$0xff]   ;;  %v20888_v29 = vld [vmem:[#allocation4 + $0x70] ss:$8 sps:$4 sm:$0xff]  }
 0x9c1   :  { %8929 = vmatpush1.bf16.msra.mxu1 %v20871_v28  ;;  %9203 = vmatpush1.bf16.msra.mxu0 %v20899_v10  ;;  %v20887_v8 = vld [vmem:[#allocation2 + $0x4] ss:$8 sps:$4 sm:$0xff]   ;;  %v20923_v39 = vld [vmem:[#allocation4 + $0x120] ss:$8 sps:$4 sm:$0xff]   ;;  %v20927_v40 = vld [vmem:[#allocation4 + $0x114] ss:$8 sps:$4 sm:$0xff]  }
 0x9c2   :  { %8930 = vmatprep.subr.bf16.mxu1 %v20872_v41  ;;  %9204 = vmatprep.subr.bf16.mxu0 %v20903_v58  ;;  %v20896_v13 = vld [vmem:[#allocation4 + $0x64] ss:$8 sps:$4 sm:$0xff]   ;;  %v20894_v15 = vld [vmem:[#allocation4 + $0x60] ss:$8 sps:$4 sm:$0xff]   ;;  %v20902_v31 = vld [vmem:[#allocation4 + $0x54] ss:$8 sps:$4 sm:$0xff]  }
 0x9c3   :  { %v20929_v4 = vld [vmem:[#allocation4 + $0x110] ss:$8 sps:$4 sm:$0xff]   ;;  %v20933_v48 = vld [vmem:[#allocation4 + $0x104] ss:$8 sps:$4 sm:$0xff]   ;;  %v20935_v61 = vld [vmem:[#allocation4 + $0x100] ss:$8 sps:$4 sm:$0xff]  }
 0x9c4   :  { %v20900_v57 = vld [vmem:[#allocation4 + $0x50] ss:$8 sps:$4 sm:$0xff]   ;;  %v20908_v37 = vld [vmem:[#allocation4 + $0x44] ss:$8 sps:$4 sm:$0xff]   ;;  %v20943_v12 = vld [vmem:[#allocation4 + $0x274] ss:$8 sps:$4 sm:$0xff]  }
 0x9c5   :  { %8931 = vmatpush1.bf16.msra.mxu1 %v20874_v44  ;;  %9205 = vmatpush1.bf16.msra.mxu0 %v20905_v60  ;;  %v20906_v26 = vld [vmem:[#allocation4 + $0x40] ss:$8 sps:$4 sm:$0xff]   ;;  %v20914_v22 = vld [vmem:[#allocation4 + $0x34] ss:$8 sps:$4 sm:$0xff]   ;;  %v20940_v0 = vld [vmem:[#allocation2 + $0x10] ss:$8 sps:$4 sm:$0xff]  }
 0x9c6   :  { %8932 = vmatprep.subr.bf16.mxu1 %v20875_v1  ;;  %9206 = vmatprep.subr.bf16.mxu0 %v20909_v18  ;;  %v20941_v59 = vld [vmem:[#allocation4 + $0x270] ss:$8 sps:$4 sm:$0xff]   ;;  %v20949_v35 = vld [vmem:[#allocation4 + $0x264] ss:$8 sps:$4 sm:$0xff]   ;;  %v20947_v56 = vld [vmem:[#allocation4 + $0x260] ss:$8 sps:$4 sm:$0xff]  }
 0x9c7   :  { %v20912_v33 = vld [vmem:[#allocation4 + $0x30] ss:$8 sps:$4 sm:$0xff]   ;;  %v20920_v16 = vld [vmem:[#allocation4 + $0x24] ss:$8 sps:$4 sm:$0xff]   ;;  %v20955_v51 = vld [vmem:[#allocation4 + $0x254] ss:$8 sps:$4 sm:$0xff]  }
 0x9c8   :  { %v20918_v45 = vld [vmem:[#allocation4 + $0x20] ss:$8 sps:$4 sm:$0xff]   ;;  %v20926_v3 = vld [vmem:[#allocation4 + $0x14] ss:$8 sps:$4 sm:$0xff]   ;;  %v20953_v21 = vld [vmem:[#allocation4 + $0x250] ss:$8 sps:$4 sm:$0xff]  }
 0x9c9   :  { %8933 = vmatpush1.bf16.msra.mxu1 %v20877_v36  ;;  %9207 = vmatpush1.bf16.msra.mxu0 %v20911_v27  ;;  %v20961_v52 = vld [vmem:[#allocation4 + $0x244] ss:$8 sps:$4 sm:$0xff]   ;;  %v20924_v42 = vld [vmem:[#allocation4 + $0x10] ss:$8 sps:$4 sm:$0xff]   ;;  %v20959_v49 = vld [vmem:[#allocation4 + $0x240] ss:$8 sps:$4 sm:$0xff]  }
 0x9ca   :  { %8934 = vmatprep.subr.bf16.mxu1 %v20878_v20  ;;  %9208 = vmatprep.subr.bf16.mxu0 %v20915_v30  ;;  %v20932_v23 = vld [vmem:[#allocation4 + $0x4] ss:$8 sps:$4 sm:$0xff]   ;;  %v20967_v6 = vld [vmem:[#allocation4 + $0x234] ss:$8 sps:$4 sm:$0xff]   ;;  %v20930_v63 = vld [vmem:[#allocation4] ss:$8 sps:$4 sm:$0xff]  }
 0x9cb   :  { %v20939_v2 = vld [vmem:[#allocation4 + $0x1f4] ss:$8 sps:$4 sm:$0xff]   ;;  %v20965_v47 = vld [vmem:[#allocation4 + $0x230] ss:$8 sps:$4 sm:$0xff]   ;;  %v20973_v38 = vld [vmem:[#allocation4 + $0x224] ss:$8 sps:$4 sm:$0xff]  }
 0x9cc   :  { %v20936_v32 = vld [vmem:[#allocation2] ss:$8 sps:$4 sm:$0xff]   ;;  %v20937_v24 = vld [vmem:[#allocation4 + $0x1f0] ss:$8 sps:$4 sm:$0xff]   ;;  %v20946_v50 = vld [vmem:[#allocation4 + $0x1e4] ss:$8 sps:$4 sm:$0xff]  }
 0x9cd   :  { %8935 = vmatpush1.bf16.msra.mxu1 %v20880_v55  ;;  %9209 = vmatpush1.bf16.msra.mxu0 %v20917_v54  ;;  %v20971_v28 = vld [vmem:[#allocation4 + $0x220] ss:$8 sps:$4 sm:$0xff]   ;;  %v20979_v41 = vld [vmem:[#allocation4 + $0x214] ss:$8 sps:$4 sm:$0xff]   ;;  %v20977_v7 = vld [vmem:[#allocation4 + $0x210] ss:$8 sps:$4 sm:$0xff]  }
 0x9ce   :  { %8936 = vmatprep.subr.bf16.mxu1 %v20881_v25  ;;  %9210 = vmatprep.subr.bf16.mxu0 %v20921_v34  ;;  %v20944_v44 = vld [vmem:[#allocation4 + $0x1e0] ss:$8 sps:$4 sm:$0xff]   ;;  %v20952_v1 = vld [vmem:[#allocation4 + $0x1d4] ss:$8 sps:$4 sm:$0xff]   ;;  %v20985_v14 = vld [vmem:[#allocation4 + $0x204] ss:$8 sps:$4 sm:$0xff]  }
 0x9cf   :  { %v20950_v36 = vld [vmem:[#allocation4 + $0x1d0] ss:$8 sps:$4 sm:$0xff]   ;;  %v20958_v20 = vld [vmem:[#allocation4 + $0x1c4] ss:$8 sps:$4 sm:$0xff]   ;;  %v20983_v53 = vld [vmem:[#allocation4 + $0x200] ss:$8 sps:$4 sm:$0xff]  }
 0x9d0   :  { %v20993_v10 = vld [vmem:[#allocation4 + $0x374] ss:$8 sps:$4 sm:$0xff]   ;;  %v20956_v55 = vld [vmem:[#allocation4 + $0x1c0] ss:$8 sps:$4 sm:$0xff]   ;;  %v20991_v60 = vld [vmem:[#allocation4 + $0x370] ss:$8 sps:$4 sm:$0xff]  }
 0x9d1   :  { %8937 = vmatpush1.bf16.msra.mxu1 %v20883_v46  ;;  %9211 = vmatpush1.bf16.msra.mxu0 %v20923_v39  ;;  %v20990_v58 = vld [vmem:[#allocation2 + $0x20] ss:$8 sps:$4 sm:$0xff]   ;;  %v20964_v25 = vld [vmem:[#allocation4 + $0x1b4] ss:$8 sps:$4 sm:$0xff]   ;;  %v20999_v18 = vld [vmem:[#allocation4 + $0x364] ss:$8 sps:$4 sm:$0xff]  }
 0x9d2   :  { %8938 = vmatprep.subr.bf16.mxu1 %v20884_v43  ;;  %9212 = vmatprep.subr.bf16.mxu0 %v20927_v40  ;;  %v20962_v46 = vld [vmem:[#allocation4 + $0x1b0] ss:$8 sps:$4 sm:$0xff]   ;;  %v20970_v43 = vld [vmem:[#allocation4 + $0x1a4] ss:$8 sps:$4 sm:$0xff]   ;;  %v20997_v27 = vld [vmem:[#allocation4 + $0x360] ss:$8 sps:$4 sm:$0xff]  }
 0x9d3   :  { %v21005_v30 = vld [vmem:[#allocation4 + $0x354] ss:$8 sps:$4 sm:$0xff]   ;;  %v21003_v54 = vld [vmem:[#allocation4 + $0x350] ss:$8 sps:$4 sm:$0xff]   ;;  %v21011_v34 = vld [vmem:[#allocation4 + $0x344] ss:$8 sps:$4 sm:$0xff]  }
 0x9d4   :  { %v21017_v39 = vld [vmem:[#allocation4 + $0x334] ss:$8 sps:$4 sm:$0xff]   ;;  %v20980_v40 = vld [vmem:[#allocation4 + $0x180] ss:$8 sps:$4 sm:$0xff]   ;;  %vm11597_vm4 = vcmask 130048  }
 0x9d5   :  { %8939 = vmatpush1.bf16.msra.mxu1 %v20886_v62  ;;  %9213 = vmatpush1.bf16.msra.mxu0 %v20929_v4  ;;  %v20968_v62 = vld [vmem:[#allocation4 + $0x1a0] ss:$8 sps:$4 sm:$0xff]   ;;  %v21023_v4 = vld [vmem:[#allocation4 + $0x324] ss:$8 sps:$4 sm:$0xff]  }
 0x9d6   :  { %9053 = vmatprep.subr.bf16.mxu1 %v20890_v11  ;;  %9214 = vmatprep.subr.bf16.mxu0 %v20933_v48  ;;  %v20976_v11 = vld [vmem:[#allocation4 + $0x194] ss:$8 sps:$4 sm:$0xff]  }
 0x9d7   :  { %v20986_v48 = vld [vmem:[#allocation2 + $0x14] ss:$8 sps:$4 sm:$0xff]  }
 0x9d8   :  { %8957 = vmatmul.mubr.bf16.vlgmr.msra.gmra.mxu1 %v20887_v8  ;;  %v20974_v8 = vld [vmem:[#allocation4 + $0x190] ss:$8 sps:$4 sm:$0xff]  }
 0x9d9   :  { %9054 = vmatpush1.bf16.msra.mxu1 %v20888_v29  ;;  %9085 = vmatprep.mubr.bf16.mxu1 %v23520_v17  ;;  %v20982_v29 = vld [vmem:[#allocation4 + $0x184] ss:$8 sps:$4 sm:$0xff]  }
 0x9da   :  { %9055 = vmatprep.subr.bf16.mxu1 %v20896_v13  ;;  %9215 = vmatpush1.bf16.msra.mxu0 %v20935_v61  ;;  %v21009_v13 = vld [vmem:[#allocation4 + $0x340] ss:$8 sps:$4 sm:$0xff]  }
 0x9db   :  { %9502 = vmatprep.subr.bf16.mxu0 %v20943_v12  ;;  %v21021_v61 = vld [vmem:[#allocation4 + $0x320] ss:$8 sps:$4 sm:$0xff]   ;;  %v21029_v12 = vld [vmem:[#allocation4 + $0x314] ss:$8 sps:$4 sm:$0xff]  }
 0x9dd   :  { %9056 = vmatpush1.bf16.msra.mxu1 %v20894_v15  ;;  %9233 = vmatmul.mubr.bf16.vlgmr.msra.gmra.mxu0 %v20940_v0  ;;  %v20989_v15 = vld [vmem:[#allocation4 + $0x2f4] ss:$8 sps:$4 sm:$0xff]   ;;  %v21027_v0 = vld [vmem:[#allocation4 + $0x310] ss:$8 sps:$4 sm:$0xff]  }
 0x9de   :  { %9057 = vmatprep.subr.bf16.mxu1 %v20902_v31  ;;  %9503 = vmatpush1.bf16.msra.mxu0 %v20941_v59  ;;  %v21015_v31 = vld [vmem:[#allocation4 + $0x330] ss:$8 sps:$4 sm:$0xff]   ;;  %v21035_v59 = vld [vmem:[#allocation4 + $0x304] ss:$8 sps:$4 sm:$0xff]  }
 0x9df   :  { %9504 = vmatprep.subr.bf16.mxu0 %v20949_v35  ;;  %9534 = vmatprep.mubr.bf16.mxu0 %v23520_v17  ;;  %v21000_v35 = vld [vmem:[#allocation4 + $0x2d0] ss:$8 sps:$4 sm:$0xff]  }
 0x9e1   :  { %9058 = vmatpush1.bf16.msra.mxu1 %v20900_v57  ;;  %v20987_v57 = vld [vmem:[#allocation4 + $0x2f0] ss:$8 sps:$4 sm:$0xff]  }
 0x9e2   :  { %9059 = vmatprep.subr.bf16.mxu1 %v20908_v37  ;;  %9505 = vmatpush1.bf16.msra.mxu0 %v20947_v56  ;;  %v20996_v37 = vld [vmem:[#allocation4 + $0x2e4] ss:$8 sps:$4 sm:$0xff]   ;;  %v21043_v56 = vld [vmem:[#allocation4 + $0x474] ss:$8 sps:$4 sm:$0xff]  }
 0x9e3   :  { %9506 = vmatprep.subr.bf16.mxu0 %v20955_v51  ;;  %v21006_v51 = vld [vmem:[#allocation4 + $0x2c0] ss:$8 sps:$4 sm:$0xff]  }
 0x9e5   :  { %9060 = vmatpush1.bf16.msra.mxu1 %v20906_v26  ;;  %v20994_v26 = vld [vmem:[#allocation4 + $0x2e0] ss:$8 sps:$4 sm:$0xff]  }
 0x9e6   :  { %9061 = vmatprep.subr.bf16.mxu1 %v20914_v22  ;;  %9507 = vmatpush1.bf16.msra.mxu0 %v20953_v21  ;;  %v21002_v22 = vld [vmem:[#allocation4 + $0x2d4] ss:$8 sps:$4 sm:$0xff]   ;;  %v21041_v21 = vld [vmem:[#allocation4 + $0x470] ss:$8 sps:$4 sm:$0xff]  }
 0x9e7   :  { %9508 = vmatprep.subr.bf16.mxu0 %v20961_v52  ;;  %v21049_v52 = vld [vmem:[#allocation4 + $0x464] ss:$8 sps:$4 sm:$0xff]  }
 0x9e9   :  { %9062 = vmatpush1.bf16.msra.mxu1 %v20912_v33  ;;  %v21008_v33 = vld [vmem:[#allocation4 + $0x2c4] ss:$8 sps:$4 sm:$0xff]  }
 0x9ea   :  { %9063 = vmatprep.subr.bf16.mxu1 %v20920_v16  ;;  %9509 = vmatpush1.bf16.msra.mxu0 %v20959_v49  ;;  %v21033_v16 = vld [vmem:[#allocation4 + $0x300] ss:$8 sps:$4 sm:$0xff]  }
 0x9eb   :  { %9510 = vmatprep.subr.bf16.mxu0 %v20967_v6  ;;  %v21047_v49 = vld [vmem:[#allocation4 + $0x460] ss:$8 sps:$4 sm:$0xff]   ;;  %v21055_v6 = vld [vmem:[#allocation4 + $0x454] ss:$8 sps:$4 sm:$0xff]  }
 0x9ed   :  { %9064 = vmatpush1.bf16.msra.mxu1 %v20918_v45  ;;  %v21040_v45 = vld [vmem:[#allocation2 + $0x30] ss:$8 sps:$4 sm:$0xff]  }
 0x9ee   :  { %9065 = vmatprep.subr.bf16.mxu1 %v20926_v3  ;;  %9511 = vmatpush1.bf16.msra.mxu0 %v20965_v47  ;;  %v21014_v3 = vld [vmem:[#allocation4 + $0x2b4] ss:$8 sps:$4 sm:$0xff]   ;;  %v21053_v47 = vld [vmem:[#allocation4 + $0x450] ss:$8 sps:$4 sm:$0xff]  }
 0x9ef   :  { %9512 = vmatprep.subr.bf16.mxu0 %v20973_v38  ;;  %v21061_v38 = vld [vmem:[#allocation4 + $0x444] ss:$8 sps:$4 sm:$0xff]  }
 0x9f1   :  { %9066 = vmatpush1.bf16.msra.mxu1 %v20924_v42  ;;  %v21012_v42 = vld [vmem:[#allocation4 + $0x2b0] ss:$8 sps:$4 sm:$0xff]  }
 0x9f2   :  { %9067 = vmatprep.subr.bf16.mxu1 %v20932_v23  ;;  %9513 = vmatpush1.bf16.msra.mxu0 %v20971_v28  ;;  %v21020_v23 = vld [vmem:[#allocation4 + $0x2a4] ss:$8 sps:$4 sm:$0xff]   ;;  %v21067_v28 = vld [vmem:[#allocation4 + $0x434] ss:$8 sps:$4 sm:$0xff]  }
 0x9f3   :  { %9514 = vmatprep.subr.bf16.mxu0 %v20979_v41  ;;  %v21030_v41 = vld [vmem:[#allocation4 + $0x280] ss:$8 sps:$4 sm:$0xff]  }
 0x9f5   :  { %9068 = vmatpush1.bf16.msra.mxu1 %v20930_v63  ;;  %v21018_v63 = vld [vmem:[#allocation4 + $0x2a0] ss:$8 sps:$4 sm:$0xff]  }
 0x9f6   :  { %9351 = vmatprep.subr.bf16.mxu1 %v20939_v2  ;;  %9515 = vmatpush1.bf16.msra.mxu0 %v20977_v7  ;;  %v21026_v2 = vld [vmem:[#allocation4 + $0x294] ss:$8 sps:$4 sm:$0xff]   ;;  %v21073_v7 = vld [vmem:[#allocation4 + $0x424] ss:$8 sps:$4 sm:$0xff]  }
 0x9f7   :  { %9516 = vmatprep.subr.bf16.mxu0 %v20985_v14  ;;  %v21036_v14 = vld [vmem:[#allocation2 + $0x24] ss:$8 sps:$4 sm:$0xff]  }
 0x9f8   :  { %9086 = vmatmul.mubr.bf16.vlgmr.msra.gmra.mxu1 %v20936_v32  ;;  %v21024_v32 = vld [vmem:[#allocation4 + $0x290] ss:$8 sps:$4 sm:$0xff]  }
 0x9f9   :  { %9352 = vmatpush1.bf16.msra.mxu1 %v20937_v24  ;;  %9383 = vmatprep.mubr.bf16.mxu1 %v23520_v17  ;;  %v21032_v24 = vld [vmem:[#allocation4 + $0x284] ss:$8 sps:$4 sm:$0xff]  }
 0x9fa   :  { %9353 = vmatprep.subr.bf16.mxu1 %v20946_v50  ;;  %9517 = vmatpush1.bf16.msra.mxu0 %v20983_v53  ;;  %v21059_v50 = vld [vmem:[#allocation4 + $0x440] ss:$8 sps:$4 sm:$0xff]  }
 0x9fb   :  { %9804 = vmatprep.subr.bf16.mxu0 %v20993_v10  ;;  %v21071_v53 = vld [vmem:[#allocation4 + $0x420] ss:$8 sps:$4 sm:$0xff]   ;;  %v21079_v10 = vld [vmem:[#allocation4 + $0x414] ss:$8 sps:$4 sm:$0xff]  }
 0x9fd   :  { %9354 = vmatpush1.bf16.msra.mxu1 %v20944_v44  ;;  %9535 = vmatmul.mubr.bf16.vlgmr.msra.gmra.mxu0 %v20990_v58  ;;  %v21039_v44 = vld [vmem:[#allocation4 + $0x3f4] ss:$8 sps:$4 sm:$0xff]  }
 0x9fe   :  { %9355 = vmatprep.subr.bf16.mxu1 %v20952_v1  ;;  %9805 = vmatpush1.bf16.msra.mxu0 %v20991_v60  ;;  %v21065_v1 = vld [vmem:[#allocation4 + $0x430] ss:$8 sps:$4 sm:$0xff]   ;;  %v21052_v58 = vld [vmem:[#allocation4 + $0x3d4] ss:$8 sps:$4 sm:$0xff]   ;;  %v21085_v60 = vld [vmem:[#allocation4 + $0x404] ss:$8 sps:$4 sm:$0xff]  }
 0x9ff   :  { %9806 = vmatprep.subr.bf16.mxu0 %v20999_v18  ;;  %9836 = vmatprep.mubr.bf16.mxu0 %v23520_v17  ;;  %v21050_v18 = vld [vmem:[#allocation4 + $0x3d0] ss:$8 sps:$4 sm:$0xff]  }
 0xa01   :  { %9356 = vmatpush1.bf16.msra.mxu1 %v20950_v36  ;;  %v21037_v36 = vld [vmem:[#allocation4 + $0x3f0] ss:$8 sps:$4 sm:$0xff]  }
 0xa02   :  { %9357 = vmatprep.subr.bf16.mxu1 %v20958_v20  ;;  %9807 = vmatpush1.bf16.msra.mxu0 %v20997_v27  ;;  %v21046_v20 = vld [vmem:[#allocation4 + $0x3e4] ss:$8 sps:$4 sm:$0xff]   ;;  %v21093_v27 = vld [vmem:[#allocation4 + $0x574] ss:$8 sps:$4 sm:$0xff]  }
 0xa03   :  { %9808 = vmatprep.subr.bf16.mxu0 %v21005_v30  ;;  %v21056_v30 = vld [vmem:[#allocation4 + $0x3c0] ss:$8 sps:$4 sm:$0xff]  }
 0xa05   :  { %9358 = vmatpush1.bf16.msra.mxu1 %v20956_v55  ;;  %v21044_v55 = vld [vmem:[#allocation4 + $0x3e0] ss:$8 sps:$4 sm:$0xff]  }
 0xa06   :  { %9359 = vmatprep.subr.bf16.mxu1 %v20964_v25  ;;  %9809 = vmatpush1.bf16.msra.mxu0 %v21003_v54  ;;  %v21077_v25 = vld [vmem:[#allocation4 + $0x410] ss:$8 sps:$4 sm:$0xff]  }
 0xa07   :  { %9810 = vmatprep.subr.bf16.mxu0 %v21011_v34  ;;  %v21091_v54 = vld [vmem:[#allocation4 + $0x570] ss:$8 sps:$4 sm:$0xff]   ;;  %v21099_v34 = vld [vmem:[#allocation4 + $0x564] ss:$8 sps:$4 sm:$0xff]  }
 0xa09   :  { %9360 = vmatpush1.bf16.msra.mxu1 %v20962_v46  ;;  %v21058_v46 = vld [vmem:[#allocation4 + $0x3c4] ss:$8 sps:$4 sm:$0xff]  }
 0xa0a   :  { %9361 = vmatprep.subr.bf16.mxu1 %v20970_v43  ;;  %9811 = vmatpush1.bf16.msra.mxu0 %v21009_v13  ;;  %v21083_v43 = vld [vmem:[#allocation4 + $0x400] ss:$8 sps:$4 sm:$0xff]  }
 0xa0b   :  { %9812 = vmatprep.subr.bf16.mxu0 %v21017_v39  ;;  %v21097_v13 = vld [vmem:[#allocation4 + $0x560] ss:$8 sps:$4 sm:$0xff]   ;;  %v21105_v39 = vld [vmem:[#allocation4 + $0x554] ss:$8 sps:$4 sm:$0xff]  }
 0xa0d   :  { %9362 = vmatpush1.bf16.msra.mxu1 %v20968_v62  ;;  %v21064_v62 = vld [vmem:[#allocation4 + $0x3b4] ss:$8 sps:$4 sm:$0xff]  }
 0xa0e   :  { %9363 = vmatprep.subr.bf16.mxu1 %v20976_v11  ;;  %9813 = vmatpush1.bf16.msra.mxu0 %v21015_v31  ;;  %v21090_v11 = vld [vmem:[#allocation2 + $0x40] ss:$8 sps:$4 sm:$0xff]   ;;  %v21103_v31 = vld [vmem:[#allocation4 + $0x550] ss:$8 sps:$4 sm:$0xff]  }
 0xa0f   :  { %9814 = vmatprep.subr.bf16.mxu0 %v21023_v4  ;;  %v21111_v4 = vld [vmem:[#allocation4 + $0x544] ss:$8 sps:$4 sm:$0xff]  }
 0xa11   :  { %9364 = vmatpush1.bf16.msra.mxu1 %v20974_v8  ;;  %v21062_v8 = vld [vmem:[#allocation4 + $0x3b0] ss:$8 sps:$4 sm:$0xff]  }
 0xa12   :  { %9365 = vmatprep.subr.bf16.mxu1 %v20982_v29  ;;  %9815 = vmatpush1.bf16.msra.mxu0 %v21021_v61  ;;  %v21070_v29 = vld [vmem:[#allocation4 + $0x3a4] ss:$8 sps:$4 sm:$0xff]   ;;  %v21117_v61 = vld [vmem:[#allocation4 + $0x534] ss:$8 sps:$4 sm:$0xff]  }
 0xa13   :  { %9816 = vmatprep.subr.bf16.mxu0 %v21029_v12  ;;  %v21080_v12 = vld [vmem:[#allocation4 + $0x380] ss:$8 sps:$4 sm:$0xff]  }
 0xa15   :  { %9366 = vmatpush1.bf16.msra.mxu1 %v20980_v40  ;;  %v21068_v40 = vld [vmem:[#allocation4 + $0x3a0] ss:$8 sps:$4 sm:$0xff]  }
 0xa16   :  { %9653 = vmatprep.subr.bf16.mxu1 %v20989_v15  ;;  %9817 = vmatpush1.bf16.msra.mxu0 %v21027_v0  ;;  %v21076_v15 = vld [vmem:[#allocation4 + $0x394] ss:$8 sps:$4 sm:$0xff]   ;;  %v21123_v0 = vld [vmem:[#allocation4 + $0x524] ss:$8 sps:$4 sm:$0xff]  }
 0xa17   :  { %9818 = vmatprep.subr.bf16.mxu0 %v21035_v59  ;;  %v21086_v59 = vld [vmem:[#allocation2 + $0x34] ss:$8 sps:$4 sm:$0xff]  }
 0xa18   :  { %9384 = vmatmul.mubr.bf16.vlgmr.msra.gmra.mxu1 %v20986_v48  ;;  %v21074_v48 = vld [vmem:[#allocation4 + $0x390] ss:$8 sps:$4 sm:$0xff]  }
 0xa19   :  { %9654 = vmatpush1.bf16.msra.mxu1 %v20987_v57  ;;  %9685 = vmatprep.mubr.bf16.mxu1 %v23520_v17  ;;  %v21082_v57 = vld [vmem:[#allocation4 + $0x384] ss:$8 sps:$4 sm:$0xff]  }
 0xa1a   :  { %9655 = vmatprep.subr.bf16.mxu1 %v20996_v37  ;;  %9819 = vmatpush1.bf16.msra.mxu0 %v21033_v16  ;;  %v21109_v37 = vld [vmem:[#allocation4 + $0x540] ss:$8 sps:$4 sm:$0xff]  }
 0xa1b   :  { %10106 = vmatprep.subr.bf16.mxu0 %v21043_v56  ;;  %v21121_v16 = vld [vmem:[#allocation4 + $0x520] ss:$8 sps:$4 sm:$0xff]   ;;  %v21129_v56 = vld [vmem:[#allocation4 + $0x514] ss:$8 sps:$4 sm:$0xff]  }
 0xa1d   :  { %9656 = vmatpush1.bf16.msra.mxu1 %v20994_v26  ;;  %9837 = vmatmul.mubr.bf16.vlgmr.msra.gmra.mxu0 %v21040_v45  ;;  %v21089_v26 = vld [vmem:[#allocation4 + $0x4f4] ss:$8 sps:$4 sm:$0xff]  }
 0xa1e   :  { %9657 = vmatprep.subr.bf16.mxu1 %v21002_v22  ;;  %10107 = vmatpush1.bf16.msra.mxu0 %v21041_v21  ;;  %v21115_v22 = vld [vmem:[#allocation4 + $0x530] ss:$8 sps:$4 sm:$0xff]   ;;  %v21102_v45 = vld [vmem:[#allocation4 + $0x4d4] ss:$8 sps:$4 sm:$0xff]   ;;  %v21135_v21 = vld [vmem:[#allocation4 + $0x504] ss:$8 sps:$4 sm:$0xff]  }
 0xa1f   :  { %10108 = vmatprep.subr.bf16.mxu0 %v21049_v52  ;;  %10138 = vmatprep.mubr.bf16.mxu0 %v23520_v17  ;;  %v21100_v52 = vld [vmem:[#allocation4 + $0x4d0] ss:$8 sps:$4 sm:$0xff]  }
 0xa21   :  { %9658 = vmatpush1.bf16.msra.mxu1 %v21000_v35  ;;  %v21087_v35 = vld [vmem:[#allocation4 + $0x4f0] ss:$8 sps:$4 sm:$0xff]  }
 0xa22   :  { %9659 = vmatprep.subr.bf16.mxu1 %v21008_v33  ;;  %10109 = vmatpush1.bf16.msra.mxu0 %v21047_v49  ;;  %v21096_v33 = vld [vmem:[#allocation4 + $0x4e4] ss:$8 sps:$4 sm:$0xff]   ;;  %v21143_v49 = vld [vmem:[#allocation4 + $0x674] ss:$8 sps:$4 sm:$0xff]  }
 0xa23   :  { %10110 = vmatprep.subr.bf16.mxu0 %v21055_v6  ;;  %v21106_v6 = vld [vmem:[#allocation4 + $0x4c0] ss:$8 sps:$4 sm:$0xff]  }
 0xa25   :  { %9660 = vmatpush1.bf16.msra.mxu1 %v21006_v51  ;;  %v21094_v51 = vld [vmem:[#allocation4 + $0x4e0] ss:$8 sps:$4 sm:$0xff]  }
 0xa26   :  { %9661 = vmatprep.subr.bf16.mxu1 %v21014_v3  ;;  %10111 = vmatpush1.bf16.msra.mxu0 %v21053_v47  ;;  %v21127_v3 = vld [vmem:[#allocation4 + $0x510] ss:$8 sps:$4 sm:$0xff]  }
 0xa27   :  { %10112 = vmatprep.subr.bf16.mxu0 %v21061_v38  ;;  %v21141_v47 = vld [vmem:[#allocation4 + $0x670] ss:$8 sps:$4 sm:$0xff]   ;;  %v21149_v38 = vld [vmem:[#allocation4 + $0x664] ss:$8 sps:$4 sm:$0xff]  }
 0xa29   :  { %9662 = vmatpush1.bf16.msra.mxu1 %v21012_v42  ;;  %v21108_v42 = vld [vmem:[#allocation4 + $0x4c4] ss:$8 sps:$4 sm:$0xff]  }
 0xa2a   :  { %9663 = vmatprep.subr.bf16.mxu1 %v21020_v23  ;;  %10113 = vmatpush1.bf16.msra.mxu0 %v21059_v50  ;;  %v21133_v23 = vld [vmem:[#allocation4 + $0x500] ss:$8 sps:$4 sm:$0xff]  }
 0xa2b   :  { %10114 = vmatprep.subr.bf16.mxu0 %v21067_v28  ;;  %v21147_v50 = vld [vmem:[#allocation4 + $0x660] ss:$8 sps:$4 sm:$0xff]   ;;  %v21155_v28 = vld [vmem:[#allocation4 + $0x654] ss:$8 sps:$4 sm:$0xff]  }
 0xa2d   :  { %9664 = vmatpush1.bf16.msra.mxu1 %v21018_v63  ;;  %v21140_v63 = vld [vmem:[#allocation2 + $0x50] ss:$8 sps:$4 sm:$0xff]  }
 0xa2e   :  { %9665 = vmatprep.subr.bf16.mxu1 %v21026_v2  ;;  %10115 = vmatpush1.bf16.msra.mxu0 %v21065_v1  ;;  %v21114_v2 = vld [vmem:[#allocation4 + $0x4b4] ss:$8 sps:$4 sm:$0xff]   ;;  %v21153_v1 = vld [vmem:[#allocation4 + $0x650] ss:$8 sps:$4 sm:$0xff]  }
 0xa2f   :  { %10116 = vmatprep.subr.bf16.mxu0 %v21073_v7  ;;  %v21161_v7 = vld [vmem:[#allocation4 + $0x644] ss:$8 sps:$4 sm:$0xff]  }
 0xa31   :  { %9666 = vmatpush1.bf16.msra.mxu1 %v21024_v32  ;;  %v21112_v32 = vld [vmem:[#allocation4 + $0x4b0] ss:$8 sps:$4 sm:$0xff]  }
 0xa32   :  { %9667 = vmatprep.subr.bf16.mxu1 %v21032_v24  ;;  %10117 = vmatpush1.bf16.msra.mxu0 %v21071_v53  ;;  %v21120_v24 = vld [vmem:[#allocation4 + $0x4a4] ss:$8 sps:$4 sm:$0xff]   ;;  %v21167_v53 = vld [vmem:[#allocation4 + $0x634] ss:$8 sps:$4 sm:$0xff]  }
 0xa33   :  { %10118 = vmatprep.subr.bf16.mxu0 %v21079_v10  ;;  %v21130_v10 = vld [vmem:[#allocation4 + $0x480] ss:$8 sps:$4 sm:$0xff]  }
 0xa35   :  { %9668 = vmatpush1.bf16.msra.mxu1 %v21030_v41  ;;  %v21118_v41 = vld [vmem:[#allocation4 + $0x4a0] ss:$8 sps:$4 sm:$0xff]  }
 0xa36   :  { %9955 = vmatprep.subr.bf16.mxu1 %v21039_v44  ;;  %10119 = vmatpush1.bf16.msra.mxu0 %v21077_v25  ;;  %v21126_v44 = vld [vmem:[#allocation4 + $0x494] ss:$8 sps:$4 sm:$0xff]   ;;  %v21173_v25 = vld [vmem:[#allocation4 + $0x624] ss:$8 sps:$4 sm:$0xff]  }
 0xa37   :  { %10120 = vmatprep.subr.bf16.mxu0 %v21085_v60  ;;  %v21136_v60 = vld [vmem:[#allocation2 + $0x44] ss:$8 sps:$4 sm:$0xff]  }
 0xa38   :  { %9686 = vmatmul.mubr.bf16.vlgmr.msra.gmra.mxu1 %v21036_v14  ;;  %v21124_v14 = vld [vmem:[#allocation4 + $0x490] ss:$8 sps:$4 sm:$0xff]  }
 0xa39   :  { %9956 = vmatpush1.bf16.msra.mxu1 %v21037_v36  ;;  %9987 = vmatprep.mubr.bf16.mxu1 %v23520_v17  ;;  %v21132_v36 = vld [vmem:[#allocation4 + $0x484] ss:$8 sps:$4 sm:$0xff]  }
 0xa3a   :  { %9957 = vmatprep.subr.bf16.mxu1 %v21046_v20  ;;  %10121 = vmatpush1.bf16.msra.mxu0 %v21083_v43  ;;  %v21159_v20 = vld [vmem:[#allocation4 + $0x640] ss:$8 sps:$4 sm:$0xff]  }
 0xa3b   :  { %10408 = vmatprep.subr.bf16.mxu0 %v21093_v27  ;;  %v21171_v43 = vld [vmem:[#allocation4 + $0x620] ss:$8 sps:$4 sm:$0xff]   ;;  %v21179_v27 = vld [vmem:[#allocation4 + $0x614] ss:$8 sps:$4 sm:$0xff]  }
 0xa3d   :  { %9958 = vmatpush1.bf16.msra.mxu1 %v21044_v55  ;;  %10139 = vmatmul.mubr.bf16.vlgmr.msra.gmra.mxu0 %v21090_v11  ;;  %v21139_v55 = vld [vmem:[#allocation4 + $0x5f4] ss:$8 sps:$4 sm:$0xff]   ;;  %v21177_v11 = vld [vmem:[#allocation4 + $0x610] ss:$8 sps:$4 sm:$0xff]  }
 0xa3e   :  { %9959 = vmatprep.subr.bf16.mxu1 %v21052_v58  ;;  %10409 = vmatpush1.bf16.msra.mxu0 %v21091_v54  ;;  %v21165_v58 = vld [vmem:[#allocation4 + $0x630] ss:$8 sps:$4 sm:$0xff]   ;;  %v21185_v54 = vld [vmem:[#allocation4 + $0x604] ss:$8 sps:$4 sm:$0xff]  }
 0xa3f   :  { %10410 = vmatprep.subr.bf16.mxu0 %v21099_v34  ;;  %10440 = vmatprep.mubr.bf16.mxu0 %v23520_v17  ;;  %v21150_v34 = vld [vmem:[#allocation4 + $0x5d0] ss:$8 sps:$4 sm:$0xff]  }
 0xa41   :  { %9960 = vmatpush1.bf16.msra.mxu1 %v21050_v18  ;;  %v21137_v18 = vld [vmem:[#allocation4 + $0x5f0] ss:$8 sps:$4 sm:$0xff]  }
 0xa42   :  { %9961 = vmatprep.subr.bf16.mxu1 %v21058_v46  ;;  %10411 = vmatpush1.bf16.msra.mxu0 %v21097_v13  ;;  %v21146_v46 = vld [vmem:[#allocation4 + $0x5e4] ss:$8 sps:$4 sm:$0xff]   ;;  %v21193_v13 = vld [vmem:[#allocation4 + $0x774] ss:$8 sps:$4 sm:$0xff]  }
 0xa43   :  { %10412 = vmatprep.subr.bf16.mxu0 %v21105_v39  ;;  %v21156_v39 = vld [vmem:[#allocation4 + $0x5c0] ss:$8 sps:$4 sm:$0xff]  }
 0xa45   :  { %9962 = vmatpush1.bf16.msra.mxu1 %v21056_v30  ;;  %v21144_v30 = vld [vmem:[#allocation4 + $0x5e0] ss:$8 sps:$4 sm:$0xff]  }
 0xa46   :  { %9963 = vmatprep.subr.bf16.mxu1 %v21064_v62  ;;  %10413 = vmatpush1.bf16.msra.mxu0 %v21103_v31  ;;  %v21152_v62 = vld [vmem:[#allocation4 + $0x5d4] ss:$8 sps:$4 sm:$0xff]   ;;  %v21191_v31 = vld [vmem:[#allocation4 + $0x770] ss:$8 sps:$4 sm:$0xff]  }
 0xa47   :  { %10414 = vmatprep.subr.bf16.mxu0 %v21111_v4  ;;  %v21199_v4 = vld [vmem:[#allocation4 + $0x764] ss:$8 sps:$4 sm:$0xff]  }
 0xa49   :  { %9964 = vmatpush1.bf16.msra.mxu1 %v21062_v8  ;;  %v21158_v8 = vld [vmem:[#allocation4 + $0x5c4] ss:$8 sps:$4 sm:$0xff]  }
 0xa4a   :  { %9965 = vmatprep.subr.bf16.mxu1 %v21070_v29  ;;  %10415 = vmatpush1.bf16.msra.mxu0 %v21109_v37  ;;  %v21183_v29 = vld [vmem:[#allocation4 + $0x600] ss:$8 sps:$4 sm:$0xff]  }
 0xa4b   :  { %10416 = vmatprep.subr.bf16.mxu0 %v21117_v61  ;;  %v21197_v37 = vld [vmem:[#allocation4 + $0x760] ss:$8 sps:$4 sm:$0xff]  }
 0xa4c   :  { %v21168_v61 = vld [vmem:[#allocation4 + $0x5a0] ss:$8 sps:$4 sm:$0xff]  }
 0xa4d   :  { %9966 = vmatpush1.bf16.msra.mxu1 %v21068_v40  ;;  %v21190_v40 = vld [vmem:[#allocation2 + $0x60] ss:$8 sps:$4 sm:$0xff]  }
 0xa4e   :  { %9967 = vmatprep.subr.bf16.mxu1 %v21076_v15  ;;  %10417 = vmatpush1.bf16.msra.mxu0 %v21115_v22  ;;  %v21164_v15 = vld [vmem:[#allocation4 + $0x5b4] ss:$8 sps:$4 sm:$0xff]   ;;  %v21203_v22 = vld [vmem:[#allocation4 + $0x750] ss:$8 sps:$4 sm:$0xff]  }
 0xa4f   :  { %10418 = vmatprep.subr.bf16.mxu0 %v21123_v0  ;;  %v21211_v0 = vld [vmem:[#allocation4 + $0x744] ss:$8 sps:$4 sm:$0xff]  }
 0xa51   :  { %9968 = vmatpush1.bf16.msra.mxu1 %v21074_v48  ;;  %v21162_v48 = vld [vmem:[#allocation4 + $0x5b0] ss:$8 sps:$4 sm:$0xff]  }
 0xa52   :  { %9969 = vmatprep.subr.bf16.mxu1 %v21082_v57  ;;  %10419 = vmatpush1.bf16.msra.mxu0 %v21121_v16  ;;  %v21170_v57 = vld [vmem:[#allocation4 + $0x5a4] ss:$8 sps:$4 sm:$0xff]   ;;  %v21217_v16 = vld [vmem:[#allocation4 + $0x734] ss:$8 sps:$4 sm:$0xff]  }
 0xa53   :  { %10420 = vmatprep.subr.bf16.mxu0 %v21129_v56  ;;  %v21180_v56 = vld [vmem:[#allocation4 + $0x580] ss:$8 sps:$4 sm:$0xff]  }
 0xa55   :  { %9970 = vmatpush1.bf16.msra.mxu1 %v21080_v12  ;;  %v21205_v12 = vld [vmem:[#allocation4 + $0x754] ss:$8 sps:$4 sm:$0xff]  }
 0xa56   :  { %10257 = vmatprep.subr.bf16.mxu1 %v21089_v26  ;;  %10421 = vmatpush1.bf16.msra.mxu0 %v21127_v3  ;;  %v21176_v26 = vld [vmem:[#allocation4 + $0x594] ss:$8 sps:$4 sm:$0xff]   ;;  %v21223_v3 = vld [vmem:[#allocation4 + $0x724] ss:$8 sps:$4 sm:$0xff]  }
 0xa57   :  { %10422 = vmatprep.subr.bf16.mxu0 %v21135_v21  ;;  %v21186_v21 = vld [vmem:[#allocation2 + $0x54] ss:$8 sps:$4 sm:$0xff]  }
 0xa58   :  { %9988 = vmatmul.mubr.bf16.vlgmr.msra.gmra.mxu1 %v21086_v59  ;;  %v21174_v59 = vld [vmem:[#allocation4 + $0x590] ss:$8 sps:$4 sm:$0xff]  }
 0xa59   :  { %10258 = vmatpush1.bf16.msra.mxu1 %v21087_v35  ;;  %10289 = vmatprep.mubr.bf16.mxu1 %v23520_v17  ;;  %v21182_v35 = vld [vmem:[#allocation4 + $0x584] ss:$8 sps:$4 sm:$0xff]  }
 0xa5a   :  { %10259 = vmatprep.subr.bf16.mxu1 %v21096_v33  ;;  %10423 = vmatpush1.bf16.msra.mxu0 %v21133_v23  ;;  %v21209_v33 = vld [vmem:[#allocation4 + $0x740] ss:$8 sps:$4 sm:$0xff]  }
 0xa5b   :  { %10710 = vmatprep.subr.bf16.mxu0 %v21143_v49  ;;  %v21221_v23 = vld [vmem:[#allocation4 + $0x720] ss:$8 sps:$4 sm:$0xff]   ;;  %v21229_v49 = vld [vmem:[#allocation4 + $0x714] ss:$8 sps:$4 sm:$0xff]  }
 0xa5d   :  { %10260 = vmatpush1.bf16.msra.mxu1 %v21094_v51  ;;  %10441 = vmatmul.mubr.bf16.vlgmr.msra.gmra.mxu0 %v21140_v63  ;;  %v21189_v51 = vld [vmem:[#allocation4 + $0x6f4] ss:$8 sps:$4 sm:$0xff]  }
 0xa5e   :  { %10261 = vmatprep.subr.bf16.mxu1 %v21102_v45  ;;  %10711 = vmatpush1.bf16.msra.mxu0 %v21141_v47  ;;  %v21215_v45 = vld [vmem:[#allocation4 + $0x730] ss:$8 sps:$4 sm:$0xff]   ;;  %v21202_v63 = vld [vmem:[#allocation4 + $0x6d4] ss:$8 sps:$4 sm:$0xff]   ;;  %v21235_v47 = vld [vmem:[#allocation4 + $0x704] ss:$8 sps:$4 sm:$0xff]  }
 0xa5f   :  { %10712 = vmatprep.subr.bf16.mxu0 %v21149_v38  ;;  %10742 = vmatprep.mubr.bf16.mxu0 %v23520_v17  ;;  %v21200_v38 = vld [vmem:[#allocation4 + $0x6d0] ss:$8 sps:$4 sm:$0xff]  }
 0xa61   :  { %10262 = vmatpush1.bf16.msra.mxu1 %v21100_v52  ;;  %v21187_v52 = vld [vmem:[#allocation4 + $0x6f0] ss:$8 sps:$4 sm:$0xff]  }
 0xa62   :  { %10263 = vmatprep.subr.bf16.mxu1 %v21108_v42  ;;  %10713 = vmatpush1.bf16.msra.mxu0 %v21147_v50  ;;  %v21196_v42 = vld [vmem:[#allocation4 + $0x6e4] ss:$8 sps:$4 sm:$0xff]   ;;  %v21243_v50 = vld [vmem:[#allocation4 + $0x874] ss:$8 sps:$4 sm:$0xff]  }
 0xa63   :  { %10714 = vmatprep.subr.bf16.mxu0 %v21155_v28  ;;  %v21206_v28 = vld [vmem:[#allocation4 + $0x6c0] ss:$8 sps:$4 sm:$0xff]  }
 0xa65   :  { %10264 = vmatpush1.bf16.msra.mxu1 %v21106_v6  ;;  %v21194_v6 = vld [vmem:[#allocation4 + $0x6e0] ss:$8 sps:$4 sm:$0xff]  }
 0xa66   :  { %10265 = vmatprep.subr.bf16.mxu1 %v21114_v2  ;;  %10715 = vmatpush1.bf16.msra.mxu0 %v21153_v1  ;;  %v21227_v2 = vld [vmem:[#allocation4 + $0x710] ss:$8 sps:$4 sm:$0xff]  }
 0xa67   :  { %10716 = vmatprep.subr.bf16.mxu0 %v21161_v7  ;;  %v21241_v1 = vld [vmem:[#allocation4 + $0x870] ss:$8 sps:$4 sm:$0xff]   ;;  %v21249_v7 = vld [vmem:[#allocation4 + $0x864] ss:$8 sps:$4 sm:$0xff]  }
 0xa69   :  { %10266 = vmatpush1.bf16.msra.mxu1 %v21112_v32  ;;  %v21208_v32 = vld [vmem:[#allocation4 + $0x6c4] ss:$8 sps:$4 sm:$0xff]  }
 0xa6a   :  { %10267 = vmatprep.subr.bf16.mxu1 %v21120_v24  ;;  %10717 = vmatpush1.bf16.msra.mxu0 %v21159_v20  ;;  %v21233_v24 = vld [vmem:[#allocation4 + $0x700] ss:$8 sps:$4 sm:$0xff]  }
 0xa6b   :  { %10718 = vmatprep.subr.bf16.mxu0 %v21167_v53  ;;  %v21247_v20 = vld [vmem:[#allocation4 + $0x860] ss:$8 sps:$4 sm:$0xff]   ;;  %v21255_v53 = vld [vmem:[#allocation4 + $0x854] ss:$8 sps:$4 sm:$0xff]  }
 0xa6d   :  { %10268 = vmatpush1.bf16.msra.mxu1 %v21118_v41  ;;  %v21240_v41 = vld [vmem:[#allocation2 + $0x70] ss:$8 sps:$4 sm:$0xff]  }
 0xa6e   :  { %10269 = vmatprep.subr.bf16.mxu1 %v21126_v44  ;;  %10719 = vmatpush1.bf16.msra.mxu0 %v21165_v58  ;;  %v21214_v44 = vld [vmem:[#allocation4 + $0x6b4] ss:$8 sps:$4 sm:$0xff]   ;;  %v21253_v58 = vld [vmem:[#allocation4 + $0x850] ss:$8 sps:$4 sm:$0xff]  }
 0xa6f   :  { %10720 = vmatprep.subr.bf16.mxu0 %v21173_v25  ;;  %v21261_v25 = vld [vmem:[#allocation4 + $0x844] ss:$8 sps:$4 sm:$0xff]  }
 0xa71   :  { %10270 = vmatpush1.bf16.msra.mxu1 %v21124_v14  ;;  %v21212_v14 = vld [vmem:[#allocation4 + $0x6b0] ss:$8 sps:$4 sm:$0xff]  }
 0xa72   :  { %10271 = vmatprep.subr.bf16.mxu1 %v21132_v36  ;;  %10721 = vmatpush1.bf16.msra.mxu0 %v21171_v43  ;;  %v21220_v36 = vld [vmem:[#allocation4 + $0x6a4] ss:$8 sps:$4 sm:$0xff]   ;;  %v21267_v43 = vld [vmem:[#allocation4 + $0x834] ss:$8 sps:$4 sm:$0xff]  }
 0xa73   :  { %10722 = vmatprep.subr.bf16.mxu0 %v21179_v27  ;;  %v21230_v27 = vld [vmem:[#allocation4 + $0x680] ss:$8 sps:$4 sm:$0xff]  }
 0xa75   :  { %10272 = vmatpush1.bf16.msra.mxu1 %v21130_v10  ;;  %v21218_v10 = vld [vmem:[#allocation4 + $0x6a0] ss:$8 sps:$4 sm:$0xff]  }
 0xa76   :  { %10559 = vmatprep.subr.bf16.mxu1 %v21139_v55  ;;  %10723 = vmatpush1.bf16.msra.mxu0 %v21177_v11  ;;  %v21226_v55 = vld [vmem:[#allocation4 + $0x694] ss:$8 sps:$4 sm:$0xff]   ;;  %v21273_v11 = vld [vmem:[#allocation4 + $0x824] ss:$8 sps:$4 sm:$0xff]  }
 0xa77   :  { %10724 = vmatprep.subr.bf16.mxu0 %v21185_v54  ;;  %v21236_v54 = vld [vmem:[#allocation2 + $0x64] ss:$8 sps:$4 sm:$0xff]  }
 0xa78   :  { %10290 = vmatmul.mubr.bf16.vlgmr.msra.gmra.mxu1 %v21136_v60  ;;  %v21224_v60 = vld [vmem:[#allocation4 + $0x690] ss:$8 sps:$4 sm:$0xff]  }
 0xa79   :  { %10560 = vmatpush1.bf16.msra.mxu1 %v21137_v18  ;;  %10591 = vmatprep.mubr.bf16.mxu1 %v23520_v17  ;;  %v21232_v18 = vld [vmem:[#allocation4 + $0x684] ss:$8 sps:$4 sm:$0xff]  }
 0xa7a   :  { %10561 = vmatprep.subr.bf16.mxu1 %v21146_v46  ;;  %10725 = vmatpush1.bf16.msra.mxu0 %v21183_v29  ;;  %v21259_v46 = vld [vmem:[#allocation4 + $0x840] ss:$8 sps:$4 sm:$0xff]  }
 0xa7b   :  { %11012 = vmatprep.subr.bf16.mxu0 %v21193_v13  ;;  %v21271_v29 = vld [vmem:[#allocation4 + $0x820] ss:$8 sps:$4 sm:$0xff]   ;;  %v21279_v13 = vld [vmem:[#allocation4 + $0x814] ss:$8 sps:$4 sm:$0xff]  }
 0xa7d   :  { %10562 = vmatpush1.bf16.msra.mxu1 %v21144_v30  ;;  %10743 = vmatmul.mubr.bf16.vlgmr.msra.gmra.mxu0 %v21190_v40  ;;  %v21239_v30 = vld [vmem:[#allocation4 + $0x7f4] ss:$8 sps:$4 sm:$0xff]  }
 0xa7e   :  { %10563 = vmatprep.subr.bf16.mxu1 %v21152_v62  ;;  %11013 = vmatpush1.bf16.msra.mxu0 %v21191_v31  ;;  %v21265_v62 = vld [vmem:[#allocation4 + $0x830] ss:$8 sps:$4 sm:$0xff]   ;;  %v21252_v40 = vld [vmem:[#allocation4 + $0x7d4] ss:$8 sps:$4 sm:$0xff]   ;;  %v21285_v31 = vld [vmem:[#allocation4 + $0x804] ss:$8 sps:$4 sm:$0xff]  }
 0xa7f   :  { %11014 = vmatprep.subr.bf16.mxu0 %v21199_v4  ;;  %11044 = vmatprep.mubr.bf16.mxu0 %v23520_v17  ;;  %v21250_v4 = vld [vmem:[#allocation4 + $0x7d0] ss:$8 sps:$4 sm:$0xff]  }
 0xa81   :  { %10564 = vmatpush1.bf16.msra.mxu1 %v21150_v34  ;;  %v21237_v34 = vld [vmem:[#allocation4 + $0x7f0] ss:$8 sps:$4 sm:$0xff]  }
 0xa82   :  { %10565 = vmatprep.subr.bf16.mxu1 %v21158_v8  ;;  %11015 = vmatpush1.bf16.msra.mxu0 %v21197_v37  ;;  %v21246_v8 = vld [vmem:[#allocation4 + $0x7e4] ss:$8 sps:$4 sm:$0xff]   ;;  %v21256_v37 = vld [vmem:[#allocation4 + $0x7c0] ss:$8 sps:$4 sm:$0xff]  }
 0xa83   :  { %11016 = vmatprep.subr.bf16.mxu0 %v21205_v12  ;;  %v21264_v12 = vld [vmem:[#allocation4 + $0x7b4] ss:$8 sps:$4 sm:$0xff]  }
 0xa85   :  { %10566 = vmatpush1.bf16.msra.mxu1 %v21156_v39  ;;  %v21244_v39 = vld [vmem:[#allocation4 + $0x7e0] ss:$8 sps:$4 sm:$0xff]  }
 0xa86   :  { %10567 = vmatprep.subr.bf16.mxu1 %v21164_v15  ;;  %11017 = vmatpush1.bf16.msra.mxu0 %v21203_v22  ;;  %v21277_v15 = vld [vmem:[#allocation4 + $0x810] ss:$8 sps:$4 sm:$0xff]   ;;  %v21270_v22 = vld [vmem:[#allocation4 + $0x7a4] ss:$8 sps:$4 sm:$0xff]  }
 0xa87   :  { %11018 = vmatprep.subr.bf16.mxu0 %v21211_v0  ;;  %v21268_v0 = vld [vmem:[#allocation4 + $0x7a0] ss:$8 sps:$4 sm:$0xff]  }
 0xa89   :  { %10568 = vmatpush1.bf16.msra.mxu1 %v21162_v48  ;;  %v21258_v48 = vld [vmem:[#allocation4 + $0x7c4] ss:$8 sps:$4 sm:$0xff]  }
 0xa8a   :  { %10569 = vmatprep.subr.bf16.mxu1 %v21170_v57  ;;  %11019 = vmatpush1.bf16.msra.mxu0 %v21209_v33  ;;  %v21283_v57 = vld [vmem:[#allocation4 + $0x800] ss:$8 sps:$4 sm:$0xff]   ;;  %v21282_v33 = vld [vmem:[#allocation4 + $0x784] ss:$8 sps:$4 sm:$0xff]  }
 0xa8b   :  { %11020 = vmatprep.subr.bf16.mxu0 %v21217_v16  ;;  %v21280_v16 = vld [vmem:[#allocation4 + $0x780] ss:$8 sps:$4 sm:$0xff]  }
 0xa8d   :  { %10570 = vmatpush1.bf16.msra.mxu1 %v21168_v61  ;;  %v21290_v61 = vld [vmem:[#allocation2 + $0x80] ss:$8 sps:$4 sm:$0xff]  }
 0xa8e   :  { %10571 = vmatprep.subr.bf16.mxu1 %v21176_v26  ;;  %11021 = vmatpush1.bf16.msra.mxu0 %v21215_v45  ;;  %v21262_v26 = vld [vmem:[#allocation4 + $0x7b0] ss:$8 sps:$4 sm:$0xff]  }
 0xa8f   :  { %11022 = vmatprep.subr.bf16.mxu0 %v21223_v3  ;;  %v21287_v45 = vld [vmem:[#allocation4 + $0x8f0] ss:$8 sps:$4 sm:$0xff]   ;;  %v21293_v3 = vld [vmem:[#allocation4 + $0x8e4] ss:$8 sps:$4 sm:$0xff]  }
 0xa91   :  { %10572 = vmatpush1.bf16.msra.mxu1 %v21174_v59  ;;  %v21276_v59 = vld [vmem:[#allocation4 + $0x794] ss:$8 sps:$4 sm:$0xff]  }
 0xa92   :  { %10573 = vmatprep.subr.bf16.mxu1 %v21182_v35  ;;  %11023 = vmatpush1.bf16.msra.mxu0 %v21221_v23  ;;  %v21274_v35 = vld [vmem:[#allocation4 + $0x790] ss:$8 sps:$4 sm:$0xff]   ;;  %v21299_v23 = vld [vmem:[#allocation4 + $0x8c4] ss:$8 sps:$4 sm:$0xff]  }
 0xa93   :  { %11024 = vmatprep.subr.bf16.mxu0 %v21229_v49  ;;  %v21297_v49 = vld [vmem:[#allocation4 + $0x8c0] ss:$8 sps:$4 sm:$0xff]  }
 0xa95   :  { %10574 = vmatpush1.bf16.msra.mxu1 %v21180_v56  ;;  %v21289_v56 = vld [vmem:[#allocation4 + $0x8f4] ss:$8 sps:$4 sm:$0xff]  }
 0xa96   :  { %10861 = vmatprep.subr.bf16.mxu1 %v21189_v51  ;;  %11025 = vmatpush1.bf16.msra.mxu0 %v21227_v2  ;;  %v21286_v51 = vld [vmem:[#allocation2 + $0x74] ss:$8 sps:$4 sm:$0xff]   ;;  %v21305_v2 = vld [vmem:[#allocation4 + $0x8a4] ss:$8 sps:$4 sm:$0xff]  }
 0xa97   :  { %11026 = vmatprep.subr.bf16.mxu0 %v21235_v47  ;;  %v21303_v47 = vld [vmem:[#allocation4 + $0x8a0] ss:$8 sps:$4 sm:$0xff]  }
 0xa98   :  { %10592 = vmatmul.mubr.bf16.vlgmr.msra.gmra.mxu1 %v21186_v21  ;;  %v21291_v21 = vld [vmem:[#allocation4 + $0x8e0] ss:$8 sps:$4 sm:$0xff]  }
 0xa99   :  { %10862 = vmatpush1.bf16.msra.mxu1 %v21187_v52  ;;  %10893 = vmatprep.mubr.bf16.mxu1 %v23520_v17  ;;  %v21296_v52 = vld [vmem:[#allocation4 + $0x8d4] ss:$8 sps:$4 sm:$0xff]  }
 0xa9a   :  { %10863 = vmatprep.subr.bf16.mxu1 %v21196_v42  ;;  %11027 = vmatpush1.bf16.msra.mxu0 %v21233_v24  ;;  %v21294_v42 = vld [vmem:[#allocation4 + $0x8d0] ss:$8 sps:$4 sm:$0xff]   ;;  %v21311_v24 = vld [vmem:[#allocation4 + $0x884] ss:$8 sps:$4 sm:$0xff]  }
 0xa9b   :  { %11314 = vmatprep.subr.bf16.mxu0 %v21243_v50  ;;  %v21309_v50 = vld [vmem:[#allocation4 + $0x880] ss:$8 sps:$4 sm:$0xff]  }
 0xa9d   :  { %10864 = vmatpush1.bf16.msra.mxu1 %v21194_v6  ;;  %11045 = vmatmul.mubr.bf16.vlgmr.msra.gmra.mxu0 %v21240_v41  ;;  %v21302_v6 = vld [vmem:[#allocation4 + $0x8b4] ss:$8 sps:$4 sm:$0xff]   ;;  %v8958_v41 = vpop.f32.mrf.mxu1 }
 0xa9e   :  { %10865 = vmatprep.subr.bf16.mxu1 %v21202_v63  ;;  %11315 = vmatpush1.bf16.msra.mxu0 %v21241_v1  ;;  %v21300_v63 = vld [vmem:[#allocation4 + $0x8b0] ss:$8 sps:$4 sm:$0xff]  }
 0xa9f   :  { %11316 = vmatprep.subr.bf16.mxu0 %v21249_v7  ;;  %11346 = vmatprep.mubr.bf16.mxu0 %v23520_v17 }
 0xaa1   :  { %10866 = vmatpush1.bf16.msra.mxu1 %v21200_v38  ;;  %v21308_v38 = vld [vmem:[#allocation4 + $0x894] ss:$8 sps:$4 sm:$0xff]  }
 0xaa2   :  { %10867 = vmatprep.subr.bf16.mxu1 %v21208_v32  ;;  %11317 = vmatpush1.bf16.msra.mxu0 %v21247_v20  ;;  %v21306_v32 = vld [vmem:[#allocation4 + $0x890] ss:$8 sps:$4 sm:$0xff]   ;;  %v9234_v20 = vpop.f32.mrf.mxu0 }
 0xaa3   :  { %11318 = vmatprep.subr.bf16.mxu0 %v21255_v53 }
 0xaa5   :  { %10868 = vmatpush1.bf16.msra.mxu1 %v21206_v28  ;;  %v21312_v28 = vld [vmem:[#allocation2 + $0x84] ss:$8 sps:$4 sm:$0xff]  }
 0xaa6   :  { %10869 = vmatprep.subr.bf16.mxu1 %v21214_v44  ;;  %11319 = vmatpush1.bf16.msra.mxu0 %v21253_v58  ;;  %v8960_v44 = vpop.f32.mrf.mxu1 }
 0xaa7   :  { %11320 = vmatprep.subr.bf16.mxu0 %v21261_v25 }
 0xaa8   :  { %v8962_v1 = vpop.f32.mrf.mxu1 }
 0xaa9   :  { %10870 = vmatpush1.bf16.msra.mxu1 %v21212_v14 }
 0xaaa   :  { %10871 = vmatprep.subr.bf16.mxu1 %v21220_v36  ;;  %11321 = vmatpush1.bf16.msra.mxu0 %v21259_v46  ;;  %v8964_v7 = vpop.f32.mrf.mxu1 }
 0xaab   :  { %11322 = vmatprep.subr.bf16.mxu0 %v21267_v43 }
 0xaad   :  { %10872 = vmatpush1.bf16.msra.mxu1 %v21218_v10  ;;  %v9236_v10 = vpop.f32.mrf.mxu0 }
 0xaae   :  { %10873 = vmatprep.subr.bf16.mxu1 %v21226_v55  ;;  %11323 = vmatpush1.bf16.msra.mxu0 %v21265_v62 }
 0xaaf   :  { %11324 = vmatprep.subr.bf16.mxu0 %v21273_v11  ;;  %v9238_v58 = vpop.f32.mrf.mxu0 }
 0xab1   :  { %10874 = vmatpush1.bf16.msra.mxu1 %v21224_v60  ;;  %v9240_v60 = vpop.f32.mrf.mxu0 }
 0xab2   :  { %10875 = vmatprep.subr.bf16.mxu1 %v21232_v18  ;;  %11325 = vmatpush1.bf16.msra.mxu0 %v21271_v29 }
 0xab3   :  { %11326 = vmatprep.subr.bf16.mxu0 %v21279_v13 }
 0xab5   :  { %10876 = vmatpush1.bf16.msra.mxu1 %v21230_v27 }
 0xab6   :  { %11163 = vmatprep.subr.bf16.mxu1 %v21239_v30  ;;  %11327 = vmatpush1.bf16.msra.mxu0 %v21277_v15 }
 0xab7   :  { %11328 = vmatprep.subr.bf16.mxu0 %v21285_v31 }
 0xab8   :  { %10894 = vmatmul.mubr.bf16.vlgmr.msra.gmra.mxu1 %v21236_v54  ;;  %v9087_v14 = vpop.f32.mrf.mxu1 }
 0xab9   :  { %11164 = vmatpush1.bf16.msra.mxu1 %v21237_v34  ;;  %11195 = vmatprep.mubr.bf16.mxu1 %v23520_v17 }
 0xaba   :  { %11165 = vmatprep.subr.bf16.mxu1 %v21246_v8  ;;  %11329 = vmatpush1.bf16.msra.mxu0 %v21283_v57  ;;  %v9089_v36 = vpop.f32.mrf.mxu1 }
 0xabc   :  { %v9091_v53 = vpop.f32.mrf.mxu1 }
 0xabd   :  { %11166 = vmatpush1.bf16.msra.mxu1 %v21244_v39  ;;  %11347 = vmatmul.mubr.bf16.vlgmr.msra.gmra.mxu0 %v21290_v61  ;;  %v9536_v46 = vpop.f32.mrf.mxu0 }
 0xabe   :  { %11167 = vmatprep.subr.bf16.mxu1 %v21252_v40  ;;  %11657 = vmatprep.mubr.bf16.mxu0 %v23520_v17  ;;  %v9093_v55 = vpop.f32.mrf.mxu1 }
 0xabf   :  { %v9538_v27 = vpop.f32.mrf.mxu0 }
 0xac1   :  { %11168 = vmatpush1.bf16.msra.mxu1 %v21250_v4  ;;  %v9540_v62 = vpop.f32.mrf.mxu0 }
 0xac2   :  { %11169 = vmatprep.subr.bf16.mxu1 %v21258_v48 }
 0xac3   :  { %v9542_v54 = vpop.f32.mrf.mxu0 }
 0xac5   :  { %11170 = vmatpush1.bf16.msra.mxu1 %v21256_v37 }
 0xac6   :  { %11171 = vmatprep.subr.bf16.mxu1 %v21264_v12 }
 0xac9   :  { %11172 = vmatpush1.bf16.msra.mxu1 %v21262_v26 }
 0xaca   :  { %11173 = vmatprep.subr.bf16.mxu1 %v21270_v22 }
 0xacd   :  { %11174 = vmatpush1.bf16.msra.mxu1 %v21268_v0 }
 0xace   :  { %11175 = vmatprep.subr.bf16.mxu1 %v21276_v59 }
 0xad1   :  { %11176 = vmatpush1.bf16.msra.mxu1 %v21274_v35 }
 0xad2   :  { %11177 = vmatprep.subr.bf16.mxu1 %v21282_v33 }
 0xad5   :  { %11178 = vmatpush1.bf16.msra.mxu1 %v21280_v16  ;;  %v9090_v16 = vadd.f32 %v9089_v36, %v8960_v44 }
 0xad6   :  { %11465 = vmatprep.subr.bf16.mxu1 %v21289_v56  ;;  %v9088_v56 = vadd.f32 %v9087_v14, %v8958_v41 }
 0xad8   :  { %11196 = vmatmul.mubr.bf16.vlgmr.msra.gmra.mxu1 %v21286_v51  ;;  %v9385_v25 = vpop.f32.mrf.mxu1 }
 0xad9   :  { %11466 = vmatpush1.bf16.msra.mxu1 %v21287_v45  ;;  %11497 = vmatprep.mubr.bf16.mxu1 %v23520_v17 }
 0xada   :  { %11467 = vmatprep.subr.bf16.mxu1 %v21293_v3  ;;  %v9387_v18 = vpop.f32.mrf.mxu1  ;;  %v9092_v3 = vadd.f32 %v9091_v53, %v8962_v1 }
 0xadc   :  { %v9389_v43 = vpop.f32.mrf.mxu1 }
 0xadd   :  { %11468 = vmatpush1.bf16.msra.mxu1 %v21291_v21  ;;  %v9838_v8 = vpop.f32.mrf.mxu0 }
 0xade   :  { %11469 = vmatprep.subr.bf16.mxu1 %v21296_v52  ;;  %v9391_v30 = vpop.f32.mrf.mxu1  ;;  %v9244_v52 = vadd.f32 %v9236_v10, %v9090_v16 }
 0xadf   :  { %v9840_v13 = vpop.f32.mrf.mxu0 }
 0xae1   :  { %11470 = vmatpush1.bf16.msra.mxu1 %v21294_v42  ;;  %v9842_v40 = vpop.f32.mrf.mxu0  ;;  %v9094_v42 = vadd.f32 %v9093_v55, %v8964_v7 }
 0xae2   :  { %11471 = vmatprep.subr.bf16.mxu1 %v21299_v23  ;;  %v9243_v23 = vadd.f32 %v9234_v20, %v9088_v56 }
 0xae3   :  { %v9844_v31 = vpop.f32.mrf.mxu0 }
 0xae5   :  { %11472 = vmatpush1.bf16.msra.mxu1 %v21297_v49 }
 0xae6   :  { %11473 = vmatprep.subr.bf16.mxu1 %v21302_v6  ;;  %v9245_v6 = vadd.f32 %v9238_v58, %v9092_v3 }
 0xae9   :  { %11474 = vmatpush1.bf16.msra.mxu1 %v21300_v63  ;;  %v9395_v63 = vadd.f32 %v9387_v18, %v9244_v52 }
 0xaea   :  { %11475 = vmatprep.subr.bf16.mxu1 %v21305_v2  ;;  %v9394_v2 = vadd.f32 %v9385_v25, %v9243_v23 }
 0xaec   :  { %v9545_v19 = vadd.f32 %v9536_v46, %v9394_v2 }
 0xaed   :  { %11476 = vmatpush1.bf16.msra.mxu1 %v21303_v47 }
 0xaee   :  { %11477 = vmatprep.subr.bf16.mxu1 %v21308_v38 }
 0xaf1   :  { %11478 = vmatpush1.bf16.msra.mxu1 %v21306_v32  ;;  %v9246_v32 = vadd.f32 %v9240_v60, %v9094_v42 }
 0xaf2   :  { %11479 = vmatprep.subr.bf16.mxu1 %v21311_v24  ;;  %v9396_v24 = vadd.f32 %v9389_v43, %v9245_v6 }
 0xaf4   :  { %v9547_v14 = vadd.f32 %v9540_v62, %v9396_v24 }
 0xaf5   :  { %11480 = vmatpush1.bf16.msra.mxu1 %v21309_v50  ;;  %v9546_v50 = vadd.f32 %v9538_v27, %v9395_v63 }
 0xaf8   :  { %11498 = vmatmul.mubr.bf16.vlgmr.msra.gmra.mxu1 %v21312_v28  ;;  %v9687_v11 = vpop.f32.mrf.mxu1  ;;  %v9397_v28 = vadd.f32 %v9391_v30, %v9246_v32 }
 0xaf9   :  { %11697 = vmatprep.mubr.bf16.mxu1 %v23520_v17  ;;  %v9696_v1 = vadd.f32 %v9687_v11, %v9545_v19 }
 0xafa   :  { %v9689_v34 = vpop.f32.mrf.mxu1  ;;  %v9548_v53 = vadd.f32 %v9542_v54, %v9397_v28 }
 0xafb   :  { %v9697_v36 = vadd.f32 %v9689_v34, %v9546_v50  ;;  %v9847_v18 = vadd.f32 %v9838_v8, %v9696_v1 }
 0xafc   :  { %v9691_v29 = vpop.f32.mrf.mxu1 }
 0xafd   :  { %v10140_v48 = vpop.f32.mrf.mxu0  ;;  %v9698_v10 = vadd.f32 %v9691_v29, %v9547_v14  ;;  %v9848_v55 = vadd.f32 %v9840_v13, %v9697_v36 }
 0xafe   :  { %v9693_v39 = vpop.f32.mrf.mxu1 }
 0xaff   :  { %v10142_v37 = vpop.f32.mrf.mxu0  ;;  %v9699_v58 = vadd.f32 %v9693_v39, %v9548_v53  ;;  %v9849_v16 = vadd.f32 %v9842_v40, %v9698_v10 }
 0xb01   :  { %v10144_v12 = vpop.f32.mrf.mxu0  ;;  %v9850_v27 = vadd.f32 %v9844_v31, %v9699_v58 }
 0xb03   :  { %v10146_v22 = vpop.f32.mrf.mxu0 }
 0xb18   :  { %v9989_v15 = vpop.f32.mrf.mxu1 }
 0xb19   :  { %v9998_v60 = vadd.f32 %v9989_v15, %v9847_v18 }
 0xb1a   :  { %v9991_v4 = vpop.f32.mrf.mxu1 }
 0xb1b   :  { %v9999_v56 = vadd.f32 %v9991_v4, %v9848_v55  ;;  %v10149_v34 = vadd.f32 %v10140_v48, %v9998_v60 }
 0xb1c   :  { %v9993_v57 = vpop.f32.mrf.mxu1 }
 0xb1d   :  { %v10442_v59 = vpop.f32.mrf.mxu0  ;;  %v10000_v30 = vadd.f32 %v9993_v57, %v9849_v16  ;;  %v10150_v52 = vadd.f32 %v10142_v37, %v9999_v56 }
 0xb1e   :  { %v9995_v61 = vpop.f32.mrf.mxu1 }
 0xb1f   :  { %v10444_v33 = vpop.f32.mrf.mxu0  ;;  %v10001_v62 = vadd.f32 %v9995_v61, %v9850_v27  ;;  %v10151_v19 = vadd.f32 %v10144_v12, %v10000_v30 }
 0xb21   :  { %v10446_v45 = vpop.f32.mrf.mxu0  ;;  %v10152_v13 = vadd.f32 %v10146_v22, %v10001_v62 }
 0xb23   :  { %v10448_v49 = vpop.f32.mrf.mxu0 }
 0xb38   :  { %v10291_v26 = vpop.f32.mrf.mxu1 }
 0xb39   :  { %v10300_v54 = vadd.f32 %v10291_v26, %v10149_v34 }
 0xb3a   :  { %v10293_v0 = vpop.f32.mrf.mxu1 }
 0xb3b   :  { %v10301_v11 = vadd.f32 %v10293_v0, %v10150_v52  ;;  %v10451_v40 = vadd.f32 %v10442_v59, %v10300_v54 }
 0xb3c   :  { %v10295_v35 = vpop.f32.mrf.mxu1 }
 0xb3d   :  { %v10744_v38 = vpop.f32.mrf.mxu0  ;;  %v10302_v39 = vadd.f32 %v10295_v35, %v10151_v19  ;;  %v10452_v8 = vadd.f32 %v10444_v33, %v10301_v11 }
 0xb3e   :  { %v10297_v51 = vpop.f32.mrf.mxu1 }
 0xb3f   :  { %v10746_v41 = vpop.f32.mrf.mxu0  ;;  %v10303_v23 = vadd.f32 %v10297_v51, %v10152_v13  ;;  %v10453_v6 = vadd.f32 %v10446_v45, %v10302_v39 }
 0xb41   :  { %v10748_v20 = vpop.f32.mrf.mxu0  ;;  %v10454_v2 = vadd.f32 %v10448_v49, %v10303_v23  ;;  %v21314_v23 = vld [vmem:[%s23478_s15] sm:$0xff]  }
 0xb43   :  { %v10750_v43 = vpop.f32.mrf.mxu0 }
 0xb58   :  { %v10593_v21 = vpop.f32.mrf.mxu1 }
 0xb59   :  { %v10602_v57 = vadd.f32 %v10593_v21, %v10451_v40  ;;  %v21315_v40 = vld [vmem:[%s23478_s15 + $0x28] sm:$0xff]  }
 0xb5a   :  { %v10595_v47 = vpop.f32.mrf.mxu1 }
 0xb5b   :  { %v10603_v31 = vadd.f32 %v10595_v47, %v10452_v8  ;;  %v10753_v0 = vadd.f32 %v10744_v38, %v10602_v57  ;;  %v21313_v8 = vld [vmem:[%s23478_s15 + $0x20] sm:$0xff]   ;;  %v21320_v57 = vld [vmem:[%s23478_s15 + $0x18] sm:$0xff]  }
 0xb5c   :  { %v10597_v44 = vpop.f32.mrf.mxu1 }
 0xb5d   :  { %v11046_v3 = vpop.f32.mrf.mxu0  ;;  %v10604_v37 = vadd.f32 %v10597_v44, %v10453_v6  ;;  %v10754_v48 = vadd.f32 %v10746_v41, %v10603_v31  ;;  %v21318_v6 = vld [vmem:[%s23478_s15 + $0x10] sm:$0xff]   ;;  %v21319_v31 = vld [vmem:[%s23478_s15 + $0x38] sm:$0xff]  }
 0xb5e   :  { %v10599_v7 = vpop.f32.mrf.mxu1 }
 0xb5f   :  { %v11048_v42 = vpop.f32.mrf.mxu0  ;;  %v10605_v12 = vadd.f32 %v10599_v7, %v10454_v2  ;;  %v10755_v24 = vadd.f32 %v10748_v20, %v10604_v37  ;;  %v11512_v7 = vld [vmem:[#allocation21] sm:$0x3] }
 0xb60   :  { %v11521_v16 = vrot.slane %v11512_v7, %v23110_v9  ;;  %v11517_v60 = vrot.slane %v11512_v7, %v23094_v5 }
 0xb61   :  { %v11050_v15 = vpop.f32.mrf.mxu0  ;;  %v10756_v33 = vadd.f32 %v10750_v43, %v10605_v12 }
 0xb63   :  { %v11052_v61 = vpop.f32.mrf.mxu0 }
 0xb78   :  { %v10895_v25 = vpop.f32.mrf.mxu1 }
 0xb79   :  { %v10904_v35 = vadd.f32 %v10895_v25, %v10753_v0 }
 0xb7a   :  { %v10897_v46 = vpop.f32.mrf.mxu1 }
 0xb7b   :  { %v10905_v22 = vadd.f32 %v10897_v46, %v10754_v48  ;;  %v11055_v47 = vadd.f32 %v11046_v3, %v10904_v35 }
 0xb7c   :  { %v10899_v29 = vpop.f32.mrf.mxu1 }
 0xb7d   :  { %v11348_v32 = vpop.f32.mrf.mxu0  ;;  %v10906_v51 = vadd.f32 %v10899_v29, %v10755_v24  ;;  %v11056_v28 = vadd.f32 %v11048_v42, %v10905_v22 }
 0xb7e   :  { %v10901_v4 = vpop.f32.mrf.mxu1 }
 0xb7f   :  { %v11350_v50 = vpop.f32.mrf.mxu0  ;;  %v10907_v45 = vadd.f32 %v10901_v4, %v10756_v33  ;;  %v11057_v21 = vadd.f32 %v11050_v15, %v10906_v51  ;;  %v21316_v4 = vld [vmem:[%s23478_s15 + $0x8] sm:$0xff]   ;;  %v21317_v15 = vld [vmem:[%s23478_s15 + $0x30] sm:$0xff]  }
 0xb81   :  { %v11352_v36 = vpop.f32.mrf.mxu0  ;;  %v11058_v41 = vadd.f32 %v11052_v61, %v10907_v45 }
 0xb83   :  { %v11354_v55 = vpop.f32.mrf.mxu0 }
 0xb98   :  { %v11197_v63 = vpop.f32.mrf.mxu1 }
 0xb99   :  { %v11206_v49 = vadd.f32 %v11197_v63, %v11055_v47  ;;  %v21321_v63 = vld [vmem:[%s23478_s15 + $0x40] sm:$0xff]  }
 0xb9a   :  { %v11199_v26 = vpop.f32.mrf.mxu1 }
 0xb9b   :  { %v11207_v14 = vadd.f32 %v11199_v26, %v11056_v28  ;;  %v11357_v20 = vadd.f32 %v11348_v32, %v11206_v49 }
 0xb9c   :  { %v11201_v59 = vpop.f32.mrf.mxu1 }
 0xb9d   :  { %v11208_v1 = vadd.f32 %v11201_v59, %v11057_v21  ;;  %v11358_v53 = vadd.f32 %v11350_v50, %v11207_v14 }
 0xb9e   :  { %v11203_v44 = vpop.f32.mrf.mxu1 }
 0xb9f   :  { %v11209_v10 = vadd.f32 %v11203_v44, %v11058_v41  ;;  %v11359_v18 = vadd.f32 %v11352_v36, %v11208_v1 }
 0xba1   :  { %v11360_v27 = vadd.f32 %v11354_v55, %v11209_v10 }
 0xbb8   :  { %v11499_v38 = vpop.f32.mrf.mxu1 }
 0xbb9   :  { %v11508_v56 = vadd.f32 %v11499_v38, %v11357_v20 }
 0xbba   :  { %v11501_v58 = vpop.f32.mrf.mxu1 }
 0xbbb   :  { %v11509_v25 = vadd.f32 %v11501_v58, %v11358_v53  ;;  %v11524_v34 = vadd.f32 %v11517_v60, %v11508_v56 }
 0xbbc   :  { %v11503_v43 = vpop.f32.mrf.mxu1 }
 0xbbd   :  { %v11510_v30 = vadd.f32 %v11503_v43, %v11359_v18  ;;  %v11525_v3 = vadd.f32 %v11521_v16, %v11509_v25  ;;  %v11528_v42 = vmax.f32 %v11524_v34, 0.0 }
 0xbbe   :  { %v11505_v46 = vpop.f32.mrf.mxu1 }
 0xbbf   :  { %v11526_v52 = vadd.f32 %v11517_v60, %v11510_v30  ;;  %v11511_v62 = vadd.f32 %v11505_v46, %v11360_v27  ;;  %v11529_v54 = vmax.f32 %v11525_v3, 0.0 }
 0xbc1   :  { %v11527_v19 = vadd.f32 %v11521_v16, %v11511_v62  ;;  %v11530_v11 = vmax.f32 %v11526_v52, 0.0 }
 0xbc3   :  { %v11531_v29 = vmax.f32 %v11527_v19, 0.0  ;;  %v11532_v39 = vpack.c.bf16 %v11530_v11, %v11528_v42 }
 0xbc5   :  { %v11533_v13 = vpack.c.bf16 %v11531_v29, %v11529_v54 }
 0xbc7   :  { %11639 = vmatprep.subr.bf16.mxu0 %v11533_v13  ;;  %20249 = vmatprep.subr.bf16.mxu1 %v11533_v13 }
 0xbc8   :  { %11640 = vmatpush1.bf16.msra.mxu0 %v11532_v39  ;;  %20250 = vmatpush1.bf16.msra.mxu1 %v11532_v39 }
 0xbcb   :  { %18194 = vmatmul.mubr.msk.bf16.vlgmr.msra.gmra.mxu1 %vm11597_vm4, %v21313_v8  ;;  %18190 = vmatmul.mubr.msk.bf16.vlgmr.msra.gmra.mxu0 %vm11597_vm4, %v21314_v23 }
 0xbcc   :  { %11707 = vmatprep.mubr.bf16.mxu1 %v23520_v17  ;;  %11667 = vmatprep.mubr.bf16.mxu0 %v23520_v17 }
 0xbd3   :  { %18195 = vmatmul.mubr.msk.bf16.gmra.mxu1 %vm11597_vm4, %v21315_v40  ;;  %18191 = vmatmul.mubr.msk.bf16.gmra.mxu0 %vm11597_vm4, %v21316_v4 }
 0xbd4   :  { %11717 = vmatprep.mubr.bf16.mxu1 %v23520_v17  ;;  %11677 = vmatprep.mubr.bf16.mxu0 %v23520_v17 }
 0xbdb   :  { %18196 = vmatmul.mubr.msk.bf16.gmra.mxu1 %vm11597_vm4, %v21317_v15  ;;  %18192 = vmatmul.mubr.msk.bf16.gmra.mxu0 %vm11597_vm4, %v21318_v6 }
 0xbdc   :  { %11727 = vmatprep.mubr.bf16.mxu1 %v23520_v17  ;;  %11687 = vmatprep.mubr.bf16.mxu0 %v23520_v17 }
 0xbe3   :  { %18197 = vmatmul.mubr.msk.bf16.gmra.mxu1 %vm11597_vm4, %v21319_v31  ;;  %18193 = vmatmul.mubr.msk.bf16.gmra.mxu0 %vm11597_vm4, %v21320_v57 }
 0xbe4   :  { %11737 = vmatprep.mubr.bf16.mxu1 %v23520_v17 }
 0xbeb   :  { %18198 = vmatmul.mubr.msk.bf16.gmra.mxu1 %vm11597_vm4, %v21321_v63 }
 0xc8b   :  { %v11699_v2 = vpop.f32.mrf.mxu1  ;;  %v11659_v37 = vpop.f32.mrf.mxu0 }
 0xc8d   :  { %v11701_v61 = vpop.f32.mrf.mxu1  ;;  %v11661_v48 = vpop.f32.mrf.mxu0 }
 0xc8e   :  { %v19056_v12 = vpack.c.bf16 %v11701_v61, %v11699_v2  ;;  %v19048_v0 = vpack.c.bf16 %v11661_v48, %v11659_v37 }
 0xc8f   :  { %v11703_v26 = vpop.f32.mrf.mxu1  ;;  %v11663_v32 = vpop.f32.mrf.mxu0 }
 0xc90   :  { %11864 = vst [vmem:[#allocation2 + $0x40] sm:$0xff] %v19056_v12  ;;  %11856 = vst [vmem:[#allocation2] sm:$0xff] %v19048_v0 }
 0xc91   :  { %v11705_v24 = vpop.f32.mrf.mxu1  ;;  %v11665_v22 = vpop.f32.mrf.mxu0 }
 0xc92   :  { %v19057_v35 = vpack.c.bf16 %v11705_v24, %v11703_v26  ;;  %v19049_v33 = vpack.c.bf16 %v11665_v22, %v11663_v32 }
 0xc93   :  { %v11709_v51 = vpop.f32.mrf.mxu1  ;;  %v11669_v59 = vpop.f32.mrf.mxu0 }
 0xc94   :  { %11865 = vst [vmem:[#allocation2 + $0x48] sm:$0xff] %v19057_v35  ;;  %11857 = vst [vmem:[#allocation2 + $0x8] sm:$0xff] %v19049_v33 }
 0xc95   :  { %v11711_v50 = vpop.f32.mrf.mxu1  ;;  %v11671_v28 = vpop.f32.mrf.mxu0 }
 0xc96   :  { %v19058_v45 = vpack.c.bf16 %v11711_v50, %v11709_v51  ;;  %v19050_v47 = vpack.c.bf16 %v11671_v28, %v11669_v59 }
 0xc97   :  { %v11713_v21 = vpop.f32.mrf.mxu1  ;;  %v11673_v14 = vpop.f32.mrf.mxu0 }
 0xc98   :  { %11866 = vst [vmem:[#allocation2 + $0x50] sm:$0xff] %v19058_v45  ;;  %11858 = vst [vmem:[#allocation2 + $0x10] sm:$0xff] %v19050_v47 }
 0xc99   :  { %v11715_v49 = vpop.f32.mrf.mxu1  ;;  %v11675_v44 = vpop.f32.mrf.mxu0 }
 0xc9a   :  { %v19059_v36 = vpack.c.bf16 %v11715_v49, %v11713_v21  ;;  %v19051_v41 = vpack.c.bf16 %v11675_v44, %v11673_v14 }
 0xc9b   :  { %v11719_v1 = vpop.f32.mrf.mxu1  ;;  %v11679_v38 = vpop.f32.mrf.mxu0 }
 0xc9c   :  { %11867 = vst [vmem:[#allocation2 + $0x58] sm:$0xff] %v19059_v36  ;;  %11859 = vst [vmem:[#allocation2 + $0x18] sm:$0xff] %v19051_v41 }
 0xc9d   :  { %v11721_v53 = vpop.f32.mrf.mxu1  ;;  %v11681_v10 = vpop.f32.mrf.mxu0 }
 0xc9e   :  { %v19060_v7 = vpack.c.bf16 %v11721_v53, %v11719_v1  ;;  %v19052_v20 = vpack.c.bf16 %v11681_v10, %v11679_v38 }
 0xc9f   :  { %v11723_v55 = vpop.f32.mrf.mxu1  ;;  %v11683_v58 = vpop.f32.mrf.mxu0 }
 0xca0   :  { %11868 = vst [vmem:[#allocation2 + $0x60] sm:$0xff] %v19060_v7  ;;  %11860 = vst [vmem:[#allocation2 + $0x20] sm:$0xff] %v19052_v20 }
 0xca1   :  { %v11725_v18 = vpop.f32.mrf.mxu1  ;;  %v11685_v25 = vpop.f32.mrf.mxu0 }
 0xca2   :  { %v19061_v16 = vpack.c.bf16 %v11725_v18, %v11723_v55  ;;  %v19053_v56 = vpack.c.bf16 %v11685_v25, %v11683_v58 }
 0xca3   :  { %v11729_v60 = vpop.f32.mrf.mxu1  ;;  %v11689_v43 = vpop.f32.mrf.mxu0 }
 0xca4   :  { %11869 = vst [vmem:[#allocation2 + $0x68] sm:$0xff] %v19061_v16  ;;  %11861 = vst [vmem:[#allocation2 + $0x28] sm:$0xff] %v19053_v56 }
 0xca5   :  { %v11731_v27 = vpop.f32.mrf.mxu1  ;;  %v11691_v30 = vpop.f32.mrf.mxu0 }
 0xca6   :  { %v19062_v46 = vpack.c.bf16 %v11731_v27, %v11729_v60  ;;  %v19054_v3 = vpack.c.bf16 %v11691_v30, %v11689_v43 }
 0xca7   :  { %v11733_v52 = vpop.f32.mrf.mxu1  ;;  %v11693_v62 = vpop.f32.mrf.mxu0 }
 0xca8   :  { %11870 = vst [vmem:[#allocation2 + $0x70] sm:$0xff] %v19062_v46  ;;  %11862 = vst [vmem:[#allocation2 + $0x30] sm:$0xff] %v19054_v3 }
 0xca9   :  { %v11735_v34 = vpop.f32.mrf.mxu1  ;;  %v11695_v19 = vpop.f32.mrf.mxu0 }
 0xcaa   :  { %v19063_v11 = vpack.c.bf16 %v11735_v34, %v11733_v52  ;;  %v19055_v54 = vpack.c.bf16 %v11695_v19, %v11693_v62 }
 0xcab   :  { %v11739_v29 = vpop.f32.mrf.mxu1 }
 0xcac   :  { %11871 = vst [vmem:[#allocation2 + $0x78] sm:$0xff] %v19063_v11  ;;  %11863 = vst [vmem:[#allocation2 + $0x38] sm:$0xff] %v19055_v54 }
 0xcad   :  { %v11741_v42 = vpop.f32.mrf.mxu1 }
 0xcae   :  { %v19064_v13 = vpack.c.bf16 %v11741_v42, %v11739_v29 }
 0xcaf   :  { %v11743_v39 = vpop.f32.mrf.mxu1 }
 0xcb0   :  { %11872 = vst [vmem:[#allocation2 + $0x80] sm:$0xff] %v19064_v13 }
 0xcb1   :  { %v11745_v8 = vpop.f32.mrf.mxu1 }
 0xcb2   :  { %v19065_v23 = vpack.c.bf16 %v11745_v8, %v11743_v39 }
 0xcb4   :  { %11873 = vst [vmem:[#allocation2 + $0x88] sm:$0xff] %v19065_v23 }
 0xcb5   :  { %22500 = dma.done.wait [#allocation6 + $0x2], 73728 }
 0xcb6   :  { %22501 = vsyncadd [#allocation6 + $0x2], 4294893568  ;;  %12143 = vmatprep.mubr.bf16.mxu1 %v23520_v17  ;;  %12391 = vmatprep.mubr.bf16.mxu0 %v23520_v17  ;;  %v21322_v40 = vld [vmem:[#allocation5 + $0x1e4] ss:$16 sps:$4 sm:$0xff]   ;;  %v21326_v15 = vld [vmem:[#allocation5 + $0x1e0] ss:$16 sps:$4 sm:$0xff]  }
 0xcb7   :  { %v21324_v4 = vld [vmem:[#allocation5 + $0xe4] ss:$16 sps:$4 sm:$0xff]   ;;  %12111 = vmatprep.subr.bf16.mxu1 %v21322_v40  ;;  %v21327_v6 = vld [vmem:[#allocation5 + $0xe0] ss:$16 sps:$4 sm:$0xff]   ;;  %v21373_v38 = vld [vmem:[#allocation5 + $0x1ec] ss:$16 sps:$4 sm:$0xff]  }
 0xcb8   :  { %12359 = vmatprep.subr.bf16.mxu0 %v21324_v4  ;;  %v21328_v31 = vld [vmem:[#allocation5 + $0x1c4] ss:$16 sps:$4 sm:$0xff]   ;;  %12112 = vmatpush1.bf16.msra.mxu1 %v21326_v15  ;;  %v21332_v63 = vld [vmem:[#allocation5 + $0x1c0] ss:$16 sps:$4 sm:$0xff]   ;;  %v21371_v20 = vld [vmem:[#allocation5 + $0x1e8] ss:$16 sps:$4 sm:$0xff]  }
 0xcb9   :  { %12360 = vmatpush1.bf16.msra.mxu0 %v21327_v6  ;;  %v21330_v57 = vld [vmem:[#allocation5 + $0xc4] ss:$16 sps:$4 sm:$0xff]   ;;  %12113 = vmatprep.subr.bf16.mxu1 %v21328_v31  ;;  %v21333_v2 = vld [vmem:[#allocation5 + $0xc0] ss:$16 sps:$4 sm:$0xff]   ;;  %v21380_v58 = vld [vmem:[#allocation5 + $0x1cc] ss:$16 sps:$4 sm:$0xff]  }
 0xcba   :  { %12361 = vmatprep.subr.bf16.mxu0 %v21330_v57  ;;  %v21334_v37 = vld [vmem:[#allocation5 + $0x1a4] ss:$16 sps:$4 sm:$0xff]   ;;  %v21338_v48 = vld [vmem:[#allocation5 + $0x1a0] ss:$16 sps:$4 sm:$0xff]   ;;  %v21378_v25 = vld [vmem:[#allocation5 + $0x1c8] ss:$16 sps:$4 sm:$0xff]  }
 0xcbb   :  { %v21336_v61 = vld [vmem:[#allocation5 + $0xa4] ss:$16 sps:$4 sm:$0xff]   ;;  %v21339_v12 = vld [vmem:[#allocation5 + $0xa0] ss:$16 sps:$4 sm:$0xff]   ;;  %v21386_v56 = vld [vmem:[#allocation5 + $0x1ac] ss:$16 sps:$4 sm:$0xff]  }
 0xcbc   :  { %12114 = vmatpush1.bf16.msra.mxu1 %v21332_v63  ;;  %v21340_v0 = vld [vmem:[#allocation5 + $0x184] ss:$16 sps:$4 sm:$0xff]   ;;  %v21344_v32 = vld [vmem:[#allocation5 + $0x180] ss:$16 sps:$4 sm:$0xff]   ;;  %v21384_v43 = vld [vmem:[#allocation5 + $0x1a8] ss:$16 sps:$4 sm:$0xff]  }
 0xcbd   :  { %12362 = vmatpush1.bf16.msra.mxu0 %v21333_v2  ;;  %12115 = vmatprep.subr.bf16.mxu1 %v21334_v37  ;;  %v21342_v26 = vld [vmem:[#allocation5 + $0x84] ss:$16 sps:$4 sm:$0xff]   ;;  %v21345_v24 = vld [vmem:[#allocation5 + $0x80] ss:$16 sps:$4 sm:$0xff]   ;;  %v21392_v30 = vld [vmem:[#allocation5 + $0x18c] ss:$16 sps:$4 sm:$0xff]  }
 0xcbe   :  { %12363 = vmatprep.subr.bf16.mxu0 %v21336_v61  ;;  %v21346_v22 = vld [vmem:[#allocation5 + $0x164] ss:$16 sps:$4 sm:$0xff]   ;;  %v21350_v33 = vld [vmem:[#allocation5 + $0x160] ss:$16 sps:$4 sm:$0xff]   ;;  %v21390_v3 = vld [vmem:[#allocation5 + $0x188] ss:$16 sps:$4 sm:$0xff]  }
 0xcbf   :  { %v21348_v35 = vld [vmem:[#allocation5 + $0x64] ss:$16 sps:$4 sm:$0xff]   ;;  %v21351_v51 = vld [vmem:[#allocation5 + $0x60] ss:$16 sps:$4 sm:$0xff]   ;;  %v21398_v62 = vld [vmem:[#allocation5 + $0x16c] ss:$16 sps:$4 sm:$0xff]  }
 0xcc0   :  { %12116 = vmatpush1.bf16.msra.mxu1 %v21338_v48  ;;  %v21352_v59 = vld [vmem:[#allocation5 + $0x144] ss:$16 sps:$4 sm:$0xff]   ;;  %v21356_v28 = vld [vmem:[#allocation5 + $0x140] ss:$16 sps:$4 sm:$0xff]   ;;  %v21396_v19 = vld [vmem:[#allocation5 + $0x168] ss:$16 sps:$4 sm:$0xff]  }
 0xcc1   :  { %12364 = vmatpush1.bf16.msra.mxu0 %v21339_v12  ;;  %12117 = vmatprep.subr.bf16.mxu1 %v21340_v0  ;;  %v21354_v50 = vld [vmem:[#allocation5 + $0x44] ss:$16 sps:$4 sm:$0xff]   ;;  %v21357_v45 = vld [vmem:[#allocation5 + $0x40] ss:$16 sps:$4 sm:$0xff]   ;;  %v21404_v54 = vld [vmem:[#allocation5 + $0x14c] ss:$16 sps:$4 sm:$0xff]  }
 0xcc2   :  { %12365 = vmatprep.subr.bf16.mxu0 %v21342_v26  ;;  %v21358_v47 = vld [vmem:[#allocation5 + $0x124] ss:$16 sps:$4 sm:$0xff]   ;;  %v21362_v14 = vld [vmem:[#allocation5 + $0x120] ss:$16 sps:$4 sm:$0xff]   ;;  %v21402_v42 = vld [vmem:[#allocation5 + $0x148] ss:$16 sps:$4 sm:$0xff]  }
 0xcc3   :  { %v21360_v21 = vld [vmem:[#allocation5 + $0x24] ss:$16 sps:$4 sm:$0xff]   ;;  %v21363_v49 = vld [vmem:[#allocation5 + $0x20] ss:$16 sps:$4 sm:$0xff]   ;;  %v21410_v39 = vld [vmem:[#allocation5 + $0x12c] ss:$16 sps:$4 sm:$0xff]  }
 0xcc4   :  { %12118 = vmatpush1.bf16.msra.mxu1 %v21344_v32  ;;  %v21364_v44 = vld [vmem:[#allocation5 + $0x104] ss:$16 sps:$4 sm:$0xff]   ;;  %v21368_v41 = vld [vmem:[#allocation5 + $0x100] ss:$16 sps:$4 sm:$0xff]   ;;  %v21408_v23 = vld [vmem:[#allocation5 + $0x128] ss:$16 sps:$4 sm:$0xff]  }
 0xcc5   :  { %12366 = vmatpush1.bf16.msra.mxu0 %v21345_v24  ;;  %12119 = vmatprep.subr.bf16.mxu1 %v21346_v22  ;;  %v21366_v36 = vld [vmem:[#allocation5 + $0x4] ss:$16 sps:$4 sm:$0xff]   ;;  %v21369_v1 = vld [vmem:[#allocation5] ss:$16 sps:$4 sm:$0xff]   ;;  %v21416_v4 = vld [vmem:[#allocation5 + $0x10c] ss:$16 sps:$4 sm:$0xff]  }
 0xcc6   :  { %12367 = vmatprep.subr.bf16.mxu0 %v21348_v35  ;;  %v21377_v53 = vld [vmem:[#allocation5 + $0x2e4] ss:$16 sps:$4 sm:$0xff]   ;;  %v23229_v7 = vld [vmem:[#allocation2] ss:$8 sps:$4 sm:$0xff]   ;;  %v21422_v57 = vld [vmem:[#allocation5 + $0xec] ss:$16 sps:$4 sm:$0xff]  }
 0xcc7   :  { %v23227_v10 = vld [vmem:[#allocation2 + $0x4] ss:$8 sps:$4 sm:$0xff]   ;;  %v21375_v55 = vld [vmem:[#allocation5 + $0x2e0] ss:$16 sps:$4 sm:$0xff]   ;;  %v21414_v6 = vld [vmem:[#allocation5 + $0x108] ss:$16 sps:$4 sm:$0xff]  }
 0xcc8   :  { %12120 = vmatpush1.bf16.msra.mxu1 %v21350_v33  ;;  %v21383_v18 = vld [vmem:[#allocation5 + $0x2c4] ss:$16 sps:$4 sm:$0xff]   ;;  %v21381_v16 = vld [vmem:[#allocation5 + $0x2c0] ss:$16 sps:$4 sm:$0xff]   ;;  %v21420_v2 = vld [vmem:[#allocation5 + $0xe8] ss:$16 sps:$4 sm:$0xff]  }
 0xcc9   :  { %12368 = vmatpush1.bf16.msra.mxu0 %v21351_v51  ;;  %12121 = vmatprep.subr.bf16.mxu1 %v21352_v59  ;;  %v21389_v60 = vld [vmem:[#allocation5 + $0x2a4] ss:$16 sps:$4 sm:$0xff]   ;;  %v21387_v27 = vld [vmem:[#allocation5 + $0x2a0] ss:$16 sps:$4 sm:$0xff]   ;;  %v21429_v48 = vld [vmem:[#allocation5 + $0xcc] ss:$16 sps:$4 sm:$0xff]  }
 0xcca   :  { %12369 = vmatprep.subr.bf16.mxu0 %v21354_v50  ;;  %v21395_v46 = vld [vmem:[#allocation5 + $0x284] ss:$16 sps:$4 sm:$0xff]   ;;  %v21393_v52 = vld [vmem:[#allocation5 + $0x280] ss:$16 sps:$4 sm:$0xff]   ;;  %v21427_v0 = vld [vmem:[#allocation5 + $0xc8] ss:$16 sps:$4 sm:$0xff]  }
 0xccb   :  { %v21401_v34 = vld [vmem:[#allocation5 + $0x264] ss:$16 sps:$4 sm:$0xff]   ;;  %v21399_v11 = vld [vmem:[#allocation5 + $0x260] ss:$16 sps:$4 sm:$0xff]   ;;  %v21435_v32 = vld [vmem:[#allocation5 + $0xac] ss:$16 sps:$4 sm:$0xff]  }
 0xccc   :  { %12122 = vmatpush1.bf16.msra.mxu1 %v21356_v28  ;;  %v21407_v29 = vld [vmem:[#allocation5 + $0x244] ss:$16 sps:$4 sm:$0xff]   ;;  %v21405_v13 = vld [vmem:[#allocation5 + $0x240] ss:$16 sps:$4 sm:$0xff]   ;;  %v21433_v22 = vld [vmem:[#allocation5 + $0xa8] ss:$16 sps:$4 sm:$0xff]  }
 0xccd   :  { %12370 = vmatpush1.bf16.msra.mxu0 %v21357_v45  ;;  %12123 = vmatprep.subr.bf16.mxu1 %v21358_v47  ;;  %v21413_v8 = vld [vmem:[#allocation5 + $0x224] ss:$16 sps:$4 sm:$0xff]   ;;  %v21411_v40 = vld [vmem:[#allocation5 + $0x220] ss:$16 sps:$4 sm:$0xff]   ;;  %v21441_v33 = vld [vmem:[#allocation5 + $0x8c] ss:$16 sps:$4 sm:$0xff]  }
 0xcce   :  { %12371 = vmatprep.subr.bf16.mxu0 %v21360_v21  ;;  %v21419_v15 = vld [vmem:[#allocation5 + $0x204] ss:$16 sps:$4 sm:$0xff]   ;;  %v21417_v31 = vld [vmem:[#allocation5 + $0x200] ss:$16 sps:$4 sm:$0xff]   ;;  %v21439_v59 = vld [vmem:[#allocation5 + $0x88] ss:$16 sps:$4 sm:$0xff]  }
 0xccf   :  { %v21426_v63 = vld [vmem:[#allocation5 + $0x3e4] ss:$16 sps:$4 sm:$0xff]   ;;  %v23235_v37 = vld [vmem:[#allocation2 + $0x10] ss:$8 sps:$4 sm:$0xff]   ;;  %v21447_v28 = vld [vmem:[#allocation5 + $0x6c] ss:$16 sps:$4 sm:$0xff]  }
 0xcd0   :  { %12124 = vmatpush1.bf16.msra.mxu1 %v21362_v14  ;;  %v21424_v61 = vld [vmem:[#allocation5 + $0x3e0] ss:$16 sps:$4 sm:$0xff]   ;;  %v21432_v12 = vld [vmem:[#allocation5 + $0x3c4] ss:$16 sps:$4 sm:$0xff]   ;;  %v21445_v47 = vld [vmem:[#allocation5 + $0x68] ss:$16 sps:$4 sm:$0xff]  }
 0xcd1   :  { %12372 = vmatpush1.bf16.msra.mxu0 %v21363_v49  ;;  %12125 = vmatprep.subr.bf16.mxu1 %v21364_v44  ;;  %v21430_v26 = vld [vmem:[#allocation5 + $0x3c0] ss:$16 sps:$4 sm:$0xff]   ;;  %v21438_v24 = vld [vmem:[#allocation5 + $0x3a4] ss:$16 sps:$4 sm:$0xff]   ;;  %v21453_v14 = vld [vmem:[#allocation5 + $0x4c] ss:$16 sps:$4 sm:$0xff]  }
 0xcd2   :  { %12373 = vmatprep.subr.bf16.mxu0 %v21366_v36  ;;  %v21436_v35 = vld [vmem:[#allocation5 + $0x3a0] ss:$16 sps:$4 sm:$0xff]   ;;  %v21444_v51 = vld [vmem:[#allocation5 + $0x384] ss:$16 sps:$4 sm:$0xff]   ;;  %v21451_v44 = vld [vmem:[#allocation5 + $0x48] ss:$16 sps:$4 sm:$0xff]  }
 0xcd3   :  { %v21442_v50 = vld [vmem:[#allocation5 + $0x380] ss:$16 sps:$4 sm:$0xff]   ;;  %v21450_v45 = vld [vmem:[#allocation5 + $0x364] ss:$16 sps:$4 sm:$0xff]  }
 0xcd4   :  { %12126 = vmatpush1.bf16.msra.mxu1 %v21368_v41  ;;  %v21448_v21 = vld [vmem:[#allocation5 + $0x360] ss:$16 sps:$4 sm:$0xff]   ;;  %v21456_v49 = vld [vmem:[#allocation5 + $0x344] ss:$16 sps:$4 sm:$0xff]   ;;  %v21459_v41 = vld [vmem:[#allocation5 + $0x2c] ss:$16 sps:$4 sm:$0xff]  }
 0xcd5   :  { %12374 = vmatpush1.bf16.msra.mxu0 %v21369_v1  ;;  %12152 = vmatprep.subr.bf16.mxu1 %v21373_v38  ;;  %v21454_v36 = vld [vmem:[#allocation5 + $0x340] ss:$16 sps:$4 sm:$0xff]   ;;  %v21462_v1 = vld [vmem:[#allocation5 + $0x324] ss:$16 sps:$4 sm:$0xff]   ;;  %v21457_v38 = vld [vmem:[#allocation5 + $0x28] ss:$16 sps:$4 sm:$0xff]  }
 0xcd6   :  { %12641 = vmatprep.subr.bf16.mxu0 %v21377_v53  ;;  %v21460_v53 = vld [vmem:[#allocation5 + $0x320] ss:$16 sps:$4 sm:$0xff]  }
 0xcd7   :  { %12144 = vmatmul.mubr.bf16.vlgmr.msra.gmra.mxu1 %v23227_v10 }
 0xcd8   :  { %12392 = vmatmul.mubr.bf16.vlgmr.msra.gmra.mxu0 %v23229_v7  ;;  %12153 = vmatpush1.bf16.msra.mxu1 %v21371_v20  ;;  %v21468_v20 = vld [vmem:[#allocation5 + $0x304] ss:$16 sps:$4 sm:$0xff]  }
 0xcd9   :  { %12642 = vmatpush1.bf16.msra.mxu0 %v21375_v55  ;;  %12154 = vmatprep.subr.bf16.mxu1 %v21380_v58  ;;  %v21463_v55 = vld [vmem:[#allocation5 + $0x8] ss:$16 sps:$4 sm:$0xff]   ;;  %v21466_v58 = vld [vmem:[#allocation5 + $0x300] ss:$16 sps:$4 sm:$0xff]  }
 0xcda   :  { %12643 = vmatprep.subr.bf16.mxu0 %v21383_v18  ;;  %12184 = vmatprep.mubr.bf16.mxu1 %v23520_v17  ;;  %v21471_v18 = vld [vmem:[#allocation5 + $0x2ec] ss:$16 sps:$4 sm:$0xff]  }
 0xcdb   :  { %12673 = vmatprep.mubr.bf16.mxu0 %v23520_v17 }
 0xcdc   :  { %12155 = vmatpush1.bf16.msra.mxu1 %v21378_v25  ;;  %v21475_v25 = vld [vmem:[#allocation5 + $0x4e4] ss:$16 sps:$4 sm:$0xff]  }
 0xcdd   :  { %12644 = vmatpush1.bf16.msra.mxu0 %v21381_v16  ;;  %12156 = vmatprep.subr.bf16.mxu1 %v21386_v56  ;;  %v21469_v16 = vld [vmem:[#allocation5 + $0x2e8] ss:$16 sps:$4 sm:$0xff]   ;;  %v23241_v56 = vld [vmem:[#allocation2 + $0x14] ss:$8 sps:$4 sm:$0xff]  }
 0xcde   :  { %12645 = vmatprep.subr.bf16.mxu0 %v21389_v60  ;;  %v21473_v60 = vld [vmem:[#allocation5 + $0x4e0] ss:$16 sps:$4 sm:$0xff]  }
 0xce0   :  { %12157 = vmatpush1.bf16.msra.mxu1 %v21384_v43  ;;  %v21478_v43 = vld [vmem:[#allocation5 + $0x2cc] ss:$16 sps:$4 sm:$0xff]  }
 0xce1   :  { %12646 = vmatpush1.bf16.msra.mxu0 %v21387_v27  ;;  %12158 = vmatprep.subr.bf16.mxu1 %v21392_v30  ;;  %v21481_v27 = vld [vmem:[#allocation5 + $0x4c4] ss:$16 sps:$4 sm:$0xff]   ;;  %v21476_v30 = vld [vmem:[#allocation5 + $0x2c8] ss:$16 sps:$4 sm:$0xff]  }
 0xce2   :  { %12647 = vmatprep.subr.bf16.mxu0 %v21395_v46  ;;  %v21479_v46 = vld [vmem:[#allocation5 + $0x4c0] ss:$16 sps:$4 sm:$0xff]  }
 0xce4   :  { %12159 = vmatpush1.bf16.msra.mxu1 %v21390_v3  ;;  %v21484_v3 = vld [vmem:[#allocation5 + $0x2ac] ss:$16 sps:$4 sm:$0xff]  }
 0xce5   :  { %12648 = vmatpush1.bf16.msra.mxu0 %v21393_v52  ;;  %12160 = vmatprep.subr.bf16.mxu1 %v21398_v62  ;;  %v21487_v52 = vld [vmem:[#allocation5 + $0x4a4] ss:$16 sps:$4 sm:$0xff]   ;;  %v21482_v62 = vld [vmem:[#allocation5 + $0x2a8] ss:$16 sps:$4 sm:$0xff]  }
 0xce6   :  { %12649 = vmatprep.subr.bf16.mxu0 %v21401_v34  ;;  %v21485_v34 = vld [vmem:[#allocation5 + $0x4a0] ss:$16 sps:$4 sm:$0xff]  }
 0xce8   :  { %12161 = vmatpush1.bf16.msra.mxu1 %v21396_v19  ;;  %v21490_v19 = vld [vmem:[#allocation5 + $0x28c] ss:$16 sps:$4 sm:$0xff]  }
 0xce9   :  { %12650 = vmatpush1.bf16.msra.mxu0 %v21399_v11  ;;  %12162 = vmatprep.subr.bf16.mxu1 %v21404_v54  ;;  %v21488_v11 = vld [vmem:[#allocation5 + $0x288] ss:$16 sps:$4 sm:$0xff]   ;;  %v21491_v54 = vld [vmem:[#allocation5 + $0x480] ss:$16 sps:$4 sm:$0xff]  }
 0xcea   :  { %12651 = vmatprep.subr.bf16.mxu0 %v21407_v29  ;;  %v21496_v29 = vld [vmem:[#allocation5 + $0x26c] ss:$16 sps:$4 sm:$0xff]  }
 0xcec   :  { %12163 = vmatpush1.bf16.msra.mxu1 %v21402_v42  ;;  %v21499_v42 = vld [vmem:[#allocation5 + $0x464] ss:$16 sps:$4 sm:$0xff]  }
 0xced   :  { %12652 = vmatpush1.bf16.msra.mxu0 %v21405_v13  ;;  %12164 = vmatprep.subr.bf16.mxu1 %v21410_v39  ;;  %v21494_v13 = vld [vmem:[#allocation5 + $0x268] ss:$16 sps:$4 sm:$0xff]   ;;  %v21497_v39 = vld [vmem:[#allocation5 + $0x460] ss:$16 sps:$4 sm:$0xff]  }
 0xcee   :  { %12653 = vmatprep.subr.bf16.mxu0 %v21413_v8  ;;  %v21502_v8 = vld [vmem:[#allocation5 + $0x24c] ss:$16 sps:$4 sm:$0xff]  }
 0xcf0   :  { %12165 = vmatpush1.bf16.msra.mxu1 %v21408_v23  ;;  %v21505_v23 = vld [vmem:[#allocation5 + $0x444] ss:$16 sps:$4 sm:$0xff]  }
 0xcf1   :  { %12654 = vmatpush1.bf16.msra.mxu0 %v21411_v40  ;;  %12166 = vmatprep.subr.bf16.mxu1 %v21416_v4  ;;  %v21500_v40 = vld [vmem:[#allocation5 + $0x248] ss:$16 sps:$4 sm:$0xff]   ;;  %v21503_v4 = vld [vmem:[#allocation5 + $0x440] ss:$16 sps:$4 sm:$0xff]  }
 0xcf2   :  { %12655 = vmatprep.subr.bf16.mxu0 %v21419_v15  ;;  %v21508_v15 = vld [vmem:[#allocation5 + $0x22c] ss:$16 sps:$4 sm:$0xff]  }
 0xcf4   :  { %12167 = vmatpush1.bf16.msra.mxu1 %v21414_v6  ;;  %v21511_v6 = vld [vmem:[#allocation5 + $0x424] ss:$16 sps:$4 sm:$0xff]  }
 0xcf5   :  { %12656 = vmatpush1.bf16.msra.mxu0 %v21417_v31  ;;  %12400 = vmatprep.subr.bf16.mxu1 %v21422_v57  ;;  %v21506_v31 = vld [vmem:[#allocation5 + $0x228] ss:$16 sps:$4 sm:$0xff]   ;;  %v21509_v57 = vld [vmem:[#allocation5 + $0x420] ss:$16 sps:$4 sm:$0xff]  }
 0xcf6   :  { %12927 = vmatprep.subr.bf16.mxu0 %v21426_v63  ;;  %v21514_v63 = vld [vmem:[#allocation5 + $0x20c] ss:$16 sps:$4 sm:$0xff]  }
 0xcf7   :  { %12185 = vmatmul.mubr.bf16.vlgmr.msra.gmra.mxu1 %v23227_v10  ;;  %v21465_v10 = vld [vmem:[#allocation5 + $0xc] ss:$16 sps:$4 sm:$0xff]  }
 0xcf8   :  { %12674 = vmatmul.mubr.bf16.vlgmr.msra.gmra.mxu0 %v23235_v37  ;;  %12401 = vmatpush1.bf16.msra.mxu1 %v21420_v2  ;;  %v21517_v2 = vld [vmem:[#allocation5 + $0x404] ss:$16 sps:$4 sm:$0xff]  }
 0xcf9   :  { %12928 = vmatpush1.bf16.msra.mxu0 %v21424_v61  ;;  %12402 = vmatprep.subr.bf16.mxu1 %v21429_v48  ;;  %v21512_v61 = vld [vmem:[#allocation5 + $0x208] ss:$16 sps:$4 sm:$0xff]   ;;  %v21515_v48 = vld [vmem:[#allocation5 + $0x400] ss:$16 sps:$4 sm:$0xff]  }
 0xcfa   :  { %12929 = vmatprep.subr.bf16.mxu0 %v21432_v12  ;;  %12432 = vmatprep.mubr.bf16.mxu1 %v23520_v17  ;;  %v21520_v12 = vld [vmem:[#allocation5 + $0x3ec] ss:$16 sps:$4 sm:$0xff]  }
 0xcfb   :  { %12959 = vmatprep.mubr.bf16.mxu0 %v23520_v17 }
 0xcfc   :  { %12403 = vmatpush1.bf16.msra.mxu1 %v21427_v0  ;;  %v21524_v0 = vld [vmem:[#allocation5 + $0x5e4] ss:$16 sps:$4 sm:$0xff]  }
 0xcfd   :  { %12930 = vmatpush1.bf16.msra.mxu0 %v21430_v26  ;;  %12404 = vmatprep.subr.bf16.mxu1 %v21435_v32  ;;  %v23247_v26 = vld [vmem:[#allocation2 + $0x20] ss:$8 sps:$4 sm:$0xff]  }
 0xcfe   :  { %12931 = vmatprep.subr.bf16.mxu0 %v21438_v24  ;;  %v21518_v32 = vld [vmem:[#allocation5 + $0x3e8] ss:$16 sps:$4 sm:$0xff]   ;;  %v21522_v24 = vld [vmem:[#allocation5 + $0x5e0] ss:$16 sps:$4 sm:$0xff]  }
 0xd00   :  { %12405 = vmatpush1.bf16.msra.mxu1 %v21433_v22  ;;  %v21527_v22 = vld [vmem:[#allocation5 + $0x3cc] ss:$16 sps:$4 sm:$0xff]  }
 0xd01   :  { %12932 = vmatpush1.bf16.msra.mxu0 %v21436_v35  ;;  %12406 = vmatprep.subr.bf16.mxu1 %v21441_v33  ;;  %v21530_v35 = vld [vmem:[#allocation5 + $0x5c4] ss:$16 sps:$4 sm:$0xff]   ;;  %v21525_v33 = vld [vmem:[#allocation5 + $0x3c8] ss:$16 sps:$4 sm:$0xff]  }
 0xd02   :  { %12933 = vmatprep.subr.bf16.mxu0 %v21444_v51  ;;  %v21528_v51 = vld [vmem:[#allocation5 + $0x5c0] ss:$16 sps:$4 sm:$0xff]  }
 0xd04   :  { %12407 = vmatpush1.bf16.msra.mxu1 %v21439_v59  ;;  %v21533_v59 = vld [vmem:[#allocation5 + $0x3ac] ss:$16 sps:$4 sm:$0xff]  }
 0xd05   :  { %12934 = vmatpush1.bf16.msra.mxu0 %v21442_v50  ;;  %12408 = vmatprep.subr.bf16.mxu1 %v21447_v28  ;;  %v21536_v50 = vld [vmem:[#allocation5 + $0x5a4] ss:$16 sps:$4 sm:$0xff]   ;;  %v21531_v28 = vld [vmem:[#allocation5 + $0x3a8] ss:$16 sps:$4 sm:$0xff]  }
 0xd06   :  { %12935 = vmatprep.subr.bf16.mxu0 %v21450_v45  ;;  %v21534_v45 = vld [vmem:[#allocation5 + $0x5a0] ss:$16 sps:$4 sm:$0xff]  }
 0xd08   :  { %12409 = vmatpush1.bf16.msra.mxu1 %v21445_v47  ;;  %v21542_v47 = vld [vmem:[#allocation5 + $0x584] ss:$16 sps:$4 sm:$0xff]  }
 0xd09   :  { %12936 = vmatpush1.bf16.msra.mxu0 %v21448_v21  ;;  %12410 = vmatprep.subr.bf16.mxu1 %v21453_v14  ;;  %v21537_v21 = vld [vmem:[#allocation5 + $0x388] ss:$16 sps:$4 sm:$0xff]   ;;  %v21540_v14 = vld [vmem:[#allocation5 + $0x580] ss:$16 sps:$4 sm:$0xff]  }
 0xd0a   :  { %12937 = vmatprep.subr.bf16.mxu0 %v21456_v49  ;;  %v21545_v49 = vld [vmem:[#allocation5 + $0x36c] ss:$16 sps:$4 sm:$0xff]  }
 0xd0c   :  { %12411 = vmatpush1.bf16.msra.mxu1 %v21451_v44  ;;  %v21548_v44 = vld [vmem:[#allocation5 + $0x564] ss:$16 sps:$4 sm:$0xff]  }
 0xd0d   :  { %12938 = vmatpush1.bf16.msra.mxu0 %v21454_v36  ;;  %12412 = vmatprep.subr.bf16.mxu1 %v21459_v41  ;;  %v21543_v36 = vld [vmem:[#allocation5 + $0x368] ss:$16 sps:$4 sm:$0xff]   ;;  %v21546_v41 = vld [vmem:[#allocation5 + $0x560] ss:$16 sps:$4 sm:$0xff]  }
 0xd0e   :  { %12939 = vmatprep.subr.bf16.mxu0 %v21462_v1  ;;  %v21551_v1 = vld [vmem:[#allocation5 + $0x34c] ss:$16 sps:$4 sm:$0xff]  }
 0xd10   :  { %12413 = vmatpush1.bf16.msra.mxu1 %v21457_v38  ;;  %v21554_v38 = vld [vmem:[#allocation5 + $0x544] ss:$16 sps:$4 sm:$0xff]  }
 0xd11   :  { %12940 = vmatpush1.bf16.msra.mxu0 %v21460_v53  ;;  %12414 = vmatprep.subr.bf16.mxu1 %v21465_v10  ;;  %v21549_v53 = vld [vmem:[#allocation5 + $0x348] ss:$16 sps:$4 sm:$0xff]   ;;  %v21552_v10 = vld [vmem:[#allocation5 + $0x540] ss:$16 sps:$4 sm:$0xff]  }
 0xd12   :  { %12941 = vmatprep.subr.bf16.mxu0 %v21468_v20  ;;  %v21557_v20 = vld [vmem:[#allocation5 + $0x32c] ss:$16 sps:$4 sm:$0xff]  }
 0xd14   :  { %12415 = vmatpush1.bf16.msra.mxu1 %v21463_v55  ;;  %v21560_v55 = vld [vmem:[#allocation5 + $0x524] ss:$16 sps:$4 sm:$0xff]  }
 0xd15   :  { %12942 = vmatpush1.bf16.msra.mxu0 %v21466_v58  ;;  %12682 = vmatprep.subr.bf16.mxu1 %v21471_v18  ;;  %v21555_v58 = vld [vmem:[#allocation5 + $0x328] ss:$16 sps:$4 sm:$0xff]   ;;  %v21558_v18 = vld [vmem:[#allocation5 + $0x520] ss:$16 sps:$4 sm:$0xff]  }
 0xd16   :  { %13213 = vmatprep.subr.bf16.mxu0 %v21475_v25  ;;  %v21563_v25 = vld [vmem:[#allocation5 + $0x30c] ss:$16 sps:$4 sm:$0xff]  }
 0xd17   :  { %12433 = vmatmul.mubr.bf16.vlgmr.msra.gmra.mxu1 %v23229_v7  ;;  %v21493_v7 = vld [vmem:[#allocation5 + $0x484] ss:$16 sps:$4 sm:$0xff]  }
 0xd18   :  { %12960 = vmatmul.mubr.bf16.vlgmr.msra.gmra.mxu0 %v23241_v56  ;;  %12683 = vmatpush1.bf16.msra.mxu1 %v21469_v16  ;;  %v21566_v16 = vld [vmem:[#allocation5 + $0x504] ss:$16 sps:$4 sm:$0xff]  }
 0xd19   :  { %13214 = vmatpush1.bf16.msra.mxu0 %v21473_v60  ;;  %12684 = vmatprep.subr.bf16.mxu1 %v21478_v43  ;;  %v21561_v60 = vld [vmem:[#allocation5 + $0x308] ss:$16 sps:$4 sm:$0xff]   ;;  %v21564_v43 = vld [vmem:[#allocation5 + $0x500] ss:$16 sps:$4 sm:$0xff]  }
 0xd1a   :  { %13215 = vmatprep.subr.bf16.mxu0 %v21481_v27  ;;  %12714 = vmatprep.mubr.bf16.mxu1 %v23520_v17  ;;  %v21569_v27 = vld [vmem:[#allocation5 + $0x4ec] ss:$16 sps:$4 sm:$0xff]  }
 0xd1b   :  { %13245 = vmatprep.mubr.bf16.mxu0 %v23520_v17 }
 0xd1c   :  { %12685 = vmatpush1.bf16.msra.mxu1 %v21476_v30  ;;  %v21573_v30 = vld [vmem:[#allocation5 + $0x6e4] ss:$16 sps:$4 sm:$0xff]  }
 0xd1d   :  { %13216 = vmatpush1.bf16.msra.mxu0 %v21479_v46  ;;  %12686 = vmatprep.subr.bf16.mxu1 %v21484_v3  ;;  %v21567_v46 = vld [vmem:[#allocation5 + $0x4e8] ss:$16 sps:$4 sm:$0xff]   ;;  %v23253_v3 = vld [vmem:[#allocation2 + $0x24] ss:$8 sps:$4 sm:$0xff]  }
 0xd1e   :  { %13217 = vmatprep.subr.bf16.mxu0 %v21487_v52  ;;  %v21571_v52 = vld [vmem:[#allocation5 + $0x6e0] ss:$16 sps:$4 sm:$0xff]  }
 0xd20   :  { %12687 = vmatpush1.bf16.msra.mxu1 %v21482_v62  ;;  %v21576_v62 = vld [vmem:[#allocation5 + $0x4cc] ss:$16 sps:$4 sm:$0xff]  }
 0xd21   :  { %13218 = vmatpush1.bf16.msra.mxu0 %v21485_v34  ;;  %12688 = vmatprep.subr.bf16.mxu1 %v21490_v19  ;;  %v21579_v34 = vld [vmem:[#allocation5 + $0x6c4] ss:$16 sps:$4 sm:$0xff]   ;;  %v21574_v19 = vld [vmem:[#allocation5 + $0x4c8] ss:$16 sps:$4 sm:$0xff]  }
 0xd22   :  { %13219 = vmatprep.subr.bf16.mxu0 %v21493_v7  ;;  %v21577_v7 = vld [vmem:[#allocation5 + $0x6c0] ss:$16 sps:$4 sm:$0xff]  }
 0xd24   :  { %12689 = vmatpush1.bf16.msra.mxu1 %v21488_v11  ;;  %v21582_v11 = vld [vmem:[#allocation5 + $0x4ac] ss:$16 sps:$4 sm:$0xff]  }
 0xd25   :  { %13220 = vmatpush1.bf16.msra.mxu0 %v21491_v54  ;;  %12690 = vmatprep.subr.bf16.mxu1 %v21496_v29  ;;  %v21585_v54 = vld [vmem:[#allocation5 + $0x6a4] ss:$16 sps:$4 sm:$0xff]   ;;  %v21580_v29 = vld [vmem:[#allocation5 + $0x4a8] ss:$16 sps:$4 sm:$0xff]  }
 0xd26   :  { %13221 = vmatprep.subr.bf16.mxu0 %v21499_v42  ;;  %v21583_v42 = vld [vmem:[#allocation5 + $0x6a0] ss:$16 sps:$4 sm:$0xff]  }
 0xd28   :  { %12691 = vmatpush1.bf16.msra.mxu1 %v21494_v13  ;;  %v21588_v13 = vld [vmem:[#allocation5 + $0x48c] ss:$16 sps:$4 sm:$0xff]  }
 0xd29   :  { %13222 = vmatpush1.bf16.msra.mxu0 %v21497_v39  ;;  %12692 = vmatprep.subr.bf16.mxu1 %v21502_v8  ;;  %v21586_v39 = vld [vmem:[#allocation5 + $0x488] ss:$16 sps:$4 sm:$0xff]   ;;  %v21589_v8 = vld [vmem:[#allocation5 + $0x680] ss:$16 sps:$4 sm:$0xff]  }
 0xd2a   :  { %13223 = vmatprep.subr.bf16.mxu0 %v21505_v23  ;;  %v21594_v23 = vld [vmem:[#allocation5 + $0x46c] ss:$16 sps:$4 sm:$0xff]  }
 0xd2c   :  { %12693 = vmatpush1.bf16.msra.mxu1 %v21500_v40  ;;  %v21597_v40 = vld [vmem:[#allocation5 + $0x664] ss:$16 sps:$4 sm:$0xff]  }
 0xd2d   :  { %13224 = vmatpush1.bf16.msra.mxu0 %v21503_v4  ;;  %12694 = vmatprep.subr.bf16.mxu1 %v21508_v15  ;;  %v21592_v4 = vld [vmem:[#allocation5 + $0x468] ss:$16 sps:$4 sm:$0xff]   ;;  %v21595_v15 = vld [vmem:[#allocation5 + $0x660] ss:$16 sps:$4 sm:$0xff]  }
 0xd2e   :  { %13225 = vmatprep.subr.bf16.mxu0 %v21511_v6  ;;  %v21600_v6 = vld [vmem:[#allocation5 + $0x44c] ss:$16 sps:$4 sm:$0xff]  }
 0xd30   :  { %12695 = vmatpush1.bf16.msra.mxu1 %v21506_v31  ;;  %v21603_v31 = vld [vmem:[#allocation5 + $0x644] ss:$16 sps:$4 sm:$0xff]  }
 0xd31   :  { %13226 = vmatpush1.bf16.msra.mxu0 %v21509_v57  ;;  %12696 = vmatprep.subr.bf16.mxu1 %v21514_v63  ;;  %v21598_v57 = vld [vmem:[#allocation5 + $0x448] ss:$16 sps:$4 sm:$0xff]   ;;  %v21601_v63 = vld [vmem:[#allocation5 + $0x640] ss:$16 sps:$4 sm:$0xff]  }
 0xd32   :  { %13227 = vmatprep.subr.bf16.mxu0 %v21517_v2  ;;  %v21606_v2 = vld [vmem:[#allocation5 + $0x42c] ss:$16 sps:$4 sm:$0xff]  }
 0xd34   :  { %12697 = vmatpush1.bf16.msra.mxu1 %v21512_v61  ;;  %v21609_v61 = vld [vmem:[#allocation5 + $0x624] ss:$16 sps:$4 sm:$0xff]  }
 0xd35   :  { %13228 = vmatpush1.bf16.msra.mxu0 %v21515_v48  ;;  %12968 = vmatprep.subr.bf16.mxu1 %v21520_v12  ;;  %v21604_v48 = vld [vmem:[#allocation5 + $0x428] ss:$16 sps:$4 sm:$0xff]   ;;  %v21607_v12 = vld [vmem:[#allocation5 + $0x620] ss:$16 sps:$4 sm:$0xff]  }
 0xd36   :  { %13499 = vmatprep.subr.bf16.mxu0 %v21524_v0  ;;  %v21612_v0 = vld [vmem:[#allocation5 + $0x40c] ss:$16 sps:$4 sm:$0xff]  }
 0xd37   :  { %12715 = vmatmul.mubr.bf16.vlgmr.msra.gmra.mxu1 %v23235_v37  ;;  %v21539_v37 = vld [vmem:[#allocation5 + $0x38c] ss:$16 sps:$4 sm:$0xff]  }
 0xd38   :  { %13246 = vmatmul.mubr.bf16.vlgmr.msra.gmra.mxu0 %v23247_v26  ;;  %12969 = vmatpush1.bf16.msra.mxu1 %v21518_v32  ;;  %v21615_v32 = vld [vmem:[#allocation5 + $0x604] ss:$16 sps:$4 sm:$0xff]  }
 0xd39   :  { %13500 = vmatpush1.bf16.msra.mxu0 %v21522_v24  ;;  %12970 = vmatprep.subr.bf16.mxu1 %v21527_v22  ;;  %v21610_v24 = vld [vmem:[#allocation5 + $0x408] ss:$16 sps:$4 sm:$0xff]   ;;  %v21613_v22 = vld [vmem:[#allocation5 + $0x600] ss:$16 sps:$4 sm:$0xff]  }
 0xd3a   :  { %13501 = vmatprep.subr.bf16.mxu0 %v21530_v35  ;;  %13000 = vmatprep.mubr.bf16.mxu1 %v23520_v17  ;;  %v21618_v35 = vld [vmem:[#allocation5 + $0x5ec] ss:$16 sps:$4 sm:$0xff]  }
 0xd3b   :  { %13531 = vmatprep.mubr.bf16.mxu0 %v23520_v17 }
 0xd3c   :  { %12971 = vmatpush1.bf16.msra.mxu1 %v21525_v33  ;;  %v21622_v33 = vld [vmem:[#allocation5 + $0x7e4] ss:$16 sps:$4 sm:$0xff]  }
 0xd3d   :  { %13502 = vmatpush1.bf16.msra.mxu0 %v21528_v51  ;;  %12972 = vmatprep.subr.bf16.mxu1 %v21533_v59  ;;  %v21616_v51 = vld [vmem:[#allocation5 + $0x5e8] ss:$16 sps:$4 sm:$0xff]  }
 0xd3e   :  { %13503 = vmatprep.subr.bf16.mxu0 %v21536_v50  ;;  %v23259_v59 = vld [vmem:[#allocation2 + $0x30] ss:$8 sps:$4 sm:$0xff]  }
 0xd3f   :  { %v21620_v50 = vld [vmem:[#allocation5 + $0x7e0] ss:$16 sps:$4 sm:$0xff]  }
 0xd40   :  { %12973 = vmatpush1.bf16.msra.mxu1 %v21531_v28  ;;  %v21625_v28 = vld [vmem:[#allocation5 + $0x5cc] ss:$16 sps:$4 sm:$0xff]  }
 0xd41   :  { %13504 = vmatpush1.bf16.msra.mxu0 %v21534_v45  ;;  %12974 = vmatprep.subr.bf16.mxu1 %v21539_v37  ;;  %v21628_v45 = vld [vmem:[#allocation5 + $0x7c4] ss:$16 sps:$4 sm:$0xff]   ;;  %v21623_v37 = vld [vmem:[#allocation5 + $0x5c8] ss:$16 sps:$4 sm:$0xff]  }
 0xd42   :  { %13505 = vmatprep.subr.bf16.mxu0 %v21542_v47  ;;  %v21626_v47 = vld [vmem:[#allocation5 + $0x7c0] ss:$16 sps:$4 sm:$0xff]  }
 0xd44   :  { %12975 = vmatpush1.bf16.msra.mxu1 %v21537_v21  ;;  %v21631_v21 = vld [vmem:[#allocation5 + $0x5ac] ss:$16 sps:$4 sm:$0xff]  }
 0xd45   :  { %13506 = vmatpush1.bf16.msra.mxu0 %v21540_v14  ;;  %12976 = vmatprep.subr.bf16.mxu1 %v21545_v49  ;;  %v21634_v14 = vld [vmem:[#allocation5 + $0x7a4] ss:$16 sps:$4 sm:$0xff]   ;;  %v21629_v49 = vld [vmem:[#allocation5 + $0x5a8] ss:$16 sps:$4 sm:$0xff]  }
 0xd46   :  { %13507 = vmatprep.subr.bf16.mxu0 %v21548_v44  ;;  %v21632_v44 = vld [vmem:[#allocation5 + $0x7a0] ss:$16 sps:$4 sm:$0xff]  }
 0xd48   :  { %12977 = vmatpush1.bf16.msra.mxu1 %v21543_v36  ;;  %v21637_v36 = vld [vmem:[#allocation5 + $0x58c] ss:$16 sps:$4 sm:$0xff]  }
 0xd49   :  { %13508 = vmatpush1.bf16.msra.mxu0 %v21546_v41  ;;  %12978 = vmatprep.subr.bf16.mxu1 %v21551_v1  ;;  %v21635_v41 = vld [vmem:[#allocation5 + $0x588] ss:$16 sps:$4 sm:$0xff]   ;;  %v21638_v1 = vld [vmem:[#allocation5 + $0x780] ss:$16 sps:$4 sm:$0xff]  }
 0xd4a   :  { %13509 = vmatprep.subr.bf16.mxu0 %v21554_v38  ;;  %v21643_v38 = vld [vmem:[#allocation5 + $0x56c] ss:$16 sps:$4 sm:$0xff]  }
 0xd4c   :  { %12979 = vmatpush1.bf16.msra.mxu1 %v21549_v53  ;;  %v21646_v53 = vld [vmem:[#allocation5 + $0x764] ss:$16 sps:$4 sm:$0xff]  }
 0xd4d   :  { %13510 = vmatpush1.bf16.msra.mxu0 %v21552_v10  ;;  %12980 = vmatprep.subr.bf16.mxu1 %v21557_v20  ;;  %v21641_v10 = vld [vmem:[#allocation5 + $0x568] ss:$16 sps:$4 sm:$0xff]   ;;  %v21644_v20 = vld [vmem:[#allocation5 + $0x760] ss:$16 sps:$4 sm:$0xff]  }
 0xd4e   :  { %13511 = vmatprep.subr.bf16.mxu0 %v21560_v55  ;;  %v21649_v55 = vld [vmem:[#allocation5 + $0x54c] ss:$16 sps:$4 sm:$0xff]  }
 0xd50   :  { %12981 = vmatpush1.bf16.msra.mxu1 %v21555_v58  ;;  %v21652_v58 = vld [vmem:[#allocation5 + $0x744] ss:$16 sps:$4 sm:$0xff]  }
 0xd51   :  { %13512 = vmatpush1.bf16.msra.mxu0 %v21558_v18  ;;  %12982 = vmatprep.subr.bf16.mxu1 %v21563_v25  ;;  %v21647_v18 = vld [vmem:[#allocation5 + $0x548] ss:$16 sps:$4 sm:$0xff]   ;;  %v21650_v25 = vld [vmem:[#allocation5 + $0x740] ss:$16 sps:$4 sm:$0xff]  }
 0xd52   :  { %13513 = vmatprep.subr.bf16.mxu0 %v21566_v16  ;;  %v21655_v16 = vld [vmem:[#allocation5 + $0x52c] ss:$16 sps:$4 sm:$0xff]  }
 0xd54   :  { %12983 = vmatpush1.bf16.msra.mxu1 %v21561_v60  ;;  %v21658_v60 = vld [vmem:[#allocation5 + $0x724] ss:$16 sps:$4 sm:$0xff]  }
 0xd55   :  { %13514 = vmatpush1.bf16.msra.mxu0 %v21564_v43  ;;  %13254 = vmatprep.subr.bf16.mxu1 %v21569_v27  ;;  %v21653_v43 = vld [vmem:[#allocation5 + $0x528] ss:$16 sps:$4 sm:$0xff]   ;;  %v21656_v27 = vld [vmem:[#allocation5 + $0x720] ss:$16 sps:$4 sm:$0xff]  }
 0xd56   :  { %13785 = vmatprep.subr.bf16.mxu0 %v21573_v30  ;;  %v21661_v30 = vld [vmem:[#allocation5 + $0x50c] ss:$16 sps:$4 sm:$0xff]  }
 0xd57   :  { %13001 = vmatmul.mubr.bf16.vlgmr.msra.gmra.mxu1 %v23241_v56  ;;  %v21591_v56 = vld [vmem:[#allocation5 + $0x684] ss:$16 sps:$4 sm:$0xff]  }
 0xd58   :  { %13532 = vmatmul.mubr.bf16.vlgmr.msra.gmra.mxu0 %v23253_v3  ;;  %13255 = vmatpush1.bf16.msra.mxu1 %v21567_v46  ;;  %v21664_v46 = vld [vmem:[#allocation5 + $0x704] ss:$16 sps:$4 sm:$0xff]  }
 0xd59   :  { %13786 = vmatpush1.bf16.msra.mxu0 %v21571_v52  ;;  %13256 = vmatprep.subr.bf16.mxu1 %v21576_v62  ;;  %v21659_v52 = vld [vmem:[#allocation5 + $0x508] ss:$16 sps:$4 sm:$0xff]   ;;  %v21662_v62 = vld [vmem:[#allocation5 + $0x700] ss:$16 sps:$4 sm:$0xff]  }
 0xd5a   :  { %13787 = vmatprep.subr.bf16.mxu0 %v21579_v34  ;;  %13286 = vmatprep.mubr.bf16.mxu1 %v23520_v17  ;;  %v21667_v34 = vld [vmem:[#allocation5 + $0x6ec] ss:$16 sps:$4 sm:$0xff]  }
 0xd5b   :  { %13817 = vmatprep.mubr.bf16.mxu0 %v23520_v17 }
 0xd5c   :  { %13257 = vmatpush1.bf16.msra.mxu1 %v21574_v19  ;;  %v21671_v19 = vld [vmem:[#allocation5 + $0x8e4] ss:$16 sps:$4 sm:$0xff]  }
 0xd5d   :  { %13788 = vmatpush1.bf16.msra.mxu0 %v21577_v7  ;;  %13258 = vmatprep.subr.bf16.mxu1 %v21582_v11  ;;  %v21665_v7 = vld [vmem:[#allocation5 + $0x6e8] ss:$16 sps:$4 sm:$0xff]   ;;  %v23265_v11 = vld [vmem:[#allocation2 + $0x34] ss:$8 sps:$4 sm:$0xff]  }
 0xd5e   :  { %13789 = vmatprep.subr.bf16.mxu0 %v21585_v54  ;;  %v21669_v54 = vld [vmem:[#allocation5 + $0x8e0] ss:$16 sps:$4 sm:$0xff]  }
 0xd60   :  { %13259 = vmatpush1.bf16.msra.mxu1 %v21580_v29  ;;  %v21674_v29 = vld [vmem:[#allocation5 + $0x6cc] ss:$16 sps:$4 sm:$0xff]  }
 0xd61   :  { %13790 = vmatpush1.bf16.msra.mxu0 %v21583_v42  ;;  %13260 = vmatprep.subr.bf16.mxu1 %v21588_v13  ;;  %v21677_v42 = vld [vmem:[#allocation5 + $0x8c4] ss:$16 sps:$4 sm:$0xff]  }
 0xd62   :  { %13791 = vmatprep.subr.bf16.mxu0 %v21591_v56 }
 0xd64   :  { %13261 = vmatpush1.bf16.msra.mxu1 %v21586_v39  ;;  %v21672_v39 = vld [vmem:[#allocation5 + $0x6c8] ss:$16 sps:$4 sm:$0xff]  }
 0xd65   :  { %13792 = vmatpush1.bf16.msra.mxu0 %v21589_v8  ;;  %13262 = vmatprep.subr.bf16.mxu1 %v21594_v23  ;;  %v21675_v23 = vld [vmem:[#allocation5 + $0x8c0] ss:$16 sps:$4 sm:$0xff]  }
 0xd66   :  { %13793 = vmatprep.subr.bf16.mxu0 %v21597_v40 }
 0xd68   :  { %13263 = vmatpush1.bf16.msra.mxu1 %v21592_v4 }
 0xd69   :  { %13794 = vmatpush1.bf16.msra.mxu0 %v21595_v15  ;;  %13264 = vmatprep.subr.bf16.mxu1 %v21600_v6  ;;  %v21680_v15 = vld [vmem:[#allocation5 + $0x6ac] ss:$16 sps:$4 sm:$0xff]   ;;  %v21683_v6 = vld [vmem:[#allocation5 + $0x8a4] ss:$16 sps:$4 sm:$0xff]  }
 0xd6a   :  { %13795 = vmatprep.subr.bf16.mxu0 %v21603_v31 }
 0xd6c   :  { %13265 = vmatpush1.bf16.msra.mxu1 %v21598_v57  ;;  %v21678_v57 = vld [vmem:[#allocation5 + $0x6a8] ss:$16 sps:$4 sm:$0xff]  }
 0xd6d   :  { %13796 = vmatpush1.bf16.msra.mxu0 %v21601_v63  ;;  %13266 = vmatprep.subr.bf16.mxu1 %v21606_v2  ;;  %v21681_v2 = vld [vmem:[#allocation5 + $0x8a0] ss:$16 sps:$4 sm:$0xff]  }
 0xd6e   :  { %13797 = vmatprep.subr.bf16.mxu0 %v21609_v61 }
 0xd70   :  { %13267 = vmatpush1.bf16.msra.mxu1 %v21604_v48  ;;  %v21686_v48 = vld [vmem:[#allocation5 + $0x68c] ss:$16 sps:$4 sm:$0xff]  }
 0xd71   :  { %13798 = vmatpush1.bf16.msra.mxu0 %v21607_v12  ;;  %13268 = vmatprep.subr.bf16.mxu1 %v21612_v0  ;;  %v21689_v12 = vld [vmem:[#allocation5 + $0x884] ss:$16 sps:$4 sm:$0xff]  }
 0xd72   :  { %13799 = vmatprep.subr.bf16.mxu0 %v21615_v32  ;;  %v21684_v32 = vld [vmem:[#allocation5 + $0x688] ss:$16 sps:$4 sm:$0xff]  }
 0xd74   :  { %13269 = vmatpush1.bf16.msra.mxu1 %v21610_v24  ;;  %v21687_v24 = vld [vmem:[#allocation5 + $0x880] ss:$16 sps:$4 sm:$0xff]  }
 0xd75   :  { %13800 = vmatpush1.bf16.msra.mxu0 %v21613_v22  ;;  %13540 = vmatprep.subr.bf16.mxu1 %v21618_v35  ;;  %v21692_v22 = vld [vmem:[#allocation5 + $0x66c] ss:$16 sps:$4 sm:$0xff]   ;;  %v21695_v35 = vld [vmem:[#allocation5 + $0x864] ss:$16 sps:$4 sm:$0xff]  }
 0xd76   :  { %14071 = vmatprep.subr.bf16.mxu0 %v21622_v33  ;;  %v21690_v33 = vld [vmem:[#allocation5 + $0x668] ss:$16 sps:$4 sm:$0xff]  }
 0xd77   :  { %13287 = vmatmul.mubr.bf16.vlgmr.msra.gmra.mxu1 %v23247_v26  ;;  %v21640_v26 = vld [vmem:[#allocation5 + $0x784] ss:$16 sps:$4 sm:$0xff]  }
 0xd78   :  { %13818 = vmatmul.mubr.bf16.vlgmr.msra.gmra.mxu0 %v23259_v59  ;;  %13541 = vmatpush1.bf16.msra.mxu1 %v21616_v51  ;;  %v21693_v51 = vld [vmem:[#allocation5 + $0x860] ss:$16 sps:$4 sm:$0xff]  }
 0xd79   :  { %14072 = vmatpush1.bf16.msra.mxu0 %v21620_v50  ;;  %13542 = vmatprep.subr.bf16.mxu1 %v21625_v28  ;;  %v21698_v50 = vld [vmem:[#allocation5 + $0x64c] ss:$16 sps:$4 sm:$0xff]   ;;  %v21701_v28 = vld [vmem:[#allocation5 + $0x844] ss:$16 sps:$4 sm:$0xff]  }
 0xd7a   :  { %14073 = vmatprep.subr.bf16.mxu0 %v21628_v45  ;;  %13572 = vmatprep.mubr.bf16.mxu1 %v23520_v17  ;;  %v21696_v45 = vld [vmem:[#allocation5 + $0x648] ss:$16 sps:$4 sm:$0xff]  }
 0xd7b   :  { %14103 = vmatprep.mubr.bf16.mxu0 %v23520_v17 }
 0xd7c   :  { %13543 = vmatpush1.bf16.msra.mxu1 %v21623_v37  ;;  %v21699_v37 = vld [vmem:[#allocation5 + $0x840] ss:$16 sps:$4 sm:$0xff]  }
 0xd7d   :  { %14074 = vmatpush1.bf16.msra.mxu0 %v21626_v47  ;;  %13544 = vmatprep.subr.bf16.mxu1 %v21631_v21  ;;  %v21704_v47 = vld [vmem:[#allocation5 + $0x62c] ss:$16 sps:$4 sm:$0xff]   ;;  %v21707_v21 = vld [vmem:[#allocation5 + $0x824] ss:$16 sps:$4 sm:$0xff]  }
 0xd7e   :  { %14075 = vmatprep.subr.bf16.mxu0 %v21634_v14  ;;  %v21702_v14 = vld [vmem:[#allocation5 + $0x628] ss:$16 sps:$4 sm:$0xff]  }
 0xd80   :  { %13545 = vmatpush1.bf16.msra.mxu1 %v21629_v49  ;;  %v21705_v49 = vld [vmem:[#allocation5 + $0x820] ss:$16 sps:$4 sm:$0xff]  }
 0xd81   :  { %14076 = vmatpush1.bf16.msra.mxu0 %v21632_v44  ;;  %13546 = vmatprep.subr.bf16.mxu1 %v21637_v36  ;;  %v21710_v44 = vld [vmem:[#allocation5 + $0x60c] ss:$16 sps:$4 sm:$0xff]   ;;  %v21713_v36 = vld [vmem:[#allocation5 + $0x804] ss:$16 sps:$4 sm:$0xff]  }
 0xd82   :  { %14077 = vmatprep.subr.bf16.mxu0 %v21640_v26  ;;  %v21708_v26 = vld [vmem:[#allocation5 + $0x608] ss:$16 sps:$4 sm:$0xff]  }
 0xd84   :  { %13547 = vmatpush1.bf16.msra.mxu1 %v21635_v41  ;;  %v21711_v41 = vld [vmem:[#allocation5 + $0x800] ss:$16 sps:$4 sm:$0xff]  }
 0xd85   :  { %14078 = vmatpush1.bf16.msra.mxu0 %v21638_v1  ;;  %13548 = vmatprep.subr.bf16.mxu1 %v21643_v38  ;;  %v21716_v1 = vld [vmem:[#allocation5 + $0x7ec] ss:$16 sps:$4 sm:$0xff]   ;;  %v21720_v38 = vld [vmem:[#allocation5 + $0x9e4] ss:$16 sps:$4 sm:$0xff]  }
 0xd86   :  { %14079 = vmatprep.subr.bf16.mxu0 %v21646_v53  ;;  %v21714_v53 = vld [vmem:[#allocation5 + $0x7e8] ss:$16 sps:$4 sm:$0xff]  }
 0xd88   :  { %13549 = vmatpush1.bf16.msra.mxu1 %v21641_v10  ;;  %v23275_v10 = vld [vmem:[#allocation2 + $0x40] ss:$8 sps:$4 sm:$0xff]  }
 0xd89   :  { %14080 = vmatpush1.bf16.msra.mxu0 %v21644_v20  ;;  %13550 = vmatprep.subr.bf16.mxu1 %v21649_v55  ;;  %v21718_v20 = vld [vmem:[#allocation5 + $0x9e0] ss:$16 sps:$4 sm:$0xff]   ;;  %v21723_v55 = vld [vmem:[#allocation5 + $0x7cc] ss:$16 sps:$4 sm:$0xff]  }
 0xd8a   :  { %14081 = vmatprep.subr.bf16.mxu0 %v21652_v58  ;;  %v21726_v58 = vld [vmem:[#allocation5 + $0x9c4] ss:$16 sps:$4 sm:$0xff]  }
 0xd8c   :  { %13551 = vmatpush1.bf16.msra.mxu1 %v21647_v18 }
 0xd8d   :  { %14082 = vmatpush1.bf16.msra.mxu0 %v21650_v25  ;;  %13552 = vmatprep.subr.bf16.mxu1 %v21655_v16  ;;  %v21721_v16 = vld [vmem:[#allocation5 + $0x7c8] ss:$16 sps:$4 sm:$0xff]  }
 0xd8e   :  { %14083 = vmatprep.subr.bf16.mxu0 %v21658_v60  ;;  %v21724_v60 = vld [vmem:[#allocation5 + $0x9c0] ss:$16 sps:$4 sm:$0xff]  }
 0xd90   :  { %13553 = vmatpush1.bf16.msra.mxu1 %v21653_v43 }
 0xd91   :  { %14084 = vmatpush1.bf16.msra.mxu0 %v21656_v27  ;;  %13554 = vmatprep.subr.bf16.mxu1 %v21661_v30  ;;  %v21729_v27 = vld [vmem:[#allocation5 + $0x7ac] ss:$16 sps:$4 sm:$0xff]  }
 0xd92   :  { %14085 = vmatprep.subr.bf16.mxu0 %v21664_v46 }
 0xd94   :  { %13555 = vmatpush1.bf16.msra.mxu1 %v21659_v52  ;;  %v21732_v52 = vld [vmem:[#allocation5 + $0x9a4] ss:$16 sps:$4 sm:$0xff]  }
 0xd95   :  { %14086 = vmatpush1.bf16.msra.mxu0 %v21662_v62  ;;  %13826 = vmatprep.subr.bf16.mxu1 %v21667_v34  ;;  %v21727_v34 = vld [vmem:[#allocation5 + $0x7a8] ss:$16 sps:$4 sm:$0xff]  }
 0xd96   :  { %14357 = vmatprep.subr.bf16.mxu0 %v21671_v19  ;;  %v21730_v19 = vld [vmem:[#allocation5 + $0x9a0] ss:$16 sps:$4 sm:$0xff]  }
 0xd97   :  { %v12145_v13 = vpop.f32.mrf.mxu1  ;;  %13573 = vmatmul.mubr.bf16.vlgmr.msra.gmra.mxu1 %v23253_v3 }
 0xd98   :  { %v12393_v56 = vpop.f32.mrf.mxu0  ;;  %14104 = vmatmul.mubr.bf16.vlgmr.msra.gmra.mxu0 %v23265_v11  ;;  %13827 = vmatpush1.bf16.msra.mxu1 %v21665_v7 }
 0xd99   :  { %v23269_v8 = vadd.f32 %v12393_v56, %v12145_v13  ;;  %14358 = vmatpush1.bf16.msra.mxu0 %v21669_v54  ;;  %v12147_v40 = vpop.f32.mrf.mxu1  ;;  %13828 = vmatprep.subr.bf16.mxu1 %v21674_v29  ;;  %v21735_v54 = vld [vmem:[#allocation5 + $0x78c] ss:$16 sps:$4 sm:$0xff]   ;;  %v21733_v56 = vld [vmem:[#allocation5 + $0x788] ss:$16 sps:$4 sm:$0xff]  }
 0xd9a   :  { %v12395_v4 = vpop.f32.mrf.mxu0  ;;  %14359 = vmatprep.subr.bf16.mxu0 %v21677_v42  ;;  %13858 = vmatprep.mubr.bf16.mxu1 %v23520_v17  ;;  %v21738_v42 = vld [vmem:[#allocation5 + $0x984] ss:$16 sps:$4 sm:$0xff]  }
 0xd9b   :  { %v23271_v31 = vadd.f32 %v12395_v4, %v12147_v40  ;;  %14389 = vmatprep.mubr.bf16.mxu0 %v23520_v17  ;;  %v12149_v3 = vpop.f32.mrf.mxu1  ;;  %v21739_v40 = vld [vmem:[#allocation5 + $0x768] ss:$16 sps:$4 sm:$0xff]   ;;  %v21742_v4 = vld [vmem:[#allocation5 + $0x960] ss:$16 sps:$4 sm:$0xff]  }
 0xd9c   :  { %v12397_v63 = vpop.f32.mrf.mxu0  ;;  %13829 = vmatpush1.bf16.msra.mxu1 %v21672_v39  ;;  %v21736_v39 = vld [vmem:[#allocation5 + $0x980] ss:$16 sps:$4 sm:$0xff]  }
 0xd9d   :  { %14360 = vmatpush1.bf16.msra.mxu0 %v21675_v23  ;;  %v12150_v61 = vpop.f32.mrf.mxu1  ;;  %13830 = vmatprep.subr.bf16.mxu1 %v21680_v15  ;;  %v21744_v23 = vld [vmem:[#allocation5 + $0x964] ss:$16 sps:$4 sm:$0xff]   ;;  %v21747_v15 = vld [vmem:[#allocation5 + $0x74c] ss:$16 sps:$4 sm:$0xff]   ;;  %v21748_v3 = vld [vmem:[#allocation5 + $0x940] ss:$16 sps:$4 sm:$0xff]  }
 0xd9e   :  { %14361 = vmatprep.subr.bf16.mxu0 %v21683_v6  ;;  %v12398_v0 = vpop.f32.mrf.mxu0  ;;  %v21750_v6 = vld [vmem:[#allocation5 + $0x944] ss:$16 sps:$4 sm:$0xff]   ;;  %v21754_v61 = vld [vmem:[#allocation5 + $0x920] ss:$16 sps:$4 sm:$0xff]  }
 0xd9f   :  { %v21756_v63 = vld [vmem:[#allocation5 + $0x924] ss:$16 sps:$4 sm:$0xff]   ;;  %v21757_v0 = vld [vmem:[#allocation5 + $0x708] ss:$16 sps:$4 sm:$0xff]  }
 0xda0   :  { %13831 = vmatpush1.bf16.msra.mxu1 %v21678_v57  ;;  %v21753_v57 = vld [vmem:[#allocation5 + $0x72c] ss:$16 sps:$4 sm:$0xff]  }
 0xda1   :  { %14362 = vmatpush1.bf16.msra.mxu0 %v21681_v2  ;;  %13832 = vmatprep.subr.bf16.mxu1 %v21686_v48  ;;  %v21751_v2 = vld [vmem:[#allocation5 + $0x728] ss:$16 sps:$4 sm:$0xff]   ;;  %v21759_v48 = vld [vmem:[#allocation5 + $0x70c] ss:$16 sps:$4 sm:$0xff]  }
 0xda2   :  { %14363 = vmatprep.subr.bf16.mxu0 %v21689_v12  ;;  %v21762_v12 = vld [vmem:[#allocation5 + $0x904] ss:$16 sps:$4 sm:$0xff]  }
 0xda4   :  { %13833 = vmatpush1.bf16.msra.mxu1 %v21684_v32  ;;  %v21760_v32 = vld [vmem:[#allocation5 + $0x900] ss:$16 sps:$4 sm:$0xff]  }
 0xda5   :  { %14364 = vmatpush1.bf16.msra.mxu0 %v21687_v24  ;;  %13834 = vmatprep.subr.bf16.mxu1 %v21692_v22  ;;  %v21765_v24 = vld [vmem:[#allocation5 + $0x8ec] ss:$16 sps:$4 sm:$0xff]   ;;  %v21769_v22 = vld [vmem:[#allocation5 + $0xae4] ss:$16 sps:$4 sm:$0xff]  }
 0xda6   :  { %14365 = vmatprep.subr.bf16.mxu0 %v21695_v35  ;;  %v21763_v35 = vld [vmem:[#allocation5 + $0x8e8] ss:$16 sps:$4 sm:$0xff]  }
 0xda8   :  { %13835 = vmatpush1.bf16.msra.mxu1 %v21690_v33  ;;  %v23291_v33 = vld [vmem:[#allocation2 + $0x44] ss:$8 sps:$4 sm:$0xff]  }
 0xda9   :  { %14366 = vmatpush1.bf16.msra.mxu0 %v21693_v51  ;;  %13836 = vmatprep.subr.bf16.mxu1 %v21698_v50  ;;  %v21767_v51 = vld [vmem:[#allocation5 + $0xae0] ss:$16 sps:$4 sm:$0xff]   ;;  %v21772_v50 = vld [vmem:[#allocation5 + $0x8cc] ss:$16 sps:$4 sm:$0xff]  }
 0xdaa   :  { %14367 = vmatprep.subr.bf16.mxu0 %v21701_v28  ;;  %v21775_v28 = vld [vmem:[#allocation5 + $0xac4] ss:$16 sps:$4 sm:$0xff]  }
 0xdac   :  { %13837 = vmatpush1.bf16.msra.mxu1 %v21696_v45 }
 0xdad   :  { %14368 = vmatpush1.bf16.msra.mxu0 %v21699_v37  ;;  %13838 = vmatprep.subr.bf16.mxu1 %v21704_v47  ;;  %v21770_v47 = vld [vmem:[#allocation5 + $0x8c8] ss:$16 sps:$4 sm:$0xff]  }
 0xdae   :  { %14369 = vmatprep.subr.bf16.mxu0 %v21707_v21 }
 0xdb0   :  { %13839 = vmatpush1.bf16.msra.mxu1 %v21702_v14 }
 0xdb1   :  { %14370 = vmatpush1.bf16.msra.mxu0 %v21705_v49  ;;  %13840 = vmatprep.subr.bf16.mxu1 %v21710_v44  ;;  %v21773_v49 = vld [vmem:[#allocation5 + $0xac0] ss:$16 sps:$4 sm:$0xff]  }
 0xdb2   :  { %14371 = vmatprep.subr.bf16.mxu0 %v21713_v36 }
 0xdb4   :  { %13841 = vmatpush1.bf16.msra.mxu1 %v21708_v26  ;;  %v21778_v26 = vld [vmem:[#allocation5 + $0x8ac] ss:$16 sps:$4 sm:$0xff]  }
 0xdb5   :  { %14372 = vmatpush1.bf16.msra.mxu0 %v21711_v41  ;;  %14112 = vmatprep.subr.bf16.mxu1 %v21716_v1  ;;  %v21781_v41 = vld [vmem:[#allocation5 + $0xaa4] ss:$16 sps:$4 sm:$0xff]  }
 0xdb6   :  { %14643 = vmatprep.subr.bf16.mxu0 %v21720_v38 }
 0xdb7   :  { %v23277_v18 = vpop.f32.mrf.mxu1  ;;  %13859 = vmatmul.mubr.bf16.vlgmr.msra.gmra.mxu1 %v23259_v59 }
 0xdb8   :  { %v12675_v25 = vpop.f32.mrf.mxu0  ;;  %14390 = vmatmul.mubr.bf16.vlgmr.msra.gmra.mxu0 %v23275_v10  ;;  %14113 = vmatpush1.bf16.msra.mxu1 %v21714_v53 }
 0xdb9   :  { %v23282_v43 = vadd.f32 %v12675_v25, %v23269_v8  ;;  %14644 = vmatpush1.bf16.msra.mxu0 %v21718_v20  ;;  %v23284_v30 = vpop.f32.mrf.mxu1  ;;  %14114 = vmatprep.subr.bf16.mxu1 %v21723_v55  ;;  %v21741_v8 = vld [vmem:[#allocation5 + $0x76c] ss:$16 sps:$4 sm:$0xff]   ;;  %v21776_v20 = vld [vmem:[#allocation5 + $0x8a8] ss:$16 sps:$4 sm:$0xff]   ;;  %v21779_v55 = vld [vmem:[#allocation5 + $0xaa0] ss:$16 sps:$4 sm:$0xff]  }
 0xdba   :  { %v12677_v46 = vpop.f32.mrf.mxu0  ;;  %14645 = vmatprep.subr.bf16.mxu0 %v21726_v58  ;;  %14144 = vmatprep.mubr.bf16.mxu1 %v23520_v17  ;;  %v21787_v25 = vld [vmem:[#allocation5 + $0xa84] ss:$16 sps:$4 sm:$0xff]  }
 0xdbb   :  { %v23287_v62 = vadd.f32 %v12677_v46, %v23271_v31  ;;  %14675 = vmatprep.mubr.bf16.mxu0 %v23520_v17  ;;  %v12190_v59 = vpop.f32.mrf.mxu1  ;;  %v21745_v31 = vld [vmem:[#allocation5 + $0x748] ss:$16 sps:$4 sm:$0xff]  }
 0xdbc   :  { %v12679_v7 = vpop.f32.mrf.mxu0  ;;  %14115 = vmatpush1.bf16.msra.mxu1 %v21721_v16  ;;  %v21788_v46 = vld [vmem:[#allocation5 + $0x868] ss:$16 sps:$4 sm:$0xff]   ;;  %v21799_v59 = vld [vmem:[#allocation5 + $0xa44] ss:$16 sps:$4 sm:$0xff]  }
 0xdbd   :  { %14646 = vmatpush1.bf16.msra.mxu0 %v21724_v60  ;;  %v12191_v29 = vpop.f32.mrf.mxu1  ;;  %14116 = vmatprep.subr.bf16.mxu1 %v21729_v27  ;;  %v21782_v60 = vld [vmem:[#allocation5 + $0x888] ss:$16 sps:$4 sm:$0xff]   ;;  %v21790_v27 = vld [vmem:[#allocation5 + $0x86c] ss:$16 sps:$4 sm:$0xff]  }
 0xdbe   :  { %14647 = vmatprep.subr.bf16.mxu0 %v21732_v52  ;;  %v12680_v13 = vpop.f32.mrf.mxu0  ;;  %v21791_v52 = vld [vmem:[#allocation5 + $0xa60] ss:$16 sps:$4 sm:$0xff]   ;;  %v21802_v7 = vld [vmem:[#allocation5 + $0x82c] ss:$16 sps:$4 sm:$0xff]   ;;  %v21800_v29 = vld [vmem:[#allocation5 + $0x828] ss:$16 sps:$4 sm:$0xff]  }
 0xdbf   :  { %v21808_v13 = vld [vmem:[#allocation5 + $0x80c] ss:$16 sps:$4 sm:$0xff]  }
 0xdc0   :  { %14117 = vmatpush1.bf16.msra.mxu1 %v21727_v34  ;;  %v21794_v34 = vld [vmem:[#allocation5 + $0x848] ss:$16 sps:$4 sm:$0xff]  }
 0xdc1   :  { %14648 = vmatpush1.bf16.msra.mxu0 %v21730_v19  ;;  %14118 = vmatprep.subr.bf16.mxu1 %v21735_v54  ;;  %v21797_v19 = vld [vmem:[#allocation5 + $0xa40] ss:$16 sps:$4 sm:$0xff]   ;;  %v21805_v54 = vld [vmem:[#allocation5 + $0xa24] ss:$16 sps:$4 sm:$0xff]  }
 0xdc2   :  { %14649 = vmatprep.subr.bf16.mxu0 %v21738_v42  ;;  %v21803_v42 = vld [vmem:[#allocation5 + $0xa20] ss:$16 sps:$4 sm:$0xff]  }
 0xdc4   :  { %14119 = vmatpush1.bf16.msra.mxu1 %v21733_v56  ;;  %v21811_v56 = vld [vmem:[#allocation5 + $0xa04] ss:$16 sps:$4 sm:$0xff]  }
 0xdc5   :  { %14650 = vmatpush1.bf16.msra.mxu0 %v21736_v39  ;;  %14120 = vmatprep.subr.bf16.mxu1 %v21741_v8  ;;  %v21806_v39 = vld [vmem:[#allocation5 + $0x808] ss:$16 sps:$4 sm:$0xff]   ;;  %v21809_v8 = vld [vmem:[#allocation5 + $0xa00] ss:$16 sps:$4 sm:$0xff]  }
 0xdc6   :  { %14651 = vmatprep.subr.bf16.mxu0 %v21744_v23  ;;  %v21814_v23 = vld [vmem:[#allocation5 + $0x9ec] ss:$16 sps:$4 sm:$0xff]  }
 0xdc8   :  { %14121 = vmatpush1.bf16.msra.mxu1 %v21739_v40  ;;  %v23309_v40 = vld [vmem:[#allocation2 + $0x50] ss:$8 sps:$4 sm:$0xff]  }
 0xdc9   :  { %14652 = vmatpush1.bf16.msra.mxu0 %v21742_v4  ;;  %14122 = vmatprep.subr.bf16.mxu1 %v21747_v15  ;;  %v21818_v4 = vld [vmem:[#allocation5 + $0xbe4] ss:$16 sps:$4 sm:$0xff]   ;;  %v21812_v15 = vld [vmem:[#allocation5 + $0x9e8] ss:$16 sps:$4 sm:$0xff]  }
 0xdca   :  { %14653 = vmatprep.subr.bf16.mxu0 %v21750_v6  ;;  %v21816_v6 = vld [vmem:[#allocation5 + $0xbe0] ss:$16 sps:$4 sm:$0xff]  }
 0xdcc   :  { %14123 = vmatpush1.bf16.msra.mxu1 %v21745_v31  ;;  %v21821_v31 = vld [vmem:[#allocation5 + $0x9cc] ss:$16 sps:$4 sm:$0xff]  }
 0xdcd   :  { %14654 = vmatpush1.bf16.msra.mxu0 %v21748_v3  ;;  %14124 = vmatprep.subr.bf16.mxu1 %v21753_v57  ;;  %v21824_v3 = vld [vmem:[#allocation5 + $0xbc4] ss:$16 sps:$4 sm:$0xff]   ;;  %v21819_v57 = vld [vmem:[#allocation5 + $0x9c8] ss:$16 sps:$4 sm:$0xff]  }
 0xdce   :  { %14655 = vmatprep.subr.bf16.mxu0 %v21756_v63  ;;  %v21822_v63 = vld [vmem:[#allocation5 + $0xbc0] ss:$16 sps:$4 sm:$0xff]  }
 0xdd0   :  { %14125 = vmatpush1.bf16.msra.mxu1 %v21751_v2 }
 0xdd1   :  { %14656 = vmatpush1.bf16.msra.mxu0 %v21754_v61  ;;  %14126 = vmatprep.subr.bf16.mxu1 %v21759_v48 }
 0xdd2   :  { %14657 = vmatprep.subr.bf16.mxu0 %v21762_v12 }
 0xdd4   :  { %14127 = vmatpush1.bf16.msra.mxu1 %v21757_v0 }
 0xdd5   :  { %14658 = vmatpush1.bf16.msra.mxu0 %v21760_v32  ;;  %14398 = vmatprep.subr.bf16.mxu1 %v21765_v24  ;;  %v21827_v24 = vld [vmem:[#allocation5 + $0x9ac] ss:$16 sps:$4 sm:$0xff]  }
 0xdd6   :  { %14929 = vmatprep.subr.bf16.mxu0 %v21769_v22  ;;  %v21830_v22 = vld [vmem:[#allocation5 + $0xba4] ss:$16 sps:$4 sm:$0xff]  }
 0xdd7   :  { %v12434_v45 = vpop.f32.mrf.mxu1  ;;  %14145 = vmatmul.mubr.bf16.vlgmr.msra.gmra.mxu1 %v23265_v11 }
 0xdd8   :  { %v12961_v37 = vpop.f32.mrf.mxu0  ;;  %14676 = vmatmul.mubr.bf16.vlgmr.msra.gmra.mxu0 %v23291_v33  ;;  %v23296_v21 = vadd.f32 %v12434_v45, %v23277_v18  ;;  %14399 = vmatpush1.bf16.msra.mxu1 %v21763_v35  ;;  %v21784_v18 = vld [vmem:[#allocation5 + $0x88c] ss:$16 sps:$4 sm:$0xff]  }
 0xdd9   :  { %v23299_v14 = vadd.f32 %v12961_v37, %v23282_v43  ;;  %14930 = vmatpush1.bf16.msra.mxu0 %v21767_v51  ;;  %v12436_v44 = vpop.f32.mrf.mxu1  ;;  %14400 = vmatprep.subr.bf16.mxu1 %v21772_v50  ;;  %v21785_v43 = vld [vmem:[#allocation5 + $0xa80] ss:$16 sps:$4 sm:$0xff]   ;;  %v21825_v51 = vld [vmem:[#allocation5 + $0x9a8] ss:$16 sps:$4 sm:$0xff]  }
 0xdda   :  { %v12963_v36 = vpop.f32.mrf.mxu0  ;;  %14931 = vmatprep.subr.bf16.mxu0 %v21775_v28  ;;  %v23302_v11 = vadd.f32 %v12436_v44, %v23284_v30  ;;  %14430 = vmatprep.mubr.bf16.mxu1 %v23520_v17  ;;  %v21793_v30 = vld [vmem:[#allocation5 + $0xa64] ss:$16 sps:$4 sm:$0xff]   ;;  %v21828_v50 = vld [vmem:[#allocation5 + $0xba0] ss:$16 sps:$4 sm:$0xff]  }
 0xddb   :  { %v23305_v1 = vadd.f32 %v12963_v36, %v23287_v62  ;;  %14961 = vmatprep.mubr.bf16.mxu0 %v23520_v17  ;;  %v12438_v38 = vpop.f32.mrf.mxu1  ;;  %v21796_v62 = vld [vmem:[#allocation5 + $0x84c] ss:$16 sps:$4 sm:$0xff]   ;;  %v21834_v44 = vld [vmem:[#allocation5 + $0xb80] ss:$16 sps:$4 sm:$0xff]  }
 0xddc   :  { %v12965_v53 = vpop.f32.mrf.mxu0  ;;  %14401 = vmatpush1.bf16.msra.mxu1 %v21770_v47  ;;  %v21833_v47 = vld [vmem:[#allocation5 + $0x98c] ss:$16 sps:$4 sm:$0xff]   ;;  %v21848_v38 = vld [vmem:[#allocation5 + $0xb44] ss:$16 sps:$4 sm:$0xff]  }
 0xddd   :  { %14932 = vmatpush1.bf16.msra.mxu0 %v21773_v49  ;;  %v12439_v58 = vpop.f32.mrf.mxu1  ;;  %14402 = vmatprep.subr.bf16.mxu1 %v21778_v26  ;;  %v21831_v49 = vld [vmem:[#allocation5 + $0x988] ss:$16 sps:$4 sm:$0xff]   ;;  %v21839_v36 = vld [vmem:[#allocation5 + $0x96c] ss:$16 sps:$4 sm:$0xff]   ;;  %v21842_v26 = vld [vmem:[#allocation5 + $0xb64] ss:$16 sps:$4 sm:$0xff]  }
 0xdde   :  { %14933 = vmatprep.subr.bf16.mxu0 %v21781_v41  ;;  %v12966_v16 = vpop.f32.mrf.mxu0  ;;  %v21837_v41 = vld [vmem:[#allocation5 + $0x968] ss:$16 sps:$4 sm:$0xff]   ;;  %v21854_v58 = vld [vmem:[#allocation5 + $0xb24] ss:$16 sps:$4 sm:$0xff]  }
 0xddf   :  { %v21843_v53 = vld [vmem:[#allocation5 + $0x948] ss:$16 sps:$4 sm:$0xff]   ;;  %v21857_v16 = vld [vmem:[#allocation5 + $0x90c] ss:$16 sps:$4 sm:$0xff]  }
 0xde0   :  { %14403 = vmatpush1.bf16.msra.mxu1 %v21776_v20  ;;  %v21846_v20 = vld [vmem:[#allocation5 + $0xb40] ss:$16 sps:$4 sm:$0xff]  }
 0xde1   :  { %14934 = vmatpush1.bf16.msra.mxu0 %v21779_v55  ;;  %14404 = vmatprep.subr.bf16.mxu1 %v21784_v18  ;;  %v21851_v55 = vld [vmem:[#allocation5 + $0x92c] ss:$16 sps:$4 sm:$0xff]   ;;  %v21849_v18 = vld [vmem:[#allocation5 + $0x928] ss:$16 sps:$4 sm:$0xff]  }
 0xde2   :  { %14935 = vmatprep.subr.bf16.mxu0 %v21787_v25  ;;  %v21852_v25 = vld [vmem:[#allocation5 + $0xb20] ss:$16 sps:$4 sm:$0xff]  }
 0xde4   :  { %14405 = vmatpush1.bf16.msra.mxu1 %v21782_v60  ;;  %v21860_v60 = vld [vmem:[#allocation5 + $0xb04] ss:$16 sps:$4 sm:$0xff]  }
 0xde5   :  { %14936 = vmatpush1.bf16.msra.mxu0 %v21785_v43  ;;  %14406 = vmatprep.subr.bf16.mxu1 %v21790_v27  ;;  %v21855_v43 = vld [vmem:[#allocation5 + $0x908] ss:$16 sps:$4 sm:$0xff]   ;;  %v21858_v27 = vld [vmem:[#allocation5 + $0xb00] ss:$16 sps:$4 sm:$0xff]  }
 0xde6   :  { %14937 = vmatprep.subr.bf16.mxu0 %v21793_v30  ;;  %v21863_v30 = vld [vmem:[#allocation5 + $0xaec] ss:$16 sps:$4 sm:$0xff]  }
 0xde8   :  { %14407 = vmatpush1.bf16.msra.mxu1 %v21788_v46  ;;  %v23327_v46 = vld [vmem:[#allocation2 + $0x54] ss:$8 sps:$4 sm:$0xff]  }
 0xde9   :  { %14938 = vmatpush1.bf16.msra.mxu0 %v21791_v52  ;;  %14408 = vmatprep.subr.bf16.mxu1 %v21796_v62  ;;  %v21867_v52 = vld [vmem:[#allocation5 + $0xce4] ss:$16 sps:$4 sm:$0xff]   ;;  %v21861_v62 = vld [vmem:[#allocation5 + $0xae8] ss:$16 sps:$4 sm:$0xff]  }
 0xdea   :  { %14939 = vmatprep.subr.bf16.mxu0 %v21799_v59  ;;  %v21865_v59 = vld [vmem:[#allocation5 + $0xce0] ss:$16 sps:$4 sm:$0xff]  }
 0xdec   :  { %14409 = vmatpush1.bf16.msra.mxu1 %v21794_v34  ;;  %v21870_v34 = vld [vmem:[#allocation5 + $0xacc] ss:$16 sps:$4 sm:$0xff]  }
 0xded   :  { %14940 = vmatpush1.bf16.msra.mxu0 %v21797_v19  ;;  %14410 = vmatprep.subr.bf16.mxu1 %v21802_v7  ;;  %v21873_v19 = vld [vmem:[#allocation5 + $0xcc4] ss:$16 sps:$4 sm:$0xff]   ;;  %v21868_v7 = vld [vmem:[#allocation5 + $0xac8] ss:$16 sps:$4 sm:$0xff]  }
 0xdee   :  { %14941 = vmatprep.subr.bf16.mxu0 %v21805_v54  ;;  %v21871_v54 = vld [vmem:[#allocation5 + $0xcc0] ss:$16 sps:$4 sm:$0xff]  }
 0xdf0   :  { %14411 = vmatpush1.bf16.msra.mxu1 %v21800_v29 }
 0xdf1   :  { %14942 = vmatpush1.bf16.msra.mxu0 %v21803_v42  ;;  %14412 = vmatprep.subr.bf16.mxu1 %v21808_v13 }
 0xdf2   :  { %14943 = vmatprep.subr.bf16.mxu0 %v21811_v56 }
 0xdf4   :  { %14413 = vmatpush1.bf16.msra.mxu1 %v21806_v39 }
 0xdf5   :  { %14944 = vmatpush1.bf16.msra.mxu0 %v21809_v8  ;;  %14684 = vmatprep.subr.bf16.mxu1 %v21814_v23  ;;  %v21876_v23 = vld [vmem:[#allocation5 + $0xaac] ss:$16 sps:$4 sm:$0xff]  }
 0xdf6   :  { %15215 = vmatprep.subr.bf16.mxu0 %v21818_v4  ;;  %v21879_v4 = vld [vmem:[#allocation5 + $0xca4] ss:$16 sps:$4 sm:$0xff]  }
 0xdf7   :  { %v12716_v2 = vpop.f32.mrf.mxu1  ;;  %14431 = vmatmul.mubr.bf16.vlgmr.msra.gmra.mxu1 %v23275_v10 }
 0xdf8   :  { %v13247_v61 = vpop.f32.mrf.mxu0  ;;  %14962 = vmatmul.mubr.bf16.vlgmr.msra.gmra.mxu0 %v23309_v40  ;;  %v23314_v48 = vadd.f32 %v12716_v2, %v23296_v21  ;;  %14685 = vmatpush1.bf16.msra.mxu1 %v21812_v15  ;;  %v21836_v21 = vld [vmem:[#allocation5 + $0xb84] ss:$16 sps:$4 sm:$0xff]   ;;  %v21882_v2 = vld [vmem:[#allocation5 + $0xa8c] ss:$16 sps:$4 sm:$0xff]  }
 0xdf9   :  { %v23317_v12 = vadd.f32 %v13247_v61, %v23299_v14  ;;  %15216 = vmatpush1.bf16.msra.mxu0 %v21816_v6  ;;  %v12718_v0 = vpop.f32.mrf.mxu1  ;;  %14686 = vmatprep.subr.bf16.mxu1 %v21821_v31  ;;  %v21874_v6 = vld [vmem:[#allocation5 + $0xaa8] ss:$16 sps:$4 sm:$0xff]   ;;  %v21877_v31 = vld [vmem:[#allocation5 + $0xca0] ss:$16 sps:$4 sm:$0xff]   ;;  %v21885_v61 = vld [vmem:[#allocation5 + $0xc84] ss:$16 sps:$4 sm:$0xff]  }
 0xdfa   :  { %v13249_v32 = vpop.f32.mrf.mxu0  ;;  %15217 = vmatprep.subr.bf16.mxu0 %v21824_v3  ;;  %v23320_v35 = vadd.f32 %v12718_v0, %v23302_v11  ;;  %14716 = vmatprep.mubr.bf16.mxu1 %v23520_v17  ;;  %v21840_v11 = vld [vmem:[#allocation5 + $0xb60] ss:$16 sps:$4 sm:$0xff]  }
 0xdfb   :  { %v23323_v10 = vadd.f32 %v13249_v32, %v23305_v1  ;;  %15247 = vmatprep.mubr.bf16.mxu0 %v23520_v17  ;;  %v12720_v28 = vpop.f32.mrf.mxu1  ;;  %v21845_v1 = vld [vmem:[#allocation5 + $0x94c] ss:$16 sps:$4 sm:$0xff]   ;;  %v21883_v0 = vld [vmem:[#allocation5 + $0xc80] ss:$16 sps:$4 sm:$0xff]  }
 0xdfc   :  { %v13251_v45 = vpop.f32.mrf.mxu0  ;;  %14687 = vmatpush1.bf16.msra.mxu1 %v21819_v57  ;;  %v21888_v32 = vld [vmem:[#allocation5 + $0xa6c] ss:$16 sps:$4 sm:$0xff]   ;;  %v21895_v28 = vld [vmem:[#allocation5 + $0xc40] ss:$16 sps:$4 sm:$0xff]  }
 0xdfd   :  { %15218 = vmatpush1.bf16.msra.mxu0 %v21822_v63  ;;  %v12721_v37 = vpop.f32.mrf.mxu1  ;;  %14688 = vmatprep.subr.bf16.mxu1 %v21827_v24  ;;  %v21891_v24 = vld [vmem:[#allocation5 + $0xc64] ss:$16 sps:$4 sm:$0xff]   ;;  %v21900_v45 = vld [vmem:[#allocation5 + $0xa2c] ss:$16 sps:$4 sm:$0xff]  }
 0xdfe   :  { %15219 = vmatprep.subr.bf16.mxu0 %v21830_v22  ;;  %v13252_v14 = vpop.f32.mrf.mxu0  ;;  %v21886_v22 = vld [vmem:[#allocation5 + $0xa68] ss:$16 sps:$4 sm:$0xff]   ;;  %v21903_v37 = vld [vmem:[#allocation5 + $0xc24] ss:$16 sps:$4 sm:$0xff]  }
 0xdff   :  { %v21906_v14 = vld [vmem:[#allocation5 + $0xa0c] ss:$16 sps:$4 sm:$0xff]  }
 0xe00   :  { %14689 = vmatpush1.bf16.msra.mxu1 %v21825_v51  ;;  %v21897_v51 = vld [vmem:[#allocation5 + $0xc44] ss:$16 sps:$4 sm:$0xff]  }
 0xe01   :  { %15220 = vmatpush1.bf16.msra.mxu0 %v21828_v50  ;;  %14690 = vmatprep.subr.bf16.mxu1 %v21833_v47  ;;  %v21892_v50 = vld [vmem:[#allocation5 + $0xa48] ss:$16 sps:$4 sm:$0xff]  }
 0xe02   :  { %15221 = vmatprep.subr.bf16.mxu0 %v21836_v21  ;;  %v21898_v47 = vld [vmem:[#allocation5 + $0xa28] ss:$16 sps:$4 sm:$0xff]   ;;  %v21901_v21 = vld [vmem:[#allocation5 + $0xc20] ss:$16 sps:$4 sm:$0xff]  }
 0xe04   :  { %14691 = vmatpush1.bf16.msra.mxu1 %v21831_v49  ;;  %v21909_v49 = vld [vmem:[#allocation5 + $0xc04] ss:$16 sps:$4 sm:$0xff]  }
 0xe05   :  { %15222 = vmatpush1.bf16.msra.mxu0 %v21834_v44  ;;  %14692 = vmatprep.subr.bf16.mxu1 %v21839_v36  ;;  %v21904_v44 = vld [vmem:[#allocation5 + $0xa08] ss:$16 sps:$4 sm:$0xff]   ;;  %v21907_v36 = vld [vmem:[#allocation5 + $0xc00] ss:$16 sps:$4 sm:$0xff]  }
 0xe06   :  { %15223 = vmatprep.subr.bf16.mxu0 %v21842_v26  ;;  %v21912_v26 = vld [vmem:[#allocation5 + $0xbec] ss:$16 sps:$4 sm:$0xff]  }
 0xe08   :  { %14693 = vmatpush1.bf16.msra.mxu1 %v21837_v41  ;;  %v21916_v41 = vld [vmem:[#allocation5 + $0xde4] ss:$16 sps:$4 sm:$0xff]  }
 0xe09   :  { %15224 = vmatpush1.bf16.msra.mxu0 %v21840_v11  ;;  %14694 = vmatprep.subr.bf16.mxu1 %v21845_v1  ;;  %v23345_v11 = vld [vmem:[#allocation2 + $0x60] ss:$8 sps:$4 sm:$0xff]  }
 0xe0a   :  { %15225 = vmatprep.subr.bf16.mxu0 %v21848_v38  ;;  %v21910_v1 = vld [vmem:[#allocation5 + $0xbe8] ss:$16 sps:$4 sm:$0xff]   ;;  %v21914_v38 = vld [vmem:[#allocation5 + $0xde0] ss:$16 sps:$4 sm:$0xff]  }
 0xe0c   :  { %14695 = vmatpush1.bf16.msra.mxu1 %v21843_v53  ;;  %v21919_v53 = vld [vmem:[#allocation5 + $0xbcc] ss:$16 sps:$4 sm:$0xff]  }
 0xe0d   :  { %15226 = vmatpush1.bf16.msra.mxu0 %v21846_v20  ;;  %14696 = vmatprep.subr.bf16.mxu1 %v21851_v55  ;;  %v21922_v20 = vld [vmem:[#allocation5 + $0xdc4] ss:$16 sps:$4 sm:$0xff]  }
 0xe0e   :  { %15227 = vmatprep.subr.bf16.mxu0 %v21854_v58 }
 0xe10   :  { %14697 = vmatpush1.bf16.msra.mxu1 %v21849_v18 }
 0xe11   :  { %15228 = vmatpush1.bf16.msra.mxu0 %v21852_v25  ;;  %14698 = vmatprep.subr.bf16.mxu1 %v21857_v16  ;;  %v21917_v16 = vld [vmem:[#allocation5 + $0xbc8] ss:$16 sps:$4 sm:$0xff]  }
 0xe12   :  { %15229 = vmatprep.subr.bf16.mxu0 %v21860_v60  ;;  %v21920_v60 = vld [vmem:[#allocation5 + $0xdc0] ss:$16 sps:$4 sm:$0xff]  }
 0xe14   :  { %14699 = vmatpush1.bf16.msra.mxu1 %v21855_v43 }
 0xe15   :  { %15230 = vmatpush1.bf16.msra.mxu0 %v21858_v27  ;;  %14970 = vmatprep.subr.bf16.mxu1 %v21863_v30  ;;  %v21925_v30 = vld [vmem:[#allocation5 + $0xbac] ss:$16 sps:$4 sm:$0xff]  }
 0xe16   :  { %15501 = vmatprep.subr.bf16.mxu0 %v21867_v52  ;;  %v21928_v52 = vld [vmem:[#allocation5 + $0xda4] ss:$16 sps:$4 sm:$0xff]  }
 0xe17   :  { %v13002_v29 = vpop.f32.mrf.mxu1  ;;  %14717 = vmatmul.mubr.bf16.vlgmr.msra.gmra.mxu1 %v23291_v33 }
 0xe18   :  { %v13533_v42 = vpop.f32.mrf.mxu0  ;;  %15248 = vmatmul.mubr.bf16.vlgmr.msra.gmra.mxu0 %v23327_v46  ;;  %v23332_v13 = vadd.f32 %v13002_v29, %v23314_v48  ;;  %14971 = vmatpush1.bf16.msra.mxu1 %v21861_v62  ;;  %v21931_v29 = vld [vmem:[#allocation5 + $0xb8c] ss:$16 sps:$4 sm:$0xff]  }
 0xe19   :  { %v23335_v56 = vadd.f32 %v13533_v42, %v23317_v12  ;;  %15502 = vmatpush1.bf16.msra.mxu0 %v21865_v59  ;;  %v13004_v39 = vpop.f32.mrf.mxu1  ;;  %14972 = vmatprep.subr.bf16.mxu1 %v21870_v34  ;;  %v21880_v12 = vld [vmem:[#allocation5 + $0xa88] ss:$16 sps:$4 sm:$0xff]   ;;  %v21934_v42 = vld [vmem:[#allocation5 + $0xd84] ss:$16 sps:$4 sm:$0xff]  }
 0xe1a   :  { %v13535_v8 = vpop.f32.mrf.mxu0  ;;  %15503 = vmatprep.subr.bf16.mxu0 %v21873_v19  ;;  %v23338_v15 = vadd.f32 %v13004_v39, %v23320_v35  ;;  %15002 = vmatprep.mubr.bf16.mxu1 %v23520_v17  ;;  %v21889_v35 = vld [vmem:[#allocation5 + $0xc60] ss:$16 sps:$4 sm:$0xff]   ;;  %v21923_v19 = vld [vmem:[#allocation5 + $0xba8] ss:$16 sps:$4 sm:$0xff]  }
 0xe1b   :  { %v23341_v33 = vadd.f32 %v13535_v8, %v23323_v10  ;;  %15533 = vmatprep.mubr.bf16.mxu0 %v23520_v17  ;;  %v13006_v3 = vpop.f32.mrf.mxu1  ;;  %v21894_v10 = vld [vmem:[#allocation5 + $0xa4c] ss:$16 sps:$4 sm:$0xff]   ;;  %v21932_v39 = vld [vmem:[#allocation5 + $0xd80] ss:$16 sps:$4 sm:$0xff]  }
 0xe1c   :  { %v13537_v57 = vpop.f32.mrf.mxu0  ;;  %14973 = vmatpush1.bf16.msra.mxu1 %v21868_v7  ;;  %v21926_v7 = vld [vmem:[#allocation5 + $0xda0] ss:$16 sps:$4 sm:$0xff]   ;;  %v21937_v8 = vld [vmem:[#allocation5 + $0xb6c] ss:$16 sps:$4 sm:$0xff]  }
 0xe1d   :  { %15504 = vmatpush1.bf16.msra.mxu0 %v21871_v54  ;;  %v13007_v63 = vpop.f32.mrf.mxu1  ;;  %14974 = vmatprep.subr.bf16.mxu1 %v21876_v23  ;;  %v21940_v23 = vld [vmem:[#allocation5 + $0xd64] ss:$16 sps:$4 sm:$0xff]   ;;  %v21944_v3 = vld [vmem:[#allocation5 + $0xd40] ss:$16 sps:$4 sm:$0xff]   ;;  %v21949_v57 = vld [vmem:[#allocation5 + $0xb2c] ss:$16 sps:$4 sm:$0xff]  }
 0xe1e   :  { %15505 = vmatprep.subr.bf16.mxu0 %v21879_v4  ;;  %v13538_v48 = vpop.f32.mrf.mxu0  ;;  %v21935_v4 = vld [vmem:[#allocation5 + $0xb68] ss:$16 sps:$4 sm:$0xff]   ;;  %v21952_v63 = vld [vmem:[#allocation5 + $0xd24] ss:$16 sps:$4 sm:$0xff]  }
 0xe1f   :  { %v21955_v48 = vld [vmem:[#allocation5 + $0xb0c] ss:$16 sps:$4 sm:$0xff]  }
 0xe20   :  { %14975 = vmatpush1.bf16.msra.mxu1 %v21874_v6  ;;  %v21946_v6 = vld [vmem:[#allocation5 + $0xd44] ss:$16 sps:$4 sm:$0xff]  }
 0xe21   :  { %15506 = vmatpush1.bf16.msra.mxu0 %v21877_v31  ;;  %14976 = vmatprep.subr.bf16.mxu1 %v21882_v2  ;;  %v21941_v31 = vld [vmem:[#allocation5 + $0xb48] ss:$16 sps:$4 sm:$0xff]  }
 0xe22   :  { %15507 = vmatprep.subr.bf16.mxu0 %v21885_v61  ;;  %v21947_v2 = vld [vmem:[#allocation5 + $0xb28] ss:$16 sps:$4 sm:$0xff]   ;;  %v21950_v61 = vld [vmem:[#allocation5 + $0xd20] ss:$16 sps:$4 sm:$0xff]  }
 0xe24   :  { %14977 = vmatpush1.bf16.msra.mxu1 %v21880_v12  ;;  %v21958_v12 = vld [vmem:[#allocation5 + $0xd04] ss:$16 sps:$4 sm:$0xff]  }
 0xe25   :  { %15508 = vmatpush1.bf16.msra.mxu0 %v21883_v0  ;;  %14978 = vmatprep.subr.bf16.mxu1 %v21888_v32  ;;  %v21953_v0 = vld [vmem:[#allocation5 + $0xb08] ss:$16 sps:$4 sm:$0xff]   ;;  %v21956_v32 = vld [vmem:[#allocation5 + $0xd00] ss:$16 sps:$4 sm:$0xff]  }
 0xe26   :  { %15509 = vmatprep.subr.bf16.mxu0 %v21891_v24  ;;  %v21961_v24 = vld [vmem:[#allocation5 + $0xcec] ss:$16 sps:$4 sm:$0xff]  }
 0xe28   :  { %14979 = vmatpush1.bf16.msra.mxu1 %v21886_v22  ;;  %v21965_v22 = vld [vmem:[#allocation5 + $0xee4] ss:$16 sps:$4 sm:$0xff]  }
 0xe29   :  { %15510 = vmatpush1.bf16.msra.mxu0 %v21889_v35  ;;  %14980 = vmatprep.subr.bf16.mxu1 %v21894_v10  ;;  %v23363_v35 = vld [vmem:[#allocation2 + $0x64] ss:$8 sps:$4 sm:$0xff]   ;;  %v21959_v10 = vld [vmem:[#allocation5 + $0xce8] ss:$16 sps:$4 sm:$0xff]  }
 0xe2a   :  { %15511 = vmatprep.subr.bf16.mxu0 %v21897_v51  ;;  %v21963_v51 = vld [vmem:[#allocation5 + $0xee0] ss:$16 sps:$4 sm:$0xff]  }
 0xe2c   :  { %14981 = vmatpush1.bf16.msra.mxu1 %v21892_v50  ;;  %v21968_v50 = vld [vmem:[#allocation5 + $0xccc] ss:$16 sps:$4 sm:$0xff]  }
 0xe2d   :  { %15512 = vmatpush1.bf16.msra.mxu0 %v21895_v28  ;;  %14982 = vmatprep.subr.bf16.mxu1 %v21900_v45  ;;  %v21971_v28 = vld [vmem:[#allocation5 + $0xec4] ss:$16 sps:$4 sm:$0xff]  }
 0xe2e   :  { %15513 = vmatprep.subr.bf16.mxu0 %v21903_v37 }
 0xe30   :  { %14983 = vmatpush1.bf16.msra.mxu1 %v21898_v47 }
 0xe31   :  { %15514 = vmatpush1.bf16.msra.mxu0 %v21901_v21  ;;  %14984 = vmatprep.subr.bf16.mxu1 %v21906_v14  ;;  %v21966_v14 = vld [vmem:[#allocation5 + $0xcc8] ss:$16 sps:$4 sm:$0xff]  }
 0xe32   :  { %15515 = vmatprep.subr.bf16.mxu0 %v21909_v49  ;;  %v21969_v49 = vld [vmem:[#allocation5 + $0xec0] ss:$16 sps:$4 sm:$0xff]  }
 0xe34   :  { %14985 = vmatpush1.bf16.msra.mxu1 %v21904_v44 }
 0xe35   :  { %15516 = vmatpush1.bf16.msra.mxu0 %v21907_v36  ;;  %15256 = vmatprep.subr.bf16.mxu1 %v21912_v26  ;;  %v21974_v26 = vld [vmem:[#allocation5 + $0xcac] ss:$16 sps:$4 sm:$0xff]  }
 0xe36   :  { %15787 = vmatprep.subr.bf16.mxu0 %v21916_v41  ;;  %v21977_v41 = vld [vmem:[#allocation5 + $0xea4] ss:$16 sps:$4 sm:$0xff]  }
 0xe37   :  { %v13288_v55 = vpop.f32.mrf.mxu1  ;;  %15003 = vmatmul.mubr.bf16.vlgmr.msra.gmra.mxu1 %v23309_v40 }
 0xe38   :  { %v13819_v58 = vpop.f32.mrf.mxu0  ;;  %15534 = vmatmul.mubr.bf16.vlgmr.msra.gmra.mxu0 %v23345_v11  ;;  %v23350_v18 = vadd.f32 %v13288_v55, %v23332_v13  ;;  %15257 = vmatpush1.bf16.msra.mxu1 %v21910_v1  ;;  %v21975_v55 = vld [vmem:[#allocation5 + $0xea0] ss:$16 sps:$4 sm:$0xff]  }
 0xe39   :  { %v23353_v25 = vadd.f32 %v13819_v58, %v23335_v56  ;;  %15788 = vmatpush1.bf16.msra.mxu0 %v21914_v38  ;;  %v13290_v43 = vpop.f32.mrf.mxu1  ;;  %15258 = vmatprep.subr.bf16.mxu1 %v21919_v53  ;;  %v21929_v56 = vld [vmem:[#allocation5 + $0xb88] ss:$16 sps:$4 sm:$0xff]  }
 0xe3a   :  { %v13821_v27 = vpop.f32.mrf.mxu0  ;;  %15789 = vmatprep.subr.bf16.mxu0 %v21922_v20  ;;  %v23356_v40 = vadd.f32 %v13290_v43, %v23338_v15  ;;  %15288 = vmatprep.mubr.bf16.mxu1 %v23520_v17  ;;  %v21938_v15 = vld [vmem:[#allocation5 + $0xd60] ss:$16 sps:$4 sm:$0xff]   ;;  %v21972_v20 = vld [vmem:[#allocation5 + $0xca8] ss:$16 sps:$4 sm:$0xff]  }
 0xe3b   :  { %v23359_v62 = vadd.f32 %v13821_v27, %v23341_v33  ;;  %15819 = vmatprep.mubr.bf16.mxu0 %v23520_v17  ;;  %v13292_v59 = vpop.f32.mrf.mxu1  ;;  %v21943_v33 = vld [vmem:[#allocation5 + $0xb4c] ss:$16 sps:$4 sm:$0xff]   ;;  %v21981_v43 = vld [vmem:[#allocation5 + $0xe80] ss:$16 sps:$4 sm:$0xff]  }
 0xe3c   :  { %v13823_v34 = vpop.f32.mrf.mxu0  ;;  %15259 = vmatpush1.bf16.msra.mxu1 %v21917_v16  ;;  %v21986_v27 = vld [vmem:[#allocation5 + $0xc6c] ss:$16 sps:$4 sm:$0xff]   ;;  %v21995_v59 = vld [vmem:[#allocation5 + $0xe44] ss:$16 sps:$4 sm:$0xff]  }
 0xe3d   :  { %15790 = vmatpush1.bf16.msra.mxu0 %v21920_v60  ;;  %v13293_v54 = vpop.f32.mrf.mxu1  ;;  %15260 = vmatprep.subr.bf16.mxu1 %v21925_v30  ;;  %v21978_v60 = vld [vmem:[#allocation5 + $0xc88] ss:$16 sps:$4 sm:$0xff]   ;;  %v21989_v30 = vld [vmem:[#allocation5 + $0xe64] ss:$16 sps:$4 sm:$0xff]  }
 0xe3e   :  { %15791 = vmatprep.subr.bf16.mxu0 %v21928_v52  ;;  %v13824_v13 = vpop.f32.mrf.mxu0  ;;  %v21984_v52 = vld [vmem:[#allocation5 + $0xc68] ss:$16 sps:$4 sm:$0xff]   ;;  %v22001_v54 = vld [vmem:[#allocation5 + $0xe24] ss:$16 sps:$4 sm:$0xff]  }
 0xe3f   :  { %v21990_v34 = vld [vmem:[#allocation5 + $0xc48] ss:$16 sps:$4 sm:$0xff]   ;;  %v22004_v13 = vld [vmem:[#allocation5 + $0xc0c] ss:$16 sps:$4 sm:$0xff]  }
 0xe40   :  { %15261 = vmatpush1.bf16.msra.mxu1 %v21923_v19  ;;  %v21993_v19 = vld [vmem:[#allocation5 + $0xe40] ss:$16 sps:$4 sm:$0xff]  }
 0xe41   :  { %15792 = vmatpush1.bf16.msra.mxu0 %v21926_v7  ;;  %15262 = vmatprep.subr.bf16.mxu1 %v21931_v29  ;;  %v21998_v7 = vld [vmem:[#allocation5 + $0xc2c] ss:$16 sps:$4 sm:$0xff]   ;;  %v21996_v29 = vld [vmem:[#allocation5 + $0xc28] ss:$16 sps:$4 sm:$0xff]  }
 0xe42   :  { %15793 = vmatprep.subr.bf16.mxu0 %v21934_v42  ;;  %v21999_v42 = vld [vmem:[#allocation5 + $0xe20] ss:$16 sps:$4 sm:$0xff]  }
 0xe44   :  { %15263 = vmatpush1.bf16.msra.mxu1 %v21929_v56  ;;  %v22007_v56 = vld [vmem:[#allocation5 + $0xe04] ss:$16 sps:$4 sm:$0xff]  }
 0xe45   :  { %15794 = vmatpush1.bf16.msra.mxu0 %v21932_v39  ;;  %15264 = vmatprep.subr.bf16.mxu1 %v21937_v8  ;;  %v22002_v39 = vld [vmem:[#allocation5 + $0xc08] ss:$16 sps:$4 sm:$0xff]   ;;  %v22005_v8 = vld [vmem:[#allocation5 + $0xe00] ss:$16 sps:$4 sm:$0xff]  }
 0xe46   :  { %15795 = vmatprep.subr.bf16.mxu0 %v21940_v23  ;;  %v22010_v23 = vld [vmem:[#allocation5 + $0xdec] ss:$16 sps:$4 sm:$0xff]  }
 0xe48   :  { %15265 = vmatpush1.bf16.msra.mxu1 %v21935_v4  ;;  %v22014_v4 = vld [vmem:[#allocation5 + $0xfe4] ss:$16 sps:$4 sm:$0xff]  }
 0xe49   :  { %15796 = vmatpush1.bf16.msra.mxu0 %v21938_v15  ;;  %15266 = vmatprep.subr.bf16.mxu1 %v21943_v33  ;;  %v23381_v15 = vld [vmem:[#allocation2 + $0x70] ss:$8 sps:$4 sm:$0xff]  }
 0xe4a   :  { %15797 = vmatprep.subr.bf16.mxu0 %v21946_v6  ;;  %v22008_v33 = vld [vmem:[#allocation5 + $0xde8] ss:$16 sps:$4 sm:$0xff]   ;;  %v22012_v6 = vld [vmem:[#allocation5 + $0xfe0] ss:$16 sps:$4 sm:$0xff]  }
 0xe4c   :  { %15267 = vmatpush1.bf16.msra.mxu1 %v21941_v31  ;;  %v22017_v31 = vld [vmem:[#allocation5 + $0xdcc] ss:$16 sps:$4 sm:$0xff]  }
 0xe4d   :  { %15798 = vmatpush1.bf16.msra.mxu0 %v21944_v3  ;;  %15268 = vmatprep.subr.bf16.mxu1 %v21949_v57  ;;  %v22020_v3 = vld [vmem:[#allocation5 + $0xfc4] ss:$16 sps:$4 sm:$0xff]  }
 0xe4e   :  { %15799 = vmatprep.subr.bf16.mxu0 %v21952_v63 }
 0xe50   :  { %15269 = vmatpush1.bf16.msra.mxu1 %v21947_v2 }
 0xe51   :  { %15800 = vmatpush1.bf16.msra.mxu0 %v21950_v61  ;;  %15270 = vmatprep.subr.bf16.mxu1 %v21955_v48  ;;  %v22015_v48 = vld [vmem:[#allocation5 + $0xdc8] ss:$16 sps:$4 sm:$0xff]  }
 0xe52   :  { %15801 = vmatprep.subr.bf16.mxu0 %v21958_v12  ;;  %v22018_v12 = vld [vmem:[#allocation5 + $0xfc0] ss:$16 sps:$4 sm:$0xff]  }
 0xe54   :  { %15271 = vmatpush1.bf16.msra.mxu1 %v21953_v0 }
 0xe55   :  { %15802 = vmatpush1.bf16.msra.mxu0 %v21956_v32  ;;  %15542 = vmatprep.subr.bf16.mxu1 %v21961_v24  ;;  %v22023_v24 = vld [vmem:[#allocation5 + $0xdac] ss:$16 sps:$4 sm:$0xff]  }
 0xe56   :  { %16073 = vmatprep.subr.bf16.mxu0 %v21965_v22  ;;  %v22026_v22 = vld [vmem:[#allocation5 + $0xfa4] ss:$16 sps:$4 sm:$0xff]  }
 0xe57   :  { %v13574_v45 = vpop.f32.mrf.mxu1  ;;  %15289 = vmatmul.mubr.bf16.vlgmr.msra.gmra.mxu1 %v23327_v46 }
 0xe58   :  { %v14105_v37 = vpop.f32.mrf.mxu0  ;;  %15820 = vmatmul.mubr.bf16.vlgmr.msra.gmra.mxu0 %v23363_v35  ;;  %v23368_v47 = vadd.f32 %v13574_v45, %v23350_v18  ;;  %15543 = vmatpush1.bf16.msra.mxu1 %v21959_v10  ;;  %v21980_v18 = vld [vmem:[#allocation5 + $0xc8c] ss:$16 sps:$4 sm:$0xff]   ;;  %v22024_v45 = vld [vmem:[#allocation5 + $0xfa0] ss:$16 sps:$4 sm:$0xff]  }
 0xe59   :  { %v23371_v21 = vadd.f32 %v14105_v37, %v23353_v25  ;;  %16074 = vmatpush1.bf16.msra.mxu0 %v21963_v51  ;;  %v13576_v44 = vpop.f32.mrf.mxu1  ;;  %15544 = vmatprep.subr.bf16.mxu1 %v21968_v50  ;;  %v21983_v25 = vld [vmem:[#allocation5 + $0xe84] ss:$16 sps:$4 sm:$0xff]  }
 0xe5a   :  { %v14107_v36 = vpop.f32.mrf.mxu0  ;;  %16075 = vmatprep.subr.bf16.mxu0 %v21971_v28  ;;  %v23374_v46 = vadd.f32 %v13576_v44, %v23356_v40  ;;  %15574 = vmatprep.mubr.bf16.mxu1 %v23520_v17  ;;  %v21987_v40 = vld [vmem:[#allocation5 + $0xe60] ss:$16 sps:$4 sm:$0xff]   ;;  %v22021_v28 = vld [vmem:[#allocation5 + $0xda8] ss:$16 sps:$4 sm:$0xff]  }
 0xe5b   :  { %v23377_v1 = vadd.f32 %v14107_v36, %v23359_v62  ;;  %16105 = vmatprep.mubr.bf16.mxu0 %v23520_v17  ;;  %v13578_v38 = vpop.f32.mrf.mxu1  ;;  %v21992_v62 = vld [vmem:[#allocation5 + $0xc4c] ss:$16 sps:$4 sm:$0xff]   ;;  %v22030_v44 = vld [vmem:[#allocation5 + $0xf80] ss:$16 sps:$4 sm:$0xff]  }
 0xe5c   :  { %v14109_v53 = vpop.f32.mrf.mxu0  ;;  %15545 = vmatpush1.bf16.msra.mxu1 %v21966_v14  ;;  %v22035_v36 = vld [vmem:[#allocation5 + $0xd6c] ss:$16 sps:$4 sm:$0xff]   ;;  %v22044_v38 = vld [vmem:[#allocation5 + $0xf44] ss:$16 sps:$4 sm:$0xff]  }
 0xe5d   :  { %16076 = vmatpush1.bf16.msra.mxu0 %v21969_v49  ;;  %v13579_v58 = vpop.f32.mrf.mxu1  ;;  %15546 = vmatprep.subr.bf16.mxu1 %v21974_v26  ;;  %v22027_v49 = vld [vmem:[#allocation5 + $0xd88] ss:$16 sps:$4 sm:$0xff]   ;;  %v22038_v26 = vld [vmem:[#allocation5 + $0xf64] ss:$16 sps:$4 sm:$0xff]  }
 0xe5e   :  { %16077 = vmatprep.subr.bf16.mxu0 %v21977_v41  ;;  %v14110_v16 = vpop.f32.mrf.mxu0  ;;  %v22033_v41 = vld [vmem:[#allocation5 + $0xd68] ss:$16 sps:$4 sm:$0xff]   ;;  %v22050_v58 = vld [vmem:[#allocation5 + $0xf24] ss:$16 sps:$4 sm:$0xff]  }
 0xe5f   :  { %v22039_v53 = vld [vmem:[#allocation5 + $0xd48] ss:$16 sps:$4 sm:$0xff]   ;;  %v22053_v16 = vld [vmem:[#allocation5 + $0xd0c] ss:$16 sps:$4 sm:$0xff]  }
 0xe60   :  { %15547 = vmatpush1.bf16.msra.mxu1 %v21972_v20  ;;  %v22042_v20 = vld [vmem:[#allocation5 + $0xf40] ss:$16 sps:$4 sm:$0xff]  }
 0xe61   :  { %16078 = vmatpush1.bf16.msra.mxu0 %v21975_v55  ;;  %15548 = vmatprep.subr.bf16.mxu1 %v21980_v18  ;;  %v22047_v55 = vld [vmem:[#allocation5 + $0xd2c] ss:$16 sps:$4 sm:$0xff]   ;;  %v22045_v18 = vld [vmem:[#allocation5 + $0xd28] ss:$16 sps:$4 sm:$0xff]  }
 0xe62   :  { %16079 = vmatprep.subr.bf16.mxu0 %v21983_v25  ;;  %v22048_v25 = vld [vmem:[#allocation5 + $0xf20] ss:$16 sps:$4 sm:$0xff]  }
 0xe64   :  { %15549 = vmatpush1.bf16.msra.mxu1 %v21978_v60  ;;  %v22056_v60 = vld [vmem:[#allocation5 + $0xf04] ss:$16 sps:$4 sm:$0xff]  }
 0xe65   :  { %16080 = vmatpush1.bf16.msra.mxu0 %v21981_v43  ;;  %15550 = vmatprep.subr.bf16.mxu1 %v21986_v27  ;;  %v22051_v43 = vld [vmem:[#allocation5 + $0xd08] ss:$16 sps:$4 sm:$0xff]   ;;  %v22054_v27 = vld [vmem:[#allocation5 + $0xf00] ss:$16 sps:$4 sm:$0xff]  }
 0xe66   :  { %16081 = vmatprep.subr.bf16.mxu0 %v21989_v30  ;;  %v22059_v30 = vld [vmem:[#allocation5 + $0xeec] ss:$16 sps:$4 sm:$0xff]  }
 0xe68   :  { %15551 = vmatpush1.bf16.msra.mxu1 %v21984_v52  ;;  %v22063_v52 = vld [vmem:[#allocation5 + $0x10e4] ss:$16 sps:$4 sm:$0xff]  }
 0xe69   :  { %16082 = vmatpush1.bf16.msra.mxu0 %v21987_v40  ;;  %15552 = vmatprep.subr.bf16.mxu1 %v21992_v62  ;;  %v23399_v40 = vld [vmem:[#allocation2 + $0x74] ss:$8 sps:$4 sm:$0xff]   ;;  %v22057_v62 = vld [vmem:[#allocation5 + $0xee8] ss:$16 sps:$4 sm:$0xff]  }
 0xe6a   :  { %16083 = vmatprep.subr.bf16.mxu0 %v21995_v59  ;;  %v22061_v59 = vld [vmem:[#allocation5 + $0x10e0] ss:$16 sps:$4 sm:$0xff]  }
 0xe6c   :  { %15553 = vmatpush1.bf16.msra.mxu1 %v21990_v34  ;;  %v22066_v34 = vld [vmem:[#allocation5 + $0xecc] ss:$16 sps:$4 sm:$0xff]  }
 0xe6d   :  { %16084 = vmatpush1.bf16.msra.mxu0 %v21993_v19  ;;  %15554 = vmatprep.subr.bf16.mxu1 %v21998_v7  ;;  %v22069_v19 = vld [vmem:[#allocation5 + $0x10c4] ss:$16 sps:$4 sm:$0xff]  }
 0xe6e   :  { %16085 = vmatprep.subr.bf16.mxu0 %v22001_v54 }
 0xe70   :  { %15555 = vmatpush1.bf16.msra.mxu1 %v21996_v29 }
 0xe71   :  { %16086 = vmatpush1.bf16.msra.mxu0 %v21999_v42  ;;  %15556 = vmatprep.subr.bf16.mxu1 %v22004_v13  ;;  %v22064_v13 = vld [vmem:[#allocation5 + $0xec8] ss:$16 sps:$4 sm:$0xff]  }
 0xe72   :  { %16087 = vmatprep.subr.bf16.mxu0 %v22007_v56  ;;  %v22067_v56 = vld [vmem:[#allocation5 + $0x10c0] ss:$16 sps:$4 sm:$0xff]  }
 0xe74   :  { %15557 = vmatpush1.bf16.msra.mxu1 %v22002_v39 }
 0xe75   :  { %16088 = vmatpush1.bf16.msra.mxu0 %v22005_v8  ;;  %15828 = vmatprep.subr.bf16.mxu1 %v22010_v23  ;;  %v22072_v23 = vld [vmem:[#allocation5 + $0xeac] ss:$16 sps:$4 sm:$0xff]  }
 0xe76   :  { %16359 = vmatprep.subr.bf16.mxu0 %v22014_v4  ;;  %v22075_v4 = vld [vmem:[#allocation5 + $0x10a4] ss:$16 sps:$4 sm:$0xff]  }
 0xe77   :  { %v13860_v57 = vpop.f32.mrf.mxu1  ;;  %15575 = vmatmul.mubr.bf16.vlgmr.msra.gmra.mxu1 %v23345_v11 }
 0xe78   :  { %v14391_v63 = vpop.f32.mrf.mxu0  ;;  %16106 = vmatmul.mubr.bf16.vlgmr.msra.gmra.mxu0 %v23381_v15  ;;  %v23386_v2 = vadd.f32 %v13860_v57, %v23368_v47  ;;  %15829 = vmatpush1.bf16.msra.mxu1 %v22008_v33  ;;  %v22029_v47 = vld [vmem:[#allocation5 + $0xd8c] ss:$16 sps:$4 sm:$0xff]   ;;  %v22073_v57 = vld [vmem:[#allocation5 + $0x10a0] ss:$16 sps:$4 sm:$0xff]  }
 0xe79   :  { %v23389_v61 = vadd.f32 %v14391_v63, %v23371_v21  ;;  %16360 = vmatpush1.bf16.msra.mxu0 %v22012_v6  ;;  %v13862_v0 = vpop.f32.mrf.mxu1  ;;  %15830 = vmatprep.subr.bf16.mxu1 %v22017_v31  ;;  %v22032_v21 = vld [vmem:[#allocation5 + $0xf84] ss:$16 sps:$4 sm:$0xff]  }
 0xe7a   :  { %v14393_v32 = vpop.f32.mrf.mxu0  ;;  %16361 = vmatprep.subr.bf16.mxu0 %v22020_v3  ;;  %v23392_v11 = vadd.f32 %v13862_v0, %v23374_v46  ;;  %15860 = vmatprep.mubr.bf16.mxu1 %v23520_v17  ;;  %v22036_v46 = vld [vmem:[#allocation5 + $0xf60] ss:$16 sps:$4 sm:$0xff]   ;;  %v22070_v3 = vld [vmem:[#allocation5 + $0xea8] ss:$16 sps:$4 sm:$0xff]  }
 0xe7b   :  { %v23395_v10 = vadd.f32 %v14393_v32, %v23377_v1  ;;  %16391 = vmatprep.mubr.bf16.mxu0 %v23520_v17  ;;  %v13864_v51 = vpop.f32.mrf.mxu1  ;;  %v22041_v1 = vld [vmem:[#allocation5 + $0xd4c] ss:$16 sps:$4 sm:$0xff]   ;;  %v22079_v0 = vld [vmem:[#allocation5 + $0x1080] ss:$16 sps:$4 sm:$0xff]  }
 0xe7c   :  { %v14395_v50 = vpop.f32.mrf.mxu0  ;;  %15831 = vmatpush1.bf16.msra.mxu1 %v22015_v48  ;;  %v22084_v32 = vld [vmem:[#allocation5 + $0xe6c] ss:$16 sps:$4 sm:$0xff]   ;;  %v22093_v51 = vld [vmem:[#allocation5 + $0x1044] ss:$16 sps:$4 sm:$0xff]  }
 0xe7d   :  { %16362 = vmatpush1.bf16.msra.mxu0 %v22018_v12  ;;  %v13865_v37 = vpop.f32.mrf.mxu1  ;;  %15832 = vmatprep.subr.bf16.mxu1 %v22023_v24  ;;  %v22076_v12 = vld [vmem:[#allocation5 + $0xe88] ss:$16 sps:$4 sm:$0xff]   ;;  %v22087_v24 = vld [vmem:[#allocation5 + $0x1064] ss:$16 sps:$4 sm:$0xff]  }
 0xe7e   :  { %16363 = vmatprep.subr.bf16.mxu0 %v22026_v22  ;;  %v14396_v14 = vpop.f32.mrf.mxu0  ;;  %v22082_v22 = vld [vmem:[#allocation5 + $0xe68] ss:$16 sps:$4 sm:$0xff]   ;;  %v22099_v37 = vld [vmem:[#allocation5 + $0x1024] ss:$16 sps:$4 sm:$0xff]  }
 0xe7f   :  { %v22088_v50 = vld [vmem:[#allocation5 + $0xe48] ss:$16 sps:$4 sm:$0xff]   ;;  %v22102_v14 = vld [vmem:[#allocation5 + $0xe0c] ss:$16 sps:$4 sm:$0xff]  }
 0xe80   :  { %15833 = vmatpush1.bf16.msra.mxu1 %v22021_v28  ;;  %v22091_v28 = vld [vmem:[#allocation5 + $0x1040] ss:$16 sps:$4 sm:$0xff]  }
 0xe81   :  { %16364 = vmatpush1.bf16.msra.mxu0 %v22024_v45  ;;  %15834 = vmatprep.subr.bf16.mxu1 %v22029_v47  ;;  %v22096_v45 = vld [vmem:[#allocation5 + $0xe2c] ss:$16 sps:$4 sm:$0xff]   ;;  %v22094_v47 = vld [vmem:[#allocation5 + $0xe28] ss:$16 sps:$4 sm:$0xff]  }
 0xe82   :  { %16365 = vmatprep.subr.bf16.mxu0 %v22032_v21  ;;  %v22097_v21 = vld [vmem:[#allocation5 + $0x1020] ss:$16 sps:$4 sm:$0xff]  }
 0xe84   :  { %15835 = vmatpush1.bf16.msra.mxu1 %v22027_v49  ;;  %v22105_v49 = vld [vmem:[#allocation5 + $0x1004] ss:$16 sps:$4 sm:$0xff]  }
 0xe85   :  { %16366 = vmatpush1.bf16.msra.mxu0 %v22030_v44  ;;  %15836 = vmatprep.subr.bf16.mxu1 %v22035_v36  ;;  %v22100_v44 = vld [vmem:[#allocation5 + $0xe08] ss:$16 sps:$4 sm:$0xff]   ;;  %v22103_v36 = vld [vmem:[#allocation5 + $0x1000] ss:$16 sps:$4 sm:$0xff]  }
 0xe86   :  { %16367 = vmatprep.subr.bf16.mxu0 %v22038_v26  ;;  %v22108_v26 = vld [vmem:[#allocation5 + $0xfec] ss:$16 sps:$4 sm:$0xff]  }
 0xe88   :  { %15837 = vmatpush1.bf16.msra.mxu1 %v22033_v41  ;;  %v22112_v41 = vld [vmem:[#allocation5 + $0x11e4] ss:$16 sps:$4 sm:$0xff]  }
 0xe89   :  { %16368 = vmatpush1.bf16.msra.mxu0 %v22036_v46  ;;  %15838 = vmatprep.subr.bf16.mxu1 %v22041_v1  ;;  %v23417_v46 = vld [vmem:[#allocation2 + $0x80] ss:$8 sps:$4 sm:$0xff]  }
 0xe8a   :  { %16369 = vmatprep.subr.bf16.mxu0 %v22044_v38  ;;  %v22106_v1 = vld [vmem:[#allocation5 + $0xfe8] ss:$16 sps:$4 sm:$0xff]   ;;  %v22110_v38 = vld [vmem:[#allocation5 + $0x11e0] ss:$16 sps:$4 sm:$0xff]  }
 0xe8c   :  { %15839 = vmatpush1.bf16.msra.mxu1 %v22039_v53  ;;  %v22115_v53 = vld [vmem:[#allocation5 + $0xfcc] ss:$16 sps:$4 sm:$0xff]  }
 0xe8d   :  { %16370 = vmatpush1.bf16.msra.mxu0 %v22042_v20  ;;  %15840 = vmatprep.subr.bf16.mxu1 %v22047_v55  ;;  %v22118_v20 = vld [vmem:[#allocation5 + $0x11c4] ss:$16 sps:$4 sm:$0xff]  }
 0xe8e   :  { %16371 = vmatprep.subr.bf16.mxu0 %v22050_v58 }
 0xe90   :  { %15841 = vmatpush1.bf16.msra.mxu1 %v22045_v18 }
 0xe91   :  { %16372 = vmatpush1.bf16.msra.mxu0 %v22048_v25  ;;  %15842 = vmatprep.subr.bf16.mxu1 %v22053_v16  ;;  %v22113_v16 = vld [vmem:[#allocation5 + $0xfc8] ss:$16 sps:$4 sm:$0xff]  }
 0xe92   :  { %16373 = vmatprep.subr.bf16.mxu0 %v22056_v60  ;;  %v22116_v60 = vld [vmem:[#allocation5 + $0x11c0] ss:$16 sps:$4 sm:$0xff]  }
 0xe94   :  { %15843 = vmatpush1.bf16.msra.mxu1 %v22051_v43 }
 0xe95   :  { %16374 = vmatpush1.bf16.msra.mxu0 %v22054_v27  ;;  %16114 = vmatprep.subr.bf16.mxu1 %v22059_v30  ;;  %v22121_v30 = vld [vmem:[#allocation5 + $0xfac] ss:$16 sps:$4 sm:$0xff]  }
 0xe96   :  { %16645 = vmatprep.subr.bf16.mxu0 %v22063_v52  ;;  %v22124_v52 = vld [vmem:[#allocation5 + $0x11a4] ss:$16 sps:$4 sm:$0xff]  }
 0xe97   :  { %v14146_v7 = vpop.f32.mrf.mxu1  ;;  %15861 = vmatmul.mubr.bf16.vlgmr.msra.gmra.mxu1 %v23363_v35 }
 0xe98   :  { %v14677_v54 = vpop.f32.mrf.mxu0  ;;  %16392 = vmatmul.mubr.bf16.vlgmr.msra.gmra.mxu0 %v23399_v40  ;;  %v23404_v29 = vadd.f32 %v14146_v7, %v23386_v2  ;;  %16115 = vmatpush1.bf16.msra.mxu1 %v22057_v62  ;;  %v22078_v2 = vld [vmem:[#allocation5 + $0xe8c] ss:$16 sps:$4 sm:$0xff]   ;;  %v22122_v7 = vld [vmem:[#allocation5 + $0x11a0] ss:$16 sps:$4 sm:$0xff]  }
 0xe99   :  { %v23407_v42 = vadd.f32 %v14677_v54, %v23389_v61  ;;  %16646 = vmatpush1.bf16.msra.mxu0 %v22061_v59  ;;  %v14148_v39 = vpop.f32.mrf.mxu1  ;;  %16116 = vmatprep.subr.bf16.mxu1 %v22066_v34  ;;  %v22081_v61 = vld [vmem:[#allocation5 + $0x1084] ss:$16 sps:$4 sm:$0xff]  }
 0xe9a   :  { %v14679_v8 = vpop.f32.mrf.mxu0  ;;  %16647 = vmatprep.subr.bf16.mxu0 %v22069_v19  ;;  %v23410_v35 = vadd.f32 %v14148_v39, %v23392_v11  ;;  %16146 = vmatprep.mubr.bf16.mxu1 %v23520_v17  ;;  %v22085_v11 = vld [vmem:[#allocation5 + $0x1060] ss:$16 sps:$4 sm:$0xff]   ;;  %v22119_v19 = vld [vmem:[#allocation5 + $0xfa8] ss:$16 sps:$4 sm:$0xff]  }
 0xe9b   :  { %v23413_v33 = vadd.f32 %v14679_v8, %v23395_v10  ;;  %16677 = vmatprep.mubr.bf16.mxu0 %v23520_v17  ;;  %v14150_v6 = vpop.f32.mrf.mxu1  ;;  %v22090_v10 = vld [vmem:[#allocation5 + $0xe4c] ss:$16 sps:$4 sm:$0xff]   ;;  %v22128_v39 = vld [vmem:[#allocation5 + $0x1180] ss:$16 sps:$4 sm:$0xff]  }
 0xe9c   :  { %v14681_v31 = vpop.f32.mrf.mxu0  ;;  %16117 = vmatpush1.bf16.msra.mxu1 %v22064_v13  ;;  %v22133_v8 = vld [vmem:[#allocation5 + $0xf6c] ss:$16 sps:$4 sm:$0xff]   ;;  %v22142_v6 = vld [vmem:[#allocation5 + $0x1144] ss:$16 sps:$4 sm:$0xff]  }
 0xe9d   :  { %16648 = vmatpush1.bf16.msra.mxu0 %v22067_v56  ;;  %v14151_v63 = vpop.f32.mrf.mxu1  ;;  %16118 = vmatprep.subr.bf16.mxu1 %v22072_v23  ;;  %v22125_v56 = vld [vmem:[#allocation5 + $0xf88] ss:$16 sps:$4 sm:$0xff]   ;;  %v22136_v23 = vld [vmem:[#allocation5 + $0x1164] ss:$16 sps:$4 sm:$0xff]  }
 0xe9e   :  { %16649 = vmatprep.subr.bf16.mxu0 %v22075_v4  ;;  %v14682_v48 = vpop.f32.mrf.mxu0  ;;  %v22131_v4 = vld [vmem:[#allocation5 + $0xf68] ss:$16 sps:$4 sm:$0xff]   ;;  %v22148_v63 = vld [vmem:[#allocation5 + $0x1124] ss:$16 sps:$4 sm:$0xff]  }
 0xe9f   :  { %v22137_v31 = vld [vmem:[#allocation5 + $0xf48] ss:$16 sps:$4 sm:$0xff]   ;;  %v22151_v48 = vld [vmem:[#allocation5 + $0xf0c] ss:$16 sps:$4 sm:$0xff]  }
 0xea0   :  { %16119 = vmatpush1.bf16.msra.mxu1 %v22070_v3  ;;  %v22140_v3 = vld [vmem:[#allocation5 + $0x1140] ss:$16 sps:$4 sm:$0xff]  }
 0xea1   :  { %16650 = vmatpush1.bf16.msra.mxu0 %v22073_v57  ;;  %16120 = vmatprep.subr.bf16.mxu1 %v22078_v2  ;;  %v22145_v57 = vld [vmem:[#allocation5 + $0xf2c] ss:$16 sps:$4 sm:$0xff]   ;;  %v22143_v2 = vld [vmem:[#allocation5 + $0xf28] ss:$16 sps:$4 sm:$0xff]  }
 0xea2   :  { %16651 = vmatprep.subr.bf16.mxu0 %v22081_v61  ;;  %v22146_v61 = vld [vmem:[#allocation5 + $0x1120] ss:$16 sps:$4 sm:$0xff]  }
 0xea4   :  { %16121 = vmatpush1.bf16.msra.mxu1 %v22076_v12  ;;  %v22154_v12 = vld [vmem:[#allocation5 + $0x1104] ss:$16 sps:$4 sm:$0xff]  }
 0xea5   :  { %16652 = vmatpush1.bf16.msra.mxu0 %v22079_v0  ;;  %16122 = vmatprep.subr.bf16.mxu1 %v22084_v32  ;;  %v22149_v0 = vld [vmem:[#allocation5 + $0xf08] ss:$16 sps:$4 sm:$0xff]   ;;  %v22152_v32 = vld [vmem:[#allocation5 + $0x1100] ss:$16 sps:$4 sm:$0xff]  }
 0xea6   :  { %16653 = vmatprep.subr.bf16.mxu0 %v22087_v24  ;;  %v22157_v24 = vld [vmem:[#allocation5 + $0x10ec] ss:$16 sps:$4 sm:$0xff]  }
 0xea8   :  { %16123 = vmatpush1.bf16.msra.mxu1 %v22082_v22  ;;  %v23435_v22 = vld [vmem:[#allocation2 + $0x84] ss:$8 sps:$4 sm:$0xff]  }
 0xea9   :  { %16654 = vmatpush1.bf16.msra.mxu0 %v22085_v11  ;;  %16124 = vmatprep.subr.bf16.mxu1 %v22090_v10  ;;  %v22155_v11 = vld [vmem:[#allocation5 + $0x10e8] ss:$16 sps:$4 sm:$0xff]   ;;  %v22161_v10 = vld [vmem:[#allocation5 + $0x10cc] ss:$16 sps:$4 sm:$0xff]  }
 0xeaa   :  { %16655 = vmatprep.subr.bf16.mxu0 %v22093_v51 }
 0xeac   :  { %16125 = vmatpush1.bf16.msra.mxu1 %v22088_v50 }
 0xead   :  { %16656 = vmatpush1.bf16.msra.mxu0 %v22091_v28  ;;  %16126 = vmatprep.subr.bf16.mxu1 %v22096_v45 }
 0xeae   :  { %16657 = vmatprep.subr.bf16.mxu0 %v22099_v37  ;;  %v22159_v37 = vld [vmem:[#allocation5 + $0x10c8] ss:$16 sps:$4 sm:$0xff]  }
 0xeb0   :  { %16127 = vmatpush1.bf16.msra.mxu1 %v22094_v47 }
 0xeb1   :  { %16658 = vmatpush1.bf16.msra.mxu0 %v22097_v21  ;;  %16128 = vmatprep.subr.bf16.mxu1 %v22102_v14  ;;  %v22164_v14 = vld [vmem:[#allocation5 + $0x10ac] ss:$16 sps:$4 sm:$0xff]  }
 0xeb2   :  { %16659 = vmatprep.subr.bf16.mxu0 %v22105_v49 }
 0xeb4   :  { %16129 = vmatpush1.bf16.msra.mxu1 %v22100_v44 }
 0xeb5   :  { %16660 = vmatpush1.bf16.msra.mxu0 %v22103_v36  ;;  %16400 = vmatprep.subr.bf16.mxu1 %v22108_v26  ;;  %v22162_v26 = vld [vmem:[#allocation5 + $0x10a8] ss:$16 sps:$4 sm:$0xff]  }
 0xeb6   :  { %16931 = vmatprep.subr.bf16.mxu0 %v22112_v41 }
 0xeb7   :  { %v14432_v55 = vpop.f32.mrf.mxu1  ;;  %16147 = vmatmul.mubr.bf16.vlgmr.msra.gmra.mxu1 %v23381_v15 }
 0xeb8   :  { %v14963_v58 = vpop.f32.mrf.mxu0  ;;  %16678 = vmatmul.mubr.bf16.vlgmr.msra.gmra.mxu0 %v23417_v46  ;;  %v23422_v18 = vadd.f32 %v14432_v55, %v23404_v29  ;;  %16401 = vmatpush1.bf16.msra.mxu1 %v22106_v1  ;;  %v22127_v29 = vld [vmem:[#allocation5 + $0xf8c] ss:$16 sps:$4 sm:$0xff]   ;;  %v22168_v55 = vld [vmem:[#allocation5 + $0x1068] ss:$16 sps:$4 sm:$0xff]  }
 0xeb9   :  { %v23425_v25 = vadd.f32 %v14963_v58, %v23407_v42  ;;  %16932 = vmatpush1.bf16.msra.mxu0 %v22110_v38  ;;  %v14434_v43 = vpop.f32.mrf.mxu1  ;;  %16402 = vmatprep.subr.bf16.mxu1 %v22115_v53  ;;  %v22130_v42 = vld [vmem:[#allocation5 + $0x1184] ss:$16 sps:$4 sm:$0xff]   ;;  %v22167_v1 = vld [vmem:[#allocation5 + $0x108c] ss:$16 sps:$4 sm:$0xff]   ;;  %v22165_v53 = vld [vmem:[#allocation5 + $0x1088] ss:$16 sps:$4 sm:$0xff]  }
 0xeba   :  { %v14965_v27 = vpop.f32.mrf.mxu0  ;;  %16933 = vmatprep.subr.bf16.mxu0 %v22118_v20  ;;  %v23428_v15 = vadd.f32 %v14434_v43, %v23410_v35  ;;  %16432 = vmatprep.mubr.bf16.mxu1 %v23520_v17  ;;  %v22134_v35 = vld [vmem:[#allocation5 + $0x1160] ss:$16 sps:$4 sm:$0xff]   ;;  %v22170_v20 = vld [vmem:[#allocation5 + $0x106c] ss:$16 sps:$4 sm:$0xff]   ;;  %v22177_v43 = vld [vmem:[#allocation5 + $0x1008] ss:$16 sps:$4 sm:$0xff]  }
 0xebb   :  { %v23431_v62 = vadd.f32 %v14965_v27, %v23413_v33  ;;  %16963 = vmatprep.mubr.bf16.mxu0 %v23520_v17  ;;  %v14436_v59 = vpop.f32.mrf.mxu1  ;;  %v22139_v33 = vld [vmem:[#allocation5 + $0xf4c] ss:$16 sps:$4 sm:$0xff]  }
 0xebc   :  { %v14967_v34 = vpop.f32.mrf.mxu0  ;;  %16403 = vmatpush1.bf16.msra.mxu1 %v22113_v16  ;;  %v22173_v58 = vld [vmem:[#allocation5 + $0x104c] ss:$16 sps:$4 sm:$0xff]   ;;  %v22174_v16 = vld [vmem:[#allocation5 + $0x1028] ss:$16 sps:$4 sm:$0xff]  }
 0xebd   :  { %16934 = vmatpush1.bf16.msra.mxu0 %v22116_v60  ;;  %v14437_v54 = vpop.f32.mrf.mxu1  ;;  %16404 = vmatprep.subr.bf16.mxu1 %v22121_v30  ;;  %v22179_v60 = vld [vmem:[#allocation5 + $0x100c] ss:$16 sps:$4 sm:$0xff]   ;;  %v22180_v30 = vld [vmem:[#allocation5 + $0x11e8] ss:$16 sps:$4 sm:$0xff]  }
 0xebe   :  { %16935 = vmatprep.subr.bf16.mxu0 %v22124_v52  ;;  %v14968_v13 = vpop.f32.mrf.mxu0  ;;  %v22182_v27 = vld [vmem:[#allocation5 + $0x11ec] ss:$16 sps:$4 sm:$0xff]  }
 0xebf   :  { %v22185_v52 = vld [vmem:[#allocation5 + $0x11cc] ss:$16 sps:$4 sm:$0xff]  }
 0xec0   :  { %16405 = vmatpush1.bf16.msra.mxu1 %v22119_v19  ;;  %v22183_v19 = vld [vmem:[#allocation5 + $0x11c8] ss:$16 sps:$4 sm:$0xff]  }
 0xec1   :  { %16936 = vmatpush1.bf16.msra.mxu0 %v22122_v7  ;;  %16406 = vmatprep.subr.bf16.mxu1 %v22127_v29  ;;  %v22188_v29 = vld [vmem:[#allocation5 + $0x11ac] ss:$16 sps:$4 sm:$0xff]  }
 0xec2   :  { %16937 = vmatprep.subr.bf16.mxu0 %v22130_v42 }
 0xec4   :  { %16407 = vmatpush1.bf16.msra.mxu1 %v22125_v56 }
 0xec5   :  { %16938 = vmatpush1.bf16.msra.mxu0 %v22128_v39  ;;  %16408 = vmatprep.subr.bf16.mxu1 %v22133_v8  ;;  %v22186_v8 = vld [vmem:[#allocation5 + $0x11a8] ss:$16 sps:$4 sm:$0xff]  }
 0xec6   :  { %16939 = vmatprep.subr.bf16.mxu0 %v22136_v23 }
 0xec8   :  { %16409 = vmatpush1.bf16.msra.mxu1 %v22131_v4  ;;  %v22191_v4 = vld [vmem:[#allocation5 + $0x118c] ss:$16 sps:$4 sm:$0xff]  }
 0xec9   :  { %16940 = vmatpush1.bf16.msra.mxu0 %v22134_v35  ;;  %16410 = vmatprep.subr.bf16.mxu1 %v22139_v33  ;;  %v22189_v35 = vld [vmem:[#allocation5 + $0x1188] ss:$16 sps:$4 sm:$0xff]   ;;  %v22194_v33 = vld [vmem:[#allocation5 + $0x116c] ss:$16 sps:$4 sm:$0xff]  }
 0xeca   :  { %16941 = vmatprep.subr.bf16.mxu0 %v22142_v6  ;;  %v22197_v6 = vld [vmem:[#allocation5 + $0x114c] ss:$16 sps:$4 sm:$0xff]  }
 0xecc   :  { %16411 = vmatpush1.bf16.msra.mxu1 %v22137_v31  ;;  %v22195_v31 = vld [vmem:[#allocation5 + $0x1148] ss:$16 sps:$4 sm:$0xff]  }
 0xecd   :  { %16942 = vmatpush1.bf16.msra.mxu0 %v22140_v3  ;;  %16412 = vmatprep.subr.bf16.mxu1 %v22145_v57  ;;  %v22200_v3 = vld [vmem:[#allocation5 + $0x112c] ss:$16 sps:$4 sm:$0xff]   ;;  %v22198_v57 = vld [vmem:[#allocation5 + $0x1128] ss:$16 sps:$4 sm:$0xff]  }
 0xece   :  { %16943 = vmatprep.subr.bf16.mxu0 %v22148_v63  ;;  %v22203_v63 = vld [vmem:[#allocation5 + $0x110c] ss:$16 sps:$4 sm:$0xff]  }
 0xed0   :  { %16413 = vmatpush1.bf16.msra.mxu1 %v22143_v2  ;;  %v22201_v2 = vld [vmem:[#allocation5 + $0x1108] ss:$16 sps:$4 sm:$0xff]  }
 0xed1   :  { %16944 = vmatpush1.bf16.msra.mxu0 %v22146_v61  ;;  %16414 = vmatprep.subr.bf16.mxu1 %v22151_v48 }
 0xed2   :  { %16945 = vmatprep.subr.bf16.mxu0 %v22154_v12 }
 0xed4   :  { %16415 = vmatpush1.bf16.msra.mxu1 %v22149_v0 }
 0xed5   :  { %16946 = vmatpush1.bf16.msra.mxu0 %v22152_v32  ;;  %16686 = vmatprep.subr.bf16.mxu1 %v22157_v24 }
 0xed7   :  { %v14718_v51 = vpop.f32.mrf.mxu1  ;;  %16433 = vmatmul.mubr.bf16.vlgmr.msra.gmra.mxu1 %v23399_v40 }
 0xed8   :  { %v15249_v50 = vpop.f32.mrf.mxu0  ;;  %16964 = vmatmul.mubr.bf16.vlgmr.msra.gmra.mxu0 %v23435_v22  ;;  %v14727_v28 = vadd.f32 %v14718_v51, %v23422_v18  ;;  %16687 = vmatpush1.bf16.msra.mxu1 %v22155_v11  ;;  %v22171_v18 = vld [vmem:[#allocation5 + $0x1048] ss:$16 sps:$4 sm:$0xff]  }
 0xed9   :  { %v15297_v45 = vadd.f32 %v15249_v50, %v23425_v25  ;;  %16718 = vmatprep.mubr.bf16.mxu1 %v23520_v17  ;;  %v14720_v47 = vpop.f32.mrf.mxu1  ;;  %16688 = vmatprep.subr.bf16.mxu1 %v22161_v10  ;;  %v22176_v25 = vld [vmem:[#allocation5 + $0x102c] ss:$16 sps:$4 sm:$0xff]  }
 0xeda   :  { %v15251_v21 = vpop.f32.mrf.mxu0  ;;  %v14728_v49 = vadd.f32 %v14720_v47, %v23428_v15 }
 0xedb   :  { %v15298_v44 = vadd.f32 %v15251_v21, %v23431_v62  ;;  %v14722_v36 = vpop.f32.mrf.mxu1 }
 0xedc   :  { %v15253_v40 = vpop.f32.mrf.mxu0  ;;  %16689 = vmatpush1.bf16.msra.mxu1 %v22159_v37 }
 0xedd   :  { %v14723_v41 = vpop.f32.mrf.mxu1  ;;  %16690 = vmatprep.subr.bf16.mxu1 %v22164_v14 }
 0xede   :  { %v15254_v38 = vpop.f32.mrf.mxu0 }
 0xee0   :  { %16691 = vmatpush1.bf16.msra.mxu1 %v22162_v26 }
 0xee1   :  { %16692 = vmatprep.subr.bf16.mxu1 %v22167_v1 }
 0xee4   :  { %16693 = vmatpush1.bf16.msra.mxu1 %v22165_v53 }
 0xee5   :  { %16694 = vmatprep.subr.bf16.mxu1 %v22170_v20 }
 0xee8   :  { %16695 = vmatpush1.bf16.msra.mxu1 %v22168_v55 }
 0xee9   :  { %16696 = vmatprep.subr.bf16.mxu1 %v22173_v58 }
 0xeec   :  { %16697 = vmatpush1.bf16.msra.mxu1 %v22171_v18 }
 0xeed   :  { %16698 = vmatprep.subr.bf16.mxu1 %v22176_v25 }
 0xef0   :  { %16699 = vmatpush1.bf16.msra.mxu1 %v22174_v16 }
 0xef1   :  { %16700 = vmatprep.subr.bf16.mxu1 %v22179_v60 }
 0xef4   :  { %16701 = vmatpush1.bf16.msra.mxu1 %v22177_v43 }
 0xef5   :  { %16972 = vmatprep.subr.bf16.mxu1 %v22182_v27 }
 0xef7   :  { %v15004_v15 = vpop.f32.mrf.mxu1  ;;  %16719 = vmatmul.mubr.bf16.vlgmr.msra.gmra.mxu1 %v23417_v46 }
 0xef8   :  { %v15535_v62 = vpop.f32.mrf.mxu0  ;;  %v15013_v59 = vadd.f32 %v15004_v15, %v14727_v28  ;;  %16973 = vmatpush1.bf16.msra.mxu1 %v22180_v30  ;;  %17004 = vmatprep.mubr.bf16.mxu1 %v23520_v17  ;;  %v22192_v17 = vld [vmem:[#allocation5 + $0x1168] ss:$16 sps:$4 sm:$0xff]  }
 0xef9   :  { %v15583_v34 = vadd.f32 %v15535_v62, %v15297_v45  ;;  %v15006_v7 = vpop.f32.mrf.mxu1  ;;  %16974 = vmatprep.subr.bf16.mxu1 %v22185_v52 }
 0xefa   :  { %v15537_v54 = vpop.f32.mrf.mxu0  ;;  %v15014_v42 = vadd.f32 %v15006_v7, %v14728_v49 }
 0xefb   :  { %v15584_v13 = vadd.f32 %v15537_v54, %v15298_v44  ;;  %v15008_v56 = vpop.f32.mrf.mxu1 }
 0xefc   :  { %v15539_v39 = vpop.f32.mrf.mxu0  ;;  %16975 = vmatpush1.bf16.msra.mxu1 %v22183_v19 }
 0xefd   :  { %v15009_v23 = vpop.f32.mrf.mxu1  ;;  %16976 = vmatprep.subr.bf16.mxu1 %v22188_v29  ;;  %v17017_v29 = vld [vmem:[#allocation23] sm:$0xf] }
 0xefe   :  { %v15540_v46 = vpop.f32.mrf.mxu0  ;;  %v17022_v39 = vrot.slane %v17017_v29, %v23094_v5 }
 0xf00   :  { %16977 = vmatpush1.bf16.msra.mxu1 %v22186_v8 }
 0xf01   :  { %16978 = vmatprep.subr.bf16.mxu1 %v22191_v4 }
 0xf04   :  { %16979 = vmatpush1.bf16.msra.mxu1 %v22189_v35  ;;  %v17026_v35 = vrot.slane %v17017_v29, %v23110_v9 }
 0xf05   :  { %16980 = vmatprep.subr.bf16.mxu1 %v22194_v33 }
 0xf08   :  { %16981 = vmatpush1.bf16.msra.mxu1 %v22192_v17 }
 0xf09   :  { %16982 = vmatprep.subr.bf16.mxu1 %v22197_v6 }
 0xf0c   :  { %16983 = vmatpush1.bf16.msra.mxu1 %v22195_v31 }
 0xf0d   :  { %16984 = vmatprep.subr.bf16.mxu1 %v22200_v3 }
 0xf10   :  { %16985 = vmatpush1.bf16.msra.mxu1 %v22198_v57 }
 0xf11   :  { %16986 = vmatprep.subr.bf16.mxu1 %v22203_v63 }
 0xf14   :  { %16987 = vmatpush1.bf16.msra.mxu1 %v22201_v2 }
 0xf17   :  { %v15290_v61 = vpop.f32.mrf.mxu1  ;;  %17005 = vmatmul.mubr.bf16.vlgmr.msra.gmra.mxu1 %v23435_v22 }
 0xf18   :  { %v15821_v48 = vpop.f32.mrf.mxu0  ;;  %v15299_v12 = vadd.f32 %v15290_v61, %v15013_v59 }
 0xf19   :  { %v15869_v0 = vadd.f32 %v15821_v48, %v15583_v34  ;;  %v15292_v32 = vpop.f32.mrf.mxu1 }
 0xf1a   :  { %v15823_v24 = vpop.f32.mrf.mxu0  ;;  %v15300_v11 = vadd.f32 %v15292_v32, %v15014_v42 }
 0xf1b   :  { %v15870_v10 = vadd.f32 %v15823_v24, %v15584_v13  ;;  %v15294_v51 = vpop.f32.mrf.mxu1  ;;  %v23521_v24 = vld [vmem:[#allocation47_spill] sm:$0xff] }
 0xf1c   :  { %v15825_v50 = vpop.f32.mrf.mxu0  ;;  %v17033_v51 = vsub.s32 3, %v23521_v24 }
 0xf1d   :  { %v15295_v28 = vpop.f32.mrf.mxu1 }
 0xf1e   :  { %v15826_v45 = vpop.f32.mrf.mxu0 }
 0xf37   :  { %v15576_v37 = vpop.f32.mrf.mxu1 }
 0xf38   :  { %v16107_v47 = vpop.f32.mrf.mxu0  ;;  %v15585_v21 = vadd.f32 %v15576_v37, %v15299_v12 }
 0xf39   :  { %v16155_v14 = vadd.f32 %v16107_v47, %v15869_v0  ;;  %v15578_v49 = vpop.f32.mrf.mxu1 }
 0xf3a   :  { %v16109_v44 = vpop.f32.mrf.mxu0  ;;  %v15586_v36 = vadd.f32 %v15578_v49, %v15300_v11  ;;  %v17029_v11 = vsub.s32 2, %v23521_v24 }
 0xf3b   :  { %v16156_v40 = vadd.f32 %v16109_v44, %v15870_v10  ;;  %v15580_v26 = vpop.f32.mrf.mxu1 }
 0xf3c   :  { %v16111_v22 = vpop.f32.mrf.mxu0  ;;  %v17030_v45 = vrot.slane %v17017_v29, %v17029_v11 }
 0xf3d   :  { %v15581_v41 = vpop.f32.mrf.mxu1 }
 0xf3e   :  { %v16112_v1 = vpop.f32.mrf.mxu0 }
 0xf57   :  { %v15862_v38 = vpop.f32.mrf.mxu1 }
 0xf58   :  { %v16393_v53 = vpop.f32.mrf.mxu0  ;;  %v15871_v20 = vadd.f32 %v15862_v38, %v15585_v21 }
 0xf59   :  { %v15864_v55 = vpop.f32.mrf.mxu1  ;;  %v16441_v42 = vadd.f32 %v16393_v53, %v16155_v14  ;;  %v17034_v14 = vrot.slane %v17017_v29, %v17033_v51 }
 0xf5a   :  { %v16395_v58 = vpop.f32.mrf.mxu0  ;;  %v15872_v18 = vadd.f32 %v15864_v55, %v15586_v36 }
 0xf5b   :  { %v15866_v25 = vpop.f32.mrf.mxu1  ;;  %v16442_v13 = vadd.f32 %v16395_v58, %v16156_v40 }
 0xf5c   :  { %v16397_v16 = vpop.f32.mrf.mxu0 }
 0xf5d   :  { %v15867_v60 = vpop.f32.mrf.mxu1 }
 0xf5e   :  { %v16398_v43 = vpop.f32.mrf.mxu0 }
 0xf77   :  { %v16148_v27 = vpop.f32.mrf.mxu1 }
 0xf78   :  { %v16679_v30 = vpop.f32.mrf.mxu0  ;;  %v16157_v52 = vadd.f32 %v16148_v27, %v15871_v20 }
 0xf79   :  { %v16150_v15 = vpop.f32.mrf.mxu1  ;;  %v16727_v56 = vadd.f32 %v16679_v30, %v16441_v42 }
 0xf7a   :  { %v16681_v62 = vpop.f32.mrf.mxu0  ;;  %v16158_v59 = vadd.f32 %v16150_v15, %v15872_v18 }
 0xf7b   :  { %v16152_v34 = vpop.f32.mrf.mxu1  ;;  %v16728_v4 = vadd.f32 %v16681_v62, %v16442_v13 }
 0xf7c   :  { %v16683_v19 = vpop.f32.mrf.mxu0 }
 0xf7d   :  { %v16153_v7 = vpop.f32.mrf.mxu1 }
 0xf7e   :  { %v16684_v54 = vpop.f32.mrf.mxu0 }
 0xf97   :  { %v16434_v8 = vpop.f32.mrf.mxu1 }
 0xf98   :  { %v16965_v23 = vpop.f32.mrf.mxu0  ;;  %v16443_v10 = vadd.f32 %v16434_v8, %v16157_v52 }
 0xf99   :  { %v17013_v46 = vadd.f32 %v16965_v23, %v16727_v56  ;;  %v16436_v33 = vpop.f32.mrf.mxu1 }
 0xf9a   :  { %v16967_v17 = vpop.f32.mrf.mxu0  ;;  %v16444_v50 = vadd.f32 %v16436_v33, %v16158_v59 }
 0xf9b   :  { %v17039_v6 = vadd.f32 %v17022_v39, %v17013_v46  ;;  %v17014_v31 = vadd.f32 %v16967_v17, %v16728_v4  ;;  %v16438_v3 = vpop.f32.mrf.mxu1 }
 0xf9c   :  { %v16969_v57 = vpop.f32.mrf.mxu0 }
 0xf9d   :  { %v17043_v63 = vmax.f32 %v17039_v6, 0.0  ;;  %v17040_v2 = vadd.f32 %v17026_v35, %v17014_v31  ;;  %v16439_v61 = vpop.f32.mrf.mxu1 }
 0xf9e   :  { %v16970_v48 = vpop.f32.mrf.mxu0 }
 0xf9f   :  { %17047 = vst [vmem:[%s23481_s18] sm:$0xff] %v17043_v63  ;;  %v17044_v5 = vmax.f32 %v17040_v2, 0.0 }
 0xfa1   :  { %17048 = vst [vmem:[%s23481_s18 + $0x8] sm:$0xff] %v17044_v5 }
 0xfb7   :  { %v16720_v9 = vpop.f32.mrf.mxu1 }
 0xfb8   :  { %v16729_v28 = vadd.f32 %v16720_v9, %v16443_v10 }
 0xfb9   :  { %v16722_v12 = vpop.f32.mrf.mxu1 }
 0xfba   :  { %v16730_v47 = vadd.f32 %v16722_v12, %v16444_v50 }
 0xfbb   :  { %v16724_v0 = vpop.f32.mrf.mxu1 }
 0xfbd   :  { %v16725_v32 = vpop.f32.mrf.mxu1 }
 0xfd7   :  { %v17006_v37 = vpop.f32.mrf.mxu1 }
 0xfd8   :  { %v17015_v21 = vadd.f32 %v17006_v37, %v16729_v28 }
 0xfd9   :  { %v17008_v49 = vpop.f32.mrf.mxu1 }
 0xfda   :  { %v17041_v44 = vadd.f32 %v17030_v45, %v17015_v21  ;;  %v17016_v36 = vadd.f32 %v17008_v49, %v16730_v47 }
 0xfdb   :  { %v17010_v40 = vpop.f32.mrf.mxu1 }
 0xfdc   :  { %v17045_v26 = vmax.f32 %v17041_v44, 0.0  ;;  %v17042_v22 = vadd.f32 %v17034_v14, %v17016_v36 }
 0xfdd   :  { %v17011_v41 = vpop.f32.mrf.mxu1 }
 0xfde   :  { %17049 = vst [vmem:[%s23481_s18 + $0x10] sm:$0xff] %v17045_v26  ;;  %v17046_v1 = vmax.f32 %v17042_v22, 0.0 }
 0xfe0   :  { %17050 = vst [vmem:[%s23481_s18 + $0x18] sm:$0xff] %v17046_v1 }
 0xfe1   :  { %17055 = vsyncpa [#allocation8], 1 }
 0xfe2   :  { %17056 = vsyncpa [#allocation10], 1 }
 0xfe3   :  { %17057 = vsyncpa [#allocation13], 1 }
 0xfe4   :  { %17058 = vsyncpa [#allocation16], 1 }
 0xfe5   :  { %17059 = vsyncpa [#allocation19], 1 }
 0xfe6   :  { %17060 = vsyncpa [#allocation22], 1 }
 0xfe7   :  { %17061 = vsyncmov [#allocation6] }
 0xfea   :  { %s17062_s26 = vpop.sfrf %17061 }
 0xfeb   :  { %p18811_p0 = scmp.ne.s32.totalorder %s17062_s26, 0 }
 0xfed   :  { %17066 = shalt.err (%p18811_p0)  }
 0xfee   :  { %17068 = vsyncmov [#allocation6 + $0x1] }
 0xff1   :  { %s17069_s6 = vpop.sfrf %17068 }
 0xff2   :  { %p18812_p1 = scmp.ne.s32.totalorder %s17069_s6, 0 }
 0xff4   :  { %17073 = shalt.err (%p18812_p1)  }
 0xff5   :  { %17075 = vsyncmov [#allocation6 + $0x2] }
 0xff8   :  { %s17076_s2 = vpop.sfrf %17075 }
 0xff9   :  { %p18813_p2 = scmp.ne.s32.totalorder %s17076_s2, 0 }
 0xffb   :  { %17080 = shalt.err (%p18813_p2)  }

</bundles_post_ra>
